<compile_context>
chip_gen: v6e
topology: v6e:2x2x1
jax: 0.10.0
libtpu: 0.0.40
codegen_flags: <defaults>
</compile_context>

<pallas_src>
import functools

import jax
import jax.numpy as jnp
from jax.experimental import pallas as pl
from jax.experimental.pallas import tpu as pltpu


# ----------------------------------------------------------------------------
# Fused kernel: 2-layer BiLSTM + classifier, single invocation, no grid.
# ----------------------------------------------------------------------------
def _bilstm_fused_kernel(x_ref,        # (T*Bp, E)   bf16, time-major, batch-padded
                         wih0_ref,     # (E, 8H)     bf16 [fwd | bwd], gates (i,f,o,g)
                         whh0_ref,     # (2, H, 4H)  bf16
                         b0_ref,       # (1, 8H)     f32  combined b_ih + b_hh
                         wih1_ref,     # (2H, 8H)    bf16
                         whh1_ref,     # (2, H, 4H)  bf16
                         b1_ref,       # (1, 8H)     f32
                         clsw_ref,     # (2H, 128)   f32 (lane-padded from 2)
                         clsb_ref,     # (1, 128)    f32
                         logits_ref,   # (Bp, 128)   f32 output
                         *, T, Bp, H):
    f32 = jnp.float32
    bf16 = jnp.bfloat16
    G = 4 * H

    def cell(pre, c):
        # pre: (Bp, 4H) f32, gate order (i, f, o, g): one sigmoid over a
        # contiguous 3H lane slice, tanh on the last H.
        sig = jax.nn.sigmoid(pre[:, 0:3 * H])
        i_g = sig[:, 0 * H:1 * H]
        f_g = sig[:, 1 * H:2 * H]
        o_g = sig[:, 2 * H:3 * H]
        g_g = jnp.tanh(pre[:, 3 * H:4 * H])
        c = f_g * c + i_g * g_g
        h = o_g * jnp.tanh(c)
        return h, c

    def bilstm_layer(gx, whh_f, whh_b, collect_seq):
        """gx: (T*Bp, 8H) f32, columns [fwd 4H | bwd 4H].

        Forward and backward chains are interleaved in one fully unrolled
        loop (T is small and static): the two chains are independent, so one
        direction's h@W_hh MXU work overlaps the other's sigmoid/tanh EUP
        latency. Only h @ W_hh sits on each serial path (input projections
        were hoisted). Returns final (h_fwd, h_bwd) and, optionally, the
        per-timestep hidden sequences.
        """
        hf = jnp.zeros((Bp, H), f32)
        cf = jnp.zeros((Bp, H), f32)
        hb = jnp.zeros((Bp, H), f32)
        cb = jnp.zeros((Bp, H), f32)
        hf_seq = [None] * T
        hb_seq = [None] * T
        for s in range(T):
            tf, tb = s, T - 1 - s
            pre_f = gx[tf * Bp:(tf + 1) * Bp, 0:G] + jnp.dot(
                hf.astype(bf16), whh_f, preferred_element_type=f32)
            pre_b = gx[tb * Bp:(tb + 1) * Bp, G:2 * G] + jnp.dot(
                hb.astype(bf16), whh_b, preferred_element_type=f32)
            hf, cf = cell(pre_f, cf)
            hb, cb = cell(pre_b, cb)
            if collect_seq:
                hf_seq[tf] = hf
                hb_seq[tb] = hb
        return hf, hb, hf_seq, hb_seq

    x = x_ref[...]                                             # (T*Bp, E) bf16

    # ---- layer 0: single fused fwd|bwd input projection (N = 8H) ----
    gx0 = jnp.dot(x, wih0_ref[...], preferred_element_type=f32) + b0_ref[...]
    _, _, hf_seq, hb_seq = bilstm_layer(gx0, whh0_ref[0], whh0_ref[1], True)

    # Inter-layer dropout: eval-mode identity.
    # TODO(synk): training-mode dropout (Bernoulli mask) intentionally omitted.

    # Layer-0 hidden sequence stays on-chip as values (no scratch round trip).
    y0 = jnp.concatenate(
        [jnp.concatenate(hf_seq, axis=0),
         jnp.concatenate(hb_seq, axis=0)], axis=1).astype(bf16)  # (T*Bp, 2H)

    # ---- layer 1: only the final hidden states are needed downstream ----
    gx1 = jnp.dot(y0, wih1_ref[...], preferred_element_type=f32) + b1_ref[...]
    hf, hb, _, _ = bilstm_layer(gx1, whh1_ref[0], whh1_ref[1], False)

    # ---- classifier on cat(h_fwd, h_bwd): split-weight form, no concat ----
    cls_w = clsw_ref[...]                                      # (2H, 128)
    logits = (jnp.dot(hf, cls_w[0:H, :], preferred_element_type=f32)
              + jnp.dot(hb, cls_w[H:2 * H, :], preferred_element_type=f32)
              + clsb_ref[...])
    logits_ref[...] = logits.astype(logits_ref.dtype)


# ----------------------------------------------------------------------------
# Helpers: gate reorder (i,f,g,o) -> (i,f,o,g)
# ----------------------------------------------------------------------------
def _reorder_gates(w, H):
    return jnp.concatenate(
        [w[..., 0:2 * H], w[..., 3 * H:4 * H], w[..., 2 * H:3 * H]], axis=-1)


# ----------------------------------------------------------------------------
# Model wrapper (glue: embedding gather + layout/packing, then one fused call).
# ----------------------------------------------------------------------------
def bilstm_classifier_forward(params, tokens):
    B, T = tokens.shape
    E = params["embedding"].shape[1]
    H = params["whh0"].shape[1]
    assert H % 128 == 0, "lane-aligned gate slices assume H is a multiple of 128"
    Bp = max(8, ((B + 7) // 8) * 8)          # sublane-tile padded batch

    # Embedding lookup (data-dependent gather kept in plain JAX glue),
    # time-major layout, batch padded to the 8-row sublane tile.
    emb = jnp.take(params["embedding"], tokens, axis=0)        # (B, T, E)
    x = jnp.transpose(emb, (1, 0, 2)).astype(jnp.float32)      # (T, B, E)
    x = jnp.pad(x, ((0, 0), (0, Bp - B), (0, 0)))
    x2d = x.reshape(T * Bp, E).astype(jnp.bfloat16)

    # Weight packing: gate reorder, fwd|bwd N-concat, bf16 MXU operands.
    def pack_ih(wih, b):
        w = jnp.concatenate([_reorder_gates(wih[0], H),
                             _reorder_gates(wih[1], H)], axis=-1)
        bias = jnp.concatenate([_reorder_gates(b[0], H),
                                _reorder_gates(b[1], H)], axis=-1)
        return w.astype(jnp.bfloat16), bias.astype(jnp.float32)

    wih0, b0 = pack_ih(params["wih0"], params["b0"])           # (E, 8H), (1, 8H)
    wih1, b1 = pack_ih(params["wih1"], params["b1"])           # (2H, 8H), (1, 8H)
    whh0 = _reorder_gates(params["whh0"], H).astype(jnp.bfloat16)  # (2, H, 4H)
    whh1 = _reorder_gates(params["whh1"], H).astype(jnp.bfloat16)
    n_cls = params["cls_w"].shape[1]
    cls_w = jnp.pad(params["cls_w"], ((0, 0), (0, 128 - n_cls)))   # (2H, 128)
    cls_b = jnp.pad(params["cls_b"], ((0, 0), (0, 128 - n_cls)))   # (1, 128)

    # Advisory cost hint for the XLA scheduler.
    flops = 2 * (T * Bp * E * 8 * H           # layer-0 fused input proj
                 + T * Bp * 2 * H * 8 * H     # layer-1 fused input proj
                 + 4 * T * Bp * H * 4 * H     # recurrent h @ W_hh (2 layers x 2 dirs)
                 + 2 * Bp * H * 128)          # classifier
    transcendentals = 4 * T * Bp * 5 * H      # 3 sigmoid + 2 tanh per step/dir/layer
    bytes_accessed = (x2d.size * 2 + wih0.size * 2 + wih1.size * 2
                      + whh0.size * 2 + whh1.size * 2
                      + (b0.size + b1.size + cls_w.size + cls_b.size) * 4
                      + Bp * 128 * 4)

    vmem_spec = pl.BlockSpec(memory_space=pltpu.MemorySpace.VMEM)
    kernel = functools.partial(_bilstm_fused_kernel, T=T, Bp=Bp, H=H)
    logits_pad = pl.pallas_call(
        kernel,
        out_shape=jax.ShapeDtypeStruct((Bp, 128), jnp.float32),
        in_specs=[vmem_spec] * 9,
        out_specs=vmem_spec,
        cost_estimate=pl.CostEstimate(flops=flops,
                                      transcendentals=transcendentals,
                                      bytes_accessed=bytes_accessed),
    )(x2d, wih0, whh0, b0, wih1, whh1, b1, cls_w, cls_b)
    # TODO(synk): for large batches on v7x, add a batch grid with
    # dimension_semantics=("parallel",) to shard across the 2 TensorCores.
    return logits_pad[:B, :n_cls]


# ----------------------------------------------------------------------------
# Pure-JAX reference (same math, f32, PyTorch (i,f,g,o) order) for checking.
# ----------------------------------------------------------------------------
def _ref_lstm_dir(x_tbd, w_ih, w_hh, b):
    H = w_hh.shape[0]
    B = x_tbd.shape[1]

    def step(carry, x_t):
        h, c = carry
        gates = x_t @ w_ih + h @ w_hh + b
        i = jax.nn.sigmoid(gates[:, :H])
        f = jax.nn.sigmoid(gates[:, H:2 * H])
        g = jnp.tanh(gates[:, 2 * H:3 * H])
        o = jax.nn.sigmoid(gates[:, 3 * H:])
        c = f * c + i * g
        h = o * jnp.tanh(c)
        return (h, c), h

    init = (jnp.zeros((B, H), jnp.float32), jnp.zeros((B, H), jnp.float32))
    (h, _), ys = jax.lax.scan(step, init, x_tbd)
    return ys, h


def _ref_forward(params, tokens):
    emb = jnp.take(params["embedding"], tokens, axis=0)
    x = jnp.transpose(emb, (1, 0, 2)).astype(jnp.float32)
    yf, _ = _ref_lstm_dir(x, params["wih0"][0], params["whh0"][0],
                          params["b0"][0])
    yb_rev, _ = _ref_lstm_dir(x[::-1], params["wih0"][1], params["whh0"][1],
                              params["b0"][1])
    x1 = jnp.concatenate([yf, yb_rev[::-1]], axis=-1)
    _, hf = _ref_lstm_dir(x1, params["wih1"][0], params["whh1"][0],
                          params["b1"][0])
    _, hb = _ref_lstm_dir(x1[::-1], params["wih1"][1], params["whh1"][1],
                          params["b1"][1])
    last_hidden = jnp.concatenate([hf, hb], axis=-1)
    return last_hidden @ params["cls_w"] + params["cls_b"]


# ----------------------------------------------------------------------------
# Deterministic parameter init (nn.Embedding / nn.LSTM / nn.Linear shapes,
# 2 layers, bidirectional; directions stacked on a leading axis).
# ----------------------------------------------------------------------------
def init_params(key, vocab_size, embed_dim, hidden_dim):
    k_emb, k_lstm, k_cls = jax.random.split(key, 3)
    bound = 1.0 / jnp.sqrt(hidden_dim)

    emb = jax.random.normal(k_emb, (vocab_size, embed_dim), jnp.float32) * 0.1
    emb = emb.at[0].set(0.0)                       # padding_idx=0

    keys = jax.random.split(k_lstm, 2 * 2 * 3)     # 2 layers x 2 dirs x 3
    ki = 0
    stacked = {}
    for layer in range(2):
        d_in = embed_dim if layer == 0 else 2 * hidden_dim
        wih, whh, b = [], [], []
        for _direction in range(2):
            wih.append(jax.random.uniform(keys[ki], (d_in, 4 * hidden_dim),
                                          jnp.float32, -bound, bound))
            whh.append(jax.random.uniform(keys[ki + 1],
                                          (hidden_dim, 4 * hidden_dim),
                                          jnp.float32, -bound, bound))
            # combined bias = b_ih + b_hh
            b.append(jax.random.uniform(keys[ki + 2], (1, 4 * hidden_dim),
                                        jnp.float32, -2 * bound, 2 * bound))
            ki += 3
        stacked[f"wih{layer}"] = jnp.stack(wih)
        stacked[f"whh{layer}"] = jnp.stack(whh)
        stacked[f"b{layer}"] = jnp.stack(b)

    k_w, k_b = jax.random.split(k_cls)
    cls_bound = 1.0 / jnp.sqrt(2 * hidden_dim)
    cls_w = jax.random.uniform(k_w, (2 * hidden_dim, 2), jnp.float32,
                               -cls_bound, cls_bound)
    cls_b = jax.random.uniform(k_b, (1, 2), jnp.float32, -cls_bound, cls_bound)

    params = {"embedding": emb, "cls_w": cls_w, "cls_b": cls_b}
    params.update(stacked)
    return params


if __name__ == "__main__":
    VOCAB, EMBED, HIDDEN = 64, 64, 128
    B, T = 2, 8

    key = jax.random.PRNGKey(0)
    k_param, k_tok = jax.random.split(key)
    params = init_params(k_param, VOCAB, EMBED, HIDDEN)
    tokens = jax.random.randint(k_tok, (B, T), 0, VOCAB, dtype=jnp.int32)

    fwd = jax.jit(bilstm_classifier_forward)
    logits = jax.block_until_ready(fwd(params, tokens))

    ref = _ref_forward(params, tokens)
    assert logits.shape == (B, 2), logits.shape
    # bf16 MXU operands with f32 accumulation -> small drift vs f32 reference.
    assert jnp.allclose(logits, ref, rtol=2e-2, atol=2e-2), (logits, ref)

    print("KERNEL_OK")
</pallas_src>

<mosaic_0001>
module attributes {stable_mosaic.version = 11 : i64} {
  func.func @_bilstm_fused_kernel(%arg0: memref<64x64xbf16, #tpu.memory_space<vmem>>, %arg1: memref<64x1024xbf16, #tpu.memory_space<vmem>>, %arg2: memref<2x128x512xbf16, #tpu.memory_space<vmem>>, %arg3: memref<1x1024xf32, #tpu.memory_space<vmem>>, %arg4: memref<256x1024xbf16, #tpu.memory_space<vmem>>, %arg5: memref<2x128x512xbf16, #tpu.memory_space<vmem>>, %arg6: memref<1x1024xf32, #tpu.memory_space<vmem>>, %arg7: memref<256x128xf32, #tpu.memory_space<vmem>>, %arg8: memref<1x128xf32, #tpu.memory_space<vmem>>, %arg9: memref<8x128xf32, #tpu.memory_space<vmem>>) attributes {dimension_semantics = [], scalar_prefetch = 0 : i64, scratch_operands = 0 : i64, tpu.core_type = #tpu.core_type<tc>} {
    %c0 = arith.constant 0 : index
    %c0_0 = arith.constant 0 : index
    %0 = vector.load %arg0[%c0, %c0_0] : memref<64x64xbf16, #tpu.memory_space<vmem>>, vector<64x64xbf16>
    %c0_1 = arith.constant 0 : index
    %c0_2 = arith.constant 0 : index
    %1 = vector.load %arg1[%c0_1, %c0_2] : memref<64x1024xbf16, #tpu.memory_space<vmem>>, vector<64x1024xbf16>
    %cst = arith.constant dense<0.000000e+00> : vector<64x1024xf32>
    %2 = tpu.matmul %0, %1, %cst {dimension_numbers = #tpu.dot_dimension_numbers<[1], [0], [0], [1], [0, 0, 1, 1], [], []>} : vector<64x64xbf16>, vector<64x1024xbf16>, vector<64x1024xf32> -> vector<64x1024xf32>
    %c0_3 = arith.constant 0 : index
    %c0_4 = arith.constant 0 : index
    %3 = vector.load %arg3[%c0_3, %c0_4] : memref<1x1024xf32, #tpu.memory_space<vmem>>, vector<1x1024xf32>
    %4 = vector.broadcast %3 : vector<1x1024xf32> to vector<64x1024xf32>
    %5 = arith.addf %2, %4 : vector<64x1024xf32>
    %c0_5 = arith.constant 0 : index
    %c0_6 = arith.constant 0 : index
    %c0_7 = arith.constant 0 : index
    %6 = vector.load %arg2[%c0_5, %c0_6, %c0_7] : memref<2x128x512xbf16, #tpu.memory_space<vmem>>, vector<1x128x512xbf16>
    %7 = vector.shape_cast %6 : vector<1x128x512xbf16> to vector<128x512xbf16>
    %c1 = arith.constant 1 : index
    %c0_8 = arith.constant 0 : index
    %c0_9 = arith.constant 0 : index
    %8 = vector.load %arg2[%c1, %c0_8, %c0_9] : memref<2x128x512xbf16, #tpu.memory_space<vmem>>, vector<1x128x512xbf16>
    %9 = vector.shape_cast %8 : vector<1x128x512xbf16> to vector<128x512xbf16>
    %cst_10 = arith.constant 0.000000e+00 : f32
    %10 = vector.broadcast %cst_10 : f32 to vector<8x128xf32>
    %cst_11 = arith.constant 0.000000e+00 : f32
    %11 = vector.broadcast %cst_11 : f32 to vector<8x128xf32>
    %cst_12 = arith.constant 0.000000e+00 : f32
    %12 = vector.broadcast %cst_12 : f32 to vector<8x128xf32>
    %cst_13 = arith.constant 0.000000e+00 : f32
    %13 = vector.broadcast %cst_13 : f32 to vector<8x128xf32>
    %14 = vector.extract_strided_slice %5 {offsets = [0, 0], sizes = [8, 512], strides = [1, 1]} : vector<64x1024xf32> to vector<8x512xf32>
    %15 = arith.truncf %10 : vector<8x128xf32> to vector<8x128xbf16>
    %cst_14 = arith.constant dense<0.000000e+00> : vector<8x512xf32>
    %16 = tpu.matmul %15, %7, %cst_14 {dimension_numbers = #tpu.dot_dimension_numbers<[1], [0], [0], [1], [0, 0, 1, 1], [], []>} : vector<8x128xbf16>, vector<128x512xbf16>, vector<8x512xf32> -> vector<8x512xf32>
    %17 = arith.addf %14, %16 : vector<8x512xf32>
    %18 = vector.extract_strided_slice %5 {offsets = [56, 512], sizes = [8, 512], strides = [1, 1]} : vector<64x1024xf32> to vector<8x512xf32>
    %19 = arith.truncf %12 : vector<8x128xf32> to vector<8x128xbf16>
    %cst_15 = arith.constant dense<0.000000e+00> : vector<8x512xf32>
    %20 = tpu.matmul %19, %9, %cst_15 {dimension_numbers = #tpu.dot_dimension_numbers<[1], [0], [0], [1], [0, 0, 1, 1], [], []>} : vector<8x128xbf16>, vector<128x512xbf16>, vector<8x512xf32> -> vector<8x512xf32>
    %21 = arith.addf %18, %20 : vector<8x512xf32>
    %22 = vector.extract_strided_slice %17 {offsets = [0, 0], sizes = [8, 384], strides = [1, 1]} : vector<8x512xf32> to vector<8x384xf32>
    %23 = arith.negf %22 : vector<8x384xf32>
    %24 = math.exp %23 : vector<8x384xf32>
    %cst_16 = arith.constant 1.000000e+00 : f32
    %25 = vector.broadcast %cst_16 : f32 to vector<8x384xf32>
    %26 = arith.addf %25, %24 : vector<8x384xf32>
    %27 = arith.divf %25, %26 : vector<8x384xf32>
    %28 = vector.extract_strided_slice %27 {offsets = [0, 0], sizes = [8, 128], strides = [1, 1]} : vector<8x384xf32> to vector<8x128xf32>
    %29 = vector.extract_strided_slice %27 {offsets = [0, 128], sizes = [8, 128], strides = [1, 1]} : vector<8x384xf32> to vector<8x128xf32>
    %30 = vector.extract_strided_slice %27 {offsets = [0, 256], sizes = [8, 128], strides = [1, 1]} : vector<8x384xf32> to vector<8x128xf32>
    %31 = vector.extract_strided_slice %17 {offsets = [0, 384], sizes = [8, 128], strides = [1, 1]} : vector<8x512xf32> to vector<8x128xf32>
    %32 = math.tanh %31 : vector<8x128xf32>
    %33 = arith.mulf %29, %11 : vector<8x128xf32>
    %34 = arith.mulf %28, %32 : vector<8x128xf32>
    %35 = arith.addf %33, %34 : vector<8x128xf32>
    %36 = math.tanh %35 : vector<8x128xf32>
    %37 = arith.mulf %30, %36 : vector<8x128xf32>
    %38 = vector.extract_strided_slice %21 {offsets = [0, 0], sizes = [8, 384], strides = [1, 1]} : vector<8x512xf32> to vector<8x384xf32>
    %39 = arith.negf %38 : vector<8x384xf32>
    %40 = math.exp %39 : vector<8x384xf32>
    %cst_17 = arith.constant 1.000000e+00 : f32
    %41 = vector.broadcast %cst_17 : f32 to vector<8x384xf32>
    %42 = arith.addf %41, %40 : vector<8x384xf32>
    %43 = arith.divf %41, %42 : vector<8x384xf32>
    %44 = vector.extract_strided_slice %43 {offsets = [0, 0], sizes = [8, 128], strides = [1, 1]} : vector<8x384xf32> to vector<8x128xf32>
    %45 = vector.extract_strided_slice %43 {offsets = [0, 128], sizes = [8, 128], strides = [1, 1]} : vector<8x384xf32> to vector<8x128xf32>
    %46 = vector.extract_strided_slice %43 {offsets = [0, 256], sizes = [8, 128], strides = [1, 1]} : vector<8x384xf32> to vector<8x128xf32>
    %47 = vector.extract_strided_slice %21 {offsets = [0, 384], sizes = [8, 128], strides = [1, 1]} : vector<8x512xf32> to vector<8x128xf32>
    %48 = math.tanh %47 : vector<8x128xf32>
    %49 = arith.mulf %45, %13 : vector<8x128xf32>
    %50 = arith.mulf %44, %48 : vector<8x128xf32>
    %51 = arith.addf %49, %50 : vector<8x128xf32>
    %52 = math.tanh %51 : vector<8x128xf32>
    %53 = arith.mulf %46, %52 : vector<8x128xf32>
    %54 = vector.extract_strided_slice %5 {offsets = [8, 0], sizes = [8, 512], strides = [1, 1]} : vector<64x1024xf32> to vector<8x512xf32>
    %55 = arith.truncf %37 : vector<8x128xf32> to vector<8x128xbf16>
    %cst_18 = arith.constant dense<0.000000e+00> : vector<8x512xf32>
    %56 = tpu.matmul %55, %7, %cst_18 {dimension_numbers = #tpu.dot_dimension_numbers<[1], [0], [0], [1], [0, 0, 1, 1], [], []>} : vector<8x128xbf16>, vector<128x512xbf16>, vector<8x512xf32> -> vector<8x512xf32>
    %57 = arith.addf %54, %56 : vector<8x512xf32>
    %58 = vector.extract_strided_slice %5 {offsets = [48, 512], sizes = [8, 512], strides = [1, 1]} : vector<64x1024xf32> to vector<8x512xf32>
    %59 = arith.truncf %53 : vector<8x128xf32> to vector<8x128xbf16>
    %cst_19 = arith.constant dense<0.000000e+00> : vector<8x512xf32>
    %60 = tpu.matmul %59, %9, %cst_19 {dimension_numbers = #tpu.dot_dimension_numbers<[1], [0], [0], [1], [0, 0, 1, 1], [], []>} : vector<8x128xbf16>, vector<128x512xbf16>, vector<8x512xf32> -> vector<8x512xf32>
    %61 = arith.addf %58, %60 : vector<8x512xf32>
    %62 = vector.extract_strided_slice %57 {offsets = [0, 0], sizes = [8, 384], strides = [1, 1]} : vector<8x512xf32> to vector<8x384xf32>
    %63 = arith.negf %62 : vector<8x384xf32>
    %64 = math.exp %63 : vector<8x384xf32>
    %cst_20 = arith.constant 1.000000e+00 : f32
    %65 = vector.broadcast %cst_20 : f32 to vector<8x384xf32>
    %66 = arith.addf %65, %64 : vector<8x384xf32>
    %67 = arith.divf %65, %66 : vector<8x384xf32>
    %68 = vector.extract_strided_slice %67 {offsets = [0, 0], sizes = [8, 128], strides = [1, 1]} : vector<8x384xf32> to vector<8x128xf32>
    %69 = vector.extract_strided_slice %67 {offsets = [0, 128], sizes = [8, 128], strides = [1, 1]} : vector<8x384xf32> to vector<8x128xf32>
    %70 = vector.extract_strided_slice %67 {offsets = [0, 256], sizes = [8, 128], strides = [1, 1]} : vector<8x384xf32> to vector<8x128xf32>
    %71 = vector.extract_strided_slice %57 {offsets = [0, 384], sizes = [8, 128], strides = [1, 1]} : vector<8x512xf32> to vector<8x128xf32>
    %72 = math.tanh %71 : vector<8x128xf32>
    %73 = arith.mulf %69, %35 : vector<8x128xf32>
    %74 = arith.mulf %68, %72 : vector<8x128xf32>
    %75 = arith.addf %73, %74 : vector<8x128xf32>
    %76 = math.tanh %75 : vector<8x128xf32>
    %77 = arith.mulf %70, %76 : vector<8x128xf32>
    %78 = vector.extract_strided_slice %61 {offsets = [0, 0], sizes = [8, 384], strides = [1, 1]} : vector<8x512xf32> to vector<8x384xf32>
    %79 = arith.negf %78 : vector<8x384xf32>
    %80 = math.exp %79 : vector<8x384xf32>
    %cst_21 = arith.constant 1.000000e+00 : f32
    %81 = vector.broadcast %cst_21 : f32 to vector<8x384xf32>
    %82 = arith.addf %81, %80 : vector<8x384xf32>
    %83 = arith.divf %81, %82 : vector<8x384xf32>
    %84 = vector.extract_strided_slice %83 {offsets = [0, 0], sizes = [8, 128], strides = [1, 1]} : vector<8x384xf32> to vector<8x128xf32>
    %85 = vector.extract_strided_slice %83 {offsets = [0, 128], sizes = [8, 128], strides = [1, 1]} : vector<8x384xf32> to vector<8x128xf32>
    %86 = vector.extract_strided_slice %83 {offsets = [0, 256], sizes = [8, 128], strides = [1, 1]} : vector<8x384xf32> to vector<8x128xf32>
    %87 = vector.extract_strided_slice %61 {offsets = [0, 384], sizes = [8, 128], strides = [1, 1]} : vector<8x512xf32> to vector<8x128xf32>
    %88 = math.tanh %87 : vector<8x128xf32>
    %89 = arith.mulf %85, %51 : vector<8x128xf32>
    %90 = arith.mulf %84, %88 : vector<8x128xf32>
    %91 = arith.addf %89, %90 : vector<8x128xf32>
    %92 = math.tanh %91 : vector<8x128xf32>
    %93 = arith.mulf %86, %92 : vector<8x128xf32>
    %94 = vector.extract_strided_slice %5 {offsets = [16, 0], sizes = [8, 512], strides = [1, 1]} : vector<64x1024xf32> to vector<8x512xf32>
    %95 = arith.truncf %77 : vector<8x128xf32> to vector<8x128xbf16>
    %cst_22 = arith.constant dense<0.000000e+00> : vector<8x512xf32>
    %96 = tpu.matmul %95, %7, %cst_22 {dimension_numbers = #tpu.dot_dimension_numbers<[1], [0], [0], [1], [0, 0, 1, 1], [], []>} : vector<8x128xbf16>, vector<128x512xbf16>, vector<8x512xf32> -> vector<8x512xf32>
    %97 = arith.addf %94, %96 : vector<8x512xf32>
    %98 = vector.extract_strided_slice %5 {offsets = [40, 512], sizes = [8, 512], strides = [1, 1]} : vector<64x1024xf32> to vector<8x512xf32>
    %99 = arith.truncf %93 : vector<8x128xf32> to vector<8x128xbf16>
    %cst_23 = arith.constant dense<0.000000e+00> : vector<8x512xf32>
    %100 = tpu.matmul %99, %9, %cst_23 {dimension_numbers = #tpu.dot_dimension_numbers<[1], [0], [0], [1], [0, 0, 1, 1], [], []>} : vector<8x128xbf16>, vector<128x512xbf16>, vector<8x512xf32> -> vector<8x512xf32>
    %101 = arith.addf %98, %100 : vector<8x512xf32>
    %102 = vector.extract_strided_slice %97 {offsets = [0, 0], sizes = [8, 384], strides = [1, 1]} : vector<8x512xf32> to vector<8x384xf32>
    %103 = arith.negf %102 : vector<8x384xf32>
    %104 = math.exp %103 : vector<8x384xf32>
    %cst_24 = arith.constant 1.000000e+00 : f32
    %105 = vector.broadcast %cst_24 : f32 to vector<8x384xf32>
    %106 = arith.addf %105, %104 : vector<8x384xf32>
    %107 = arith.divf %105, %106 : vector<8x384xf32>
    %108 = vector.extract_strided_slice %107 {offsets = [0, 0], sizes = [8, 128], strides = [1, 1]} : vector<8x384xf32> to vector<8x128xf32>
    %109 = vector.extract_strided_slice %107 {offsets = [0, 128], sizes = [8, 128], strides = [1, 1]} : vector<8x384xf32> to vector<8x128xf32>
    %110 = vector.extract_strided_slice %107 {offsets = [0, 256], sizes = [8, 128], strides = [1, 1]} : vector<8x384xf32> to vector<8x128xf32>
    %111 = vector.extract_strided_slice %97 {offsets = [0, 384], sizes = [8, 128], strides = [1, 1]} : vector<8x512xf32> to vector<8x128xf32>
    %112 = math.tanh %111 : vector<8x128xf32>
    %113 = arith.mulf %109, %75 : vector<8x128xf32>
    %114 = arith.mulf %108, %112 : vector<8x128xf32>
    %115 = arith.addf %113, %114 : vector<8x128xf32>
    %116 = math.tanh %115 : vector<8x128xf32>
    %117 = arith.mulf %110, %116 : vector<8x128xf32>
    %118 = vector.extract_strided_slice %101 {offsets = [0, 0], sizes = [8, 384], strides = [1, 1]} : vector<8x512xf32> to vector<8x384xf32>
    %119 = arith.negf %118 : vector<8x384xf32>
    %120 = math.exp %119 : vector<8x384xf32>
    %cst_25 = arith.constant 1.000000e+00 : f32
    %121 = vector.broadcast %cst_25 : f32 to vector<8x384xf32>
    %122 = arith.addf %121, %120 : vector<8x384xf32>
    %123 = arith.divf %121, %122 : vector<8x384xf32>
    %124 = vector.extract_strided_slice %123 {offsets = [0, 0], sizes = [8, 128], strides = [1, 1]} : vector<8x384xf32> to vector<8x128xf32>
    %125 = vector.extract_strided_slice %123 {offsets = [0, 128], sizes = [8, 128], strides = [1, 1]} : vector<8x384xf32> to vector<8x128xf32>
    %126 = vector.extract_strided_slice %123 {offsets = [0, 256], sizes = [8, 128], strides = [1, 1]} : vector<8x384xf32> to vector<8x128xf32>
    %127 = vector.extract_strided_slice %101 {offsets = [0, 384], sizes = [8, 128], strides = [1, 1]} : vector<8x512xf32> to vector<8x128xf32>
    %128 = math.tanh %127 : vector<8x128xf32>
    %129 = arith.mulf %125, %91 : vector<8x128xf32>
    %130 = arith.mulf %124, %128 : vector<8x128xf32>
    %131 = arith.addf %129, %130 : vector<8x128xf32>
    %132 = math.tanh %131 : vector<8x128xf32>
    %133 = arith.mulf %126, %132 : vector<8x128xf32>
    %134 = vector.extract_strided_slice %5 {offsets = [24, 0], sizes = [8, 512], strides = [1, 1]} : vector<64x1024xf32> to vector<8x512xf32>
    %135 = arith.truncf %117 : vector<8x128xf32> to vector<8x128xbf16>
    %cst_26 = arith.constant dense<0.000000e+00> : vector<8x512xf32>
    %136 = tpu.matmul %135, %7, %cst_26 {dimension_numbers = #tpu.dot_dimension_numbers<[1], [0], [0], [1], [0, 0, 1, 1], [], []>} : vector<8x128xbf16>, vector<128x512xbf16>, vector<8x512xf32> -> vector<8x512xf32>
    %137 = arith.addf %134, %136 : vector<8x512xf32>
    %138 = vector.extract_strided_slice %5 {offsets = [32, 512], sizes = [8, 512], strides = [1, 1]} : vector<64x1024xf32> to vector<8x512xf32>
    %139 = arith.truncf %133 : vector<8x128xf32> to vector<8x128xbf16>
    %cst_27 = arith.constant dense<0.000000e+00> : vector<8x512xf32>
    %140 = tpu.matmul %139, %9, %cst_27 {dimension_numbers = #tpu.dot_dimension_numbers<[1], [0], [0], [1], [0, 0, 1, 1], [], []>} : vector<8x128xbf16>, vector<128x512xbf16>, vector<8x512xf32> -> vector<8x512xf32>
    %141 = arith.addf %138, %140 : vector<8x512xf32>
    %142 = vector.extract_strided_slice %137 {offsets = [0, 0], sizes = [8, 384], strides = [1, 1]} : vector<8x512xf32> to vector<8x384xf32>
    %143 = arith.negf %142 : vector<8x384xf32>
    %144 = math.exp %143 : vector<8x384xf32>
    %cst_28 = arith.constant 1.000000e+00 : f32
    %145 = vector.broadcast %cst_28 : f32 to vector<8x384xf32>
    %146 = arith.addf %145, %144 : vector<8x384xf32>
    %147 = arith.divf %145, %146 : vector<8x384xf32>
    %148 = vector.extract_strided_slice %147 {offsets = [0, 0], sizes = [8, 128], strides = [1, 1]} : vector<8x384xf32> to vector<8x128xf32>
    %149 = vector.extract_strided_slice %147 {offsets = [0, 128], sizes = [8, 128], strides = [1, 1]} : vector<8x384xf32> to vector<8x128xf32>
    %150 = vector.extract_strided_slice %147 {offsets = [0, 256], sizes = [8, 128], strides = [1, 1]} : vector<8x384xf32> to vector<8x128xf32>
    %151 = vector.extract_strided_slice %137 {offsets = [0, 384], sizes = [8, 128], strides = [1, 1]} : vector<8x512xf32> to vector<8x128xf32>
    %152 = math.tanh %151 : vector<8x128xf32>
    %153 = arith.mulf %149, %115 : vector<8x128xf32>
    %154 = arith.mulf %148, %152 : vector<8x128xf32>
    %155 = arith.addf %153, %154 : vector<8x128xf32>
    %156 = math.tanh %155 : vector<8x128xf32>
    %157 = arith.mulf %150, %156 : vector<8x128xf32>
    %158 = vector.extract_strided_slice %141 {offsets = [0, 0], sizes = [8, 384], strides = [1, 1]} : vector<8x512xf32> to vector<8x384xf32>
    %159 = arith.negf %158 : vector<8x384xf32>
    %160 = math.exp %159 : vector<8x384xf32>
    %cst_29 = arith.constant 1.000000e+00 : f32
    %161 = vector.broadcast %cst_29 : f32 to vector<8x384xf32>
    %162 = arith.addf %161, %160 : vector<8x384xf32>
    %163 = arith.divf %161, %162 : vector<8x384xf32>
    %164 = vector.extract_strided_slice %163 {offsets = [0, 0], sizes = [8, 128], strides = [1, 1]} : vector<8x384xf32> to vector<8x128xf32>
    %165 = vector.extract_strided_slice %163 {offsets = [0, 128], sizes = [8, 128], strides = [1, 1]} : vector<8x384xf32> to vector<8x128xf32>
    %166 = vector.extract_strided_slice %163 {offsets = [0, 256], sizes = [8, 128], strides = [1, 1]} : vector<8x384xf32> to vector<8x128xf32>
    %167 = vector.extract_strided_slice %141 {offsets = [0, 384], sizes = [8, 128], strides = [1, 1]} : vector<8x512xf32> to vector<8x128xf32>
    %168 = math.tanh %167 : vector<8x128xf32>
    %169 = arith.mulf %165, %131 : vector<8x128xf32>
    %170 = arith.mulf %164, %168 : vector<8x128xf32>
    %171 = arith.addf %169, %170 : vector<8x128xf32>
    %172 = math.tanh %171 : vector<8x128xf32>
    %173 = arith.mulf %166, %172 : vector<8x128xf32>
    %174 = vector.extract_strided_slice %5 {offsets = [32, 0], sizes = [8, 512], strides = [1, 1]} : vector<64x1024xf32> to vector<8x512xf32>
    %175 = arith.truncf %157 : vector<8x128xf32> to vector<8x128xbf16>
    %cst_30 = arith.constant dense<0.000000e+00> : vector<8x512xf32>
    %176 = tpu.matmul %175, %7, %cst_30 {dimension_numbers = #tpu.dot_dimension_numbers<[1], [0], [0], [1], [0, 0, 1, 1], [], []>} : vector<8x128xbf16>, vector<128x512xbf16>, vector<8x512xf32> -> vector<8x512xf32>
    %177 = arith.addf %174, %176 : vector<8x512xf32>
    %178 = vector.extract_strided_slice %5 {offsets = [24, 512], sizes = [8, 512], strides = [1, 1]} : vector<64x1024xf32> to vector<8x512xf32>
    %179 = arith.truncf %173 : vector<8x128xf32> to vector<8x128xbf16>
    %cst_31 = arith.constant dense<0.000000e+00> : vector<8x512xf32>
    %180 = tpu.matmul %179, %9, %cst_31 {dimension_numbers = #tpu.dot_dimension_numbers<[1], [0], [0], [1], [0, 0, 1, 1], [], []>} : vector<8x128xbf16>, vector<128x512xbf16>, vector<8x512xf32> -> vector<8x512xf32>
    %181 = arith.addf %178, %180 : vector<8x512xf32>
    %182 = vector.extract_strided_slice %177 {offsets = [0, 0], sizes = [8, 384], strides = [1, 1]} : vector<8x512xf32> to vector<8x384xf32>
    %183 = arith.negf %182 : vector<8x384xf32>
    %184 = math.exp %183 : vector<8x384xf32>
    %cst_32 = arith.constant 1.000000e+00 : f32
    %185 = vector.broadcast %cst_32 : f32 to vector<8x384xf32>
    %186 = arith.addf %185, %184 : vector<8x384xf32>
    %187 = arith.divf %185, %186 : vector<8x384xf32>
    %188 = vector.extract_strided_slice %187 {offsets = [0, 0], sizes = [8, 128], strides = [1, 1]} : vector<8x384xf32> to vector<8x128xf32>
    %189 = vector.extract_strided_slice %187 {offsets = [0, 128], sizes = [8, 128], strides = [1, 1]} : vector<8x384xf32> to vector<8x128xf32>
    %190 = vector.extract_strided_slice %187 {offsets = [0, 256], sizes = [8, 128], strides = [1, 1]} : vector<8x384xf32> to vector<8x128xf32>
    %191 = vector.extract_strided_slice %177 {offsets = [0, 384], sizes = [8, 128], strides = [1, 1]} : vector<8x512xf32> to vector<8x128xf32>
    %192 = math.tanh %191 : vector<8x128xf32>
    %193 = arith.mulf %189, %155 : vector<8x128xf32>
    %194 = arith.mulf %188, %192 : vector<8x128xf32>
    %195 = arith.addf %193, %194 : vector<8x128xf32>
    %196 = math.tanh %195 : vector<8x128xf32>
    %197 = arith.mulf %190, %196 : vector<8x128xf32>
    %198 = vector.extract_strided_slice %181 {offsets = [0, 0], sizes = [8, 384], strides = [1, 1]} : vector<8x512xf32> to vector<8x384xf32>
    %199 = arith.negf %198 : vector<8x384xf32>
    %200 = math.exp %199 : vector<8x384xf32>
    %cst_33 = arith.constant 1.000000e+00 : f32
    %201 = vector.broadcast %cst_33 : f32 to vector<8x384xf32>
    %202 = arith.addf %201, %200 : vector<8x384xf32>
    %203 = arith.divf %201, %202 : vector<8x384xf32>
    %204 = vector.extract_strided_slice %203 {offsets = [0, 0], sizes = [8, 128], strides = [1, 1]} : vector<8x384xf32> to vector<8x128xf32>
    %205 = vector.extract_strided_slice %203 {offsets = [0, 128], sizes = [8, 128], strides = [1, 1]} : vector<8x384xf32> to vector<8x128xf32>
    %206 = vector.extract_strided_slice %203 {offsets = [0, 256], sizes = [8, 128], strides = [1, 1]} : vector<8x384xf32> to vector<8x128xf32>
    %207 = vector.extract_strided_slice %181 {offsets = [0, 384], sizes = [8, 128], strides = [1, 1]} : vector<8x512xf32> to vector<8x128xf32>
    %208 = math.tanh %207 : vector<8x128xf32>
    %209 = arith.mulf %205, %171 : vector<8x128xf32>
    %210 = arith.mulf %204, %208 : vector<8x128xf32>
    %211 = arith.addf %209, %210 : vector<8x128xf32>
    %212 = math.tanh %211 : vector<8x128xf32>
    %213 = arith.mulf %206, %212 : vector<8x128xf32>
    %214 = vector.extract_strided_slice %5 {offsets = [40, 0], sizes = [8, 512], strides = [1, 1]} : vector<64x1024xf32> to vector<8x512xf32>
    %215 = arith.truncf %197 : vector<8x128xf32> to vector<8x128xbf16>
    %cst_34 = arith.constant dense<0.000000e+00> : vector<8x512xf32>
    %216 = tpu.matmul %215, %7, %cst_34 {dimension_numbers = #tpu.dot_dimension_numbers<[1], [0], [0], [1], [0, 0, 1, 1], [], []>} : vector<8x128xbf16>, vector<128x512xbf16>, vector<8x512xf32> -> vector<8x512xf32>
    %217 = arith.addf %214, %216 : vector<8x512xf32>
    %218 = vector.extract_strided_slice %5 {offsets = [16, 512], sizes = [8, 512], strides = [1, 1]} : vector<64x1024xf32> to vector<8x512xf32>
    %219 = arith.truncf %213 : vector<8x128xf32> to vector<8x128xbf16>
    %cst_35 = arith.constant dense<0.000000e+00> : vector<8x512xf32>
    %220 = tpu.matmul %219, %9, %cst_35 {dimension_numbers = #tpu.dot_dimension_numbers<[1], [0], [0], [1], [0, 0, 1, 1], [], []>} : vector<8x128xbf16>, vector<128x512xbf16>, vector<8x512xf32> -> vector<8x512xf32>
    %221 = arith.addf %218, %220 : vector<8x512xf32>
    %222 = vector.extract_strided_slice %217 {offsets = [0, 0], sizes = [8, 384], strides = [1, 1]} : vector<8x512xf32> to vector<8x384xf32>
    %223 = arith.negf %222 : vector<8x384xf32>
    %224 = math.exp %223 : vector<8x384xf32>
    %cst_36 = arith.constant 1.000000e+00 : f32
    %225 = vector.broadcast %cst_36 : f32 to vector<8x384xf32>
    %226 = arith.addf %225, %224 : vector<8x384xf32>
    %227 = arith.divf %225, %226 : vector<8x384xf32>
    %228 = vector.extract_strided_slice %227 {offsets = [0, 0], sizes = [8, 128], strides = [1, 1]} : vector<8x384xf32> to vector<8x128xf32>
    %229 = vector.extract_strided_slice %227 {offsets = [0, 128], sizes = [8, 128], strides = [1, 1]} : vector<8x384xf32> to vector<8x128xf32>
    %230 = vector.extract_strided_slice %227 {offsets = [0, 256], sizes = [8, 128], strides = [1, 1]} : vector<8x384xf32> to vector<8x128xf32>
    %231 = vector.extract_strided_slice %217 {offsets = [0, 384], sizes = [8, 128], strides = [1, 1]} : vector<8x512xf32> to vector<8x128xf32>
    %232 = math.tanh %231 : vector<8x128xf32>
    %233 = arith.mulf %229, %195 : vector<8x128xf32>
    %234 = arith.mulf %228, %232 : vector<8x128xf32>
    %235 = arith.addf %233, %234 : vector<8x128xf32>
    %236 = math.tanh %235 : vector<8x128xf32>
    %237 = arith.mulf %230, %236 : vector<8x128xf32>
    %238 = vector.extract_strided_slice %221 {offsets = [0, 0], sizes = [8, 384], strides = [1, 1]} : vector<8x512xf32> to vector<8x384xf32>
    %239 = arith.negf %238 : vector<8x384xf32>
    %240 = math.exp %239 : vector<8x384xf32>
    %cst_37 = arith.constant 1.000000e+00 : f32
    %241 = vector.broadcast %cst_37 : f32 to vector<8x384xf32>
    %242 = arith.addf %241, %240 : vector<8x384xf32>
    %243 = arith.divf %241, %242 : vector<8x384xf32>
    %244 = vector.extract_strided_slice %243 {offsets = [0, 0], sizes = [8, 128], strides = [1, 1]} : vector<8x384xf32> to vector<8x128xf32>
    %245 = vector.extract_strided_slice %243 {offsets = [0, 128], sizes = [8, 128], strides = [1, 1]} : vector<8x384xf32> to vector<8x128xf32>
    %246 = vector.extract_strided_slice %243 {offsets = [0, 256], sizes = [8, 128], strides = [1, 1]} : vector<8x384xf32> to vector<8x128xf32>
    %247 = vector.extract_strided_slice %221 {offsets = [0, 384], sizes = [8, 128], strides = [1, 1]} : vector<8x512xf32> to vector<8x128xf32>
    %248 = math.tanh %247 : vector<8x128xf32>
    %249 = arith.mulf %245, %211 : vector<8x128xf32>
    %250 = arith.mulf %244, %248 : vector<8x128xf32>
    %251 = arith.addf %249, %250 : vector<8x128xf32>
    %252 = math.tanh %251 : vector<8x128xf32>
    %253 = arith.mulf %246, %252 : vector<8x128xf32>
    %254 = vector.extract_strided_slice %5 {offsets = [48, 0], sizes = [8, 512], strides = [1, 1]} : vector<64x1024xf32> to vector<8x512xf32>
    %255 = arith.truncf %237 : vector<8x128xf32> to vector<8x128xbf16>
    %cst_38 = arith.constant dense<0.000000e+00> : vector<8x512xf32>
    %256 = tpu.matmul %255, %7, %cst_38 {dimension_numbers = #tpu.dot_dimension_numbers<[1], [0], [0], [1], [0, 0, 1, 1], [], []>} : vector<8x128xbf16>, vector<128x512xbf16>, vector<8x512xf32> -> vector<8x512xf32>
    %257 = arith.addf %254, %256 : vector<8x512xf32>
    %258 = vector.extract_strided_slice %5 {offsets = [8, 512], sizes = [8, 512], strides = [1, 1]} : vector<64x1024xf32> to vector<8x512xf32>
    %259 = arith.truncf %253 : vector<8x128xf32> to vector<8x128xbf16>
    %cst_39 = arith.constant dense<0.000000e+00> : vector<8x512xf32>
    %260 = tpu.matmul %259, %9, %cst_39 {dimension_numbers = #tpu.dot_dimension_numbers<[1], [0], [0], [1], [0, 0, 1, 1], [], []>} : vector<8x128xbf16>, vector<128x512xbf16>, vector<8x512xf32> -> vector<8x512xf32>
    %261 = arith.addf %258, %260 : vector<8x512xf32>
    %262 = vector.extract_strided_slice %257 {offsets = [0, 0], sizes = [8, 384], strides = [1, 1]} : vector<8x512xf32> to vector<8x384xf32>
    %263 = arith.negf %262 : vector<8x384xf32>
    %264 = math.exp %263 : vector<8x384xf32>
    %cst_40 = arith.constant 1.000000e+00 : f32
    %265 = vector.broadcast %cst_40 : f32 to vector<8x384xf32>
    %266 = arith.addf %265, %264 : vector<8x384xf32>
    %267 = arith.divf %265, %266 : vector<8x384xf32>
    %268 = vector.extract_strided_slice %267 {offsets = [0, 0], sizes = [8, 128], strides = [1, 1]} : vector<8x384xf32> to vector<8x128xf32>
    %269 = vector.extract_strided_slice %267 {offsets = [0, 128], sizes = [8, 128], strides = [1, 1]} : vector<8x384xf32> to vector<8x128xf32>
    %270 = vector.extract_strided_slice %267 {offsets = [0, 256], sizes = [8, 128], strides = [1, 1]} : vector<8x384xf32> to vector<8x128xf32>
    %271 = vector.extract_strided_slice %257 {offsets = [0, 384], sizes = [8, 128], strides = [1, 1]} : vector<8x512xf32> to vector<8x128xf32>
    %272 = math.tanh %271 : vector<8x128xf32>
    %273 = arith.mulf %269, %235 : vector<8x128xf32>
    %274 = arith.mulf %268, %272 : vector<8x128xf32>
    %275 = arith.addf %273, %274 : vector<8x128xf32>
    %276 = math.tanh %275 : vector<8x128xf32>
    %277 = arith.mulf %270, %276 : vector<8x128xf32>
    %278 = vector.extract_strided_slice %261 {offsets = [0, 0], sizes = [8, 384], strides = [1, 1]} : vector<8x512xf32> to vector<8x384xf32>
    %279 = arith.negf %278 : vector<8x384xf32>
    %280 = math.exp %279 : vector<8x384xf32>
    %cst_41 = arith.constant 1.000000e+00 : f32
    %281 = vector.broadcast %cst_41 : f32 to vector<8x384xf32>
    %282 = arith.addf %281, %280 : vector<8x384xf32>
    %283 = arith.divf %281, %282 : vector<8x384xf32>
    %284 = vector.extract_strided_slice %283 {offsets = [0, 0], sizes = [8, 128], strides = [1, 1]} : vector<8x384xf32> to vector<8x128xf32>
    %285 = vector.extract_strided_slice %283 {offsets = [0, 128], sizes = [8, 128], strides = [1, 1]} : vector<8x384xf32> to vector<8x128xf32>
    %286 = vector.extract_strided_slice %283 {offsets = [0, 256], sizes = [8, 128], strides = [1, 1]} : vector<8x384xf32> to vector<8x128xf32>
    %287 = vector.extract_strided_slice %261 {offsets = [0, 384], sizes = [8, 128], strides = [1, 1]} : vector<8x512xf32> to vector<8x128xf32>
    %288 = math.tanh %287 : vector<8x128xf32>
    %289 = arith.mulf %285, %251 : vector<8x128xf32>
    %290 = arith.mulf %284, %288 : vector<8x128xf32>
    %291 = arith.addf %289, %290 : vector<8x128xf32>
    %292 = math.tanh %291 : vector<8x128xf32>
    %293 = arith.mulf %286, %292 : vector<8x128xf32>
    %294 = vector.extract_strided_slice %5 {offsets = [56, 0], sizes = [8, 512], strides = [1, 1]} : vector<64x1024xf32> to vector<8x512xf32>
    %295 = arith.truncf %277 : vector<8x128xf32> to vector<8x128xbf16>
    %cst_42 = arith.constant dense<0.000000e+00> : vector<8x512xf32>
    %296 = tpu.matmul %295, %7, %cst_42 {dimension_numbers = #tpu.dot_dimension_numbers<[1], [0], [0], [1], [0, 0, 1, 1], [], []>} : vector<8x128xbf16>, vector<128x512xbf16>, vector<8x512xf32> -> vector<8x512xf32>
    %297 = arith.addf %294, %296 : vector<8x512xf32>
    %298 = vector.extract_strided_slice %5 {offsets = [0, 512], sizes = [8, 512], strides = [1, 1]} : vector<64x1024xf32> to vector<8x512xf32>
    %299 = arith.truncf %293 : vector<8x128xf32> to vector<8x128xbf16>
    %cst_43 = arith.constant dense<0.000000e+00> : vector<8x512xf32>
    %300 = tpu.matmul %299, %9, %cst_43 {dimension_numbers = #tpu.dot_dimension_numbers<[1], [0], [0], [1], [0, 0, 1, 1], [], []>} : vector<8x128xbf16>, vector<128x512xbf16>, vector<8x512xf32> -> vector<8x512xf32>
    %301 = arith.addf %298, %300 : vector<8x512xf32>
    %302 = vector.extract_strided_slice %297 {offsets = [0, 0], sizes = [8, 384], strides = [1, 1]} : vector<8x512xf32> to vector<8x384xf32>
    %303 = arith.negf %302 : vector<8x384xf32>
    %304 = math.exp %303 : vector<8x384xf32>
    %cst_44 = arith.constant 1.000000e+00 : f32
    %305 = vector.broadcast %cst_44 : f32 to vector<8x384xf32>
    %306 = arith.addf %305, %304 : vector<8x384xf32>
    %307 = arith.divf %305, %306 : vector<8x384xf32>
    %308 = vector.extract_strided_slice %307 {offsets = [0, 0], sizes = [8, 128], strides = [1, 1]} : vector<8x384xf32> to vector<8x128xf32>
    %309 = vector.extract_strided_slice %307 {offsets = [0, 128], sizes = [8, 128], strides = [1, 1]} : vector<8x384xf32> to vector<8x128xf32>
    %310 = vector.extract_strided_slice %307 {offsets = [0, 256], sizes = [8, 128], strides = [1, 1]} : vector<8x384xf32> to vector<8x128xf32>
    %311 = vector.extract_strided_slice %297 {offsets = [0, 384], sizes = [8, 128], strides = [1, 1]} : vector<8x512xf32> to vector<8x128xf32>
    %312 = math.tanh %311 : vector<8x128xf32>
    %313 = arith.mulf %309, %275 : vector<8x128xf32>
    %314 = arith.mulf %308, %312 : vector<8x128xf32>
    %315 = arith.addf %313, %314 : vector<8x128xf32>
    %316 = math.tanh %315 : vector<8x128xf32>
    %317 = arith.mulf %310, %316 : vector<8x128xf32>
    %318 = vector.extract_strided_slice %301 {offsets = [0, 0], sizes = [8, 384], strides = [1, 1]} : vector<8x512xf32> to vector<8x384xf32>
    %319 = arith.negf %318 : vector<8x384xf32>
    %320 = math.exp %319 : vector<8x384xf32>
    %cst_45 = arith.constant 1.000000e+00 : f32
    %321 = vector.broadcast %cst_45 : f32 to vector<8x384xf32>
    %322 = arith.addf %321, %320 : vector<8x384xf32>
    %323 = arith.divf %321, %322 : vector<8x384xf32>
    %324 = vector.extract_strided_slice %323 {offsets = [0, 0], sizes = [8, 128], strides = [1, 1]} : vector<8x384xf32> to vector<8x128xf32>
    %325 = vector.extract_strided_slice %323 {offsets = [0, 128], sizes = [8, 128], strides = [1, 1]} : vector<8x384xf32> to vector<8x128xf32>
    %326 = vector.extract_strided_slice %323 {offsets = [0, 256], sizes = [8, 128], strides = [1, 1]} : vector<8x384xf32> to vector<8x128xf32>
    %327 = vector.extract_strided_slice %301 {offsets = [0, 384], sizes = [8, 128], strides = [1, 1]} : vector<8x512xf32> to vector<8x128xf32>
    %328 = math.tanh %327 : vector<8x128xf32>
    %329 = arith.mulf %325, %291 : vector<8x128xf32>
    %330 = arith.mulf %324, %328 : vector<8x128xf32>
    %331 = arith.addf %329, %330 : vector<8x128xf32>
    %332 = math.tanh %331 : vector<8x128xf32>
    %333 = arith.mulf %326, %332 : vector<8x128xf32>
    %334 = tpu.concatenate %37, %77, %117, %157, %197, %237, %277, %317 in 0 : vector<8x128xf32>, vector<8x128xf32>, vector<8x128xf32>, vector<8x128xf32>, vector<8x128xf32>, vector<8x128xf32>, vector<8x128xf32>, vector<8x128xf32> -> vector<64x128xf32>
    %335 = tpu.concatenate %333, %293, %253, %213, %173, %133, %93, %53 in 0 : vector<8x128xf32>, vector<8x128xf32>, vector<8x128xf32>, vector<8x128xf32>, vector<8x128xf32>, vector<8x128xf32>, vector<8x128xf32>, vector<8x128xf32> -> vector<64x128xf32>
    %336 = tpu.concatenate %334, %335 in 1 : vector<64x128xf32>, vector<64x128xf32> -> vector<64x256xf32>
    %337 = arith.truncf %336 : vector<64x256xf32> to vector<64x256xbf16>
    %c0_46 = arith.constant 0 : index
    %c0_47 = arith.constant 0 : index
    %338 = vector.load %arg4[%c0_46, %c0_47] : memref<256x1024xbf16, #tpu.memory_space<vmem>>, vector<256x1024xbf16>
    %cst_48 = arith.constant dense<0.000000e+00> : vector<64x1024xf32>
    %339 = tpu.matmul %337, %338, %cst_48 {dimension_numbers = #tpu.dot_dimension_numbers<[1], [0], [0], [1], [0, 0, 1, 1], [], []>} : vector<64x256xbf16>, vector<256x1024xbf16>, vector<64x1024xf32> -> vector<64x1024xf32>
    %c0_49 = arith.constant 0 : index
    %c0_50 = arith.constant 0 : index
    %340 = vector.load %arg6[%c0_49, %c0_50] : memref<1x1024xf32, #tpu.memory_space<vmem>>, vector<1x1024xf32>
    %341 = vector.broadcast %340 : vector<1x1024xf32> to vector<64x1024xf32>
    %342 = arith.addf %339, %341 : vector<64x1024xf32>
    %c0_51 = arith.constant 0 : index
    %c0_52 = arith.constant 0 : index
    %c0_53 = arith.constant 0 : index
    %343 = vector.load %arg5[%c0_51, %c0_52, %c0_53] : memref<2x128x512xbf16, #tpu.memory_space<vmem>>, vector<1x128x512xbf16>
    %344 = vector.shape_cast %343 : vector<1x128x512xbf16> to vector<128x512xbf16>
    %c1_54 = arith.constant 1 : index
    %c0_55 = arith.constant 0 : index
    %c0_56 = arith.constant 0 : index
    %345 = vector.load %arg5[%c1_54, %c0_55, %c0_56] : memref<2x128x512xbf16, #tpu.memory_space<vmem>>, vector<1x128x512xbf16>
    %346 = vector.shape_cast %345 : vector<1x128x512xbf16> to vector<128x512xbf16>
    %cst_57 = arith.constant 0.000000e+00 : f32
    %347 = vector.broadcast %cst_57 : f32 to vector<8x128xf32>
    %cst_58 = arith.constant 0.000000e+00 : f32
    %348 = vector.broadcast %cst_58 : f32 to vector<8x128xf32>
    %cst_59 = arith.constant 0.000000e+00 : f32
    %349 = vector.broadcast %cst_59 : f32 to vector<8x128xf32>
    %cst_60 = arith.constant 0.000000e+00 : f32
    %350 = vector.broadcast %cst_60 : f32 to vector<8x128xf32>
    %351 = vector.extract_strided_slice %342 {offsets = [0, 0], sizes = [8, 512], strides = [1, 1]} : vector<64x1024xf32> to vector<8x512xf32>
    %352 = arith.truncf %347 : vector<8x128xf32> to vector<8x128xbf16>
    %cst_61 = arith.constant dense<0.000000e+00> : vector<8x512xf32>
    %353 = tpu.matmul %352, %344, %cst_61 {dimension_numbers = #tpu.dot_dimension_numbers<[1], [0], [0], [1], [0, 0, 1, 1], [], []>} : vector<8x128xbf16>, vector<128x512xbf16>, vector<8x512xf32> -> vector<8x512xf32>
    %354 = arith.addf %351, %353 : vector<8x512xf32>
    %355 = vector.extract_strided_slice %342 {offsets = [56, 512], sizes = [8, 512], strides = [1, 1]} : vector<64x1024xf32> to vector<8x512xf32>
    %356 = arith.truncf %349 : vector<8x128xf32> to vector<8x128xbf16>
    %cst_62 = arith.constant dense<0.000000e+00> : vector<8x512xf32>
    %357 = tpu.matmul %356, %346, %cst_62 {dimension_numbers = #tpu.dot_dimension_numbers<[1], [0], [0], [1], [0, 0, 1, 1], [], []>} : vector<8x128xbf16>, vector<128x512xbf16>, vector<8x512xf32> -> vector<8x512xf32>
    %358 = arith.addf %355, %357 : vector<8x512xf32>
    %359 = vector.extract_strided_slice %354 {offsets = [0, 0], sizes = [8, 384], strides = [1, 1]} : vector<8x512xf32> to vector<8x384xf32>
    %360 = arith.negf %359 : vector<8x384xf32>
    %361 = math.exp %360 : vector<8x384xf32>
    %cst_63 = arith.constant 1.000000e+00 : f32
    %362 = vector.broadcast %cst_63 : f32 to vector<8x384xf32>
    %363 = arith.addf %362, %361 : vector<8x384xf32>
    %364 = arith.divf %362, %363 : vector<8x384xf32>
    %365 = vector.extract_strided_slice %364 {offsets = [0, 0], sizes = [8, 128], strides = [1, 1]} : vector<8x384xf32> to vector<8x128xf32>
    %366 = vector.extract_strided_slice %364 {offsets = [0, 128], sizes = [8, 128], strides = [1, 1]} : vector<8x384xf32> to vector<8x128xf32>
    %367 = vector.extract_strided_slice %364 {offsets = [0, 256], sizes = [8, 128], strides = [1, 1]} : vector<8x384xf32> to vector<8x128xf32>
    %368 = vector.extract_strided_slice %354 {offsets = [0, 384], sizes = [8, 128], strides = [1, 1]} : vector<8x512xf32> to vector<8x128xf32>
    %369 = math.tanh %368 : vector<8x128xf32>
    %370 = arith.mulf %366, %348 : vector<8x128xf32>
    %371 = arith.mulf %365, %369 : vector<8x128xf32>
    %372 = arith.addf %370, %371 : vector<8x128xf32>
    %373 = math.tanh %372 : vector<8x128xf32>
    %374 = arith.mulf %367, %373 : vector<8x128xf32>
    %375 = vector.extract_strided_slice %358 {offsets = [0, 0], sizes = [8, 384], strides = [1, 1]} : vector<8x512xf32> to vector<8x384xf32>
    %376 = arith.negf %375 : vector<8x384xf32>
    %377 = math.exp %376 : vector<8x384xf32>
    %cst_64 = arith.constant 1.000000e+00 : f32
    %378 = vector.broadcast %cst_64 : f32 to vector<8x384xf32>
    %379 = arith.addf %378, %377 : vector<8x384xf32>
    %380 = arith.divf %378, %379 : vector<8x384xf32>
    %381 = vector.extract_strided_slice %380 {offsets = [0, 0], sizes = [8, 128], strides = [1, 1]} : vector<8x384xf32> to vector<8x128xf32>
    %382 = vector.extract_strided_slice %380 {offsets = [0, 128], sizes = [8, 128], strides = [1, 1]} : vector<8x384xf32> to vector<8x128xf32>
    %383 = vector.extract_strided_slice %380 {offsets = [0, 256], sizes = [8, 128], strides = [1, 1]} : vector<8x384xf32> to vector<8x128xf32>
    %384 = vector.extract_strided_slice %358 {offsets = [0, 384], sizes = [8, 128], strides = [1, 1]} : vector<8x512xf32> to vector<8x128xf32>
    %385 = math.tanh %384 : vector<8x128xf32>
    %386 = arith.mulf %382, %350 : vector<8x128xf32>
    %387 = arith.mulf %381, %385 : vector<8x128xf32>
    %388 = arith.addf %386, %387 : vector<8x128xf32>
    %389 = math.tanh %388 : vector<8x128xf32>
    %390 = arith.mulf %383, %389 : vector<8x128xf32>
    %391 = vector.extract_strided_slice %342 {offsets = [8, 0], sizes = [8, 512], strides = [1, 1]} : vector<64x1024xf32> to vector<8x512xf32>
    %392 = arith.truncf %374 : vector<8x128xf32> to vector<8x128xbf16>
    %cst_65 = arith.constant dense<0.000000e+00> : vector<8x512xf32>
    %393 = tpu.matmul %392, %344, %cst_65 {dimension_numbers = #tpu.dot_dimension_numbers<[1], [0], [0], [1], [0, 0, 1, 1], [], []>} : vector<8x128xbf16>, vector<128x512xbf16>, vector<8x512xf32> -> vector<8x512xf32>
    %394 = arith.addf %391, %393 : vector<8x512xf32>
    %395 = vector.extract_strided_slice %342 {offsets = [48, 512], sizes = [8, 512], strides = [1, 1]} : vector<64x1024xf32> to vector<8x512xf32>
    %396 = arith.truncf %390 : vector<8x128xf32> to vector<8x128xbf16>
    %cst_66 = arith.constant dense<0.000000e+00> : vector<8x512xf32>
    %397 = tpu.matmul %396, %346, %cst_66 {dimension_numbers = #tpu.dot_dimension_numbers<[1], [0], [0], [1], [0, 0, 1, 1], [], []>} : vector<8x128xbf16>, vector<128x512xbf16>, vector<8x512xf32> -> vector<8x512xf32>
    %398 = arith.addf %395, %397 : vector<8x512xf32>
    %399 = vector.extract_strided_slice %394 {offsets = [0, 0], sizes = [8, 384], strides = [1, 1]} : vector<8x512xf32> to vector<8x384xf32>
    %400 = arith.negf %399 : vector<8x384xf32>
    %401 = math.exp %400 : vector<8x384xf32>
    %cst_67 = arith.constant 1.000000e+00 : f32
    %402 = vector.broadcast %cst_67 : f32 to vector<8x384xf32>
    %403 = arith.addf %402, %401 : vector<8x384xf32>
    %404 = arith.divf %402, %403 : vector<8x384xf32>
    %405 = vector.extract_strided_slice %404 {offsets = [0, 0], sizes = [8, 128], strides = [1, 1]} : vector<8x384xf32> to vector<8x128xf32>
    %406 = vector.extract_strided_slice %404 {offsets = [0, 128], sizes = [8, 128], strides = [1, 1]} : vector<8x384xf32> to vector<8x128xf32>
    %407 = vector.extract_strided_slice %404 {offsets = [0, 256], sizes = [8, 128], strides = [1, 1]} : vector<8x384xf32> to vector<8x128xf32>
    %408 = vector.extract_strided_slice %394 {offsets = [0, 384], sizes = [8, 128], strides = [1, 1]} : vector<8x512xf32> to vector<8x128xf32>
    %409 = math.tanh %408 : vector<8x128xf32>
    %410 = arith.mulf %406, %372 : vector<8x128xf32>
    %411 = arith.mulf %405, %409 : vector<8x128xf32>
    %412 = arith.addf %410, %411 : vector<8x128xf32>
    %413 = math.tanh %412 : vector<8x128xf32>
    %414 = arith.mulf %407, %413 : vector<8x128xf32>
    %415 = vector.extract_strided_slice %398 {offsets = [0, 0], sizes = [8, 384], strides = [1, 1]} : vector<8x512xf32> to vector<8x384xf32>
    %416 = arith.negf %415 : vector<8x384xf32>
    %417 = math.exp %416 : vector<8x384xf32>
    %cst_68 = arith.constant 1.000000e+00 : f32
    %418 = vector.broadcast %cst_68 : f32 to vector<8x384xf32>
    %419 = arith.addf %418, %417 : vector<8x384xf32>
    %420 = arith.divf %418, %419 : vector<8x384xf32>
    %421 = vector.extract_strided_slice %420 {offsets = [0, 0], sizes = [8, 128], strides = [1, 1]} : vector<8x384xf32> to vector<8x128xf32>
    %422 = vector.extract_strided_slice %420 {offsets = [0, 128], sizes = [8, 128], strides = [1, 1]} : vector<8x384xf32> to vector<8x128xf32>
    %423 = vector.extract_strided_slice %420 {offsets = [0, 256], sizes = [8, 128], strides = [1, 1]} : vector<8x384xf32> to vector<8x128xf32>
    %424 = vector.extract_strided_slice %398 {offsets = [0, 384], sizes = [8, 128], strides = [1, 1]} : vector<8x512xf32> to vector<8x128xf32>
    %425 = math.tanh %424 : vector<8x128xf32>
    %426 = arith.mulf %422, %388 : vector<8x128xf32>
    %427 = arith.mulf %421, %425 : vector<8x128xf32>
    %428 = arith.addf %426, %427 : vector<8x128xf32>
    %429 = math.tanh %428 : vector<8x128xf32>
    %430 = arith.mulf %423, %429 : vector<8x128xf32>
    %431 = vector.extract_strided_slice %342 {offsets = [16, 0], sizes = [8, 512], strides = [1, 1]} : vector<64x1024xf32> to vector<8x512xf32>
    %432 = arith.truncf %414 : vector<8x128xf32> to vector<8x128xbf16>
    %cst_69 = arith.constant dense<0.000000e+00> : vector<8x512xf32>
    %433 = tpu.matmul %432, %344, %cst_69 {dimension_numbers = #tpu.dot_dimension_numbers<[1], [0], [0], [1], [0, 0, 1, 1], [], []>} : vector<8x128xbf16>, vector<128x512xbf16>, vector<8x512xf32> -> vector<8x512xf32>
    %434 = arith.addf %431, %433 : vector<8x512xf32>
    %435 = vector.extract_strided_slice %342 {offsets = [40, 512], sizes = [8, 512], strides = [1, 1]} : vector<64x1024xf32> to vector<8x512xf32>
    %436 = arith.truncf %430 : vector<8x128xf32> to vector<8x128xbf16>
    %cst_70 = arith.constant dense<0.000000e+00> : vector<8x512xf32>
    %437 = tpu.matmul %436, %346, %cst_70 {dimension_numbers = #tpu.dot_dimension_numbers<[1], [0], [0], [1], [0, 0, 1, 1], [], []>} : vector<8x128xbf16>, vector<128x512xbf16>, vector<8x512xf32> -> vector<8x512xf32>
    %438 = arith.addf %435, %437 : vector<8x512xf32>
    %439 = vector.extract_strided_slice %434 {offsets = [0, 0], sizes = [8, 384], strides = [1, 1]} : vector<8x512xf32> to vector<8x384xf32>
    %440 = arith.negf %439 : vector<8x384xf32>
    %441 = math.exp %440 : vector<8x384xf32>
    %cst_71 = arith.constant 1.000000e+00 : f32
    %442 = vector.broadcast %cst_71 : f32 to vector<8x384xf32>
    %443 = arith.addf %442, %441 : vector<8x384xf32>
    %444 = arith.divf %442, %443 : vector<8x384xf32>
    %445 = vector.extract_strided_slice %444 {offsets = [0, 0], sizes = [8, 128], strides = [1, 1]} : vector<8x384xf32> to vector<8x128xf32>
    %446 = vector.extract_strided_slice %444 {offsets = [0, 128], sizes = [8, 128], strides = [1, 1]} : vector<8x384xf32> to vector<8x128xf32>
    %447 = vector.extract_strided_slice %444 {offsets = [0, 256], sizes = [8, 128], strides = [1, 1]} : vector<8x384xf32> to vector<8x128xf32>
    %448 = vector.extract_strided_slice %434 {offsets = [0, 384], sizes = [8, 128], strides = [1, 1]} : vector<8x512xf32> to vector<8x128xf32>
    %449 = math.tanh %448 : vector<8x128xf32>
    %450 = arith.mulf %446, %412 : vector<8x128xf32>
    %451 = arith.mulf %445, %449 : vector<8x128xf32>
    %452 = arith.addf %450, %451 : vector<8x128xf32>
    %453 = math.tanh %452 : vector<8x128xf32>
    %454 = arith.mulf %447, %453 : vector<8x128xf32>
    %455 = vector.extract_strided_slice %438 {offsets = [0, 0], sizes = [8, 384], strides = [1, 1]} : vector<8x512xf32> to vector<8x384xf32>
    %456 = arith.negf %455 : vector<8x384xf32>
    %457 = math.exp %456 : vector<8x384xf32>
    %cst_72 = arith.constant 1.000000e+00 : f32
    %458 = vector.broadcast %cst_72 : f32 to vector<8x384xf32>
    %459 = arith.addf %458, %457 : vector<8x384xf32>
    %460 = arith.divf %458, %459 : vector<8x384xf32>
    %461 = vector.extract_strided_slice %460 {offsets = [0, 0], sizes = [8, 128], strides = [1, 1]} : vector<8x384xf32> to vector<8x128xf32>
    %462 = vector.extract_strided_slice %460 {offsets = [0, 128], sizes = [8, 128], strides = [1, 1]} : vector<8x384xf32> to vector<8x128xf32>
    %463 = vector.extract_strided_slice %460 {offsets = [0, 256], sizes = [8, 128], strides = [1, 1]} : vector<8x384xf32> to vector<8x128xf32>
    %464 = vector.extract_strided_slice %438 {offsets = [0, 384], sizes = [8, 128], strides = [1, 1]} : vector<8x512xf32> to vector<8x128xf32>
    %465 = math.tanh %464 : vector<8x128xf32>
    %466 = arith.mulf %462, %428 : vector<8x128xf32>
    %467 = arith.mulf %461, %465 : vector<8x128xf32>
    %468 = arith.addf %466, %467 : vector<8x128xf32>
    %469 = math.tanh %468 : vector<8x128xf32>
    %470 = arith.mulf %463, %469 : vector<8x128xf32>
    %471 = vector.extract_strided_slice %342 {offsets = [24, 0], sizes = [8, 512], strides = [1, 1]} : vector<64x1024xf32> to vector<8x512xf32>
    %472 = arith.truncf %454 : vector<8x128xf32> to vector<8x128xbf16>
    %cst_73 = arith.constant dense<0.000000e+00> : vector<8x512xf32>
    %473 = tpu.matmul %472, %344, %cst_73 {dimension_numbers = #tpu.dot_dimension_numbers<[1], [0], [0], [1], [0, 0, 1, 1], [], []>} : vector<8x128xbf16>, vector<128x512xbf16>, vector<8x512xf32> -> vector<8x512xf32>
    %474 = arith.addf %471, %473 : vector<8x512xf32>
    %475 = vector.extract_strided_slice %342 {offsets = [32, 512], sizes = [8, 512], strides = [1, 1]} : vector<64x1024xf32> to vector<8x512xf32>
    %476 = arith.truncf %470 : vector<8x128xf32> to vector<8x128xbf16>
    %cst_74 = arith.constant dense<0.000000e+00> : vector<8x512xf32>
    %477 = tpu.matmul %476, %346, %cst_74 {dimension_numbers = #tpu.dot_dimension_numbers<[1], [0], [0], [1], [0, 0, 1, 1], [], []>} : vector<8x128xbf16>, vector<128x512xbf16>, vector<8x512xf32> -> vector<8x512xf32>
    %478 = arith.addf %475, %477 : vector<8x512xf32>
    %479 = vector.extract_strided_slice %474 {offsets = [0, 0], sizes = [8, 384], strides = [1, 1]} : vector<8x512xf32> to vector<8x384xf32>
    %480 = arith.negf %479 : vector<8x384xf32>
    %481 = math.exp %480 : vector<8x384xf32>
    %cst_75 = arith.constant 1.000000e+00 : f32
    %482 = vector.broadcast %cst_75 : f32 to vector<8x384xf32>
    %483 = arith.addf %482, %481 : vector<8x384xf32>
    %484 = arith.divf %482, %483 : vector<8x384xf32>
    %485 = vector.extract_strided_slice %484 {offsets = [0, 0], sizes = [8, 128], strides = [1, 1]} : vector<8x384xf32> to vector<8x128xf32>
    %486 = vector.extract_strided_slice %484 {offsets = [0, 128], sizes = [8, 128], strides = [1, 1]} : vector<8x384xf32> to vector<8x128xf32>
    %487 = vector.extract_strided_slice %484 {offsets = [0, 256], sizes = [8, 128], strides = [1, 1]} : vector<8x384xf32> to vector<8x128xf32>
    %488 = vector.extract_strided_slice %474 {offsets = [0, 384], sizes = [8, 128], strides = [1, 1]} : vector<8x512xf32> to vector<8x128xf32>
    %489 = math.tanh %488 : vector<8x128xf32>
    %490 = arith.mulf %486, %452 : vector<8x128xf32>
    %491 = arith.mulf %485, %489 : vector<8x128xf32>
    %492 = arith.addf %490, %491 : vector<8x128xf32>
    %493 = math.tanh %492 : vector<8x128xf32>
    %494 = arith.mulf %487, %493 : vector<8x128xf32>
    %495 = vector.extract_strided_slice %478 {offsets = [0, 0], sizes = [8, 384], strides = [1, 1]} : vector<8x512xf32> to vector<8x384xf32>
    %496 = arith.negf %495 : vector<8x384xf32>
    %497 = math.exp %496 : vector<8x384xf32>
    %cst_76 = arith.constant 1.000000e+00 : f32
    %498 = vector.broadcast %cst_76 : f32 to vector<8x384xf32>
    %499 = arith.addf %498, %497 : vector<8x384xf32>
    %500 = arith.divf %498, %499 : vector<8x384xf32>
    %501 = vector.extract_strided_slice %500 {offsets = [0, 0], sizes = [8, 128], strides = [1, 1]} : vector<8x384xf32> to vector<8x128xf32>
    %502 = vector.extract_strided_slice %500 {offsets = [0, 128], sizes = [8, 128], strides = [1, 1]} : vector<8x384xf32> to vector<8x128xf32>
    %503 = vector.extract_strided_slice %500 {offsets = [0, 256], sizes = [8, 128], strides = [1, 1]} : vector<8x384xf32> to vector<8x128xf32>
    %504 = vector.extract_strided_slice %478 {offsets = [0, 384], sizes = [8, 128], strides = [1, 1]} : vector<8x512xf32> to vector<8x128xf32>
    %505 = math.tanh %504 : vector<8x128xf32>
    %506 = arith.mulf %502, %468 : vector<8x128xf32>
    %507 = arith.mulf %501, %505 : vector<8x128xf32>
    %508 = arith.addf %506, %507 : vector<8x128xf32>
    %509 = math.tanh %508 : vector<8x128xf32>
    %510 = arith.mulf %503, %509 : vector<8x128xf32>
    %511 = vector.extract_strided_slice %342 {offsets = [32, 0], sizes = [8, 512], strides = [1, 1]} : vector<64x1024xf32> to vector<8x512xf32>
    %512 = arith.truncf %494 : vector<8x128xf32> to vector<8x128xbf16>
    %cst_77 = arith.constant dense<0.000000e+00> : vector<8x512xf32>
    %513 = tpu.matmul %512, %344, %cst_77 {dimension_numbers = #tpu.dot_dimension_numbers<[1], [0], [0], [1], [0, 0, 1, 1], [], []>} : vector<8x128xbf16>, vector<128x512xbf16>, vector<8x512xf32> -> vector<8x512xf32>
    %514 = arith.addf %511, %513 : vector<8x512xf32>
    %515 = vector.extract_strided_slice %342 {offsets = [24, 512], sizes = [8, 512], strides = [1, 1]} : vector<64x1024xf32> to vector<8x512xf32>
    %516 = arith.truncf %510 : vector<8x128xf32> to vector<8x128xbf16>
    %cst_78 = arith.constant dense<0.000000e+00> : vector<8x512xf32>
    %517 = tpu.matmul %516, %346, %cst_78 {dimension_numbers = #tpu.dot_dimension_numbers<[1], [0], [0], [1], [0, 0, 1, 1], [], []>} : vector<8x128xbf16>, vector<128x512xbf16>, vector<8x512xf32> -> vector<8x512xf32>
    %518 = arith.addf %515, %517 : vector<8x512xf32>
    %519 = vector.extract_strided_slice %514 {offsets = [0, 0], sizes = [8, 384], strides = [1, 1]} : vector<8x512xf32> to vector<8x384xf32>
    %520 = arith.negf %519 : vector<8x384xf32>
    %521 = math.exp %520 : vector<8x384xf32>
    %cst_79 = arith.constant 1.000000e+00 : f32
    %522 = vector.broadcast %cst_79 : f32 to vector<8x384xf32>
    %523 = arith.addf %522, %521 : vector<8x384xf32>
    %524 = arith.divf %522, %523 : vector<8x384xf32>
    %525 = vector.extract_strided_slice %524 {offsets = [0, 0], sizes = [8, 128], strides = [1, 1]} : vector<8x384xf32> to vector<8x128xf32>
    %526 = vector.extract_strided_slice %524 {offsets = [0, 128], sizes = [8, 128], strides = [1, 1]} : vector<8x384xf32> to vector<8x128xf32>
    %527 = vector.extract_strided_slice %524 {offsets = [0, 256], sizes = [8, 128], strides = [1, 1]} : vector<8x384xf32> to vector<8x128xf32>
    %528 = vector.extract_strided_slice %514 {offsets = [0, 384], sizes = [8, 128], strides = [1, 1]} : vector<8x512xf32> to vector<8x128xf32>
    %529 = math.tanh %528 : vector<8x128xf32>
    %530 = arith.mulf %526, %492 : vector<8x128xf32>
    %531 = arith.mulf %525, %529 : vector<8x128xf32>
    %532 = arith.addf %530, %531 : vector<8x128xf32>
    %533 = math.tanh %532 : vector<8x128xf32>
    %534 = arith.mulf %527, %533 : vector<8x128xf32>
    %535 = vector.extract_strided_slice %518 {offsets = [0, 0], sizes = [8, 384], strides = [1, 1]} : vector<8x512xf32> to vector<8x384xf32>
    %536 = arith.negf %535 : vector<8x384xf32>
    %537 = math.exp %536 : vector<8x384xf32>
    %cst_80 = arith.constant 1.000000e+00 : f32
    %538 = vector.broadcast %cst_80 : f32 to vector<8x384xf32>
    %539 = arith.addf %538, %537 : vector<8x384xf32>
    %540 = arith.divf %538, %539 : vector<8x384xf32>
    %541 = vector.extract_strided_slice %540 {offsets = [0, 0], sizes = [8, 128], strides = [1, 1]} : vector<8x384xf32> to vector<8x128xf32>
    %542 = vector.extract_strided_slice %540 {offsets = [0, 128], sizes = [8, 128], strides = [1, 1]} : vector<8x384xf32> to vector<8x128xf32>
    %543 = vector.extract_strided_slice %540 {offsets = [0, 256], sizes = [8, 128], strides = [1, 1]} : vector<8x384xf32> to vector<8x128xf32>
    %544 = vector.extract_strided_slice %518 {offsets = [0, 384], sizes = [8, 128], strides = [1, 1]} : vector<8x512xf32> to vector<8x128xf32>
    %545 = math.tanh %544 : vector<8x128xf32>
    %546 = arith.mulf %542, %508 : vector<8x128xf32>
    %547 = arith.mulf %541, %545 : vector<8x128xf32>
    %548 = arith.addf %546, %547 : vector<8x128xf32>
    %549 = math.tanh %548 : vector<8x128xf32>
    %550 = arith.mulf %543, %549 : vector<8x128xf32>
    %551 = vector.extract_strided_slice %342 {offsets = [40, 0], sizes = [8, 512], strides = [1, 1]} : vector<64x1024xf32> to vector<8x512xf32>
    %552 = arith.truncf %534 : vector<8x128xf32> to vector<8x128xbf16>
    %cst_81 = arith.constant dense<0.000000e+00> : vector<8x512xf32>
    %553 = tpu.matmul %552, %344, %cst_81 {dimension_numbers = #tpu.dot_dimension_numbers<[1], [0], [0], [1], [0, 0, 1, 1], [], []>} : vector<8x128xbf16>, vector<128x512xbf16>, vector<8x512xf32> -> vector<8x512xf32>
    %554 = arith.addf %551, %553 : vector<8x512xf32>
    %555 = vector.extract_strided_slice %342 {offsets = [16, 512], sizes = [8, 512], strides = [1, 1]} : vector<64x1024xf32> to vector<8x512xf32>
    %556 = arith.truncf %550 : vector<8x128xf32> to vector<8x128xbf16>
    %cst_82 = arith.constant dense<0.000000e+00> : vector<8x512xf32>
    %557 = tpu.matmul %556, %346, %cst_82 {dimension_numbers = #tpu.dot_dimension_numbers<[1], [0], [0], [1], [0, 0, 1, 1], [], []>} : vector<8x128xbf16>, vector<128x512xbf16>, vector<8x512xf32> -> vector<8x512xf32>
    %558 = arith.addf %555, %557 : vector<8x512xf32>
    %559 = vector.extract_strided_slice %554 {offsets = [0, 0], sizes = [8, 384], strides = [1, 1]} : vector<8x512xf32> to vector<8x384xf32>
    %560 = arith.negf %559 : vector<8x384xf32>
    %561 = math.exp %560 : vector<8x384xf32>
    %cst_83 = arith.constant 1.000000e+00 : f32
    %562 = vector.broadcast %cst_83 : f32 to vector<8x384xf32>
    %563 = arith.addf %562, %561 : vector<8x384xf32>
    %564 = arith.divf %562, %563 : vector<8x384xf32>
    %565 = vector.extract_strided_slice %564 {offsets = [0, 0], sizes = [8, 128], strides = [1, 1]} : vector<8x384xf32> to vector<8x128xf32>
    %566 = vector.extract_strided_slice %564 {offsets = [0, 128], sizes = [8, 128], strides = [1, 1]} : vector<8x384xf32> to vector<8x128xf32>
    %567 = vector.extract_strided_slice %564 {offsets = [0, 256], sizes = [8, 128], strides = [1, 1]} : vector<8x384xf32> to vector<8x128xf32>
    %568 = vector.extract_strided_slice %554 {offsets = [0, 384], sizes = [8, 128], strides = [1, 1]} : vector<8x512xf32> to vector<8x128xf32>
    %569 = math.tanh %568 : vector<8x128xf32>
    %570 = arith.mulf %566, %532 : vector<8x128xf32>
    %571 = arith.mulf %565, %569 : vector<8x128xf32>
    %572 = arith.addf %570, %571 : vector<8x128xf32>
    %573 = math.tanh %572 : vector<8x128xf32>
    %574 = arith.mulf %567, %573 : vector<8x128xf32>
    %575 = vector.extract_strided_slice %558 {offsets = [0, 0], sizes = [8, 384], strides = [1, 1]} : vector<8x512xf32> to vector<8x384xf32>
    %576 = arith.negf %575 : vector<8x384xf32>
    %577 = math.exp %576 : vector<8x384xf32>
    %cst_84 = arith.constant 1.000000e+00 : f32
    %578 = vector.broadcast %cst_84 : f32 to vector<8x384xf32>
    %579 = arith.addf %578, %577 : vector<8x384xf32>
    %580 = arith.divf %578, %579 : vector<8x384xf32>
    %581 = vector.extract_strided_slice %580 {offsets = [0, 0], sizes = [8, 128], strides = [1, 1]} : vector<8x384xf32> to vector<8x128xf32>
    %582 = vector.extract_strided_slice %580 {offsets = [0, 128], sizes = [8, 128], strides = [1, 1]} : vector<8x384xf32> to vector<8x128xf32>
    %583 = vector.extract_strided_slice %580 {offsets = [0, 256], sizes = [8, 128], strides = [1, 1]} : vector<8x384xf32> to vector<8x128xf32>
    %584 = vector.extract_strided_slice %558 {offsets = [0, 384], sizes = [8, 128], strides = [1, 1]} : vector<8x512xf32> to vector<8x128xf32>
    %585 = math.tanh %584 : vector<8x128xf32>
    %586 = arith.mulf %582, %548 : vector<8x128xf32>
    %587 = arith.mulf %581, %585 : vector<8x128xf32>
    %588 = arith.addf %586, %587 : vector<8x128xf32>
    %589 = math.tanh %588 : vector<8x128xf32>
    %590 = arith.mulf %583, %589 : vector<8x128xf32>
    %591 = vector.extract_strided_slice %342 {offsets = [48, 0], sizes = [8, 512], strides = [1, 1]} : vector<64x1024xf32> to vector<8x512xf32>
    %592 = arith.truncf %574 : vector<8x128xf32> to vector<8x128xbf16>
    %cst_85 = arith.constant dense<0.000000e+00> : vector<8x512xf32>
    %593 = tpu.matmul %592, %344, %cst_85 {dimension_numbers = #tpu.dot_dimension_numbers<[1], [0], [0], [1], [0, 0, 1, 1], [], []>} : vector<8x128xbf16>, vector<128x512xbf16>, vector<8x512xf32> -> vector<8x512xf32>
    %594 = arith.addf %591, %593 : vector<8x512xf32>
    %595 = vector.extract_strided_slice %342 {offsets = [8, 512], sizes = [8, 512], strides = [1, 1]} : vector<64x1024xf32> to vector<8x512xf32>
    %596 = arith.truncf %590 : vector<8x128xf32> to vector<8x128xbf16>
    %cst_86 = arith.constant dense<0.000000e+00> : vector<8x512xf32>
    %597 = tpu.matmul %596, %346, %cst_86 {dimension_numbers = #tpu.dot_dimension_numbers<[1], [0], [0], [1], [0, 0, 1, 1], [], []>} : vector<8x128xbf16>, vector<128x512xbf16>, vector<8x512xf32> -> vector<8x512xf32>
    %598 = arith.addf %595, %597 : vector<8x512xf32>
    %599 = vector.extract_strided_slice %594 {offsets = [0, 0], sizes = [8, 384], strides = [1, 1]} : vector<8x512xf32> to vector<8x384xf32>
    %600 = arith.negf %599 : vector<8x384xf32>
    %601 = math.exp %600 : vector<8x384xf32>
    %cst_87 = arith.constant 1.000000e+00 : f32
    %602 = vector.broadcast %cst_87 : f32 to vector<8x384xf32>
    %603 = arith.addf %602, %601 : vector<8x384xf32>
    %604 = arith.divf %602, %603 : vector<8x384xf32>
    %605 = vector.extract_strided_slice %604 {offsets = [0, 0], sizes = [8, 128], strides = [1, 1]} : vector<8x384xf32> to vector<8x128xf32>
    %606 = vector.extract_strided_slice %604 {offsets = [0, 128], sizes = [8, 128], strides = [1, 1]} : vector<8x384xf32> to vector<8x128xf32>
    %607 = vector.extract_strided_slice %604 {offsets = [0, 256], sizes = [8, 128], strides = [1, 1]} : vector<8x384xf32> to vector<8x128xf32>
    %608 = vector.extract_strided_slice %594 {offsets = [0, 384], sizes = [8, 128], strides = [1, 1]} : vector<8x512xf32> to vector<8x128xf32>
    %609 = math.tanh %608 : vector<8x128xf32>
    %610 = arith.mulf %606, %572 : vector<8x128xf32>
    %611 = arith.mulf %605, %609 : vector<8x128xf32>
    %612 = arith.addf %610, %611 : vector<8x128xf32>
    %613 = math.tanh %612 : vector<8x128xf32>
    %614 = arith.mulf %607, %613 : vector<8x128xf32>
    %615 = vector.extract_strided_slice %598 {offsets = [0, 0], sizes = [8, 384], strides = [1, 1]} : vector<8x512xf32> to vector<8x384xf32>
    %616 = arith.negf %615 : vector<8x384xf32>
    %617 = math.exp %616 : vector<8x384xf32>
    %cst_88 = arith.constant 1.000000e+00 : f32
    %618 = vector.broadcast %cst_88 : f32 to vector<8x384xf32>
    %619 = arith.addf %618, %617 : vector<8x384xf32>
    %620 = arith.divf %618, %619 : vector<8x384xf32>
    %621 = vector.extract_strided_slice %620 {offsets = [0, 0], sizes = [8, 128], strides = [1, 1]} : vector<8x384xf32> to vector<8x128xf32>
    %622 = vector.extract_strided_slice %620 {offsets = [0, 128], sizes = [8, 128], strides = [1, 1]} : vector<8x384xf32> to vector<8x128xf32>
    %623 = vector.extract_strided_slice %620 {offsets = [0, 256], sizes = [8, 128], strides = [1, 1]} : vector<8x384xf32> to vector<8x128xf32>
    %624 = vector.extract_strided_slice %598 {offsets = [0, 384], sizes = [8, 128], strides = [1, 1]} : vector<8x512xf32> to vector<8x128xf32>
    %625 = math.tanh %624 : vector<8x128xf32>
    %626 = arith.mulf %622, %588 : vector<8x128xf32>
    %627 = arith.mulf %621, %625 : vector<8x128xf32>
    %628 = arith.addf %626, %627 : vector<8x128xf32>
    %629 = math.tanh %628 : vector<8x128xf32>
    %630 = arith.mulf %623, %629 : vector<8x128xf32>
    %631 = vector.extract_strided_slice %342 {offsets = [56, 0], sizes = [8, 512], strides = [1, 1]} : vector<64x1024xf32> to vector<8x512xf32>
    %632 = arith.truncf %614 : vector<8x128xf32> to vector<8x128xbf16>
    %cst_89 = arith.constant dense<0.000000e+00> : vector<8x512xf32>
    %633 = tpu.matmul %632, %344, %cst_89 {dimension_numbers = #tpu.dot_dimension_numbers<[1], [0], [0], [1], [0, 0, 1, 1], [], []>} : vector<8x128xbf16>, vector<128x512xbf16>, vector<8x512xf32> -> vector<8x512xf32>
    %634 = arith.addf %631, %633 : vector<8x512xf32>
    %635 = vector.extract_strided_slice %342 {offsets = [0, 512], sizes = [8, 512], strides = [1, 1]} : vector<64x1024xf32> to vector<8x512xf32>
    %636 = arith.truncf %630 : vector<8x128xf32> to vector<8x128xbf16>
    %cst_90 = arith.constant dense<0.000000e+00> : vector<8x512xf32>
    %637 = tpu.matmul %636, %346, %cst_90 {dimension_numbers = #tpu.dot_dimension_numbers<[1], [0], [0], [1], [0, 0, 1, 1], [], []>} : vector<8x128xbf16>, vector<128x512xbf16>, vector<8x512xf32> -> vector<8x512xf32>
    %638 = arith.addf %635, %637 : vector<8x512xf32>
    %639 = vector.extract_strided_slice %634 {offsets = [0, 0], sizes = [8, 384], strides = [1, 1]} : vector<8x512xf32> to vector<8x384xf32>
    %640 = arith.negf %639 : vector<8x384xf32>
    %641 = math.exp %640 : vector<8x384xf32>
    %cst_91 = arith.constant 1.000000e+00 : f32
    %642 = vector.broadcast %cst_91 : f32 to vector<8x384xf32>
    %643 = arith.addf %642, %641 : vector<8x384xf32>
    %644 = arith.divf %642, %643 : vector<8x384xf32>
    %645 = vector.extract_strided_slice %644 {offsets = [0, 0], sizes = [8, 128], strides = [1, 1]} : vector<8x384xf32> to vector<8x128xf32>
    %646 = vector.extract_strided_slice %644 {offsets = [0, 128], sizes = [8, 128], strides = [1, 1]} : vector<8x384xf32> to vector<8x128xf32>
    %647 = vector.extract_strided_slice %644 {offsets = [0, 256], sizes = [8, 128], strides = [1, 1]} : vector<8x384xf32> to vector<8x128xf32>
    %648 = vector.extract_strided_slice %634 {offsets = [0, 384], sizes = [8, 128], strides = [1, 1]} : vector<8x512xf32> to vector<8x128xf32>
    %649 = math.tanh %648 : vector<8x128xf32>
    %650 = arith.mulf %646, %612 : vector<8x128xf32>
    %651 = arith.mulf %645, %649 : vector<8x128xf32>
    %652 = arith.addf %650, %651 : vector<8x128xf32>
    %653 = math.tanh %652 : vector<8x128xf32>
    %654 = arith.mulf %647, %653 : vector<8x128xf32>
    %655 = vector.extract_strided_slice %638 {offsets = [0, 0], sizes = [8, 384], strides = [1, 1]} : vector<8x512xf32> to vector<8x384xf32>
    %656 = arith.negf %655 : vector<8x384xf32>
    %657 = math.exp %656 : vector<8x384xf32>
    %cst_92 = arith.constant 1.000000e+00 : f32
    %658 = vector.broadcast %cst_92 : f32 to vector<8x384xf32>
    %659 = arith.addf %658, %657 : vector<8x384xf32>
    %660 = arith.divf %658, %659 : vector<8x384xf32>
    %661 = vector.extract_strided_slice %660 {offsets = [0, 0], sizes = [8, 128], strides = [1, 1]} : vector<8x384xf32> to vector<8x128xf32>
    %662 = vector.extract_strided_slice %660 {offsets = [0, 128], sizes = [8, 128], strides = [1, 1]} : vector<8x384xf32> to vector<8x128xf32>
    %663 = vector.extract_strided_slice %660 {offsets = [0, 256], sizes = [8, 128], strides = [1, 1]} : vector<8x384xf32> to vector<8x128xf32>
    %664 = vector.extract_strided_slice %638 {offsets = [0, 384], sizes = [8, 128], strides = [1, 1]} : vector<8x512xf32> to vector<8x128xf32>
    %665 = math.tanh %664 : vector<8x128xf32>
    %666 = arith.mulf %662, %628 : vector<8x128xf32>
    %667 = arith.mulf %661, %665 : vector<8x128xf32>
    %668 = arith.addf %666, %667 : vector<8x128xf32>
    %669 = math.tanh %668 : vector<8x128xf32>
    %670 = arith.mulf %663, %669 : vector<8x128xf32>
    %c0_93 = arith.constant 0 : index
    %c0_94 = arith.constant 0 : index
    %671 = vector.load %arg7[%c0_93, %c0_94] : memref<256x128xf32, #tpu.memory_space<vmem>>, vector<256x128xf32>
    %672 = vector.extract_strided_slice %671 {offsets = [0, 0], sizes = [128, 128], strides = [1, 1]} : vector<256x128xf32> to vector<128x128xf32>
    %cst_95 = arith.constant dense<0.000000e+00> : vector<8x128xf32>
    %673 = tpu.matmul %654, %672, %cst_95 {dimension_numbers = #tpu.dot_dimension_numbers<[1], [0], [0], [1], [0, 0, 1, 1], [], []>} : vector<8x128xf32>, vector<128x128xf32>, vector<8x128xf32> -> vector<8x128xf32>
    %674 = vector.extract_strided_slice %671 {offsets = [128, 0], sizes = [128, 128], strides = [1, 1]} : vector<256x128xf32> to vector<128x128xf32>
    %cst_96 = arith.constant dense<0.000000e+00> : vector<8x128xf32>
    %675 = tpu.matmul %670, %674, %cst_96 {dimension_numbers = #tpu.dot_dimension_numbers<[1], [0], [0], [1], [0, 0, 1, 1], [], []>} : vector<8x128xf32>, vector<128x128xf32>, vector<8x128xf32> -> vector<8x128xf32>
    %676 = arith.addf %673, %675 : vector<8x128xf32>
    %c0_97 = arith.constant 0 : index
    %c0_98 = arith.constant 0 : index
    %677 = vector.load %arg8[%c0_97, %c0_98] : memref<1x128xf32, #tpu.memory_space<vmem>>, vector<1x128xf32>
    %678 = vector.broadcast %677 : vector<1x128xf32> to vector<8x128xf32>
    %679 = arith.addf %676, %678 : vector<8x128xf32>
    %c0_99 = arith.constant 0 : index
    %c0_100 = arith.constant 0 : index
    %680 = vector.load %arg9[%c0_99, %c0_100] : memref<8x128xf32, #tpu.memory_space<vmem>>, vector<8x128xf32>
    tpu.vector_store %arg9[%c0_99, %c0_100], %679 {strides = array<i32>} : memref<8x128xf32, #tpu.memory_space<vmem>>, vector<8x128xf32>,
    return
  }
}

</mosaic_0001>

<bundles_post_ra>
// kernel: bilstm_classifier_forward.1
= control target key start
LH: loop header
LB: loop body
LE: loop exit
PB: predicated region body
PF: predicated region fallthrough
CT: control target
= control target key end

     0   :  { %v11975_v3 = vmov 0   ;;  %vm295_vm0 = vcmask 523264   ;;  %vm7755_vm1 = vmmov 0   ;;  %s11965_s1 = inlined_call_operand.vmem [shape: bf16[64,1024], index: 1, kind: input, shape index: {}]   ;;  %s11966_s0 = inlined_call_operand.vmem [shape: bf16[64,64], index: 0, kind: input, shape index: {}]   ;;  %s11967_s2 = inlined_call_operand.vmem [shape: bf16[2,128,512], index: 2, kind: input, shape index: {}]   ;;  %s11968_s3 = inlined_call_operand.vmem [shape: f32[1,1024], index: 3, kind: input, shape index: {}]   ;;  %s11969_s4 = inlined_call_operand.vmem [shape: bf16[256,1024], index: 4, kind: input, shape index: {}]   ;;  %s11970_s5 = inlined_call_operand.vmem [shape: bf16[2,128,512], index: 5, kind: input, shape index: {}]   ;;  %s11971_s6 = inlined_call_operand.vmem [shape: f32[1,1024], index: 6, kind: input, shape index: {}]   ;;  %s11972_s7 = inlined_call_operand.vmem [shape: f32[256,128], index: 7, kind: input, shape index: {}]   ;;  %s11973_s8 = inlined_call_operand.vmem [shape: f32[1,128], index: 8, kind: input, shape index: {}]   ;;  %s11974_s9 = inlined_call_operand.vmem [shape: f32[8,128], index: 9, kind: output, shape index: {}]  }
   0x1   :  { %v65_v0 = vld [vmem:[%s11965_s1 + $0xc0] sm:$0xff]  ;;  %v66_v2 = vld [vmem:[%s11965_s1 + $0xc8] sm:$0xff]  ;;  %340 = vmatprep.mubr.bf16.mxu0 %v11975_v3  ;;  %413 = vmatprep.mubr.bf16.mxu1 %v11975_v3  ;;  %v67_v31 = vld [vmem:[%s11965_s1 + $0xd0] sm:$0xff] }
   0x2   :  { %v69_v1 = vld [vmem:[%s11965_s1 + $0xe0] sm:$0xff]  ;;  %v70_v5 = vld [vmem:[%s11965_s1 + $0xe8] sm:$0xff]  ;;  %v71_v32 = vld [vmem:[%s11965_s1 + $0xf0] sm:$0xff] }
   0x3   :  { %v6242_v4 = vcombine.high %v65_v0, %v69_v1  ;;  %v6241_v6 = vcombine.low %v65_v0, %v69_v1  ;;  %v57_v7 = vld [vmem:[%s11965_s1 + $0x80] sm:$0xff]  ;;  %v6244_v9 = vcombine.high %v66_v2, %v70_v5  ;;  %v6243_v10 = vcombine.low %v66_v2, %v70_v5  ;;  %v58_v12 = vld [vmem:[%s11965_s1 + $0x88] sm:$0xff]  ;;  %v68_v33 = vld [vmem:[%s11965_s1 + $0xd8] sm:$0xff] }
   0x4   :  { %v61_v8 = vld [vmem:[%s11965_s1 + $0xa0] sm:$0xff]  ;;  %v62_v13 = vld [vmem:[%s11965_s1 + $0xa8] sm:$0xff]  ;;  %v72_v34 = vld [vmem:[%s11965_s1 + $0xf8] sm:$0xff]  ;;  %v6246_v37 = vcombine.high %v67_v31, %v71_v32  ;;  %v6245_v42 = vcombine.low %v67_v31, %v71_v32 }
   0x5   :  { %v6234_v11 = vcombine.high %v57_v7, %v61_v8  ;;  %v49_v14 = vld [vmem:[%s11965_s1 + $0x40] sm:$0xff]  ;;  %316 = vmatprep.subr.bf16.mxu0 %v6242_v4  ;;  %v6236_v15 = vcombine.high %v58_v12, %v62_v13  ;;  %v50_v17 = vld [vmem:[%s11965_s1 + $0x48] sm:$0xff]  ;;  %389 = vmatprep.subr.bf16.mxu1 %v6244_v9  ;;  %v6233_v19 = vcombine.low %v57_v7, %v61_v8  ;;  %v59_v39 = vld [vmem:[%s11965_s1 + $0x90] sm:$0xff] }
   0x6   :  { %v53_v16 = vld [vmem:[%s11965_s1 + $0x60] sm:$0xff]  ;;  %v54_v18 = vld [vmem:[%s11965_s1 + $0x68] sm:$0xff]  ;;  %317 = vmatpush1.bf16.msra.mxu0 %v6241_v6  ;;  %390 = vmatpush1.bf16.msra.mxu1 %v6243_v10  ;;  %v6235_v20 = vcombine.low %v58_v12, %v62_v13  ;;  %v6248_v40 = vcombine.high %v68_v33, %v72_v34  ;;  %v63_v41 = vld [vmem:[%s11965_s1 + $0xb0] sm:$0xff]  ;;  %v6247_v47 = vcombine.low %v68_v33, %v72_v34 }
   0x7   :  { %318 = vmatprep.subr.bf16.mxu0 %v6234_v11  ;;  %v6226_v21 = vcombine.high %v49_v14, %v53_v16  ;;  %391 = vmatprep.subr.bf16.mxu1 %v6236_v15  ;;  %v6228_v22 = vcombine.high %v50_v17, %v54_v18  ;;  %v41_v23 = vld [vmem:[%s11965_s1] sm:$0xff]  ;;  %v42_v25 = vld [vmem:[%s11965_s1 + $0x8] sm:$0xff]  ;;  %v6225_v27 = vcombine.low %v49_v14, %v53_v16  ;;  %v60_v43 = vld [vmem:[%s11965_s1 + $0x98] sm:$0xff] }
   0x8   :  { %v45_v24 = vld [vmem:[%s11965_s1 + $0x20] sm:$0xff]  ;;  %v46_v26 = vld [vmem:[%s11965_s1 + $0x28] sm:$0xff]  ;;  %v6227_v28 = vcombine.low %v50_v17, %v54_v18  ;;  %v64_v44 = vld [vmem:[%s11965_s1 + $0xb8] sm:$0xff]  ;;  %v6238_v46 = vcombine.high %v59_v39, %v63_v41  ;;  %v6237_v51 = vcombine.low %v59_v39, %v63_v41 }
   0x9   :  { %v6218_v29 = vcombine.high %v41_v23, %v45_v24  ;;  %v6220_v30 = vcombine.high %v42_v25, %v46_v26  ;;  %v6217_v35 = vcombine.low %v41_v23, %v45_v24  ;;  %v6219_v36 = vcombine.low %v42_v25, %v46_v26  ;;  %v7871_v38 = vld [vmem:[%s11966_s0] sm:$0xff]   ;;  %v51_v45 = vld [vmem:[%s11965_s1 + $0x50] sm:$0xff]  ;;  %v52_v50 = vld [vmem:[%s11965_s1 + $0x58] sm:$0xff] }
   0xa   :  { %319 = vmatpush1.bf16.msra.mxu0 %v6233_v19  ;;  %392 = vmatpush1.bf16.msra.mxu1 %v6235_v20  ;;  %v55_v48 = vld [vmem:[%s11965_s1 + $0x70] sm:$0xff]  ;;  %v6240_v49 = vcombine.high %v60_v43, %v64_v44  ;;  %v56_v52 = vld [vmem:[%s11965_s1 + $0x78] sm:$0xff]  ;;  %v7906_v54 = vld [vmem:[%s11966_s0 + $0x8] sm:$0xff]   ;;  %v6239_v55 = vcombine.low %v60_v43, %v64_v44 }
   0xb   :  { %320 = vmatprep.subr.bf16.mxu0 %v6226_v21  ;;  %393 = vmatprep.subr.bf16.mxu1 %v6228_v22  ;;  %v6230_v53 = vcombine.high %v51_v45, %v55_v48  ;;  %v43_v56 = vld [vmem:[%s11965_s1 + $0x10] sm:$0xff]  ;;  %v6232_v57 = vcombine.high %v52_v50, %v56_v52  ;;  %v44_v59 = vld [vmem:[%s11965_s1 + $0x18] sm:$0xff]  ;;  %v6229_v61 = vcombine.low %v51_v45, %v55_v48 }
   0xc   :  { %v47_v58 = vld [vmem:[%s11965_s1 + $0x30] sm:$0xff]  ;;  %v48_v60 = vld [vmem:[%s11965_s1 + $0x38] sm:$0xff]  ;;  %v6231_v62 = vcombine.low %v52_v50, %v56_v52 }
   0xd   :  { %v6222_v63 = vcombine.high %v43_v56, %v47_v58  ;;  %v6224_v0 = vcombine.high %v44_v59, %v48_v60  ;;  %v6221_v1 = vcombine.low %v43_v56, %v47_v58  ;;  %v7929_v2 = vld [vmem:[%s11966_s0 + $0x10] sm:$0xff]   ;;  %v6223_v4 = vcombine.low %v44_v59, %v48_v60  ;;  %v7939_v6 = vld [vmem:[%s11967_s2 + $0xec] ss:$16 sps:$4 sm:$0xff]   ;;  %v7968_v9 = vld [vmem:[%s11967_s2 + $0xe8] ss:$16 sps:$4 sm:$0xff]  }
   0xe   :  { %321 = vmatpush1.bf16.msra.mxu0 %v6225_v27  ;;  %394 = vmatpush1.bf16.msra.mxu1 %v6227_v28  ;;  %v7934_v5 = vld [vmem:[%s11967_s2 + $0xe4] ss:$16 sps:$4 sm:$0xff]   ;;  %v7952_v7 = vld [vmem:[%s11966_s0 + $0x18] sm:$0xff]   ;;  %v7963_v8 = vld [vmem:[%s11967_s2 + $0xe0] ss:$16 sps:$4 sm:$0xff]  }
   0xf   :  { %322 = vmatprep.subr.bf16.mxu0 %v6218_v29  ;;  %395 = vmatprep.subr.bf16.mxu1 %v6220_v30  ;;  %v7973_v10 = vld [vmem:[%s11967_s2 + $0xc4] ss:$16 sps:$4 sm:$0xff]   ;;  %v7978_v11 = vld [vmem:[%s11967_s2 + $0xcc] ss:$16 sps:$4 sm:$0xff]   ;;  %v7985_v12 = vld [vmem:[%s11967_s2 + $0xc0] ss:$16 sps:$4 sm:$0xff]  }
  0x10   :  { %12183 = vst [vmem:[#allocation2_spill] sm:$0xff] %v7973_v10  ;;  %12184 = vst [vmem:[#allocation3_spill] sm:$0xff] %v7978_v11  ;;  %v7993_v13 = vld [vmem:[%s11967_s2 + $0xc8] ss:$16 sps:$4 sm:$0xff]   ;;  %v8000_v14 = vld [vmem:[%s11967_s2 + $0xa4] ss:$16 sps:$4 sm:$0xff]  }
  0x11   :  { %12185 = vst [vmem:[#allocation4_spill] sm:$0xff] %v7985_v12  ;;  %12186 = vst [vmem:[#allocation5_spill] sm:$0xff] %v7993_v13  ;;  %v8007_v15 = vld [vmem:[%s11967_s2 + $0xac] ss:$16 sps:$4 sm:$0xff]   ;;  %v8014_v16 = vld [vmem:[%s11967_s2 + $0xa0] ss:$16 sps:$4 sm:$0xff]  }
  0x12   :  { %323 = vmatpush1.bf16.msra.mxu0 %v6217_v35  ;;  %396 = vmatpush1.bf16.msra.mxu1 %v6219_v36  ;;  %12187 = vst [vmem:[#allocation6_spill] sm:$0xff] %v8000_v14  ;;  %12188 = vst [vmem:[#allocation7_spill] sm:$0xff] %v8007_v15  ;;  %v8021_v17 = vld [vmem:[%s11967_s2 + $0xa8] ss:$16 sps:$4 sm:$0xff]   ;;  %v8026_v18 = vld [vmem:[%s11967_s2 + $0x84] ss:$16 sps:$4 sm:$0xff]  }
  0x13   :  { %462 = vmatprep.subr.bf16.mxu0 %v6246_v37  ;;  %535 = vmatprep.subr.bf16.mxu1 %v6248_v40  ;;  %12189 = vst [vmem:[#allocation8_spill] sm:$0xff] %v8014_v16  ;;  %12190 = vst [vmem:[#allocation9_spill] sm:$0xff] %v8021_v17  ;;  %v8032_v19 = vld [vmem:[%s11967_s2 + $0x8c] ss:$16 sps:$4 sm:$0xff]   ;;  %v8042_v20 = vld [vmem:[%s11967_s2 + $0x80] ss:$16 sps:$4 sm:$0xff]  }
  0x14   :  { %12191 = vst [vmem:[#allocation10_spill] sm:$0xff] %v8026_v18  ;;  %12192 = vst [vmem:[#allocation11_spill] sm:$0xff] %v8032_v19  ;;  %v8049_v21 = vld [vmem:[%s11967_s2 + $0x88] ss:$16 sps:$4 sm:$0xff]   ;;  %v8054_v22 = vld [vmem:[%s11967_s2 + $0x64] ss:$16 sps:$4 sm:$0xff]  }
  0x15   :  { %6249 = vmatmul.mubr.msk.bf16.vlgmr.msra.gmra.mxu0 %vm295_vm0, %v7871_v38  ;;  %6253 = vmatmul.mubr.msk.bf16.vlgmr.msra.gmra.mxu1 %vm295_vm0, %v7871_v38  ;;  %12193 = vst [vmem:[#allocation12_spill] sm:$0xff] %v8042_v20  ;;  %12194 = vst [vmem:[#allocation13_spill] sm:$0xff] %v8049_v21  ;;  %v8061_v23 = vld [vmem:[%s11967_s2 + $0x6c] ss:$16 sps:$4 sm:$0xff]   ;;  %v8068_v24 = vld [vmem:[%s11967_s2 + $0x60] ss:$16 sps:$4 sm:$0xff]  }
  0x16   :  { %463 = vmatpush1.bf16.msra.mxu0 %v6245_v42  ;;  %350 = vmatprep.mubr.bf16.mxu0 %v11975_v3  ;;  %12195 = vst [vmem:[#allocation14_spill] sm:$0xff] %v8054_v22  ;;  %12196 = vst [vmem:[#allocation15_spill] sm:$0xff] %v8061_v23  ;;  %v8075_v25 = vld [vmem:[%s11967_s2 + $0x68] ss:$16 sps:$4 sm:$0xff]   ;;  %v8080_v26 = vld [vmem:[%s11967_s2 + $0x44] ss:$16 sps:$4 sm:$0xff]  }
  0x17   :  { %423 = vmatprep.mubr.bf16.mxu1 %v11975_v3  ;;  %464 = vmatprep.subr.bf16.mxu0 %v6238_v46  ;;  %12197 = vst [vmem:[#allocation16_spill] sm:$0xff] %v8068_v24  ;;  %12198 = vst [vmem:[#allocation17_spill] sm:$0xff] %v8075_v25  ;;  %v8086_v27 = vld [vmem:[%s11967_s2 + $0x4c] ss:$16 sps:$4 sm:$0xff]   ;;  %v8096_v28 = vld [vmem:[%s11967_s2 + $0x40] ss:$16 sps:$4 sm:$0xff]  }
  0x18   :  { %536 = vmatpush1.bf16.msra.mxu1 %v6247_v47  ;;  %12199 = vst [vmem:[#allocation18_spill] sm:$0xff] %v8080_v26  ;;  %12200 = vst [vmem:[#allocation19_spill] sm:$0xff] %v8086_v27  ;;  %v8103_v29 = vld [vmem:[%s11967_s2 + $0x48] ss:$16 sps:$4 sm:$0xff]   ;;  %v8108_v30 = vld [vmem:[%s11967_s2 + $0x24] ss:$16 sps:$4 sm:$0xff]  }
  0x19   :  { %537 = vmatprep.subr.bf16.mxu1 %v6240_v49  ;;  %12201 = vst [vmem:[#allocation20_spill] sm:$0xff] %v8096_v28  ;;  %12202 = vst [vmem:[#allocation21_spill] sm:$0xff] %v8103_v29  ;;  %v8115_v31 = vld [vmem:[%s11967_s2 + $0x2c] ss:$16 sps:$4 sm:$0xff]   ;;  %v8122_v32 = vld [vmem:[%s11967_s2 + $0x20] ss:$16 sps:$4 sm:$0xff]  }
  0x1a   :  { %465 = vmatpush1.bf16.msra.mxu0 %v6237_v51  ;;  %12203 = vst [vmem:[#allocation22_spill] sm:$0xff] %v8108_v30  ;;  %12204 = vst [vmem:[#allocation23_spill] sm:$0xff] %v8115_v31  ;;  %v8129_v33 = vld [vmem:[%s11967_s2 + $0x28] ss:$16 sps:$4 sm:$0xff]   ;;  %v8134_v34 = vld [vmem:[%s11967_s2 + $0x4] ss:$16 sps:$4 sm:$0xff]  }
  0x1b   :  { %466 = vmatprep.subr.bf16.mxu0 %v6230_v53  ;;  %12205 = vst [vmem:[#allocation24_spill] sm:$0xff] %v8122_v32  ;;  %12206 = vst [vmem:[#allocation25_spill] sm:$0xff] %v8129_v33  ;;  %v8140_v35 = vld [vmem:[%s11967_s2 + $0xc] ss:$16 sps:$4 sm:$0xff]   ;;  %v8150_v36 = vld [vmem:[%s11967_s2] ss:$16 sps:$4 sm:$0xff]  }
  0x1c   :  { %538 = vmatpush1.bf16.msra.mxu1 %v6239_v55  ;;  %12207 = vst [vmem:[#allocation26_spill] sm:$0xff] %v8134_v34  ;;  %12208 = vst [vmem:[#allocation27_spill] sm:$0xff] %v8140_v35  ;;  %v8157_v37 = vld [vmem:[%s11967_s2 + $0x8] ss:$16 sps:$4 sm:$0xff]   ;;  %v8169_v39 = vld [vmem:[%s11967_s2 + $0x1ec] ss:$16 sps:$4 sm:$0xff]  }
  0x1d   :  { %6250 = vmatmul.mubr.msk.bf16.gmra.mxu0 %vm295_vm0, %v7906_v54  ;;  %539 = vmatprep.subr.bf16.mxu1 %v6232_v57  ;;  %12209 = vst [vmem:[#allocation28_spill] sm:$0xff] %v8150_v36  ;;  %12210 = vst [vmem:[#allocation29_spill] sm:$0xff] %v8157_v37  ;;  %v8176_v40 = vld [vmem:[%s11967_s2 + $0x1e0] ss:$16 sps:$4 sm:$0xff]   ;;  %v8183_v41 = vld [vmem:[%s11967_s2 + $0x1e8] ss:$16 sps:$4 sm:$0xff]  }
  0x1e   :  { %6254 = vmatmul.mubr.msk.bf16.gmra.mxu1 %vm295_vm0, %v7906_v54  ;;  %360 = vmatprep.mubr.bf16.mxu0 %v11975_v3  ;;  %12212 = vst [vmem:[#allocation31_spill] sm:$0xff] %v8169_v39  ;;  %v8188_v42 = vld [vmem:[%s11967_s2 + $0x1c4] ss:$16 sps:$4 sm:$0xff]   ;;  %v8194_v43 = vld [vmem:[%s11967_s2 + $0x1cc] ss:$16 sps:$4 sm:$0xff]  }
  0x1f   :  { %433 = vmatprep.mubr.bf16.mxu1 %v11975_v3  ;;  %467 = vmatpush1.bf16.msra.mxu0 %v6229_v61  ;;  %v8202_v44 = vld [vmem:[%s11967_s2 + $0x1c0] ss:$16 sps:$4 sm:$0xff]   ;;  %v8209_v45 = vld [vmem:[%s11967_s2 + $0x1c8] ss:$16 sps:$4 sm:$0xff]   ;;  %v8214_v46 = vld [vmem:[%s11967_s2 + $0x1a4] ss:$16 sps:$4 sm:$0xff]  }
  0x20   :  { %468 = vmatprep.subr.bf16.mxu0 %v6222_v63  ;;  %540 = vmatpush1.bf16.msra.mxu1 %v6231_v62  ;;  %v8220_v47 = vld [vmem:[%s11967_s2 + $0x1ac] ss:$16 sps:$4 sm:$0xff]   ;;  %v8228_v48 = vld [vmem:[%s11967_s2 + $0x1a0] ss:$16 sps:$4 sm:$0xff]   ;;  %v8235_v49 = vld [vmem:[%s11967_s2 + $0x1a8] ss:$16 sps:$4 sm:$0xff]  }
  0x21   :  { %541 = vmatprep.subr.bf16.mxu1 %v6224_v0  ;;  %v8240_v50 = vld [vmem:[%s11967_s2 + $0x184] ss:$16 sps:$4 sm:$0xff]   ;;  %v8246_v51 = vld [vmem:[%s11967_s2 + $0x18c] ss:$16 sps:$4 sm:$0xff]   ;;  %v8252_v52 = vld [vmem:[%s11967_s2 + $0x180] ss:$16 sps:$4 sm:$0xff]  }
  0x22   :  { %v8259_v53 = vld [vmem:[%s11967_s2 + $0x188] ss:$16 sps:$4 sm:$0xff]   ;;  %v8270_v55 = vld [vmem:[%s11967_s2 + $0x16c] ss:$16 sps:$4 sm:$0xff]   ;;  %v8276_v56 = vld [vmem:[%s11967_s2 + $0x160] ss:$16 sps:$4 sm:$0xff]  }
  0x23   :  { %469 = vmatpush1.bf16.msra.mxu0 %v6221_v1  ;;  %v8283_v57 = vld [vmem:[%s11967_s2 + $0x168] ss:$16 sps:$4 sm:$0xff]   ;;  %v8288_v58 = vld [vmem:[%s11967_s2 + $0x144] ss:$16 sps:$4 sm:$0xff]   ;;  %v8294_v59 = vld [vmem:[%s11967_s2 + $0x14c] ss:$16 sps:$4 sm:$0xff]  }
  0x24   :  { %542 = vmatpush1.bf16.msra.mxu1 %v6223_v4  ;;  %825 = vmatprep.subr.bf16.mxu0 %v7934_v5  ;;  %v8300_v60 = vld [vmem:[%s11967_s2 + $0x140] ss:$16 sps:$4 sm:$0xff]   ;;  %v8307_v61 = vld [vmem:[%s11967_s2 + $0x148] ss:$16 sps:$4 sm:$0xff]   ;;  %v8312_v62 = vld [vmem:[%s11967_s2 + $0x124] ss:$16 sps:$4 sm:$0xff]  }
  0x25   :  { %6251 = vmatmul.mubr.msk.bf16.gmra.mxu0 %vm295_vm0, %v7929_v2  ;;  %866 = vmatprep.subr.bf16.mxu1 %v7939_v6  ;;  %v8318_v63 = vld [vmem:[%s11967_s2 + $0x12c] ss:$16 sps:$4 sm:$0xff]   ;;  %v8324_v0 = vld [vmem:[%s11967_s2 + $0x120] ss:$16 sps:$4 sm:$0xff]   ;;  %v8331_v1 = vld [vmem:[%s11967_s2 + $0x128] ss:$16 sps:$4 sm:$0xff]  }
  0x26   :  { %6255 = vmatmul.mubr.msk.bf16.gmra.mxu1 %vm295_vm0, %v7929_v2  ;;  %370 = vmatprep.mubr.bf16.mxu0 %v11975_v3  ;;  %12213 = vst [vmem:[#allocation32_spill] sm:$0xff] %v8324_v0  ;;  %v8342_v4 = vld [vmem:[%s11967_s2 + $0x10c] ss:$16 sps:$4 sm:$0xff]  }
  0x27   :  { %443 = vmatprep.mubr.bf16.mxu1 %v11975_v3 }
  0x2d   :  { %6252 = vmatmul.mubr.msk.bf16.gmra.mxu0 %vm295_vm0, %v7952_v7 }
  0x2e   :  { %6256 = vmatmul.mubr.msk.bf16.gmra.mxu1 %vm295_vm0, %v7952_v7  ;;  %486 = vmatprep.mubr.bf16.mxu0 %v11975_v3 }
  0x2f   :  { %559 = vmatprep.mubr.bf16.mxu1 %v11975_v3 }
  0x35   :  { %6257 = vmatmul.mubr.msk.bf16.vlgmr.msra.gmra.mxu0 %vm295_vm0, %v7871_v38 }
  0x36   :  { %6261 = vmatmul.mubr.msk.bf16.vlgmr.msra.gmra.mxu1 %vm295_vm0, %v7871_v38  ;;  %826 = vmatpush1.bf16.msra.mxu0 %v7963_v8  ;;  %v8162_v38 = vld [vmem:[%s11967_s2 + $0x1e4] ss:$16 sps:$4 sm:$0xff]  }
  0x37   :  { %867 = vmatpush1.bf16.msra.mxu1 %v7968_v9  ;;  %827 = vmatprep.subr.bf16.mxu0 %v7973_v10  ;;  %12211 = vst [vmem:[#allocation30_spill] sm:$0xff] %v8162_v38 }
  0x38   :  { %868 = vmatprep.subr.bf16.mxu1 %v7978_v11  ;;  %496 = vmatprep.mubr.bf16.mxu0 %v11975_v3 }
  0x39   :  { %569 = vmatprep.mubr.bf16.mxu1 %v11975_v3 }
  0x3a   :  { %828 = vmatpush1.bf16.msra.mxu0 %v7985_v12 }
  0x3b   :  { %869 = vmatpush1.bf16.msra.mxu1 %v7993_v13  ;;  %829 = vmatprep.subr.bf16.mxu0 %v8000_v14 }
  0x3c   :  { %870 = vmatprep.subr.bf16.mxu1 %v8007_v15 }
  0x3d   :  { %6258 = vmatmul.mubr.msk.bf16.gmra.mxu0 %vm295_vm0, %v7906_v54 }
  0x3e   :  { %6262 = vmatmul.mubr.msk.bf16.gmra.mxu1 %vm295_vm0, %v7906_v54  ;;  %830 = vmatpush1.bf16.msra.mxu0 %v8014_v16  ;;  %v8264_v54 = vld [vmem:[%s11967_s2 + $0x164] ss:$16 sps:$4 sm:$0xff]  }
  0x3f   :  { %871 = vmatpush1.bf16.msra.mxu1 %v8021_v17  ;;  %831 = vmatprep.subr.bf16.mxu0 %v8026_v18 }
  0x40   :  { %872 = vmatprep.subr.bf16.mxu1 %v8032_v19  ;;  %506 = vmatprep.mubr.bf16.mxu0 %v11975_v3 }
  0x41   :  { %579 = vmatprep.mubr.bf16.mxu1 %v11975_v3 }
  0x42   :  { %832 = vmatpush1.bf16.msra.mxu0 %v8042_v20 }
  0x43   :  { %873 = vmatpush1.bf16.msra.mxu1 %v8049_v21  ;;  %833 = vmatprep.subr.bf16.mxu0 %v8054_v22 }
  0x44   :  { %874 = vmatprep.subr.bf16.mxu1 %v8061_v23 }
  0x45   :  { %6259 = vmatmul.mubr.msk.bf16.gmra.mxu0 %vm295_vm0, %v7929_v2 }
  0x46   :  { %6263 = vmatmul.mubr.msk.bf16.gmra.mxu1 %vm295_vm0, %v7929_v2  ;;  %834 = vmatpush1.bf16.msra.mxu0 %v8068_v24  ;;  %v8336_v2 = vld [vmem:[%s11967_s2 + $0x104] ss:$16 sps:$4 sm:$0xff]  }
  0x47   :  { %875 = vmatpush1.bf16.msra.mxu1 %v8075_v25  ;;  %835 = vmatprep.subr.bf16.mxu0 %v8080_v26 }
  0x48   :  { %876 = vmatprep.subr.bf16.mxu1 %v8086_v27  ;;  %516 = vmatprep.mubr.bf16.mxu0 %v11975_v3 }
  0x49   :  { %589 = vmatprep.mubr.bf16.mxu1 %v11975_v3 }
  0x4a   :  { %836 = vmatpush1.bf16.msra.mxu0 %v8096_v28 }
  0x4b   :  { %877 = vmatpush1.bf16.msra.mxu1 %v8103_v29  ;;  %837 = vmatprep.subr.bf16.mxu0 %v8108_v30 }
  0x4c   :  { %878 = vmatprep.subr.bf16.mxu1 %v8115_v31 }
  0x4d   :  { %6260 = vmatmul.mubr.msk.bf16.gmra.mxu0 %vm295_vm0, %v7952_v7 }
  0x4e   :  { %6264 = vmatmul.mubr.msk.bf16.gmra.mxu1 %vm295_vm0, %v7952_v7  ;;  %838 = vmatpush1.bf16.msra.mxu0 %v8122_v32  ;;  %v8348_v7 = vld [vmem:[%s11967_s2 + $0x100] ss:$16 sps:$4 sm:$0xff]  }
  0x4f   :  { %879 = vmatpush1.bf16.msra.mxu1 %v8129_v33  ;;  %839 = vmatprep.subr.bf16.mxu0 %v8134_v34 }
  0x50   :  { %880 = vmatprep.subr.bf16.mxu1 %v8140_v35  ;;  %857 = vmatprep.mubr.bf16.mxu0 %v11975_v3 }
  0x51   :  { %898 = vmatprep.mubr.bf16.mxu1 %v11975_v3 }
  0x52   :  { %840 = vmatpush1.bf16.msra.mxu0 %v8150_v36 }
  0x53   :  { %881 = vmatpush1.bf16.msra.mxu1 %v8157_v37  ;;  %1071 = vmatprep.subr.bf16.mxu0 %v8162_v38 }
  0x54   :  { %1112 = vmatprep.subr.bf16.mxu1 %v8169_v39 }
  0x55   :  { %858 = vmatmul.mubr.bf16.vlgmr.msra.gmra.mxu0 %v11975_v3 }
  0x56   :  { %899 = vmatmul.mubr.bf16.vlgmr.msra.gmra.mxu1 %v11975_v3  ;;  %1072 = vmatpush1.bf16.msra.mxu0 %v8176_v40 }
  0x57   :  { %1113 = vmatpush1.bf16.msra.mxu1 %v8183_v41  ;;  %1073 = vmatprep.subr.bf16.mxu0 %v8188_v42 }
  0x58   :  { %1114 = vmatprep.subr.bf16.mxu1 %v8194_v43  ;;  %1103 = vmatprep.mubr.bf16.mxu0 %v11975_v3 }
  0x59   :  { %1144 = vmatprep.mubr.bf16.mxu1 %v11975_v3  ;;  %v8355_v3 = vld [vmem:[%s11967_s2 + $0x108] ss:$16 sps:$4 sm:$0xff]  }
  0x5a   :  { %1074 = vmatpush1.bf16.msra.mxu0 %v8202_v44 }
  0x5b   :  { %1115 = vmatpush1.bf16.msra.mxu1 %v8209_v45  ;;  %1075 = vmatprep.subr.bf16.mxu0 %v8214_v46 }
  0x5c   :  { %1116 = vmatprep.subr.bf16.mxu1 %v8220_v47 }
  0x5e   :  { %1076 = vmatpush1.bf16.msra.mxu0 %v8228_v48 }
  0x5f   :  { %1117 = vmatpush1.bf16.msra.mxu1 %v8235_v49  ;;  %1077 = vmatprep.subr.bf16.mxu0 %v8240_v50 }
  0x60   :  { %1118 = vmatprep.subr.bf16.mxu1 %v8246_v51 }
  0x62   :  { %1078 = vmatpush1.bf16.msra.mxu0 %v8252_v52 }
  0x63   :  { %1119 = vmatpush1.bf16.msra.mxu1 %v8259_v53  ;;  %1079 = vmatprep.subr.bf16.mxu0 %v8264_v54 }
  0x64   :  { %1120 = vmatprep.subr.bf16.mxu1 %v8270_v55 }
  0x66   :  { %1080 = vmatpush1.bf16.msra.mxu0 %v8276_v56 }
  0x67   :  { %1121 = vmatpush1.bf16.msra.mxu1 %v8283_v57  ;;  %1081 = vmatprep.subr.bf16.mxu0 %v8288_v58 }
  0x68   :  { %1122 = vmatprep.subr.bf16.mxu1 %v8294_v59 }
  0x6a   :  { %1082 = vmatpush1.bf16.msra.mxu0 %v8300_v60 }
  0x6b   :  { %1123 = vmatpush1.bf16.msra.mxu1 %v8307_v61  ;;  %1083 = vmatprep.subr.bf16.mxu0 %v8312_v62 }
  0x6c   :  { %1124 = vmatprep.subr.bf16.mxu1 %v8318_v63 }
  0x6e   :  { %1084 = vmatpush1.bf16.msra.mxu0 %v8324_v0  ;;  %v12214_v0 = vmov 0  }
  0x6f   :  { %1125 = vmatpush1.bf16.msra.mxu1 %v8331_v1  ;;  %1085 = vmatprep.subr.bf16.mxu0 %v8336_v2 }
  0x70   :  { %1126 = vmatprep.subr.bf16.mxu1 %v8342_v4 }
  0x72   :  { %1086 = vmatpush1.bf16.msra.mxu0 %v8348_v7 }
  0x73   :  { %1127 = vmatpush1.bf16.msra.mxu1 %v8355_v3  ;;  %1206 = vmatprep.subr.bf16.mxu0 %v7934_v5 }
  0x74   :  { %1247 = vmatprep.subr.bf16.mxu1 %v7939_v6 }
  0x75   :  { %1104 = vmatmul.mubr.bf16.vlgmr.msra.gmra.mxu0 %v12214_v0 }
  0x76   :  { %1145 = vmatmul.mubr.bf16.vlgmr.msra.gmra.mxu1 %v12214_v0  ;;  %1207 = vmatpush1.bf16.msra.mxu0 %v7963_v8 }
  0x77   :  { %1248 = vmatpush1.bf16.msra.mxu1 %v7968_v9  ;;  %1208 = vmatprep.subr.bf16.mxu0 %v7973_v10 }
  0x78   :  { %1249 = vmatprep.subr.bf16.mxu1 %v7978_v11  ;;  %1238 = vmatprep.mubr.bf16.mxu0 %v12214_v0 }
  0x79   :  { %1279 = vmatprep.mubr.bf16.mxu1 %v12214_v0 }
  0x7a   :  { %1209 = vmatpush1.bf16.msra.mxu0 %v7985_v12 }
  0x7b   :  { %1250 = vmatpush1.bf16.msra.mxu1 %v7993_v13  ;;  %1210 = vmatprep.subr.bf16.mxu0 %v8000_v14 }
  0x7c   :  { %1251 = vmatprep.subr.bf16.mxu1 %v8007_v15 }
  0x7e   :  { %1211 = vmatpush1.bf16.msra.mxu0 %v8014_v16 }
  0x7f   :  { %1252 = vmatpush1.bf16.msra.mxu1 %v8021_v17  ;;  %1212 = vmatprep.subr.bf16.mxu0 %v8026_v18 }
  0x80   :  { %1253 = vmatprep.subr.bf16.mxu1 %v8032_v19 }
  0x82   :  { %1213 = vmatpush1.bf16.msra.mxu0 %v8042_v20 }
  0x83   :  { %1254 = vmatpush1.bf16.msra.mxu1 %v8049_v21  ;;  %1214 = vmatprep.subr.bf16.mxu0 %v8054_v22 }
  0x84   :  { %1255 = vmatprep.subr.bf16.mxu1 %v8061_v23 }
  0x86   :  { %1215 = vmatpush1.bf16.msra.mxu0 %v8068_v24 }
  0x87   :  { %1256 = vmatpush1.bf16.msra.mxu1 %v8075_v25  ;;  %1216 = vmatprep.subr.bf16.mxu0 %v8080_v26 }
  0x88   :  { %1257 = vmatprep.subr.bf16.mxu1 %v8086_v27 }
  0x8a   :  { %1217 = vmatpush1.bf16.msra.mxu0 %v8096_v28 }
  0x8b   :  { %1258 = vmatpush1.bf16.msra.mxu1 %v8103_v29  ;;  %1218 = vmatprep.subr.bf16.mxu0 %v8108_v30  ;;  %v75_v29 = vlaneseq }
  0x8c   :  { %1259 = vmatprep.subr.bf16.mxu1 %v8115_v31 }
  0x8d   :  { %v8398_v30 = vshrl.u32 %v75_v29, 7 }
  0x8e   :  { %1219 = vmatpush1.bf16.msra.mxu0 %v8122_v32 }
  0x8f   :  { %1260 = vmatpush1.bf16.msra.mxu1 %v8129_v33  ;;  %1220 = vmatprep.subr.bf16.mxu0 %v8134_v34  ;;  %12215 = vst [vmem:[#allocation33_spill] sm:$0xff] %v8398_v30  ;;  %v11994_v31 = vsub.s32 2, %v8398_v30  ;;  %v11997_v32 = vsub.s32 0, %v8398_v30  ;;  %v8405_v34 = vld [vmem:[%s11968_s3] sm:$0xff]  ;;  %v12000_v28 = vsub.s32 1, %v8398_v30  ;;  %v12003_v25 = vsub.s32 3, %v8398_v30 }
  0x90   :  { %1261 = vmatprep.subr.bf16.mxu1 %v8140_v35 }
  0x91   :  { %v8440_v22 = vrot.slane %v8405_v34, %v12000_v28 }
  0x92   :  { %1221 = vmatpush1.bf16.msra.mxu0 %v8150_v36 }
  0x93   :  { %1262 = vmatpush1.bf16.msra.mxu1 %v8157_v37  ;;  %1293 = vmatprep.subr.bf16.mxu0 %v8162_v38  ;;  %v8421_v38 = vrot.slane %v8405_v34, %v11997_v32  ;;  %12220 = vst [vmem:[#allocation38_spill] sm:$0xff] %v8440_v22 }
  0x94   :  { %1334 = vmatprep.subr.bf16.mxu1 %v8169_v39  ;;  %v8414_v39 = vrot.slane %v8405_v34, %v11994_v31 }
  0xd5   :  { %v8407_v35 = vpop.f32.mrf.mxu0  ;;  %v8409_v36 = vpop.f32.mrf.mxu1 }
  0xd7   :  { %v8416_v29 = vpop.f32.mrf.mxu0  ;;  %v8423_v37 = vpop.f32.mrf.mxu1 }
  0xd9   :  { %v346_v33 = vpop.f32.mrf.mxu0  ;;  %v419_v26 = vpop.f32.mrf.mxu1 }
  0xda   :  { %v8427_v27 = vadd.f32 %v346_v33, %v8421_v38  ;;  %v8431_v31 = vadd.f32 %v419_v26, %v8414_v39 }
  0xdb   :  { %v8433_v24 = vpop.f32.mrf.mxu0  ;;  %v8435_v23 = vpop.f32.mrf.mxu1 }
  0xdc   :  { %12216 = vst [vmem:[#allocation34_spill] sm:$0xff] %v8427_v27  ;;  %12217 = vst [vmem:[#allocation35_spill] sm:$0xff] %v8431_v31  ;;  %v8448_v27 = vrot.slane %v8405_v34, %v12003_v25 }
  0xdd   :  { %12218 = vst [vmem:[#allocation36_spill] sm:$0xff] %v8433_v24  ;;  %12219 = vst [vmem:[#allocation37_spill] sm:$0xff] %v8435_v23  ;;  %v352_v32 = vpop.f32.mrf.mxu0 }
  0xde   :  { %v8443_v21 = vadd.f32 %v352_v32, %v8421_v38  ;;  %v425_v33 = vpop.f32.mrf.mxu1  ;;  %12222 = vst [vmem:[#allocation40_spill] sm:$0xff] %v8448_v27 }
  0xdf   :  { %v8451_v26 = vadd.f32 %v425_v33, %v8414_v39  ;;  %v354_v31 = vpop.f32.mrf.mxu0 }
  0xe0   :  { %12221 = vst [vmem:[#allocation39_spill] sm:$0xff] %v8443_v21  ;;  %v8454_v23 = vadd.f32 %v354_v31, %v8440_v22  ;;  %v427_v24 = vpop.f32.mrf.mxu1 }
  0xe1   :  { %12223 = vst [vmem:[#allocation41_spill] sm:$0xff] %v8451_v26  ;;  %v8457_v28 = vadd.f32 %v427_v24, %v8448_v27  ;;  %v356_v20 = vpop.f32.mrf.mxu0 }
  0xe2   :  { %12224 = vst [vmem:[#allocation42_spill] sm:$0xff] %v8454_v23  ;;  %v8460_v32 = vadd.f32 %v356_v20, %v8421_v38  ;;  %v429_v21 = vpop.f32.mrf.mxu1 }
  0xe3   :  { %12225 = vst [vmem:[#allocation43_spill] sm:$0xff] %v8457_v28  ;;  %v8463_v19 = vadd.f32 %v429_v21, %v8414_v39  ;;  %v8465_v25 = vpop.f32.mrf.mxu0 }
  0xe4   :  { %12226 = vst [vmem:[#allocation44_spill] sm:$0xff] %v8460_v32  ;;  %12228 = vst [vmem:[#allocation46_spill] sm:$0xff] %v8465_v25  ;;  %v8467_v33 = vpop.f32.mrf.mxu1 }
  0xe5   :  { %12227 = vst [vmem:[#allocation45_spill] sm:$0xff] %v8463_v19  ;;  %12229 = vst [vmem:[#allocation47_spill] sm:$0xff] %v8467_v33  ;;  %v362_v26 = vpop.f32.mrf.mxu0 }
  0xe6   :  { %v8470_v31 = vadd.f32 %v362_v26, %v8421_v38  ;;  %v435_v23 = vpop.f32.mrf.mxu1 }
  0xe7   :  { %v8473_v24 = vadd.f32 %v435_v23, %v8414_v39  ;;  %v364_v28 = vpop.f32.mrf.mxu0 }
  0xe8   :  { %12230 = vst [vmem:[#allocation48_spill] sm:$0xff] %v8470_v31  ;;  %v8476_v20 = vadd.f32 %v364_v28, %v8440_v22  ;;  %v437_v32 = vpop.f32.mrf.mxu1 }
  0xe9   :  { %12231 = vst [vmem:[#allocation49_spill] sm:$0xff] %v8473_v24  ;;  %v8479_v21 = vadd.f32 %v437_v32, %v8448_v27  ;;  %v366_v19 = vpop.f32.mrf.mxu0 }
  0xea   :  { %12232 = vst [vmem:[#allocation50_spill] sm:$0xff] %v8476_v20  ;;  %v8482_v25 = vadd.f32 %v366_v19, %v8421_v38  ;;  %v439_v33 = vpop.f32.mrf.mxu1 }
  0xeb   :  { %12233 = vst [vmem:[#allocation51_spill] sm:$0xff] %v8479_v21  ;;  %v8485_v26 = vadd.f32 %v439_v33, %v8414_v39  ;;  %v8487_v31 = vpop.f32.mrf.mxu0 }
  0xec   :  { %12234 = vst [vmem:[#allocation52_spill] sm:$0xff] %v8482_v25  ;;  %12236 = vst [vmem:[#allocation54_spill] sm:$0xff] %v8487_v31  ;;  %v8489_v23 = vpop.f32.mrf.mxu1 }
  0xed   :  { %12235 = vst [vmem:[#allocation53_spill] sm:$0xff] %v8485_v26  ;;  %12237 = vst [vmem:[#allocation55_spill] sm:$0xff] %v8489_v23  ;;  %v372_v24 = vpop.f32.mrf.mxu0 }
  0xee   :  { %v8492_v28 = vadd.f32 %v372_v24, %v8421_v38  ;;  %v445_v20 = vpop.f32.mrf.mxu1 }
  0xef   :  { %v8496_v21 = vadd.f32 %v445_v20, %v8414_v39  ;;  %v374_v19 = vpop.f32.mrf.mxu0 }
  0xf0   :  { %12238 = vst [vmem:[#allocation56_spill] sm:$0xff] %v8492_v28  ;;  %v8500_v33 = vadd.f32 %v374_v19, %v8440_v22  ;;  %v447_v26 = vpop.f32.mrf.mxu1 }
  0xf1   :  { %12239 = vst [vmem:[#allocation57_spill] sm:$0xff] %v8496_v21  ;;  %v8504_v23 = vadd.f32 %v447_v26, %v8448_v27  ;;  %v376_v24 = vpop.f32.mrf.mxu0  ;;  %v12243_v21 = vsub.s32 4, %v8398_v30  ;;  %v12246_v26 = vsub.s32 6, %v8398_v30 }
  0xf2   :  { %12240 = vst [vmem:[#allocation58_spill] sm:$0xff] %v8500_v33  ;;  %v8508_v32 = vadd.f32 %v376_v24, %v8421_v38  ;;  %v449_v20 = vpop.f32.mrf.mxu1  ;;  %v12248_v24 = vsub.s32 5, %v8398_v30 }
  0xf3   :  { %12241 = vst [vmem:[#allocation59_spill] sm:$0xff] %v8504_v23  ;;  %v8513_v25 = vrot.slane %v8405_v34, %v12243_v21  ;;  %v8516_v19 = vadd.f32 %v449_v20, %v8414_v39  ;;  %v8518_v33 = vpop.f32.mrf.mxu0  ;;  %v8523_v31 = vrot.slane %v8405_v34, %v12246_v26  ;;  %v12250_v21 = vsub.s32 7, %v8398_v30 }
  0xf4   :  { %12242 = vst [vmem:[#allocation60_spill] sm:$0xff] %v8508_v32  ;;  %12245 = vst [vmem:[#allocation62_spill] sm:$0xff] %v8518_v33  ;;  %v8525_v28 = vpop.f32.mrf.mxu1  ;;  %v8530_v32 = vrot.slane %v8405_v34, %v12248_v24 }
  0xf5   :  { %12244 = vst [vmem:[#allocation61_spill] sm:$0xff] %v8516_v19  ;;  %12247 = vst [vmem:[#allocation63_spill] sm:$0xff] %v8525_v28  ;;  %v488_v23 = vpop.f32.mrf.mxu0  ;;  %v8535_v20 = vrot.slane %v8405_v34, %v12250_v21 }
  0xf6   :  { %12249 = vst [vmem:[#allocation64_spill] sm:$0xff] %v8530_v32  ;;  %v8538_v19 = vadd.f32 %v488_v23, %v8513_v25  ;;  %v561_v33 = vpop.f32.mrf.mxu1 }
  0xf7   :  { %12251 = vst [vmem:[#allocation65_spill] sm:$0xff] %v8535_v20  ;;  %v8541_v26 = vadd.f32 %v561_v33, %v8523_v31  ;;  %v490_v18 = vpop.f32.mrf.mxu0 }
  0xf8   :  { %12252 = vst [vmem:[#allocation66_spill] sm:$0xff] %v8538_v19  ;;  %v8544_v28 = vadd.f32 %v490_v18, %v8530_v32  ;;  %v563_v17 = vpop.f32.mrf.mxu1 }
  0xf9   :  { %12253 = vst [vmem:[#allocation67_spill] sm:$0xff] %v8541_v26  ;;  %v8547_v24 = vadd.f32 %v563_v17, %v8535_v20  ;;  %v492_v16 = vpop.f32.mrf.mxu0 }
  0xfa   :  { %12254 = vst [vmem:[#allocation68_spill] sm:$0xff] %v8544_v28  ;;  %v8550_v30 = vadd.f32 %v492_v16, %v8513_v25  ;;  %v565_v34 = vpop.f32.mrf.mxu1 }
  0xfb   :  { %12255 = vst [vmem:[#allocation69_spill] sm:$0xff] %v8547_v24  ;;  %v8553_v23 = vadd.f32 %v565_v34, %v8523_v31  ;;  %v8555_v21 = vpop.f32.mrf.mxu0 }
  0xfc   :  { %12256 = vst [vmem:[#allocation70_spill] sm:$0xff] %v8550_v30  ;;  %12258 = vst [vmem:[#allocation72_spill] sm:$0xff] %v8555_v21  ;;  %v8557_v33 = vpop.f32.mrf.mxu1 }
  0xfd   :  { %12257 = vst [vmem:[#allocation71_spill] sm:$0xff] %v8553_v23  ;;  %12259 = vst [vmem:[#allocation73_spill] sm:$0xff] %v8557_v33  ;;  %v498_v26 = vpop.f32.mrf.mxu0 }
  0xfe   :  { %v8560_v18 = vadd.f32 %v498_v26, %v8513_v25  ;;  %v571_v28 = vpop.f32.mrf.mxu1 }
  0xff   :  { %v8563_v17 = vadd.f32 %v571_v28, %v8523_v31  ;;  %v500_v24 = vpop.f32.mrf.mxu0 }
 0x100   :  { %12260 = vst [vmem:[#allocation74_spill] sm:$0xff] %v8560_v18  ;;  %v8566_v16 = vadd.f32 %v500_v24, %v8530_v32  ;;  %v573_v19 = vpop.f32.mrf.mxu1 }
 0x101   :  { %12261 = vst [vmem:[#allocation75_spill] sm:$0xff] %v8563_v17  ;;  %v8569_v34 = vadd.f32 %v573_v19, %v8535_v20  ;;  %v502_v23 = vpop.f32.mrf.mxu0 }
 0x102   :  { %12262 = vst [vmem:[#allocation76_spill] sm:$0xff] %v8566_v16  ;;  %v8572_v30 = vadd.f32 %v502_v23, %v8513_v25  ;;  %v575_v33 = vpop.f32.mrf.mxu1 }
 0x103   :  { %12263 = vst [vmem:[#allocation77_spill] sm:$0xff] %v8569_v34  ;;  %v8575_v26 = vadd.f32 %v575_v33, %v8523_v31  ;;  %v8577_v21 = vpop.f32.mrf.mxu0 }
 0x104   :  { %12264 = vst [vmem:[#allocation78_spill] sm:$0xff] %v8572_v30  ;;  %12266 = vst [vmem:[#allocation80_spill] sm:$0xff] %v8577_v21  ;;  %v8579_v28 = vpop.f32.mrf.mxu1 }
 0x105   :  { %12265 = vst [vmem:[#allocation79_spill] sm:$0xff] %v8575_v26  ;;  %12267 = vst [vmem:[#allocation81_spill] sm:$0xff] %v8579_v28  ;;  %v508_v17 = vpop.f32.mrf.mxu0 }
 0x106   :  { %v8582_v24 = vadd.f32 %v508_v17, %v8513_v25  ;;  %v581_v16 = vpop.f32.mrf.mxu1 }
 0x107   :  { %v8585_v19 = vadd.f32 %v581_v16, %v8523_v31  ;;  %v510_v34 = vpop.f32.mrf.mxu0 }
 0x108   :  { %12268 = vst [vmem:[#allocation82_spill] sm:$0xff] %v8582_v24  ;;  %v8588_v23 = vadd.f32 %v510_v34, %v8530_v32  ;;  %v583_v18 = vpop.f32.mrf.mxu1 }
 0x109   :  { %12269 = vst [vmem:[#allocation83_spill] sm:$0xff] %v8585_v19  ;;  %v8591_v33 = vadd.f32 %v583_v18, %v8535_v20  ;;  %v512_v26 = vpop.f32.mrf.mxu0 }
 0x10a   :  { %12270 = vst [vmem:[#allocation84_spill] sm:$0xff] %v8588_v23  ;;  %v8594_v30 = vadd.f32 %v512_v26, %v8513_v25  ;;  %v585_v28 = vpop.f32.mrf.mxu1 }
 0x10b   :  { %12271 = vst [vmem:[#allocation85_spill] sm:$0xff] %v8591_v33  ;;  %v8597_v17 = vadd.f32 %v585_v28, %v8523_v31  ;;  %v8599_v21 = vpop.f32.mrf.mxu0 }
 0x10c   :  { %12272 = vst [vmem:[#allocation86_spill] sm:$0xff] %v8594_v30  ;;  %12274 = vst [vmem:[#allocation88_spill] sm:$0xff] %v8599_v21  ;;  %v8601_v16 = vpop.f32.mrf.mxu1 }
 0x10d   :  { %12273 = vst [vmem:[#allocation87_spill] sm:$0xff] %v8597_v17  ;;  %12275 = vst [vmem:[#allocation89_spill] sm:$0xff] %v8601_v16  ;;  %v518_v19 = vpop.f32.mrf.mxu0  ;;  %v343_v16 = vadd.f32 %v8407_v35, %v8421_v38  ;;  %v416_v35 = vadd.f32 %v8409_v36, %v8414_v39 }
 0x10e   :  { %v8604_v34 = vadd.f32 %v518_v19, %v8513_v25  ;;  %v591_v23 = vpop.f32.mrf.mxu1 }
 0x10f   :  { %v8607_v18 = vadd.f32 %v591_v23, %v8523_v31  ;;  %v520_v33 = vpop.f32.mrf.mxu0  ;;  %v345_v23 = vadd.f32 %v8416_v29, %v8440_v22  ;;  %v418_v29 = vadd.f32 %v8423_v37, %v8448_v27 }
 0x110   :  { %12276 = vst [vmem:[#allocation90_spill] sm:$0xff] %v8604_v34  ;;  %v8610_v26 = vadd.f32 %v520_v33, %v8530_v32  ;;  %v593_v24 = vpop.f32.mrf.mxu1 }
 0x111   :  { %12277 = vst [vmem:[#allocation91_spill] sm:$0xff] %v8607_v18  ;;  %v8613_v28 = vadd.f32 %v593_v24, %v8535_v20  ;;  %v522_v17 = vpop.f32.mrf.mxu0 }
 0x112   :  { %12278 = vst [vmem:[#allocation92_spill] sm:$0xff] %v8610_v26  ;;  %v595_v30 = vpop.f32.mrf.mxu1 }
 0x113   :  { %12279 = vst [vmem:[#allocation93_spill] sm:$0xff] %v8613_v28  ;;  %v524_v21 = vpop.f32.mrf.mxu0 }
 0x114   :  { %v597_v19 = vpop.f32.mrf.mxu1 }
 0x115   :  { %v859_v34 = vpop.f32.mrf.mxu0 }
 0x116   :  { %v907_v18 = vadd.f32 %v859_v34, %v343_v16  ;;  %v900_v15 = vpop.f32.mrf.mxu1 }
 0x117   :  { %v861_v14 = vpop.f32.mrf.mxu0  ;;  %v909_v38 = vadd.f32 %v900_v15, %v416_v35  ;;  %v525_v15 = vadd.f32 %v524_v21, %v8530_v32 }
 0x118   :  { %v6361_v33 = vmul.f32 -1.442695, %v907_v18  ;;  %v908_v26 = vadd.f32 %v861_v14, %v345_v23  ;;  %v902_v13 = vpop.f32.mrf.mxu1 }
 0x119   :  { %v863_v12 = vpop.f32.mrf.mxu0  ;;  %v6363_v16 = vmul.f32 -1.442695, %v909_v38  ;;  %v910_v34 = vadd.f32 %v902_v13, %v418_v29 }
 0x11a   :  { %6985 = vpow2.f32 %v6361_v33  ;;  %v6362_v24 = vmul.f32 -1.442695, %v908_v26  ;;  %v904_v28 = vpop.f32.mrf.mxu1 }
 0x11b   :  { %v864_v11 = vpop.f32.mrf.mxu0 }
 0x11c   :  { %6987 = vpow2.f32 %v6362_v24  ;;  %v905_v10 = vpop.f32.mrf.mxu1  ;;  %v523_v11 = vadd.f32 %v522_v17, %v8513_v25 }
 0x11d   :  { %6989 = vpow2.f32 %v6363_v16 }
 0x11e   :  { %6991 = vtanh.f32 %v910_v34 }
 0x127   :  { %v6986_v22 = vpop.eup %6985 }
 0x128   :  { %v1166_v18 = vadd.f32 1.0, %v6986_v22 }
 0x129   :  { %v6988_v14 = vpop.eup %6987 }
 0x12a   :  { %6993 = vrcp.f32 %v1166_v18  ;;  %v1167_v12 = vadd.f32 1.0, %v6988_v14  ;;  %v6990_v10 = vpop.eup %6989  ;;  %v596_v14 = vadd.f32 %v595_v30, %v8523_v31 }
 0x12b   :  { %v6992_v28 = vpop.eup %6991  ;;  %v1168_v38 = vadd.f32 1.0, %v6990_v10 }
 0x12c   :  { %6995 = vrcp.f32 %v1167_v12 }
 0x135   :  { %v1105_v26 = vpop.f32.mrf.mxu0 }
 0x136   :  { %v1153_v36 = vadd.f32 %v1105_v26, %v523_v11  ;;  %v1146_v39 = vpop.f32.mrf.mxu1  ;;  %v598_v11 = vadd.f32 %v597_v19, %v8535_v20 }
 0x137   :  { %v6994_v37 = vpop.eup %6993  ;;  %v1107_v23 = vpop.f32.mrf.mxu0  ;;  %v1155_v12 = vadd.f32 %v1146_v39, %v596_v14  ;;  %v12283_v14 = vld [vmem:[#allocation2_spill] sm:$0xff] }
 0x138   :  { %v1177_v13 = vmul.f32 %v6994_v37, %v6992_v28  ;;  %v6364_v33 = vmul.f32 -1.442695, %v1153_v36  ;;  %v1154_v22 = vadd.f32 %v1107_v23, %v525_v15  ;;  %v1148_v24 = vpop.f32.mrf.mxu1 }
 0x139   :  { %v6996_v35 = vpop.eup %6995  ;;  %v1109_v29 = vpop.f32.mrf.mxu0  ;;  %v6366_v26 = vmul.f32 -1.442695, %v1155_v12  ;;  %v1156_v28 = vadd.f32 %v1148_v24, %v598_v11  ;;  %v12284_v12 = vld [vmem:[#allocation3_spill] sm:$0xff]  ;;  %v12285_v11 = vld [vmem:[#allocation4_spill] sm:$0xff] }
 0x13a   :  { %v1176_v16 = vmul.f32 0.0, %v6996_v35  ;;  %6997 = vpow2.f32 %v6364_v33  ;;  %v6365_v34 = vmul.f32 -1.442695, %v1154_v22  ;;  %v1150_v25 = vpop.f32.mrf.mxu1 }
 0x13b   :  { %v1110_v17 = vpop.f32.mrf.mxu0 }
 0x13c   :  { %v8625_v18 = vadd.f32 %v1177_v13, %v1176_v16  ;;  %6999 = vpow2.f32 %v6365_v34  ;;  %v1151_v21 = vpop.f32.mrf.mxu1  ;;  %v12281_v16 = vld [vmem:[#allocation32_spill] sm:$0xff] }
 0x13d   :  { %7001 = vrcp.f32 %v1168_v38 }
 0x13e   :  { %7003 = vtanh.f32 %v8625_v18 }
 0x13f   :  { %7005 = vpow2.f32 %v6366_v26  ;;  %v12286_v26 = vld [vmem:[#allocation5_spill] sm:$0xff] }
 0x147   :  { %v6998_v10 = vpop.eup %6997 }
 0x148   :  { %v1190_v15 = vadd.f32 1.0, %v6998_v10  ;;  %v12289_v10 = vld [vmem:[#allocation8_spill] sm:$0xff] }
 0x149   :  { %v7000_v36 = vpop.eup %6999 }
 0x14a   :  { %v7002_v37 = vpop.eup %7001  ;;  %7007 = vrcp.f32 %v1190_v15  ;;  %v1191_v23 = vadd.f32 1.0, %v7000_v36  ;;  %v12293_v15 = vld [vmem:[#allocation12_spill] sm:$0xff]  ;;  %v12294_v36 = vld [vmem:[#allocation13_spill] sm:$0xff] }
 0x14b   :  { %v7004_v13 = vpop.eup %7003  ;;  %7009 = vtanh.f32 %v1156_v28  ;;  %v12292_v28 = vld [vmem:[#allocation11_spill] sm:$0xff] }
 0x14c   :  { %7011 = vrcp.f32 %v1191_v23  ;;  %v8630_v33 = vmul.f32 %v7004_v13, %v7002_v37  ;;  %v7006_v31 = vpop.eup %7005  ;;  %v12295_v37 = vld [vmem:[#allocation14_spill] sm:$0xff]  ;;  %v12296_v23 = vld [vmem:[#allocation15_spill] sm:$0xff]  ;;  %v12297_v13 = vld [vmem:[#allocation16_spill] sm:$0xff] }
 0x14d   :  { %v1192_v24 = vadd.f32 1.0, %v7006_v31  ;;  %v12299_v31 = vld [vmem:[#allocation18_spill] sm:$0xff] }
 0x14e   :  { %12280 = vst [vmem:[#allocation94_spill] sm:$0xff] %v8630_v33  ;;  %v1205_v30 = vpack.c.bf16 %v8630_v33, %v8630_v33 }
 0x14f   :  { %7013 = vrcp.f32 %v1192_v24  ;;  %v12303_v24 = vld [vmem:[#allocation22_spill] sm:$0xff] }
 0x150   :  { %1239 = vmatmul.mubr.bf16.vlgmr.msra.gmra.mxu0 %v1205_v30  ;;  %1280 = vmatmul.mubr.bf16.vlgmr.msra.gmra.mxu1 %v1205_v30  ;;  %v12298_v30 = vld [vmem:[#allocation17_spill] sm:$0xff] }
 0x151   :  { %1294 = vmatpush1.bf16.msra.mxu0 %v8176_v40  ;;  %1335 = vmatpush1.bf16.msra.mxu1 %v8183_v41 }
 0x152   :  { %1295 = vmatprep.subr.bf16.mxu0 %v8188_v42  ;;  %1336 = vmatprep.subr.bf16.mxu1 %v8194_v43 }
 0x153   :  { %1325 = vmatprep.mubr.bf16.mxu0 %v12214_v0  ;;  %1366 = vmatprep.mubr.bf16.mxu1 %v12214_v0 }
 0x155   :  { %1296 = vmatpush1.bf16.msra.mxu0 %v8202_v44  ;;  %1337 = vmatpush1.bf16.msra.mxu1 %v8209_v45 }
 0x156   :  { %1297 = vmatprep.subr.bf16.mxu0 %v8214_v46  ;;  %1338 = vmatprep.subr.bf16.mxu1 %v8220_v47 }
 0x157   :  { %v7008_v19 = vpop.eup %7007 }
 0x158   :  { %v7010_v39 = vpop.eup %7009 }
 0x159   :  { %v7012_v22 = vpop.eup %7011  ;;  %1298 = vmatpush1.bf16.msra.mxu0 %v8228_v48  ;;  %1339 = vmatpush1.bf16.msra.mxu1 %v8235_v49  ;;  %v1201_v38 = vmul.f32 %v7010_v39, %v7008_v19  ;;  %v12300_v19 = vld [vmem:[#allocation19_spill] sm:$0xff]  ;;  %v12301_v39 = vld [vmem:[#allocation20_spill] sm:$0xff] }
 0x15a   :  { %v1200_v35 = vmul.f32 0.0, %v7012_v22  ;;  %1299 = vmatprep.subr.bf16.mxu0 %v8240_v50  ;;  %1340 = vmatprep.subr.bf16.mxu1 %v8246_v51  ;;  %v12302_v22 = vld [vmem:[#allocation21_spill] sm:$0xff] }
 0x15c   :  { %v8648_v29 = vadd.f32 %v1201_v38, %v1200_v35  ;;  %v7014_v34 = vpop.eup %7013  ;;  %v12304_v35 = vld [vmem:[#allocation23_spill] sm:$0xff]  ;;  %v12305_v38 = vld [vmem:[#allocation24_spill] sm:$0xff] }
 0x15d   :  { %1300 = vmatpush1.bf16.msra.mxu0 %v8252_v52  ;;  %1341 = vmatpush1.bf16.msra.mxu1 %v8259_v53 }
 0x15e   :  { %7015 = vtanh.f32 %v8648_v29  ;;  %1301 = vmatprep.subr.bf16.mxu0 %v8264_v54  ;;  %1342 = vmatprep.subr.bf16.mxu1 %v8270_v55 }
 0x161   :  { %1302 = vmatpush1.bf16.msra.mxu0 %v8276_v56  ;;  %1343 = vmatpush1.bf16.msra.mxu1 %v8283_v57 }
 0x162   :  { %1303 = vmatprep.subr.bf16.mxu0 %v8288_v58  ;;  %1344 = vmatprep.subr.bf16.mxu1 %v8294_v59 }
 0x165   :  { %1304 = vmatpush1.bf16.msra.mxu0 %v8300_v60  ;;  %1345 = vmatpush1.bf16.msra.mxu1 %v8307_v61 }
 0x166   :  { %1305 = vmatprep.subr.bf16.mxu0 %v8312_v62  ;;  %1346 = vmatprep.subr.bf16.mxu1 %v8318_v63 }
 0x169   :  { %1306 = vmatpush1.bf16.msra.mxu0 %v12281_v16  ;;  %1347 = vmatpush1.bf16.msra.mxu1 %v8331_v1 }
 0x16a   :  { %1307 = vmatprep.subr.bf16.mxu0 %v8336_v2  ;;  %1348 = vmatprep.subr.bf16.mxu1 %v8342_v4 }
 0x16b   :  { %v7016_v25 = vpop.eup %7015 }
 0x16c   :  { %v8667_v17 = vmul.f32 %v7016_v25, %v7014_v34  ;;  %v12306_v34 = vld [vmem:[#allocation25_spill] sm:$0xff]  ;;  %v12307_v25 = vld [vmem:[#allocation26_spill] sm:$0xff] }
 0x16d   :  { %1308 = vmatpush1.bf16.msra.mxu0 %v8348_v7  ;;  %1349 = vmatpush1.bf16.msra.mxu1 %v8355_v3 }
 0x16e   :  { %12282 = vst [vmem:[#allocation32_spill] sm:$0xff] %v8667_v17  ;;  %v1292_v21 = vpack.c.bf16 %v8667_v17, %v8667_v17  ;;  %1428 = vmatprep.subr.bf16.mxu0 %v7934_v5  ;;  %1469 = vmatprep.subr.bf16.mxu1 %v7939_v6  ;;  %v12287_v5 = vld [vmem:[#allocation6_spill] sm:$0xff]  ;;  %v12288_v6 = vld [vmem:[#allocation7_spill] sm:$0xff] }
 0x170   :  { %1326 = vmatmul.mubr.bf16.vlgmr.msra.gmra.mxu0 %v1292_v21  ;;  %1367 = vmatmul.mubr.bf16.vlgmr.msra.gmra.mxu1 %v1292_v21  ;;  %v12308_v21 = vld [vmem:[#allocation27_spill] sm:$0xff] }
 0x171   :  { %1429 = vmatpush1.bf16.msra.mxu0 %v7963_v8  ;;  %1470 = vmatpush1.bf16.msra.mxu1 %v7968_v9  ;;  %v12290_v8 = vld [vmem:[#allocation9_spill] sm:$0xff]  ;;  %v12291_v9 = vld [vmem:[#allocation10_spill] sm:$0xff] }
 0x172   :  { %1430 = vmatprep.subr.bf16.mxu0 %v12283_v14  ;;  %1471 = vmatprep.subr.bf16.mxu1 %v12284_v12  ;;  %v12309_v14 = vld [vmem:[#allocation28_spill] sm:$0xff]  ;;  %v12310_v12 = vld [vmem:[#allocation29_spill] sm:$0xff] }
 0x173   :  { %1460 = vmatprep.mubr.bf16.mxu0 %v12214_v0  ;;  %1501 = vmatprep.mubr.bf16.mxu1 %v12214_v0 }
 0x175   :  { %1431 = vmatpush1.bf16.msra.mxu0 %v12285_v11  ;;  %1472 = vmatpush1.bf16.msra.mxu1 %v12286_v26  ;;  %v12311_v11 = vld [vmem:[#allocation30_spill] sm:$0xff]  ;;  %v12312_v26 = vld [vmem:[#allocation31_spill] sm:$0xff] }
 0x176   :  { %1432 = vmatprep.subr.bf16.mxu0 %v12287_v5  ;;  %1473 = vmatprep.subr.bf16.mxu1 %v12288_v6 }
 0x179   :  { %1433 = vmatpush1.bf16.msra.mxu0 %v12289_v10  ;;  %1474 = vmatpush1.bf16.msra.mxu1 %v12290_v8  ;;  %v12313_v10 = vld [vmem:[#allocation38_spill] sm:$0xff]  ;;  %v12314_v8 = vld [vmem:[#allocation36_spill] sm:$0xff] }
 0x17a   :  { %1434 = vmatprep.subr.bf16.mxu0 %v12291_v9  ;;  %1475 = vmatprep.subr.bf16.mxu1 %v12292_v28  ;;  %v349_v9 = vadd.f32 %v12314_v8, %v12313_v10  ;;  %v12315_v28 = vld [vmem:[#allocation34_spill] sm:$0xff] }
 0x17d   :  { %1435 = vmatpush1.bf16.msra.mxu0 %v12293_v15  ;;  %1476 = vmatpush1.bf16.msra.mxu1 %v12294_v36 }
 0x17e   :  { %1436 = vmatprep.subr.bf16.mxu0 %v12295_v37  ;;  %1477 = vmatprep.subr.bf16.mxu1 %v12296_v23 }
 0x181   :  { %1437 = vmatpush1.bf16.msra.mxu0 %v12297_v13  ;;  %1478 = vmatpush1.bf16.msra.mxu1 %v12298_v30 }
 0x182   :  { %1438 = vmatprep.subr.bf16.mxu0 %v12299_v31  ;;  %1479 = vmatprep.subr.bf16.mxu1 %v12300_v19 }
 0x185   :  { %1439 = vmatpush1.bf16.msra.mxu0 %v12301_v39  ;;  %1480 = vmatpush1.bf16.msra.mxu1 %v12302_v22 }
 0x186   :  { %1440 = vmatprep.subr.bf16.mxu0 %v12303_v24  ;;  %1481 = vmatprep.subr.bf16.mxu1 %v12304_v35  ;;  %v12316_v24 = vld [vmem:[#allocation35_spill] sm:$0xff] }
 0x189   :  { %1441 = vmatpush1.bf16.msra.mxu0 %v12305_v38  ;;  %1482 = vmatpush1.bf16.msra.mxu1 %v12306_v34  ;;  %v12317_v38 = vld [vmem:[#allocation37_spill] sm:$0xff] }
 0x18a   :  { %1442 = vmatprep.subr.bf16.mxu0 %v12307_v25  ;;  %1483 = vmatprep.subr.bf16.mxu1 %v12308_v21  ;;  %v422_v34 = vadd.f32 %v12317_v38, %v8448_v27 }
 0x18d   :  { %1443 = vmatpush1.bf16.msra.mxu0 %v12309_v14  ;;  %1484 = vmatpush1.bf16.msra.mxu1 %v12310_v12 }
 0x18e   :  { %1515 = vmatprep.subr.bf16.mxu0 %v12311_v11  ;;  %1556 = vmatprep.subr.bf16.mxu1 %v12312_v26 }
 0x210   :  { %v1240_v5 = vpop.f32.mrf.mxu0  ;;  %v1281_v6 = vpop.f32.mrf.mxu1 }
 0x211   :  { %v1288_v15 = vadd.f32 %v1240_v5, %v12315_v28  ;;  %v1290_v35 = vadd.f32 %v1281_v6, %v12316_v24 }
 0x212   :  { %v1242_v36 = vpop.f32.mrf.mxu0  ;;  %v1283_v37 = vpop.f32.mrf.mxu1 }
 0x213   :  { %v6367_v23 = vmul.f32 -1.442695, %v1288_v15  ;;  %v1289_v13 = vadd.f32 %v1242_v36, %v349_v9  ;;  %v6369_v25 = vmul.f32 -1.442695, %v1290_v35  ;;  %v1291_v21 = vadd.f32 %v1283_v37, %v422_v34  ;;  %v12318_v15 = vld [vmem:[#allocation90_spill] sm:$0xff]  ;;  %v12319_v37 = vld [vmem:[#allocation92_spill] sm:$0xff] }
 0x214   :  { %v1244_v30 = vpop.f32.mrf.mxu0  ;;  %v1285_v31 = vpop.f32.mrf.mxu1 }
 0x215   :  { %7017 = vpow2.f32 %v6367_v23  ;;  %v6368_v19 = vmul.f32 -1.442695, %v1289_v13 }
 0x216   :  { %v1245_v39 = vpop.f32.mrf.mxu0  ;;  %v1286_v22 = vpop.f32.mrf.mxu1 }
 0x217   :  { %7019 = vpow2.f32 %v6368_v19 }
 0x218   :  { %7021 = vpow2.f32 %v6369_v25 }
 0x219   :  { %7023 = vtanh.f32 %v1291_v21 }
 0x222   :  { %v7018_v14 = vpop.eup %7017 }
 0x223   :  { %v1388_v12 = vadd.f32 1.0, %v7018_v14 }
 0x224   :  { %v7020_v11 = vpop.eup %7019 }
 0x225   :  { %7025 = vrcp.f32 %v1388_v12  ;;  %v1389_v26 = vadd.f32 1.0, %v7020_v11  ;;  %v7022_v5 = vpop.eup %7021  ;;  %v12320_v12 = vld [vmem:[#allocation91_spill] sm:$0xff] }
 0x226   :  { %v7024_v28 = vpop.eup %7023  ;;  %v1390_v22 = vadd.f32 1.0, %v7022_v5 }
 0x227   :  { %7027 = vrcp.f32 %v1389_v26 }
 0x230   :  { %v1327_v8 = vpop.f32.mrf.mxu0  ;;  %v1368_v9 = vpop.f32.mrf.mxu1 }
 0x231   :  { %v1375_v36 = vadd.f32 %v1327_v8, %v12318_v15  ;;  %v1377_v11 = vadd.f32 %v1368_v9, %v12320_v12  ;;  %v12321_v8 = vld [vmem:[#allocation93_spill] sm:$0xff] }
 0x232   :  { %v7026_v6 = vpop.eup %7025  ;;  %v1329_v23 = vpop.f32.mrf.mxu0  ;;  %v8958_v12 = vld [vmem:[%s11967_s2 + $0x8] ss:$16 sps:$4 sm:$0xff]  }
 0x233   :  { %v1370_v13 = vpop.f32.mrf.mxu1  ;;  %v1399_v30 = vmul.f32 %v7026_v6, %v7024_v28  ;;  %v6370_v31 = vmul.f32 -1.442695, %v1375_v36  ;;  %v1376_v19 = vadd.f32 %v1329_v23, %v12319_v37  ;;  %v6372_v26 = vmul.f32 -1.442695, %v1377_v11  ;;  %12348 = vst [vmem:[#allocation28_spill] sm:$0xff] %v8958_v12 }
 0x234   :  { %v7028_v39 = vpop.eup %7027  ;;  %v1331_v24 = vpop.f32.mrf.mxu0  ;;  %v1378_v28 = vadd.f32 %v1370_v13, %v12321_v8  ;;  %v8964_v11 = vld [vmem:[%s11967_s2 + $0x1e4] ss:$16 sps:$4 sm:$0xff]  }
 0x235   :  { %v1372_v35 = vpop.f32.mrf.mxu1  ;;  %v1398_v38 = vmul.f32 %v7028_v39, %v8625_v18  ;;  %7029 = vpow2.f32 %v6370_v31  ;;  %v6371_v34 = vmul.f32 -1.442695, %v1376_v19  ;;  %v8904_v19 = vld [vmem:[%s11967_s2 + $0x40] ss:$16 sps:$4 sm:$0xff]   ;;  %v8910_v39 = vld [vmem:[%s11967_s2 + $0x48] ss:$16 sps:$4 sm:$0xff]  }
 0x236   :  { %v1332_v25 = vpop.f32.mrf.mxu0  ;;  %12339 = vst [vmem:[#allocation19_spill] sm:$0xff] %v8904_v19  ;;  %12340 = vst [vmem:[#allocation20_spill] sm:$0xff] %v8910_v39  ;;  %v8922_v24 = vld [vmem:[%s11967_s2 + $0x2c] ss:$16 sps:$4 sm:$0xff]   ;;  %v8928_v35 = vld [vmem:[%s11967_s2 + $0x20] ss:$16 sps:$4 sm:$0xff]  }
 0x237   :  { %v1373_v21 = vpop.f32.mrf.mxu1  ;;  %v8718_v14 = vadd.f32 %v1399_v30, %v1398_v38  ;;  %7031 = vpow2.f32 %v6371_v34  ;;  %12342 = vst [vmem:[#allocation22_spill] sm:$0xff] %v8922_v24  ;;  %12343 = vst [vmem:[#allocation23_spill] sm:$0xff] %v8928_v35  ;;  %v8934_v38 = vld [vmem:[%s11967_s2 + $0x28] ss:$16 sps:$4 sm:$0xff]   ;;  %v8940_v34 = vld [vmem:[%s11967_s2 + $0x4] ss:$16 sps:$4 sm:$0xff]  }
 0x238   :  { %7033 = vrcp.f32 %v1390_v22  ;;  %v8916_v22 = vld [vmem:[%s11967_s2 + $0x24] ss:$16 sps:$4 sm:$0xff]   ;;  %12344 = vst [vmem:[#allocation24_spill] sm:$0xff] %v8934_v38  ;;  %12345 = vst [vmem:[#allocation25_spill] sm:$0xff] %v8940_v34  ;;  %v8946_v25 = vld [vmem:[%s11967_s2 + $0xc] ss:$16 sps:$4 sm:$0xff]  }
 0x239   :  { %7035 = vtanh.f32 %v8718_v14  ;;  %12341 = vst [vmem:[#allocation21_spill] sm:$0xff] %v8916_v22  ;;  %12346 = vst [vmem:[#allocation26_spill] sm:$0xff] %v8946_v25  ;;  %v8952_v21 = vld [vmem:[%s11967_s2] ss:$16 sps:$4 sm:$0xff]  }
 0x23a   :  { %7037 = vpow2.f32 %v6372_v26  ;;  %12347 = vst [vmem:[#allocation27_spill] sm:$0xff] %v8952_v21  ;;  %12349 = vst [vmem:[#allocation29_spill] sm:$0xff] %v8964_v11  ;;  %v8970_v26 = vld [vmem:[%s11967_s2 + $0x1ec] ss:$16 sps:$4 sm:$0xff]  }
 0x23b   :  { %7039 = vtanh.f32 %v1378_v28  ;;  %12350 = vst [vmem:[#allocation30_spill] sm:$0xff] %v8970_v26 }
 0x242   :  { %v7030_v5 = vpop.eup %7029 }
 0x243   :  { %v1412_v15 = vadd.f32 1.0, %v7030_v5  ;;  %v12351_v5 = vld [vmem:[#allocation39_spill] sm:$0xff] }
 0x244   :  { %v7032_v36 = vpop.eup %7031 }
 0x245   :  { %v7034_v18 = vpop.eup %7033  ;;  %7041 = vrcp.f32 %v1412_v15  ;;  %v1413_v6 = vadd.f32 1.0, %v7032_v36 }
 0x246   :  { %v7036_v23 = vpop.eup %7035 }
 0x247   :  { %7043 = vrcp.f32 %v1413_v6  ;;  %v8723_v30 = vmul.f32 %v7036_v23, %v7034_v18  ;;  %v7038_v9 = vpop.eup %7037  ;;  %v12352_v23 = vld [vmem:[#allocation42_spill] sm:$0xff] }
 0x248   :  { %v7040_v13 = vpop.eup %7039 }
 0x249   :  { %12322 = vst [vmem:[#allocation2_spill] sm:$0xff] %v8723_v30  ;;  %v1427_v31 = vpack.c.bf16 %v8723_v30, %v8723_v30 }
 0x24b   :  { %1461 = vmatmul.mubr.bf16.vlgmr.msra.gmra.mxu0 %v1427_v31  ;;  %1502 = vmatmul.mubr.bf16.vlgmr.msra.gmra.mxu1 %v1427_v31 }
 0x24c   :  { %1516 = vmatpush1.bf16.msra.mxu0 %v8176_v40  ;;  %1557 = vmatpush1.bf16.msra.mxu1 %v8183_v41 }
 0x24d   :  { %1517 = vmatprep.subr.bf16.mxu0 %v8188_v42  ;;  %1558 = vmatprep.subr.bf16.mxu1 %v8194_v43  ;;  %v1414_v42 = vadd.f32 1.0, %v7038_v9 }
 0x24e   :  { %1547 = vmatprep.mubr.bf16.mxu0 %v12214_v0  ;;  %1588 = vmatprep.mubr.bf16.mxu1 %v12214_v0 }
 0x24f   :  { %7045 = vrcp.f32 %v1414_v42  ;;  %v12353_v42 = vld [vmem:[#allocation41_spill] sm:$0xff] }
 0x250   :  { %1518 = vmatpush1.bf16.msra.mxu0 %v8202_v44  ;;  %1559 = vmatpush1.bf16.msra.mxu1 %v8209_v45 }
 0x251   :  { %1519 = vmatprep.subr.bf16.mxu0 %v8214_v46  ;;  %1560 = vmatprep.subr.bf16.mxu1 %v8220_v47 }
 0x252   :  { %v7042_v40 = vpop.eup %7041 }
 0x253   :  { %v1423_v41 = vmul.f32 %v7042_v40, %v7040_v13 }
 0x254   :  { %v7044_v37 = vpop.eup %7043  ;;  %1520 = vmatpush1.bf16.msra.mxu0 %v8228_v48  ;;  %1561 = vmatpush1.bf16.msra.mxu1 %v8235_v49  ;;  %v8770_v49 = vld [vmem:[%s11967_s2 + $0xe4] ss:$16 sps:$4 sm:$0xff]  }
 0x255   :  { %v1422_v43 = vmul.f32 %v7044_v37, %v8648_v29  ;;  %1521 = vmatprep.subr.bf16.mxu0 %v8240_v50  ;;  %1562 = vmatprep.subr.bf16.mxu1 %v8246_v51  ;;  %v8776_v50 = vld [vmem:[%s11967_s2 + $0xec] ss:$16 sps:$4 sm:$0xff]   ;;  %v8788_v51 = vld [vmem:[%s11967_s2 + $0xe8] ss:$16 sps:$4 sm:$0xff]   ;;  %v8892_v29 = vld [vmem:[%s11967_s2 + $0x44] ss:$16 sps:$4 sm:$0xff]  }
 0x256   :  { %12337 = vst [vmem:[#allocation17_spill] sm:$0xff] %v8892_v29 }
 0x257   :  { %v8742_v44 = vadd.f32 %v1423_v41, %v1422_v43 }
 0x258   :  { %1522 = vmatpush1.bf16.msra.mxu0 %v8252_v52  ;;  %1563 = vmatpush1.bf16.msra.mxu1 %v8259_v53  ;;  %v8794_v52 = vld [vmem:[%s11967_s2 + $0xc4] ss:$16 sps:$4 sm:$0xff]   ;;  %v8800_v53 = vld [vmem:[%s11967_s2 + $0xcc] ss:$16 sps:$4 sm:$0xff]  }
 0x259   :  { %7047 = vtanh.f32 %v8742_v44  ;;  %1523 = vmatprep.subr.bf16.mxu0 %v8264_v54  ;;  %1564 = vmatprep.subr.bf16.mxu1 %v8270_v55  ;;  %v8808_v54 = vld [vmem:[%s11967_s2 + $0xc0] ss:$16 sps:$4 sm:$0xff]   ;;  %v8814_v55 = vld [vmem:[%s11967_s2 + $0xc8] ss:$16 sps:$4 sm:$0xff]  }
 0x25a   :  { %12324 = vst [vmem:[#allocation4_spill] sm:$0xff] %v8814_v55 }
 0x25c   :  { %1524 = vmatpush1.bf16.msra.mxu0 %v8276_v56  ;;  %1565 = vmatpush1.bf16.msra.mxu1 %v8283_v57  ;;  %v7046_v45 = vpop.eup %7045  ;;  %v8820_v56 = vld [vmem:[%s11967_s2 + $0xa4] ss:$16 sps:$4 sm:$0xff]   ;;  %v8826_v57 = vld [vmem:[%s11967_s2 + $0xac] ss:$16 sps:$4 sm:$0xff]  }
 0x25d   :  { %1525 = vmatprep.subr.bf16.mxu0 %v8288_v58  ;;  %1566 = vmatprep.subr.bf16.mxu1 %v8294_v59  ;;  %12325 = vst [vmem:[#allocation5_spill] sm:$0xff] %v8820_v56  ;;  %12326 = vst [vmem:[#allocation6_spill] sm:$0xff] %v8826_v57  ;;  %v8832_v58 = vld [vmem:[%s11967_s2 + $0xa0] ss:$16 sps:$4 sm:$0xff]   ;;  %v8838_v59 = vld [vmem:[%s11967_s2 + $0xa8] ss:$16 sps:$4 sm:$0xff]  }
 0x25e   :  { %12327 = vst [vmem:[#allocation7_spill] sm:$0xff] %v8832_v58  ;;  %12328 = vst [vmem:[#allocation8_spill] sm:$0xff] %v8838_v59 }
 0x260   :  { %1526 = vmatpush1.bf16.msra.mxu0 %v8300_v60  ;;  %1567 = vmatpush1.bf16.msra.mxu1 %v8307_v61  ;;  %v8844_v60 = vld [vmem:[%s11967_s2 + $0x84] ss:$16 sps:$4 sm:$0xff]   ;;  %v8850_v61 = vld [vmem:[%s11967_s2 + $0x8c] ss:$16 sps:$4 sm:$0xff]  }
 0x261   :  { %1527 = vmatprep.subr.bf16.mxu0 %v8312_v62  ;;  %1568 = vmatprep.subr.bf16.mxu1 %v8318_v63  ;;  %12329 = vst [vmem:[#allocation9_spill] sm:$0xff] %v8844_v60  ;;  %12330 = vst [vmem:[#allocation10_spill] sm:$0xff] %v8850_v61  ;;  %v8856_v62 = vld [vmem:[%s11967_s2 + $0x80] ss:$16 sps:$4 sm:$0xff]   ;;  %v8862_v63 = vld [vmem:[%s11967_s2 + $0x88] ss:$16 sps:$4 sm:$0xff]  }
 0x262   :  { %12331 = vst [vmem:[#allocation11_spill] sm:$0xff] %v8856_v62  ;;  %12332 = vst [vmem:[#allocation12_spill] sm:$0xff] %v8862_v63 }
 0x264   :  { %1528 = vmatpush1.bf16.msra.mxu0 %v12281_v16  ;;  %1569 = vmatpush1.bf16.msra.mxu1 %v8331_v1  ;;  %v8868_v1 = vld [vmem:[%s11967_s2 + $0x64] ss:$16 sps:$4 sm:$0xff]   ;;  %v8898_v16 = vld [vmem:[%s11967_s2 + $0x4c] ss:$16 sps:$4 sm:$0xff]  }
 0x265   :  { %1529 = vmatprep.subr.bf16.mxu0 %v8336_v2  ;;  %1570 = vmatprep.subr.bf16.mxu1 %v8342_v4  ;;  %12333 = vst [vmem:[#allocation13_spill] sm:$0xff] %v8868_v1  ;;  %v8874_v2 = vld [vmem:[%s11967_s2 + $0x6c] ss:$16 sps:$4 sm:$0xff]   ;;  %v8880_v4 = vld [vmem:[%s11967_s2 + $0x60] ss:$16 sps:$4 sm:$0xff]   ;;  %12338 = vst [vmem:[#allocation18_spill] sm:$0xff] %v8898_v16 }
 0x266   :  { %v7048_v46 = vpop.eup %7047  ;;  %12334 = vst [vmem:[#allocation14_spill] sm:$0xff] %v8874_v2  ;;  %12335 = vst [vmem:[#allocation15_spill] sm:$0xff] %v8880_v4 }
 0x267   :  { %v8761_v47 = vmul.f32 %v7048_v46, %v7046_v45  ;;  %v12354_v46 = vld [vmem:[#allocation43_spill] sm:$0xff] }
 0x268   :  { %1530 = vmatpush1.bf16.msra.mxu0 %v8348_v7  ;;  %1571 = vmatpush1.bf16.msra.mxu1 %v8355_v3  ;;  %v8782_v3 = vld [vmem:[%s11967_s2 + $0xe0] ss:$16 sps:$4 sm:$0xff]   ;;  %v8886_v7 = vld [vmem:[%s11967_s2 + $0x68] ss:$16 sps:$4 sm:$0xff]  }
 0x269   :  { %12323 = vst [vmem:[#allocation3_spill] sm:$0xff] %v8761_v47  ;;  %v1514_v48 = vpack.c.bf16 %v8761_v47, %v8761_v47  ;;  %1650 = vmatprep.subr.bf16.mxu0 %v8770_v49  ;;  %1691 = vmatprep.subr.bf16.mxu1 %v8776_v50  ;;  %12336 = vst [vmem:[#allocation16_spill] sm:$0xff] %v8886_v7 }
 0x26b   :  { %1548 = vmatmul.mubr.bf16.vlgmr.msra.gmra.mxu0 %v1514_v48  ;;  %1589 = vmatmul.mubr.bf16.vlgmr.msra.gmra.mxu1 %v1514_v48 }
 0x26c   :  { %1651 = vmatpush1.bf16.msra.mxu0 %v8782_v3  ;;  %1692 = vmatpush1.bf16.msra.mxu1 %v8788_v51 }
 0x26d   :  { %1652 = vmatprep.subr.bf16.mxu0 %v8794_v52  ;;  %1693 = vmatprep.subr.bf16.mxu1 %v8800_v53 }
 0x26e   :  { %1682 = vmatprep.mubr.bf16.mxu0 %v12214_v0  ;;  %1723 = vmatprep.mubr.bf16.mxu1 %v12214_v0 }
 0x270   :  { %1653 = vmatpush1.bf16.msra.mxu0 %v8808_v54  ;;  %1694 = vmatpush1.bf16.msra.mxu1 %v8814_v55 }
 0x271   :  { %1654 = vmatprep.subr.bf16.mxu0 %v8820_v56  ;;  %1695 = vmatprep.subr.bf16.mxu1 %v8826_v57 }
 0x274   :  { %1655 = vmatpush1.bf16.msra.mxu0 %v8832_v58  ;;  %1696 = vmatpush1.bf16.msra.mxu1 %v8838_v59 }
 0x275   :  { %1656 = vmatprep.subr.bf16.mxu0 %v8844_v60  ;;  %1697 = vmatprep.subr.bf16.mxu1 %v8850_v61 }
 0x278   :  { %1657 = vmatpush1.bf16.msra.mxu0 %v8856_v62  ;;  %1698 = vmatpush1.bf16.msra.mxu1 %v8862_v63 }
 0x279   :  { %1658 = vmatprep.subr.bf16.mxu0 %v8868_v1  ;;  %1699 = vmatprep.subr.bf16.mxu1 %v8874_v2 }
 0x27c   :  { %1659 = vmatpush1.bf16.msra.mxu0 %v8880_v4  ;;  %1700 = vmatpush1.bf16.msra.mxu1 %v8886_v7 }
 0x27d   :  { %1660 = vmatprep.subr.bf16.mxu0 %v8892_v29  ;;  %1701 = vmatprep.subr.bf16.mxu1 %v8898_v16 }
 0x280   :  { %1661 = vmatpush1.bf16.msra.mxu0 %v8904_v19  ;;  %1702 = vmatpush1.bf16.msra.mxu1 %v8910_v39 }
 0x281   :  { %1662 = vmatprep.subr.bf16.mxu0 %v8916_v22  ;;  %1703 = vmatprep.subr.bf16.mxu1 %v8922_v24 }
 0x284   :  { %1663 = vmatpush1.bf16.msra.mxu0 %v8928_v35  ;;  %1704 = vmatpush1.bf16.msra.mxu1 %v8934_v38 }
 0x285   :  { %1664 = vmatprep.subr.bf16.mxu0 %v8940_v34  ;;  %1705 = vmatprep.subr.bf16.mxu1 %v8946_v25 }
 0x288   :  { %1665 = vmatpush1.bf16.msra.mxu0 %v8952_v21  ;;  %1706 = vmatpush1.bf16.msra.mxu1 %v8958_v12 }
 0x289   :  { %1737 = vmatprep.subr.bf16.mxu0 %v8964_v11  ;;  %1778 = vmatprep.subr.bf16.mxu1 %v8970_v26 }
 0x30b   :  { %v1462_v8 = vpop.f32.mrf.mxu0  ;;  %v1503_v28 = vpop.f32.mrf.mxu1 }
 0x30c   :  { %v1510_v15 = vadd.f32 %v1462_v8, %v12351_v5  ;;  %v1512_v43 = vadd.f32 %v1503_v28, %v12353_v42 }
 0x30d   :  { %v1464_v36 = vpop.f32.mrf.mxu0  ;;  %v1505_v18 = vpop.f32.mrf.mxu1 }
 0x30e   :  { %v6373_v6 = vmul.f32 -1.442695, %v1510_v15  ;;  %v1511_v31 = vadd.f32 %v1464_v36, %v12352_v23  ;;  %v6375_v45 = vmul.f32 -1.442695, %v1512_v43  ;;  %v1513_v48 = vadd.f32 %v1505_v18, %v12354_v46 }
 0x30f   :  { %v1466_v9 = vpop.f32.mrf.mxu0  ;;  %v1507_v13 = vpop.f32.mrf.mxu1 }
 0x310   :  { %7049 = vpow2.f32 %v6373_v6  ;;  %v6374_v40 = vmul.f32 -1.442695, %v1511_v31  ;;  %v12355_v31 = vld [vmem:[#allocation88_spill] sm:$0xff]  ;;  %v12356_v13 = vld [vmem:[#allocation86_spill] sm:$0xff] }
 0x311   :  { %v1467_v41 = vpop.f32.mrf.mxu0  ;;  %v1508_v37 = vpop.f32.mrf.mxu1  ;;  %v515_v9 = vadd.f32 %v12355_v31, %v8530_v32  ;;  %v12358_v31 = vld [vmem:[#allocation89_spill] sm:$0xff]  ;;  %v9144_v32 = vld [vmem:[%s11967_s2 + $0x120] ss:$16 sps:$4 sm:$0xff]  }
 0x312   :  { %7051 = vpow2.f32 %v6374_v40  ;;  %12365 = vst [vmem:[#allocation92_spill] sm:$0xff] %v9144_v32 }
 0x313   :  { %7053 = vpow2.f32 %v6375_v45 }
 0x314   :  { %7055 = vtanh.f32 %v1513_v48 }
 0x31d   :  { %v7050_v17 = vpop.eup %7049 }
 0x31e   :  { %v1610_v47 = vadd.f32 1.0, %v7050_v17 }
 0x31f   :  { %v7052_v8 = vpop.eup %7051 }
 0x320   :  { %7057 = vrcp.f32 %v1610_v47  ;;  %v1611_v5 = vadd.f32 1.0, %v7052_v8  ;;  %v7054_v15 = vpop.eup %7053 }
 0x321   :  { %v7056_v23 = vpop.eup %7055  ;;  %v1612_v45 = vadd.f32 1.0, %v7054_v15 }
 0x322   :  { %7059 = vrcp.f32 %v1611_v5 }
 0x32b   :  { %v1549_v36 = vpop.f32.mrf.mxu0  ;;  %v1590_v6 = vpop.f32.mrf.mxu1 }
 0x32c   :  { %v1597_v28 = vadd.f32 %v1549_v36, %v12356_v13  ;;  %v12357_v36 = vld [vmem:[#allocation87_spill] sm:$0xff] }
 0x32d   :  { %v7058_v40 = vpop.eup %7057  ;;  %v1551_v41 = vpop.f32.mrf.mxu0 }
 0x32e   :  { %v1592_v18 = vpop.f32.mrf.mxu1  ;;  %v1621_v37 = vmul.f32 %v7058_v40, %v7056_v23  ;;  %v6376_v17 = vmul.f32 -1.442695, %v1597_v28  ;;  %v1598_v42 = vadd.f32 %v1551_v41, %v515_v9  ;;  %v1599_v23 = vadd.f32 %v1590_v6, %v12357_v36  ;;  %v9038_v36 = vld [vmem:[%s11967_s2 + $0x1ac] ss:$16 sps:$4 sm:$0xff]  }
 0x32f   :  { %v7060_v43 = vpop.eup %7059  ;;  %v1553_v47 = vpop.f32.mrf.mxu0  ;;  %v588_v9 = vadd.f32 %v12358_v31, %v8535_v20  ;;  %v9138_v20 = vld [vmem:[%s11967_s2 + $0x12c] ss:$16 sps:$4 sm:$0xff]  }
 0x330   :  { %v1594_v46 = vpop.f32.mrf.mxu1  ;;  %v1620_v48 = vmul.f32 %v7060_v43, %v8718_v14  ;;  %7061 = vpow2.f32 %v6376_v17  ;;  %v6377_v8 = vmul.f32 -1.442695, %v1598_v42  ;;  %v6378_v15 = vmul.f32 -1.442695, %v1599_v23  ;;  %v9000_v42 = vld [vmem:[%s11967_s2 + $0x1e8] ss:$16 sps:$4 sm:$0xff]  }
 0x331   :  { %v1554_v5 = vpop.f32.mrf.mxu0  ;;  %v1600_v13 = vadd.f32 %v1592_v18, %v588_v9  ;;  %v8994_v18 = vld [vmem:[%s11967_s2 + $0x1e0] ss:$16 sps:$4 sm:$0xff]   ;;  %v9006_v43 = vld [vmem:[%s11967_s2 + $0x1c4] ss:$16 sps:$4 sm:$0xff]   ;;  %12364 = vst [vmem:[#allocation90_spill] sm:$0xff] %v9138_v20 }
 0x332   :  { %v1595_v30 = vpop.f32.mrf.mxu1  ;;  %v8981_v33 = vadd.f32 %v1621_v37, %v1620_v48  ;;  %7063 = vpow2.f32 %v6377_v8  ;;  %v9020_v46 = vld [vmem:[%s11967_s2 + $0x1c0] ss:$16 sps:$4 sm:$0xff]   ;;  %v9026_v48 = vld [vmem:[%s11967_s2 + $0x1c8] ss:$16 sps:$4 sm:$0xff]   ;;  %v9032_v5 = vld [vmem:[%s11967_s2 + $0x1a4] ss:$16 sps:$4 sm:$0xff]  }
 0x333   :  { %7065 = vrcp.f32 %v1612_v45  ;;  %v9012_v45 = vld [vmem:[%s11967_s2 + $0x1cc] ss:$16 sps:$4 sm:$0xff]  }
 0x334   :  { %7067 = vtanh.f32 %v8981_v33 }
 0x335   :  { %7069 = vpow2.f32 %v6378_v15 }
 0x336   :  { %7071 = vtanh.f32 %v1600_v13  ;;  %v9044_v13 = vld [vmem:[%s11967_s2 + $0x1a0] ss:$16 sps:$4 sm:$0xff]  }
 0x33d   :  { %v7062_v28 = vpop.eup %7061 }
 0x33e   :  { %v1634_v40 = vadd.f32 1.0, %v7062_v28  ;;  %v9050_v28 = vld [vmem:[%s11967_s2 + $0x1a8] ss:$16 sps:$4 sm:$0xff]  }
 0x33f   :  { %v7064_v14 = vpop.eup %7063 }
 0x340   :  { %v7066_v41 = vpop.eup %7065  ;;  %7073 = vrcp.f32 %v1634_v40  ;;  %v1635_v30 = vadd.f32 1.0, %v7064_v14  ;;  %v9057_v14 = vld [vmem:[%s11967_s2 + $0x184] ss:$16 sps:$4 sm:$0xff]  }
 0x341   :  { %v7068_v37 = vpop.eup %7067 }
 0x342   :  { %7075 = vrcp.f32 %v1635_v30  ;;  %v8987_v17 = vmul.f32 %v7068_v37, %v7066_v41  ;;  %v7070_v47 = vpop.eup %7069  ;;  %v9063_v41 = vld [vmem:[%s11967_s2 + $0x18c] ss:$16 sps:$4 sm:$0xff]   ;;  %v9077_v37 = vld [vmem:[%s11967_s2 + $0x188] ss:$16 sps:$4 sm:$0xff]  }
 0x343   :  { %v7072_v8 = vpop.eup %7071  ;;  %v1636_v15 = vadd.f32 1.0, %v7070_v47  ;;  %v9090_v47 = vld [vmem:[%s11967_s2 + $0x16c] ss:$16 sps:$4 sm:$0xff]  }
 0x344   :  { %12359 = vst [vmem:[#allocation31_spill] sm:$0xff] %v8987_v17  ;;  %v1649_v6 = vpack.c.bf16 %v8987_v17, %v8987_v17  ;;  %v9132_v17 = vld [vmem:[%s11967_s2 + $0x124] ss:$16 sps:$4 sm:$0xff]  }
 0x345   :  { %7077 = vrcp.f32 %v1636_v15  ;;  %v9120_v15 = vld [vmem:[%s11967_s2 + $0x140] ss:$16 sps:$4 sm:$0xff]   ;;  %12363 = vst [vmem:[#allocation37_spill] sm:$0xff] %v9132_v17 }
 0x346   :  { %1683 = vmatmul.mubr.bf16.vlgmr.msra.gmra.mxu0 %v1649_v6  ;;  %1724 = vmatmul.mubr.bf16.vlgmr.msra.gmra.mxu1 %v1649_v6  ;;  %v9084_v6 = vld [vmem:[%s11967_s2 + $0x164] ss:$16 sps:$4 sm:$0xff]   ;;  %12361 = vst [vmem:[#allocation34_spill] sm:$0xff] %v9120_v15 }
 0x347   :  { %1738 = vmatpush1.bf16.msra.mxu0 %v8994_v18  ;;  %1779 = vmatpush1.bf16.msra.mxu1 %v9000_v42 }
 0x348   :  { %1739 = vmatprep.subr.bf16.mxu0 %v9006_v43  ;;  %1780 = vmatprep.subr.bf16.mxu1 %v9012_v45 }
 0x349   :  { %1769 = vmatprep.mubr.bf16.mxu0 %v12214_v0  ;;  %1810 = vmatprep.mubr.bf16.mxu1 %v12214_v0 }
 0x34b   :  { %1740 = vmatpush1.bf16.msra.mxu0 %v9020_v46  ;;  %1781 = vmatpush1.bf16.msra.mxu1 %v9026_v48 }
 0x34c   :  { %1741 = vmatprep.subr.bf16.mxu0 %v9032_v5  ;;  %1782 = vmatprep.subr.bf16.mxu1 %v9038_v36 }
 0x34d   :  { %v7074_v23 = vpop.eup %7073 }
 0x34e   :  { %v1645_v31 = vmul.f32 %v7074_v23, %v7072_v8  ;;  %v9096_v8 = vld [vmem:[%s11967_s2 + $0x160] ss:$16 sps:$4 sm:$0xff]   ;;  %v9102_v23 = vld [vmem:[%s11967_s2 + $0x168] ss:$16 sps:$4 sm:$0xff]  }
 0x34f   :  { %v7076_v9 = vpop.eup %7075  ;;  %1742 = vmatpush1.bf16.msra.mxu0 %v9044_v13  ;;  %1783 = vmatpush1.bf16.msra.mxu1 %v9050_v28 }
 0x350   :  { %v1644_v40 = vmul.f32 %v7076_v9, %v8742_v44  ;;  %1743 = vmatprep.subr.bf16.mxu0 %v9057_v14  ;;  %1784 = vmatprep.subr.bf16.mxu1 %v9063_v41  ;;  %v9071_v44 = vld [vmem:[%s11967_s2 + $0x180] ss:$16 sps:$4 sm:$0xff]   ;;  %v9114_v9 = vld [vmem:[%s11967_s2 + $0x14c] ss:$16 sps:$4 sm:$0xff]  }
 0x351   :  { %12360 = vst [vmem:[#allocation36_spill] sm:$0xff] %v9114_v9 }
 0x352   :  { %v9066_v30 = vadd.f32 %v1645_v31, %v1644_v40  ;;  %v9108_v31 = vld [vmem:[%s11967_s2 + $0x144] ss:$16 sps:$4 sm:$0xff]   ;;  %v9126_v40 = vld [vmem:[%s11967_s2 + $0x148] ss:$16 sps:$4 sm:$0xff]  }
 0x353   :  { %1744 = vmatpush1.bf16.msra.mxu0 %v9071_v44  ;;  %1785 = vmatpush1.bf16.msra.mxu1 %v9077_v37  ;;  %12362 = vst [vmem:[#allocation35_spill] sm:$0xff] %v9126_v40 }
 0x354   :  { %7079 = vtanh.f32 %v9066_v30  ;;  %1745 = vmatprep.subr.bf16.mxu0 %v9084_v6  ;;  %1786 = vmatprep.subr.bf16.mxu1 %v9090_v47 }
 0x357   :  { %1746 = vmatpush1.bf16.msra.mxu0 %v9096_v8  ;;  %1787 = vmatpush1.bf16.msra.mxu1 %v9102_v23 }
 0x358   :  { %1747 = vmatprep.subr.bf16.mxu0 %v9108_v31  ;;  %1788 = vmatprep.subr.bf16.mxu1 %v9114_v9 }
 0x35b   :  { %1748 = vmatpush1.bf16.msra.mxu0 %v9120_v15  ;;  %1789 = vmatpush1.bf16.msra.mxu1 %v9126_v40  ;;  %v9150_v40 = vld [vmem:[%s11967_s2 + $0x128] ss:$16 sps:$4 sm:$0xff]   ;;  %v9156_v15 = vld [vmem:[%s11967_s2 + $0x104] ss:$16 sps:$4 sm:$0xff]  }
 0x35c   :  { %1749 = vmatprep.subr.bf16.mxu0 %v9132_v17  ;;  %1790 = vmatprep.subr.bf16.mxu1 %v9138_v20  ;;  %12366 = vst [vmem:[#allocation91_spill] sm:$0xff] %v9150_v40  ;;  %v7078_v17 = vpop.eup %7077  ;;  %12367 = vst [vmem:[#allocation93_spill] sm:$0xff] %v9156_v15  ;;  %v9162_v20 = vld [vmem:[%s11967_s2 + $0x10c] ss:$16 sps:$4 sm:$0xff]  }
 0x35d   :  { %12368 = vst [vmem:[#allocation39_spill] sm:$0xff] %v9162_v20 }
 0x35f   :  { %1750 = vmatpush1.bf16.msra.mxu0 %v9144_v32  ;;  %1791 = vmatpush1.bf16.msra.mxu1 %v9150_v40  ;;  %v9170_v40 = vld [vmem:[%s11967_s2 + $0x100] ss:$16 sps:$4 sm:$0xff]  }
 0x360   :  { %1751 = vmatprep.subr.bf16.mxu0 %v9156_v15  ;;  %1792 = vmatprep.subr.bf16.mxu1 %v9162_v20  ;;  %v9176_v15 = vld [vmem:[%s11967_s2 + $0x108] ss:$16 sps:$4 sm:$0xff]  }
 0x361   :  { %v7080_v32 = vpop.eup %7079 }
 0x362   :  { %v9165_v9 = vmul.f32 %v7080_v32, %v7078_v17  ;;  %v12370_v17 = vld [vmem:[#allocation46_spill] sm:$0xff] }
 0x363   :  { %1752 = vmatpush1.bf16.msra.mxu0 %v9170_v40  ;;  %1793 = vmatpush1.bf16.msra.mxu1 %v9176_v15 }
 0x364   :  { %12369 = vst [vmem:[#allocation42_spill] sm:$0xff] %v9165_v9  ;;  %v1736_v20 = vpack.c.bf16 %v9165_v9, %v9165_v9  ;;  %1872 = vmatprep.subr.bf16.mxu0 %v8770_v49  ;;  %1913 = vmatprep.subr.bf16.mxu1 %v8776_v50  ;;  %v359_v9 = vadd.f32 %v12370_v17, %v12313_v10 }
 0x366   :  { %1770 = vmatmul.mubr.bf16.vlgmr.msra.gmra.mxu0 %v1736_v20  ;;  %1811 = vmatmul.mubr.bf16.vlgmr.msra.gmra.mxu1 %v1736_v20 }
 0x367   :  { %1873 = vmatpush1.bf16.msra.mxu0 %v8782_v3  ;;  %1914 = vmatpush1.bf16.msra.mxu1 %v8788_v51 }
 0x368   :  { %1874 = vmatprep.subr.bf16.mxu0 %v8794_v52  ;;  %1915 = vmatprep.subr.bf16.mxu1 %v8800_v53 }
 0x369   :  { %1904 = vmatprep.mubr.bf16.mxu0 %v12214_v0  ;;  %1945 = vmatprep.mubr.bf16.mxu1 %v12214_v0 }
 0x36b   :  { %1875 = vmatpush1.bf16.msra.mxu0 %v8808_v54  ;;  %1916 = vmatpush1.bf16.msra.mxu1 %v8814_v55 }
 0x36c   :  { %1876 = vmatprep.subr.bf16.mxu0 %v8820_v56  ;;  %1917 = vmatprep.subr.bf16.mxu1 %v8826_v57 }
 0x36f   :  { %1877 = vmatpush1.bf16.msra.mxu0 %v8832_v58  ;;  %1918 = vmatpush1.bf16.msra.mxu1 %v8838_v59 }
 0x370   :  { %1878 = vmatprep.subr.bf16.mxu0 %v8844_v60  ;;  %1919 = vmatprep.subr.bf16.mxu1 %v8850_v61 }
 0x373   :  { %1879 = vmatpush1.bf16.msra.mxu0 %v8856_v62  ;;  %1920 = vmatpush1.bf16.msra.mxu1 %v8862_v63 }
 0x374   :  { %1880 = vmatprep.subr.bf16.mxu0 %v8868_v1  ;;  %1921 = vmatprep.subr.bf16.mxu1 %v8874_v2 }
 0x377   :  { %1881 = vmatpush1.bf16.msra.mxu0 %v8880_v4  ;;  %1922 = vmatpush1.bf16.msra.mxu1 %v8886_v7 }
 0x378   :  { %1882 = vmatprep.subr.bf16.mxu0 %v8892_v29  ;;  %1923 = vmatprep.subr.bf16.mxu1 %v8898_v16  ;;  %v12373_v29 = vld [vmem:[#allocation47_spill] sm:$0xff] }
 0x379   :  { %v432_v7 = vadd.f32 %v12373_v29, %v8448_v27 }
 0x37b   :  { %1883 = vmatpush1.bf16.msra.mxu0 %v8904_v19  ;;  %1924 = vmatpush1.bf16.msra.mxu1 %v8910_v39 }
 0x37c   :  { %1884 = vmatprep.subr.bf16.mxu0 %v8916_v22  ;;  %1925 = vmatprep.subr.bf16.mxu1 %v8922_v24 }
 0x37f   :  { %1885 = vmatpush1.bf16.msra.mxu0 %v8928_v35  ;;  %1926 = vmatpush1.bf16.msra.mxu1 %v8934_v38  ;;  %v12371_v35 = vld [vmem:[#allocation44_spill] sm:$0xff] }
 0x380   :  { %1886 = vmatprep.subr.bf16.mxu0 %v8940_v34  ;;  %1927 = vmatprep.subr.bf16.mxu1 %v8946_v25 }
 0x383   :  { %1887 = vmatpush1.bf16.msra.mxu0 %v8952_v21  ;;  %1928 = vmatpush1.bf16.msra.mxu1 %v8958_v12 }
 0x384   :  { %1959 = vmatprep.subr.bf16.mxu0 %v8964_v11  ;;  %2000 = vmatprep.subr.bf16.mxu1 %v8970_v26  ;;  %v12372_v11 = vld [vmem:[#allocation45_spill] sm:$0xff] }
 0x406   :  { %v1684_v32 = vpop.f32.mrf.mxu0  ;;  %v1725_v20 = vpop.f32.mrf.mxu1 }
 0x407   :  { %v1732_v24 = vadd.f32 %v1684_v32, %v12371_v35  ;;  %v1734_v26 = vadd.f32 %v1725_v20, %v12372_v11 }
 0x408   :  { %v1686_v38 = vpop.f32.mrf.mxu0  ;;  %v1727_v22 = vpop.f32.mrf.mxu1 }
 0x409   :  { %v6379_v34 = vmul.f32 -1.442695, %v1732_v24  ;;  %v1733_v39 = vadd.f32 %v1686_v38, %v359_v9  ;;  %v6381_v4 = vmul.f32 -1.442695, %v1734_v26  ;;  %v1735_v17 = vadd.f32 %v1727_v22, %v432_v7  ;;  %v12375_v7 = vld [vmem:[#allocation84_spill] sm:$0xff] }
 0x40a   :  { %v1688_v25 = vpop.f32.mrf.mxu0  ;;  %v1729_v19 = vpop.f32.mrf.mxu1 }
 0x40b   :  { %7081 = vpow2.f32 %v6379_v34  ;;  %v6380_v21 = vmul.f32 -1.442695, %v1733_v39  ;;  %v12374_v34 = vld [vmem:[#allocation82_spill] sm:$0xff] }
 0x40c   :  { %v1689_v12 = vpop.f32.mrf.mxu0  ;;  %v1730_v16 = vpop.f32.mrf.mxu1 }
 0x40d   :  { %7083 = vpow2.f32 %v6380_v21 }
 0x40e   :  { %7085 = vpow2.f32 %v6381_v4 }
 0x40f   :  { %7087 = vtanh.f32 %v1735_v17 }
 0x418   :  { %v7082_v10 = vpop.eup %7081 }
 0x419   :  { %v1832_v35 = vadd.f32 1.0, %v7082_v10 }
 0x41a   :  { %v7084_v32 = vpop.eup %7083 }
 0x41b   :  { %7089 = vrcp.f32 %v1832_v35  ;;  %v1833_v24 = vadd.f32 1.0, %v7084_v32  ;;  %v7086_v19 = vpop.eup %7085 }
 0x41c   :  { %v7088_v16 = vpop.eup %7087  ;;  %v1834_v4 = vadd.f32 1.0, %v7086_v19 }
 0x41d   :  { %7091 = vrcp.f32 %v1833_v24 }
 0x426   :  { %v1771_v39 = vpop.f32.mrf.mxu0  ;;  %v1812_v38 = vpop.f32.mrf.mxu1 }
 0x427   :  { %v1819_v25 = vadd.f32 %v1771_v39, %v12374_v34  ;;  %v12376_v39 = vld [vmem:[#allocation83_spill] sm:$0xff] }
 0x428   :  { %v7090_v21 = vpop.eup %7089  ;;  %v1773_v12 = vpop.f32.mrf.mxu0 }
 0x429   :  { %v1814_v11 = vpop.f32.mrf.mxu1  ;;  %v1843_v29 = vmul.f32 %v7090_v21, %v7088_v16  ;;  %v6382_v26 = vmul.f32 -1.442695, %v1819_v25  ;;  %v1820_v22 = vadd.f32 %v1773_v12, %v12375_v7  ;;  %v1821_v16 = vadd.f32 %v1812_v38, %v12376_v39  ;;  %v12377_v25 = vld [vmem:[#allocation85_spill] sm:$0xff]  ;;  %v12381_v39 = vld [vmem:[#allocation35_spill] sm:$0xff] }
 0x42a   :  { %v7092_v10 = vpop.eup %7091  ;;  %v1775_v9 = vpop.f32.mrf.mxu0  ;;  %v1822_v21 = vadd.f32 %v1814_v11, %v12377_v25  ;;  %v12384_v25 = vld [vmem:[#allocation92_spill] sm:$0xff] }
 0x42b   :  { %v1816_v20 = vpop.f32.mrf.mxu1  ;;  %v1842_v17 = vmul.f32 %v7092_v10, %v8981_v33  ;;  %7093 = vpow2.f32 %v6382_v26  ;;  %v6383_v35 = vmul.f32 -1.442695, %v1820_v22  ;;  %v6384_v34 = vmul.f32 -1.442695, %v1821_v16  ;;  %v12382_v16 = vld [vmem:[#allocation37_spill] sm:$0xff] }
 0x42c   :  { %v1776_v32 = vpop.f32.mrf.mxu0 }
 0x42d   :  { %v1817_v24 = vpop.f32.mrf.mxu1  ;;  %v9226_v27 = vadd.f32 %v1843_v29, %v1842_v17  ;;  %7095 = vpow2.f32 %v6383_v35 }
 0x42e   :  { %7097 = vrcp.f32 %v1834_v4  ;;  %v12380_v24 = vld [vmem:[#allocation34_spill] sm:$0xff] }
 0x42f   :  { %7099 = vtanh.f32 %v9226_v27 }
 0x430   :  { %7101 = vpow2.f32 %v6384_v34  ;;  %v12383_v34 = vld [vmem:[#allocation90_spill] sm:$0xff] }
 0x431   :  { %7103 = vtanh.f32 %v1822_v21  ;;  %v12385_v21 = vld [vmem:[#allocation91_spill] sm:$0xff] }
 0x438   :  { %v7094_v19 = vpop.eup %7093 }
 0x439   :  { %v1856_v12 = vadd.f32 1.0, %v7094_v19 }
 0x43a   :  { %v7096_v7 = vpop.eup %7095 }
 0x43b   :  { %v7098_v33 = vpop.eup %7097  ;;  %7105 = vrcp.f32 %v1856_v12  ;;  %v1857_v26 = vadd.f32 1.0, %v7096_v7  ;;  %v12386_v12 = vld [vmem:[#allocation93_spill] sm:$0xff]  ;;  %v12387_v7 = vld [vmem:[#allocation39_spill] sm:$0xff] }
 0x43c   :  { %v7100_v22 = vpop.eup %7099 }
 0x43d   :  { %7107 = vrcp.f32 %v1857_v26  ;;  %v9231_v29 = vmul.f32 %v7100_v22, %v7098_v33  ;;  %v7102_v38 = vpop.eup %7101 }
 0x43e   :  { %v7104_v11 = vpop.eup %7103  ;;  %v1858_v17 = vadd.f32 1.0, %v7102_v38  ;;  %v12390_v38 = vld [vmem:[#allocation16_spill] sm:$0xff] }
 0x43f   :  { %12378 = vst [vmem:[#allocation41_spill] sm:$0xff] %v9231_v29  ;;  %v1871_v10 = vpack.c.bf16 %v9231_v29, %v9231_v29  ;;  %v12401_v29 = vld [vmem:[#allocation27_spill] sm:$0xff] }
 0x440   :  { %7109 = vrcp.f32 %v1858_v17  ;;  %v12395_v17 = vld [vmem:[#allocation21_spill] sm:$0xff] }
 0x441   :  { %1905 = vmatmul.mubr.bf16.vlgmr.msra.gmra.mxu0 %v1871_v10  ;;  %1946 = vmatmul.mubr.bf16.vlgmr.msra.gmra.mxu1 %v1871_v10  ;;  %v12389_v10 = vld [vmem:[#allocation15_spill] sm:$0xff] }
 0x442   :  { %1960 = vmatpush1.bf16.msra.mxu0 %v8994_v18  ;;  %2001 = vmatpush1.bf16.msra.mxu1 %v9000_v42 }
 0x443   :  { %1961 = vmatprep.subr.bf16.mxu0 %v9006_v43  ;;  %2002 = vmatprep.subr.bf16.mxu1 %v9012_v45 }
 0x444   :  { %1991 = vmatprep.mubr.bf16.mxu0 %v12214_v0  ;;  %2032 = vmatprep.mubr.bf16.mxu1 %v12214_v0 }
 0x446   :  { %1962 = vmatpush1.bf16.msra.mxu0 %v9020_v46  ;;  %2003 = vmatpush1.bf16.msra.mxu1 %v9026_v48 }
 0x447   :  { %1963 = vmatprep.subr.bf16.mxu0 %v9032_v5  ;;  %2004 = vmatprep.subr.bf16.mxu1 %v9038_v36 }
 0x448   :  { %v7106_v4 = vpop.eup %7105 }
 0x449   :  { %v1867_v9 = vmul.f32 %v7106_v4, %v7104_v11  ;;  %v12391_v11 = vld [vmem:[#allocation17_spill] sm:$0xff]  ;;  %v12392_v4 = vld [vmem:[#allocation18_spill] sm:$0xff] }
 0x44a   :  { %v7108_v20 = vpop.eup %7107  ;;  %1964 = vmatpush1.bf16.msra.mxu0 %v9044_v13  ;;  %2005 = vmatpush1.bf16.msra.mxu1 %v9050_v28 }
 0x44b   :  { %v1866_v35 = vmul.f32 %v7108_v20, %v9066_v30  ;;  %1965 = vmatprep.subr.bf16.mxu0 %v9057_v14  ;;  %2006 = vmatprep.subr.bf16.mxu1 %v9063_v41  ;;  %v12379_v30 = vld [vmem:[#allocation36_spill] sm:$0xff] }
 0x44c   :  { %v12394_v20 = vld [vmem:[#allocation20_spill] sm:$0xff] }
 0x44d   :  { %v9250_v32 = vadd.f32 %v1867_v9, %v1866_v35  ;;  %v7110_v19 = vpop.eup %7109  ;;  %v12393_v9 = vld [vmem:[#allocation19_spill] sm:$0xff]  ;;  %v12396_v35 = vld [vmem:[#allocation22_spill] sm:$0xff] }
 0x44e   :  { %1966 = vmatpush1.bf16.msra.mxu0 %v9071_v44  ;;  %2007 = vmatpush1.bf16.msra.mxu1 %v9077_v37 }
 0x44f   :  { %7111 = vtanh.f32 %v9250_v32  ;;  %1967 = vmatprep.subr.bf16.mxu0 %v9084_v6  ;;  %2008 = vmatprep.subr.bf16.mxu1 %v9090_v47 }
 0x452   :  { %1968 = vmatpush1.bf16.msra.mxu0 %v9096_v8  ;;  %2009 = vmatpush1.bf16.msra.mxu1 %v9102_v23 }
 0x453   :  { %1969 = vmatprep.subr.bf16.mxu0 %v9108_v31  ;;  %2010 = vmatprep.subr.bf16.mxu1 %v12379_v30 }
 0x456   :  { %1970 = vmatpush1.bf16.msra.mxu0 %v12380_v24  ;;  %2011 = vmatpush1.bf16.msra.mxu1 %v12381_v39 }
 0x457   :  { %1971 = vmatprep.subr.bf16.mxu0 %v12382_v16  ;;  %2012 = vmatprep.subr.bf16.mxu1 %v12383_v34 }
 0x45a   :  { %1972 = vmatpush1.bf16.msra.mxu0 %v12384_v25  ;;  %2013 = vmatpush1.bf16.msra.mxu1 %v12385_v21 }
 0x45b   :  { %1973 = vmatprep.subr.bf16.mxu0 %v12386_v12  ;;  %2014 = vmatprep.subr.bf16.mxu1 %v12387_v7 }
 0x45c   :  { %v7112_v33 = vpop.eup %7111 }
 0x45d   :  { %v9269_v26 = vmul.f32 %v7112_v33, %v7110_v19  ;;  %v12397_v19 = vld [vmem:[#allocation23_spill] sm:$0xff]  ;;  %v12398_v33 = vld [vmem:[#allocation24_spill] sm:$0xff] }
 0x45e   :  { %1974 = vmatpush1.bf16.msra.mxu0 %v9170_v40  ;;  %2015 = vmatpush1.bf16.msra.mxu1 %v9176_v15 }
 0x45f   :  { %12388 = vst [vmem:[#allocation43_spill] sm:$0xff] %v9269_v26  ;;  %v1958_v22 = vpack.c.bf16 %v9269_v26, %v9269_v26  ;;  %2094 = vmatprep.subr.bf16.mxu0 %v8770_v49  ;;  %2135 = vmatprep.subr.bf16.mxu1 %v8776_v50  ;;  %v12400_v26 = vld [vmem:[#allocation26_spill] sm:$0xff] }
 0x461   :  { %1992 = vmatmul.mubr.bf16.vlgmr.msra.gmra.mxu0 %v1958_v22  ;;  %2033 = vmatmul.mubr.bf16.vlgmr.msra.gmra.mxu1 %v1958_v22  ;;  %v12399_v22 = vld [vmem:[#allocation25_spill] sm:$0xff] }
 0x462   :  { %2095 = vmatpush1.bf16.msra.mxu0 %v8782_v3  ;;  %2136 = vmatpush1.bf16.msra.mxu1 %v8788_v51 }
 0x463   :  { %2096 = vmatprep.subr.bf16.mxu0 %v8794_v52  ;;  %2137 = vmatprep.subr.bf16.mxu1 %v8800_v53 }
 0x464   :  { %2126 = vmatprep.mubr.bf16.mxu0 %v12214_v0  ;;  %2167 = vmatprep.mubr.bf16.mxu1 %v12214_v0 }
 0x466   :  { %2097 = vmatpush1.bf16.msra.mxu0 %v8808_v54  ;;  %2138 = vmatpush1.bf16.msra.mxu1 %v8814_v55 }
 0x467   :  { %2098 = vmatprep.subr.bf16.mxu0 %v8820_v56  ;;  %2139 = vmatprep.subr.bf16.mxu1 %v8826_v57 }
 0x46a   :  { %2099 = vmatpush1.bf16.msra.mxu0 %v8832_v58  ;;  %2140 = vmatpush1.bf16.msra.mxu1 %v8838_v59 }
 0x46b   :  { %2100 = vmatprep.subr.bf16.mxu0 %v8844_v60  ;;  %2141 = vmatprep.subr.bf16.mxu1 %v8850_v61 }
 0x46e   :  { %2101 = vmatpush1.bf16.msra.mxu0 %v8856_v62  ;;  %2142 = vmatpush1.bf16.msra.mxu1 %v8862_v63 }
 0x46f   :  { %2102 = vmatprep.subr.bf16.mxu0 %v8868_v1  ;;  %2143 = vmatprep.subr.bf16.mxu1 %v8874_v2 }
 0x472   :  { %2103 = vmatpush1.bf16.msra.mxu0 %v12389_v10  ;;  %2144 = vmatpush1.bf16.msra.mxu1 %v12390_v38  ;;  %v12405_v38 = vld [vmem:[#allocation48_spill] sm:$0xff] }
 0x473   :  { %2104 = vmatprep.subr.bf16.mxu0 %v12391_v11  ;;  %2145 = vmatprep.subr.bf16.mxu1 %v12392_v4  ;;  %v12402_v11 = vld [vmem:[#allocation28_spill] sm:$0xff]  ;;  %v12403_v4 = vld [vmem:[#allocation29_spill] sm:$0xff] }
 0x476   :  { %2105 = vmatpush1.bf16.msra.mxu0 %v12393_v9  ;;  %2146 = vmatpush1.bf16.msra.mxu1 %v12394_v20  ;;  %v12404_v9 = vld [vmem:[#allocation30_spill] sm:$0xff] }
 0x477   :  { %2106 = vmatprep.subr.bf16.mxu0 %v12395_v17  ;;  %2147 = vmatprep.subr.bf16.mxu1 %v12396_v35 }
 0x47a   :  { %2107 = vmatpush1.bf16.msra.mxu0 %v12397_v19  ;;  %2148 = vmatpush1.bf16.msra.mxu1 %v12398_v33  ;;  %v12406_v33 = vld [vmem:[#allocation50_spill] sm:$0xff] }
 0x47b   :  { %2108 = vmatprep.subr.bf16.mxu0 %v12399_v22  ;;  %2149 = vmatprep.subr.bf16.mxu1 %v12400_v26 }
 0x47e   :  { %2109 = vmatpush1.bf16.msra.mxu0 %v12401_v29  ;;  %2150 = vmatpush1.bf16.msra.mxu1 %v12402_v11  ;;  %v12407_v11 = vld [vmem:[#allocation49_spill] sm:$0xff] }
 0x47f   :  { %2181 = vmatprep.subr.bf16.mxu0 %v12403_v4  ;;  %2222 = vmatprep.subr.bf16.mxu1 %v12404_v9  ;;  %v12408_v9 = vld [vmem:[#allocation51_spill] sm:$0xff] }
 0x501   :  { %v1906_v20 = vpop.f32.mrf.mxu0  ;;  %v1947_v17 = vpop.f32.mrf.mxu1 }
 0x502   :  { %v1954_v35 = vadd.f32 %v1906_v20, %v12405_v38  ;;  %v1956_v4 = vadd.f32 %v1947_v17, %v12407_v11 }
 0x503   :  { %v1908_v10 = vpop.f32.mrf.mxu0  ;;  %v1949_v19 = vpop.f32.mrf.mxu1 }
 0x504   :  { %v6385_v2 = vmul.f32 -1.442695, %v1954_v35  ;;  %v1955_v1 = vadd.f32 %v1908_v10, %v12406_v33  ;;  %v6387_v61 = vmul.f32 -1.442695, %v1956_v4  ;;  %v1957_v60 = vadd.f32 %v1949_v19, %v12408_v9  ;;  %v12411_v35 = vld [vmem:[#allocation78_spill] sm:$0xff] }
 0x505   :  { %v1910_v22 = vpop.f32.mrf.mxu0  ;;  %v1951_v63 = vpop.f32.mrf.mxu1 }
 0x506   :  { %7113 = vpow2.f32 %v6385_v2  ;;  %v6386_v26 = vmul.f32 -1.442695, %v1955_v1 }
 0x507   :  { %v1911_v29 = vpop.f32.mrf.mxu0  ;;  %v1952_v62 = vpop.f32.mrf.mxu1 }
 0x508   :  { %7115 = vpow2.f32 %v6386_v26  ;;  %v12409_v29 = vld [vmem:[#allocation64_spill] sm:$0xff] }
 0x509   :  { %7117 = vpow2.f32 %v6387_v61  ;;  %v12410_v62 = vld [vmem:[#allocation80_spill] sm:$0xff] }
 0x50a   :  { %7119 = vtanh.f32 %v1957_v60  ;;  %v505_v26 = vadd.f32 %v12410_v62, %v12409_v29  ;;  %v12413_v62 = vld [vmem:[#allocation65_spill] sm:$0xff] }
 0x513   :  { %v7114_v59 = vpop.eup %7113 }
 0x514   :  { %v2054_v58 = vadd.f32 1.0, %v7114_v59 }
 0x515   :  { %v7116_v38 = vpop.eup %7115 }
 0x516   :  { %7121 = vrcp.f32 %v2054_v58  ;;  %v2055_v20 = vadd.f32 1.0, %v7116_v38  ;;  %v7118_v10 = vpop.eup %7117 }
 0x517   :  { %v7120_v1 = vpop.eup %7119  ;;  %v2056_v60 = vadd.f32 1.0, %v7118_v10 }
 0x518   :  { %7123 = vrcp.f32 %v2055_v20 }
 0x521   :  { %v1993_v63 = vpop.f32.mrf.mxu0  ;;  %v2034_v2 = vpop.f32.mrf.mxu1 }
 0x522   :  { %v2041_v11 = vadd.f32 %v1993_v63, %v12411_v35  ;;  %v12412_v63 = vld [vmem:[#allocation79_spill] sm:$0xff] }
 0x523   :  { %v7122_v4 = vpop.eup %7121  ;;  %v1995_v17 = vpop.f32.mrf.mxu0 }
 0x524   :  { %v2036_v9 = vpop.f32.mrf.mxu1  ;;  %v2065_v19 = vmul.f32 %v7122_v4, %v7120_v1  ;;  %v6388_v59 = vmul.f32 -1.442695, %v2041_v11  ;;  %v2042_v61 = vadd.f32 %v1995_v17, %v505_v26  ;;  %v2043_v1 = vadd.f32 %v2034_v2, %v12412_v63  ;;  %v12414_v26 = vld [vmem:[#allocation81_spill] sm:$0xff] }
 0x525   :  { %v7124_v33 = vpop.eup %7123  ;;  %v1997_v58 = vpop.f32.mrf.mxu0  ;;  %v578_v35 = vadd.f32 %v12414_v26, %v12413_v62 }
 0x526   :  { %v2038_v22 = vpop.f32.mrf.mxu1  ;;  %v2064_v38 = vmul.f32 %v7124_v33, %v9226_v27  ;;  %7125 = vpow2.f32 %v6388_v59  ;;  %v6389_v20 = vmul.f32 -1.442695, %v2042_v61  ;;  %v6390_v10 = vmul.f32 -1.442695, %v2043_v1 }
 0x527   :  { %v1998_v57 = vpop.f32.mrf.mxu0  ;;  %v2044_v11 = vadd.f32 %v2036_v9, %v578_v35  ;;  %v12415_v35 = vld [vmem:[#allocation4_spill] sm:$0xff] }
 0x528   :  { %v2039_v56 = vpop.f32.mrf.mxu1  ;;  %v9319_v55 = vadd.f32 %v2065_v19, %v2064_v38  ;;  %7127 = vpow2.f32 %v6389_v20 }
 0x529   :  { %7129 = vrcp.f32 %v2056_v60 }
 0x52a   :  { %7131 = vtanh.f32 %v9319_v55 }
 0x52b   :  { %7133 = vpow2.f32 %v6390_v10  ;;  %v12418_v10 = vld [vmem:[#allocation7_spill] sm:$0xff] }
 0x52c   :  { %7135 = vtanh.f32 %v2044_v11  ;;  %v12423_v11 = vld [vmem:[#allocation12_spill] sm:$0xff] }
 0x533   :  { %v7126_v4 = vpop.eup %7125 }
 0x534   :  { %v2078_v17 = vadd.f32 1.0, %v7126_v4  ;;  %v12424_v4 = vld [vmem:[#allocation13_spill] sm:$0xff] }
 0x535   :  { %v7128_v27 = vpop.eup %7127 }
 0x536   :  { %v7130_v57 = vpop.eup %7129  ;;  %7137 = vrcp.f32 %v2078_v17  ;;  %v2079_v56 = vadd.f32 1.0, %v7128_v27  ;;  %v12426_v17 = vld [vmem:[#allocation15_spill] sm:$0xff]  ;;  %v12427_v27 = vld [vmem:[#allocation16_spill] sm:$0xff] }
 0x537   :  { %v7132_v19 = vpop.eup %7131 }
 0x538   :  { %7139 = vrcp.f32 %v2079_v56  ;;  %v9325_v59 = vmul.f32 %v7132_v19, %v7130_v57  ;;  %v7134_v9 = vpop.eup %7133  ;;  %v12428_v57 = vld [vmem:[#allocation17_spill] sm:$0xff]  ;;  %v12429_v56 = vld [vmem:[#allocation18_spill] sm:$0xff]  ;;  %v12430_v19 = vld [vmem:[#allocation19_spill] sm:$0xff] }
 0x539   :  { %v7136_v61 = vpop.eup %7135  ;;  %v2080_v22 = vadd.f32 1.0, %v7134_v9  ;;  %v12432_v9 = vld [vmem:[#allocation21_spill] sm:$0xff] }
 0x53a   :  { %v2093_v2 = vpack.c.bf16 %v9325_v59, %v9325_v59 }
 0x53b   :  { %7141 = vrcp.f32 %v2080_v22  ;;  %v12437_v22 = vld [vmem:[#allocation26_spill] sm:$0xff] }
 0x53c   :  { %2127 = vmatmul.mubr.bf16.vlgmr.msra.gmra.mxu0 %v2093_v2  ;;  %2168 = vmatmul.mubr.bf16.vlgmr.msra.gmra.mxu1 %v2093_v2  ;;  %v12431_v2 = vld [vmem:[#allocation20_spill] sm:$0xff] }
 0x53d   :  { %2182 = vmatpush1.bf16.msra.mxu0 %v8994_v18  ;;  %2223 = vmatpush1.bf16.msra.mxu1 %v9000_v42 }
 0x53e   :  { %2183 = vmatprep.subr.bf16.mxu0 %v9006_v43  ;;  %2224 = vmatprep.subr.bf16.mxu1 %v9012_v45 }
 0x53f   :  { %2213 = vmatprep.mubr.bf16.mxu0 %v12214_v0  ;;  %2254 = vmatprep.mubr.bf16.mxu1 %v12214_v0 }
 0x541   :  { %2184 = vmatpush1.bf16.msra.mxu0 %v9020_v46  ;;  %2225 = vmatpush1.bf16.msra.mxu1 %v9026_v48 }
 0x542   :  { %2185 = vmatprep.subr.bf16.mxu0 %v9032_v5  ;;  %2226 = vmatprep.subr.bf16.mxu1 %v9038_v36 }
 0x543   :  { %v7138_v33 = vpop.eup %7137 }
 0x544   :  { %v2089_v60 = vmul.f32 %v7138_v33, %v7136_v61  ;;  %v12433_v61 = vld [vmem:[#allocation22_spill] sm:$0xff]  ;;  %v12434_v33 = vld [vmem:[#allocation23_spill] sm:$0xff] }
 0x545   :  { %v7140_v58 = vpop.eup %7139  ;;  %2186 = vmatpush1.bf16.msra.mxu0 %v9044_v13  ;;  %2227 = vmatpush1.bf16.msra.mxu1 %v9050_v28 }
 0x546   :  { %v2088_v38 = vmul.f32 %v7140_v58, %v9250_v32  ;;  %2187 = vmatprep.subr.bf16.mxu0 %v9057_v14  ;;  %2228 = vmatprep.subr.bf16.mxu1 %v9063_v41  ;;  %v12436_v58 = vld [vmem:[#allocation25_spill] sm:$0xff] }
 0x548   :  { %v9344_v20 = vadd.f32 %v2089_v60, %v2088_v38  ;;  %v7142_v32 = vpop.eup %7141  ;;  %v12435_v60 = vld [vmem:[#allocation24_spill] sm:$0xff]  ;;  %v12438_v38 = vld [vmem:[#allocation27_spill] sm:$0xff] }
 0x549   :  { %2188 = vmatpush1.bf16.msra.mxu0 %v9071_v44  ;;  %2229 = vmatpush1.bf16.msra.mxu1 %v9077_v37 }
 0x54a   :  { %7143 = vtanh.f32 %v9344_v20  ;;  %2189 = vmatprep.subr.bf16.mxu0 %v9084_v6  ;;  %2230 = vmatprep.subr.bf16.mxu1 %v9090_v47 }
 0x54d   :  { %2190 = vmatpush1.bf16.msra.mxu0 %v9096_v8  ;;  %2231 = vmatpush1.bf16.msra.mxu1 %v9102_v23 }
 0x54e   :  { %2191 = vmatprep.subr.bf16.mxu0 %v9108_v31  ;;  %2232 = vmatprep.subr.bf16.mxu1 %v12379_v30 }
 0x551   :  { %2192 = vmatpush1.bf16.msra.mxu0 %v12380_v24  ;;  %2233 = vmatpush1.bf16.msra.mxu1 %v12381_v39 }
 0x552   :  { %2193 = vmatprep.subr.bf16.mxu0 %v12382_v16  ;;  %2234 = vmatprep.subr.bf16.mxu1 %v12383_v34 }
 0x555   :  { %2194 = vmatpush1.bf16.msra.mxu0 %v12384_v25  ;;  %2235 = vmatpush1.bf16.msra.mxu1 %v12385_v21 }
 0x556   :  { %2195 = vmatprep.subr.bf16.mxu0 %v12386_v12  ;;  %2236 = vmatprep.subr.bf16.mxu1 %v12387_v7 }
 0x557   :  { %v7144_v63 = vpop.eup %7143 }
 0x558   :  { %v9363_v1 = vmul.f32 %v7144_v63, %v7142_v32  ;;  %v12439_v32 = vld [vmem:[#allocation28_spill] sm:$0xff]  ;;  %v12440_v63 = vld [vmem:[#allocation29_spill] sm:$0xff] }
 0x559   :  { %2196 = vmatpush1.bf16.msra.mxu0 %v9170_v40  ;;  %2237 = vmatpush1.bf16.msra.mxu1 %v9176_v15 }
 0x55a   :  { %v2180_v26 = vpack.c.bf16 %v9363_v1, %v9363_v1  ;;  %2316 = vmatprep.subr.bf16.mxu0 %v8770_v49  ;;  %2357 = vmatprep.subr.bf16.mxu1 %v8776_v50  ;;  %v12416_v49 = vld [vmem:[#allocation5_spill] sm:$0xff]  ;;  %v12417_v50 = vld [vmem:[#allocation6_spill] sm:$0xff] }
 0x55c   :  { %2214 = vmatmul.mubr.bf16.vlgmr.msra.gmra.mxu0 %v2180_v26  ;;  %2255 = vmatmul.mubr.bf16.vlgmr.msra.gmra.mxu1 %v2180_v26  ;;  %v12441_v26 = vld [vmem:[#allocation30_spill] sm:$0xff] }
 0x55d   :  { %2317 = vmatpush1.bf16.msra.mxu0 %v8782_v3  ;;  %2358 = vmatpush1.bf16.msra.mxu1 %v8788_v51  ;;  %v12419_v3 = vld [vmem:[#allocation8_spill] sm:$0xff]  ;;  %v12420_v51 = vld [vmem:[#allocation9_spill] sm:$0xff] }
 0x55e   :  { %2318 = vmatprep.subr.bf16.mxu0 %v8794_v52  ;;  %2359 = vmatprep.subr.bf16.mxu1 %v8800_v53  ;;  %v12421_v52 = vld [vmem:[#allocation10_spill] sm:$0xff]  ;;  %v12422_v53 = vld [vmem:[#allocation11_spill] sm:$0xff] }
 0x55f   :  { %2348 = vmatprep.mubr.bf16.mxu0 %v12214_v0  ;;  %2389 = vmatprep.mubr.bf16.mxu1 %v12214_v0 }
 0x561   :  { %2319 = vmatpush1.bf16.msra.mxu0 %v8808_v54  ;;  %2360 = vmatpush1.bf16.msra.mxu1 %v12415_v35  ;;  %v12425_v54 = vld [vmem:[#allocation14_spill] sm:$0xff] }
 0x562   :  { %2320 = vmatprep.subr.bf16.mxu0 %v12416_v49  ;;  %2361 = vmatprep.subr.bf16.mxu1 %v12417_v50  ;;  %v12442_v50 = vld [vmem:[#allocation38_spill] sm:$0xff] }
 0x565   :  { %2321 = vmatpush1.bf16.msra.mxu0 %v12418_v10  ;;  %2362 = vmatpush1.bf16.msra.mxu1 %v12419_v3  ;;  %v12443_v10 = vld [vmem:[#allocation54_spill] sm:$0xff] }
 0x566   :  { %2322 = vmatprep.subr.bf16.mxu0 %v12420_v51  ;;  %2363 = vmatprep.subr.bf16.mxu1 %v12421_v52  ;;  %v369_v3 = vadd.f32 %v12443_v10, %v12442_v50  ;;  %v12444_v51 = vld [vmem:[#allocation52_spill] sm:$0xff] }
 0x569   :  { %2323 = vmatpush1.bf16.msra.mxu0 %v12422_v53  ;;  %2364 = vmatpush1.bf16.msra.mxu1 %v12423_v11 }
 0x56a   :  { %2324 = vmatprep.subr.bf16.mxu0 %v12424_v4  ;;  %2365 = vmatprep.subr.bf16.mxu1 %v12425_v54 }
 0x56d   :  { %2325 = vmatpush1.bf16.msra.mxu0 %v12426_v17  ;;  %2366 = vmatpush1.bf16.msra.mxu1 %v12427_v27 }
 0x56e   :  { %2326 = vmatprep.subr.bf16.mxu0 %v12428_v57  ;;  %2367 = vmatprep.subr.bf16.mxu1 %v12429_v56 }
 0x571   :  { %2327 = vmatpush1.bf16.msra.mxu0 %v12430_v19  ;;  %2368 = vmatpush1.bf16.msra.mxu1 %v12431_v2  ;;  %v12445_v2 = vld [vmem:[#allocation53_spill] sm:$0xff] }
 0x572   :  { %2328 = vmatprep.subr.bf16.mxu0 %v12432_v9  ;;  %2369 = vmatprep.subr.bf16.mxu1 %v12433_v61  ;;  %v12446_v61 = vld [vmem:[#allocation40_spill] sm:$0xff] }
 0x575   :  { %2329 = vmatpush1.bf16.msra.mxu0 %v12434_v33  ;;  %2370 = vmatpush1.bf16.msra.mxu1 %v12435_v60  ;;  %v12447_v33 = vld [vmem:[#allocation55_spill] sm:$0xff] }
 0x576   :  { %2330 = vmatprep.subr.bf16.mxu0 %v12436_v58  ;;  %2371 = vmatprep.subr.bf16.mxu1 %v12437_v22  ;;  %v442_v60 = vadd.f32 %v12447_v33, %v12446_v61 }
 0x579   :  { %2331 = vmatpush1.bf16.msra.mxu0 %v12438_v38  ;;  %2372 = vmatpush1.bf16.msra.mxu1 %v12439_v32 }
 0x57a   :  { %2403 = vmatprep.subr.bf16.mxu0 %v12440_v63  ;;  %2444 = vmatprep.subr.bf16.mxu1 %v12441_v26 }
 0x5fc   :  { %v2128_v35 = vpop.f32.mrf.mxu0  ;;  %v2169_v49 = vpop.f32.mrf.mxu1 }
 0x5fd   :  { %v2176_v52 = vadd.f32 %v2128_v35, %v12444_v51  ;;  %v2178_v9 = vadd.f32 %v2169_v49, %v12445_v2 }
 0x5fe   :  { %v2130_v53 = vpop.f32.mrf.mxu0  ;;  %v2171_v11 = vpop.f32.mrf.mxu1 }
 0x5ff   :  { %v6391_v4 = vmul.f32 -1.442695, %v2176_v52  ;;  %v2177_v54 = vadd.f32 %v2130_v53, %v369_v3  ;;  %v6393_v58 = vmul.f32 -1.442695, %v2178_v9  ;;  %v2179_v22 = vadd.f32 %v2171_v11, %v442_v60  ;;  %v12448_v52 = vld [vmem:[#allocation74_spill] sm:$0xff]  ;;  %v12449_v11 = vld [vmem:[#allocation76_spill] sm:$0xff] }
 0x600   :  { %v2132_v17 = vpop.f32.mrf.mxu0  ;;  %v2173_v27 = vpop.f32.mrf.mxu1 }
 0x601   :  { %7145 = vpow2.f32 %v6391_v4  ;;  %v6392_v57 = vmul.f32 -1.442695, %v2177_v54 }
 0x602   :  { %v2133_v56 = vpop.f32.mrf.mxu0  ;;  %v2174_v19 = vpop.f32.mrf.mxu1 }
 0x603   :  { %7147 = vpow2.f32 %v6392_v57 }
 0x604   :  { %7149 = vpow2.f32 %v6393_v58 }
 0x605   :  { %7151 = vtanh.f32 %v2179_v22 }
 0x60e   :  { %v7146_v38 = vpop.eup %7145 }
 0x60f   :  { %v2276_v32 = vadd.f32 1.0, %v7146_v38 }
 0x610   :  { %v7148_v63 = vpop.eup %7147 }
 0x611   :  { %7153 = vrcp.f32 %v2276_v32  ;;  %v2277_v26 = vadd.f32 1.0, %v7148_v63  ;;  %v7150_v35 = vpop.eup %7149  ;;  %v12450_v32 = vld [vmem:[#allocation75_spill] sm:$0xff] }
 0x612   :  { %v7152_v51 = vpop.eup %7151  ;;  %v2278_v19 = vadd.f32 1.0, %v7150_v35 }
 0x613   :  { %7155 = vrcp.f32 %v2277_v26 }
 0x61c   :  { %v2215_v10 = vpop.f32.mrf.mxu0  ;;  %v2256_v3 = vpop.f32.mrf.mxu1 }
 0x61d   :  { %v2263_v53 = vadd.f32 %v2215_v10, %v12448_v52  ;;  %v2265_v63 = vadd.f32 %v2256_v3, %v12450_v32  ;;  %v12451_v10 = vld [vmem:[#allocation77_spill] sm:$0xff] }
 0x61e   :  { %v7154_v49 = vpop.eup %7153  ;;  %v2217_v4 = vpop.f32.mrf.mxu0  ;;  %v7592_v32 = vld [vmem:[%s11967_s2 + $0x8] ss:$16 sps:$4 sm:$0xff]  }
 0x61f   :  { %v2258_v54 = vpop.f32.mrf.mxu1  ;;  %v2287_v17 = vmul.f32 %v7154_v49, %v7152_v51  ;;  %v6394_v27 = vmul.f32 -1.442695, %v2263_v53  ;;  %v2264_v57 = vadd.f32 %v2217_v4, %v12449_v11  ;;  %v6396_v26 = vmul.f32 -1.442695, %v2265_v63  ;;  %v7593_v63 = vld [vmem:[%s11967_s2 + $0x1e4] ss:$16 sps:$4 sm:$0xff]  }
 0x620   :  { %v7156_v56 = vpop.eup %7155  ;;  %v2219_v2 = vpop.f32.mrf.mxu0  ;;  %v2266_v51 = vadd.f32 %v2258_v54, %v12451_v10 }
 0x621   :  { %v2260_v9 = vpop.f32.mrf.mxu1  ;;  %v2286_v33 = vmul.f32 %v7156_v56, %v9319_v55  ;;  %7157 = vpow2.f32 %v6394_v27  ;;  %v6395_v60 = vmul.f32 -1.442695, %v2264_v57  ;;  %v7583_v57 = vld [vmem:[%s11967_s2 + $0x40] ss:$16 sps:$4 sm:$0xff]   ;;  %v7584_v56 = vld [vmem:[%s11967_s2 + $0x48] ss:$16 sps:$4 sm:$0xff]  }
 0x622   :  { %v2220_v58 = vpop.f32.mrf.mxu0  ;;  %v7586_v2 = vld [vmem:[%s11967_s2 + $0x2c] ss:$16 sps:$4 sm:$0xff]   ;;  %v7587_v9 = vld [vmem:[%s11967_s2 + $0x20] ss:$16 sps:$4 sm:$0xff]  }
 0x623   :  { %v2261_v22 = vpop.f32.mrf.mxu1  ;;  %v9414_v38 = vadd.f32 %v2287_v17, %v2286_v33  ;;  %7159 = vpow2.f32 %v6395_v60  ;;  %v7588_v33 = vld [vmem:[%s11967_s2 + $0x28] ss:$16 sps:$4 sm:$0xff]   ;;  %v7589_v60 = vld [vmem:[%s11967_s2 + $0x4] ss:$16 sps:$4 sm:$0xff]   ;;  %v7590_v58 = vld [vmem:[%s11967_s2 + $0xc] ss:$16 sps:$4 sm:$0xff]  }
 0x624   :  { %7161 = vrcp.f32 %v2278_v19  ;;  %v7585_v19 = vld [vmem:[%s11967_s2 + $0x24] ss:$16 sps:$4 sm:$0xff]   ;;  %v7591_v22 = vld [vmem:[%s11967_s2] ss:$16 sps:$4 sm:$0xff]  }
 0x625   :  { %7163 = vtanh.f32 %v9414_v38 }
 0x626   :  { %7165 = vpow2.f32 %v6396_v26  ;;  %v7594_v26 = vld [vmem:[%s11967_s2 + $0x1ec] ss:$16 sps:$4 sm:$0xff]  }
 0x627   :  { %7167 = vtanh.f32 %v2266_v51 }
 0x62e   :  { %v7158_v35 = vpop.eup %7157 }
 0x62f   :  { %v2300_v52 = vadd.f32 1.0, %v7158_v35  ;;  %v12452_v35 = vld [vmem:[#allocation56_spill] sm:$0xff] }
 0x630   :  { %v7160_v53 = vpop.eup %7159 }
 0x631   :  { %v7162_v55 = vpop.eup %7161  ;;  %7169 = vrcp.f32 %v2300_v52  ;;  %v2301_v49 = vadd.f32 1.0, %v7160_v53 }
 0x632   :  { %v7164_v4 = vpop.eup %7163 }
 0x633   :  { %7171 = vrcp.f32 %v2301_v49  ;;  %v9419_v17 = vmul.f32 %v7164_v4, %v7162_v55  ;;  %v7166_v3 = vpop.eup %7165  ;;  %v12453_v4 = vld [vmem:[#allocation58_spill] sm:$0xff] }
 0x634   :  { %v7168_v54 = vpop.eup %7167 }
 0x635   :  { %v2315_v27 = vpack.c.bf16 %v9419_v17, %v9419_v17 }
 0x637   :  { %2349 = vmatmul.mubr.bf16.vlgmr.msra.gmra.mxu0 %v2315_v27  ;;  %2390 = vmatmul.mubr.bf16.vlgmr.msra.gmra.mxu1 %v2315_v27 }
 0x638   :  { %2404 = vmatpush1.bf16.msra.mxu0 %v8994_v18  ;;  %2445 = vmatpush1.bf16.msra.mxu1 %v9000_v42 }
 0x639   :  { %2405 = vmatprep.subr.bf16.mxu0 %v9006_v43  ;;  %2446 = vmatprep.subr.bf16.mxu1 %v9012_v45  ;;  %v2302_v43 = vadd.f32 1.0, %v7166_v3 }
 0x63a   :  { %2435 = vmatprep.mubr.bf16.mxu0 %v12214_v0  ;;  %2476 = vmatprep.mubr.bf16.mxu1 %v12214_v0 }
 0x63b   :  { %7173 = vrcp.f32 %v2302_v43  ;;  %v12454_v43 = vld [vmem:[#allocation57_spill] sm:$0xff] }
 0x63c   :  { %2406 = vmatpush1.bf16.msra.mxu0 %v9020_v46  ;;  %2447 = vmatpush1.bf16.msra.mxu1 %v9026_v48 }
 0x63d   :  { %2407 = vmatprep.subr.bf16.mxu0 %v9032_v5  ;;  %2448 = vmatprep.subr.bf16.mxu1 %v9038_v36 }
 0x63e   :  { %v7170_v18 = vpop.eup %7169 }
 0x63f   :  { %v2311_v42 = vmul.f32 %v7170_v18, %v7168_v54 }
 0x640   :  { %v7172_v11 = vpop.eup %7171  ;;  %2408 = vmatpush1.bf16.msra.mxu0 %v9044_v13  ;;  %2449 = vmatpush1.bf16.msra.mxu1 %v9050_v28  ;;  %v7561_v28 = vld [vmem:[%s11967_s2 + $0xe4] ss:$16 sps:$4 sm:$0xff]  }
 0x641   :  { %v2310_v45 = vmul.f32 %v7172_v11, %v9344_v20  ;;  %2409 = vmatprep.subr.bf16.mxu0 %v9057_v14  ;;  %2450 = vmatprep.subr.bf16.mxu1 %v9063_v41  ;;  %v7562_v14 = vld [vmem:[%s11967_s2 + $0xec] ss:$16 sps:$4 sm:$0xff]   ;;  %v7563_v41 = vld [vmem:[%s11967_s2 + $0xe0] ss:$16 sps:$4 sm:$0xff]  }
 0x642   :  { %v7582_v20 = vld [vmem:[%s11967_s2 + $0x4c] ss:$16 sps:$4 sm:$0xff]  }
 0x643   :  { %v9438_v46 = vadd.f32 %v2311_v42, %v2310_v45 }
 0x644   :  { %2410 = vmatpush1.bf16.msra.mxu0 %v9071_v44  ;;  %2451 = vmatpush1.bf16.msra.mxu1 %v9077_v37  ;;  %v7564_v44 = vld [vmem:[%s11967_s2 + $0xe8] ss:$16 sps:$4 sm:$0xff]   ;;  %v7565_v37 = vld [vmem:[%s11967_s2 + $0xc4] ss:$16 sps:$4 sm:$0xff]  }
 0x645   :  { %7175 = vtanh.f32 %v9438_v46  ;;  %2411 = vmatprep.subr.bf16.mxu0 %v9084_v6  ;;  %2452 = vmatprep.subr.bf16.mxu1 %v9090_v47  ;;  %v7566_v6 = vld [vmem:[%s11967_s2 + $0xcc] ss:$16 sps:$4 sm:$0xff]   ;;  %v7567_v47 = vld [vmem:[%s11967_s2 + $0xc0] ss:$16 sps:$4 sm:$0xff]  }
 0x648   :  { %2412 = vmatpush1.bf16.msra.mxu0 %v9096_v8  ;;  %2453 = vmatpush1.bf16.msra.mxu1 %v9102_v23  ;;  %v7174_v48 = vpop.eup %7173  ;;  %v7568_v8 = vld [vmem:[%s11967_s2 + $0xc8] ss:$16 sps:$4 sm:$0xff]   ;;  %v7569_v23 = vld [vmem:[%s11967_s2 + $0xa4] ss:$16 sps:$4 sm:$0xff]  }
 0x649   :  { %2413 = vmatprep.subr.bf16.mxu0 %v9108_v31  ;;  %2454 = vmatprep.subr.bf16.mxu1 %v12379_v30  ;;  %v7570_v31 = vld [vmem:[%s11967_s2 + $0xac] ss:$16 sps:$4 sm:$0xff]   ;;  %v7573_v30 = vld [vmem:[%s11967_s2 + $0x84] ss:$16 sps:$4 sm:$0xff]  }
 0x64c   :  { %2414 = vmatpush1.bf16.msra.mxu0 %v12380_v24  ;;  %2455 = vmatpush1.bf16.msra.mxu1 %v12381_v39  ;;  %v7574_v24 = vld [vmem:[%s11967_s2 + $0x8c] ss:$16 sps:$4 sm:$0xff]   ;;  %v7575_v39 = vld [vmem:[%s11967_s2 + $0x80] ss:$16 sps:$4 sm:$0xff]  }
 0x64d   :  { %2415 = vmatprep.subr.bf16.mxu0 %v12382_v16  ;;  %2456 = vmatprep.subr.bf16.mxu1 %v12383_v34  ;;  %v7576_v16 = vld [vmem:[%s11967_s2 + $0x88] ss:$16 sps:$4 sm:$0xff]   ;;  %v7577_v34 = vld [vmem:[%s11967_s2 + $0x64] ss:$16 sps:$4 sm:$0xff]  }
 0x650   :  { %2416 = vmatpush1.bf16.msra.mxu0 %v12384_v25  ;;  %2457 = vmatpush1.bf16.msra.mxu1 %v12385_v21  ;;  %v7578_v25 = vld [vmem:[%s11967_s2 + $0x6c] ss:$16 sps:$4 sm:$0xff]   ;;  %v7579_v21 = vld [vmem:[%s11967_s2 + $0x60] ss:$16 sps:$4 sm:$0xff]  }
 0x651   :  { %2417 = vmatprep.subr.bf16.mxu0 %v12386_v12  ;;  %2458 = vmatprep.subr.bf16.mxu1 %v12387_v7  ;;  %v7580_v12 = vld [vmem:[%s11967_s2 + $0x68] ss:$16 sps:$4 sm:$0xff]   ;;  %v7581_v7 = vld [vmem:[%s11967_s2 + $0x44] ss:$16 sps:$4 sm:$0xff]  }
 0x652   :  { %v7176_v5 = vpop.eup %7175 }
 0x653   :  { %v9457_v36 = vmul.f32 %v7176_v5, %v7174_v48  ;;  %v12455_v5 = vld [vmem:[#allocation59_spill] sm:$0xff] }
 0x654   :  { %2418 = vmatpush1.bf16.msra.mxu0 %v9170_v40  ;;  %2459 = vmatpush1.bf16.msra.mxu1 %v9176_v15  ;;  %v7571_v15 = vld [vmem:[%s11967_s2 + $0xa0] ss:$16 sps:$4 sm:$0xff]   ;;  %v7572_v40 = vld [vmem:[%s11967_s2 + $0xa8] ss:$16 sps:$4 sm:$0xff]  }
 0x655   :  { %v2402_v13 = vpack.c.bf16 %v9457_v36, %v9457_v36  ;;  %2538 = vmatprep.subr.bf16.mxu0 %v7561_v28  ;;  %2579 = vmatprep.subr.bf16.mxu1 %v7562_v14 }
 0x657   :  { %2436 = vmatmul.mubr.bf16.vlgmr.msra.gmra.mxu0 %v2402_v13  ;;  %2477 = vmatmul.mubr.bf16.vlgmr.msra.gmra.mxu1 %v2402_v13 }
 0x658   :  { %2539 = vmatpush1.bf16.msra.mxu0 %v7563_v41  ;;  %2580 = vmatpush1.bf16.msra.mxu1 %v7564_v44 }
 0x659   :  { %2540 = vmatprep.subr.bf16.mxu0 %v7565_v37  ;;  %2581 = vmatprep.subr.bf16.mxu1 %v7566_v6 }
 0x65a   :  { %2570 = vmatprep.mubr.bf16.mxu0 %v12214_v0  ;;  %2611 = vmatprep.mubr.bf16.mxu1 %v12214_v0 }
 0x65c   :  { %2541 = vmatpush1.bf16.msra.mxu0 %v7567_v47  ;;  %2582 = vmatpush1.bf16.msra.mxu1 %v7568_v8 }
 0x65d   :  { %2542 = vmatprep.subr.bf16.mxu0 %v7569_v23  ;;  %2583 = vmatprep.subr.bf16.mxu1 %v7570_v31  ;;  %v12456_v23 = vld [vmem:[#allocation72_spill] sm:$0xff] }
 0x65e   :  { %v495_v31 = vadd.f32 %v12456_v23, %v12409_v29  ;;  %v12458_v29 = vld [vmem:[#allocation71_spill] sm:$0xff]  ;;  %v7611_v23 = vld [vmem:[%s11967_s2 + $0x160] ss:$16 sps:$4 sm:$0xff]  }
 0x660   :  { %2543 = vmatpush1.bf16.msra.mxu0 %v7571_v15  ;;  %2584 = vmatpush1.bf16.msra.mxu1 %v7572_v40  ;;  %v12457_v15 = vld [vmem:[#allocation70_spill] sm:$0xff] }
 0x661   :  { %2544 = vmatprep.subr.bf16.mxu0 %v7573_v30  ;;  %2585 = vmatprep.subr.bf16.mxu1 %v7574_v24 }
 0x664   :  { %2545 = vmatpush1.bf16.msra.mxu0 %v7575_v39  ;;  %2586 = vmatpush1.bf16.msra.mxu1 %v7576_v16 }
 0x665   :  { %2546 = vmatprep.subr.bf16.mxu0 %v7577_v34  ;;  %2587 = vmatprep.subr.bf16.mxu1 %v7578_v25 }
 0x668   :  { %2547 = vmatpush1.bf16.msra.mxu0 %v7579_v21  ;;  %2588 = vmatpush1.bf16.msra.mxu1 %v7580_v12 }
 0x669   :  { %2548 = vmatprep.subr.bf16.mxu0 %v7581_v7  ;;  %2589 = vmatprep.subr.bf16.mxu1 %v7582_v20 }
 0x66c   :  { %2549 = vmatpush1.bf16.msra.mxu0 %v7583_v57  ;;  %2590 = vmatpush1.bf16.msra.mxu1 %v7584_v56 }
 0x66d   :  { %2550 = vmatprep.subr.bf16.mxu0 %v7585_v19  ;;  %2591 = vmatprep.subr.bf16.mxu1 %v7586_v2 }
 0x670   :  { %2551 = vmatpush1.bf16.msra.mxu0 %v7587_v9  ;;  %2592 = vmatpush1.bf16.msra.mxu1 %v7588_v33 }
 0x671   :  { %2552 = vmatprep.subr.bf16.mxu0 %v7589_v60  ;;  %2593 = vmatprep.subr.bf16.mxu1 %v7590_v58  ;;  %v12459_v60 = vld [vmem:[#allocation73_spill] sm:$0xff] }
 0x672   :  { %v568_v58 = vadd.f32 %v12459_v60, %v12413_v62  ;;  %v7595_v62 = vld [vmem:[%s11967_s2 + $0x1e0] ss:$16 sps:$4 sm:$0xff]   ;;  %v2824_v60 = vld [vmem:[%s11969_s4 + $0x1c8] sm:$0xff] }
 0x674   :  { %2553 = vmatpush1.bf16.msra.mxu0 %v7591_v22  ;;  %2594 = vmatpush1.bf16.msra.mxu1 %v7592_v32 }
 0x675   :  { %2625 = vmatprep.subr.bf16.mxu0 %v7593_v63  ;;  %2666 = vmatprep.subr.bf16.mxu1 %v7594_v26 }
 0x6f7   :  { %v2350_v10 = vpop.f32.mrf.mxu0  ;;  %v2391_v51 = vpop.f32.mrf.mxu1 }
 0x6f8   :  { %v2398_v52 = vadd.f32 %v2350_v10, %v12452_v35  ;;  %v2400_v45 = vadd.f32 %v2391_v51, %v12454_v43 }
 0x6f9   :  { %v2352_v53 = vpop.f32.mrf.mxu0  ;;  %v2393_v55 = vpop.f32.mrf.mxu1 }
 0x6fa   :  { %v6397_v49 = vmul.f32 -1.442695, %v2398_v52  ;;  %v2399_v27 = vadd.f32 %v2352_v53, %v12453_v4  ;;  %v6399_v48 = vmul.f32 -1.442695, %v2400_v45  ;;  %v2401_v13 = vadd.f32 %v2393_v55, %v12455_v5  ;;  %v7596_v55 = vld [vmem:[%s11967_s2 + $0x1e8] ss:$16 sps:$4 sm:$0xff]  }
 0x6fb   :  { %v2354_v3 = vpop.f32.mrf.mxu0  ;;  %v2395_v54 = vpop.f32.mrf.mxu1  ;;  %v7598_v4 = vld [vmem:[%s11967_s2 + $0x1cc] ss:$16 sps:$4 sm:$0xff]  }
 0x6fc   :  { %7177 = vpow2.f32 %v6397_v49  ;;  %v6398_v18 = vmul.f32 -1.442695, %v2399_v27  ;;  %v7597_v49 = vld [vmem:[%s11967_s2 + $0x1c4] ss:$16 sps:$4 sm:$0xff]   ;;  %v7599_v3 = vld [vmem:[%s11967_s2 + $0x1c0] ss:$16 sps:$4 sm:$0xff]  }
 0x6fd   :  { %v2355_v42 = vpop.f32.mrf.mxu0  ;;  %v2396_v11 = vpop.f32.mrf.mxu1  ;;  %v7600_v54 = vld [vmem:[%s11967_s2 + $0x1c8] ss:$16 sps:$4 sm:$0xff]  }
 0x6fe   :  { %7179 = vpow2.f32 %v6398_v18  ;;  %v7601_v42 = vld [vmem:[%s11967_s2 + $0x1a4] ss:$16 sps:$4 sm:$0xff]   ;;  %v7602_v11 = vld [vmem:[%s11967_s2 + $0x1ac] ss:$16 sps:$4 sm:$0xff]  }
 0x6ff   :  { %7181 = vpow2.f32 %v6399_v48 }
 0x700   :  { %7183 = vtanh.f32 %v2401_v13  ;;  %v7603_v13 = vld [vmem:[%s11967_s2 + $0x1a0] ss:$16 sps:$4 sm:$0xff]  }
 0x709   :  { %v7178_v28 = vpop.eup %7177 }
 0x70a   :  { %v2498_v14 = vadd.f32 1.0, %v7178_v28  ;;  %v7604_v28 = vld [vmem:[%s11967_s2 + $0x1a8] ss:$16 sps:$4 sm:$0xff]  }
 0x70b   :  { %v7180_v41 = vpop.eup %7179 }
 0x70c   :  { %7185 = vrcp.f32 %v2498_v14  ;;  %v2499_v44 = vadd.f32 1.0, %v7180_v41  ;;  %v7182_v37 = vpop.eup %7181  ;;  %v7605_v41 = vld [vmem:[%s11967_s2 + $0x184] ss:$16 sps:$4 sm:$0xff]  }
 0x70d   :  { %v7184_v8 = vpop.eup %7183  ;;  %v2500_v12 = vadd.f32 1.0, %v7182_v37 }
 0x70e   :  { %7187 = vrcp.f32 %v2499_v44  ;;  %v7606_v44 = vld [vmem:[%s11967_s2 + $0x18c] ss:$16 sps:$4 sm:$0xff]  }
 0x717   :  { %v2437_v6 = vpop.f32.mrf.mxu0  ;;  %v2478_v47 = vpop.f32.mrf.mxu1 }
 0x718   :  { %v2485_v40 = vadd.f32 %v2437_v6, %v12457_v15  ;;  %v2487_v33 = vadd.f32 %v2478_v47, %v12458_v29  ;;  %v7607_v6 = vld [vmem:[%s11967_s2 + $0x180] ss:$16 sps:$4 sm:$0xff]   ;;  %v7609_v47 = vld [vmem:[%s11967_s2 + $0x164] ss:$16 sps:$4 sm:$0xff]  }
 0x719   :  { %v7186_v30 = vpop.eup %7185  ;;  %v2439_v24 = vpop.f32.mrf.mxu0  ;;  %v7613_v15 = vld [vmem:[%s11967_s2 + $0x144] ss:$16 sps:$4 sm:$0xff]  }
 0x71a   :  { %v2480_v39 = vpop.f32.mrf.mxu1  ;;  %v2509_v16 = vmul.f32 %v7186_v30, %v7184_v8  ;;  %v6400_v34 = vmul.f32 -1.442695, %v2485_v40  ;;  %v2486_v25 = vadd.f32 %v2439_v24, %v495_v31  ;;  %v6402_v22 = vmul.f32 -1.442695, %v2487_v33  ;;  %v7610_v8 = vld [vmem:[%s11967_s2 + $0x16c] ss:$16 sps:$4 sm:$0xff]  }
 0x71b   :  { %v7188_v21 = vpop.eup %7187  ;;  %v2441_v7 = vpop.f32.mrf.mxu0  ;;  %v2488_v32 = vadd.f32 %v2480_v39, %v568_v58  ;;  %v7612_v31 = vld [vmem:[%s11967_s2 + $0x168] ss:$16 sps:$4 sm:$0xff]   ;;  %v7614_v40 = vld [vmem:[%s11967_s2 + $0x14c] ss:$16 sps:$4 sm:$0xff]   ;;  %v7615_v30 = vld [vmem:[%s11967_s2 + $0x140] ss:$16 sps:$4 sm:$0xff]  }
 0x71c   :  { %v2482_v20 = vpop.f32.mrf.mxu1  ;;  %v2508_v57 = vmul.f32 %v7188_v21, %v9414_v38  ;;  %7189 = vpow2.f32 %v6400_v34  ;;  %v6401_v56 = vmul.f32 -1.442695, %v2486_v25  ;;  %v7616_v24 = vld [vmem:[%s11967_s2 + $0x148] ss:$16 sps:$4 sm:$0xff]   ;;  %v7617_v39 = vld [vmem:[%s11967_s2 + $0x124] ss:$16 sps:$4 sm:$0xff]  }
 0x71d   :  { %v2442_v19 = vpop.f32.mrf.mxu0  ;;  %v7619_v34 = vld [vmem:[%s11967_s2 + $0x120] ss:$16 sps:$4 sm:$0xff]   ;;  %v7620_v25 = vld [vmem:[%s11967_s2 + $0x128] ss:$16 sps:$4 sm:$0xff]   ;;  %v7622_v7 = vld [vmem:[%s11967_s2 + $0x10c] ss:$16 sps:$4 sm:$0xff]  }
 0x71e   :  { %v2483_v2 = vpop.f32.mrf.mxu1  ;;  %v9575_v9 = vadd.f32 %v2509_v16, %v2508_v57  ;;  %7191 = vpow2.f32 %v6401_v56  ;;  %v7618_v16 = vld [vmem:[%s11967_s2 + $0x12c] ss:$16 sps:$4 sm:$0xff]   ;;  %v7623_v56 = vld [vmem:[%s11967_s2 + $0x100] ss:$16 sps:$4 sm:$0xff]   ;;  %v7624_v19 = vld [vmem:[%s11967_s2 + $0x108] ss:$16 sps:$4 sm:$0xff]  }
 0x71f   :  { %7193 = vrcp.f32 %v2500_v12  ;;  %v7621_v12 = vld [vmem:[%s11967_s2 + $0x104] ss:$16 sps:$4 sm:$0xff]  }
 0x720   :  { %7195 = vtanh.f32 %v9575_v9  ;;  %v2823_v29 = vld [vmem:[%s11969_s4 + $0x1c0] sm:$0xff] }
 0x721   :  { %7197 = vpow2.f32 %v6402_v22  ;;  %v2827_v33 = vld [vmem:[%s11969_s4 + $0x1e0] sm:$0xff]  ;;  %v2828_v22 = vld [vmem:[%s11969_s4 + $0x1e8] sm:$0xff] }
 0x722   :  { %7199 = vtanh.f32 %v2488_v32  ;;  %v6466_v58 = vcombine.high %v2823_v29, %v2827_v33  ;;  %v6465_v32 = vcombine.low %v2823_v29, %v2827_v33 }
 0x729   :  { %v7190_v63 = vpop.eup %7189 }
 0x72a   :  { %v2522_v26 = vadd.f32 1.0, %v7190_v63  ;;  %v6467_v63 = vcombine.low %v2824_v60, %v2828_v22 }
 0x72b   :  { %v7192_v38 = vpop.eup %7191 }
 0x72c   :  { %v7194_v10 = vpop.eup %7193  ;;  %7201 = vrcp.f32 %v2522_v26  ;;  %v2523_v51 = vadd.f32 1.0, %v7192_v38  ;;  %v6468_v26 = vcombine.high %v2824_v60, %v2828_v22  ;;  %v2815_v38 = vld [vmem:[%s11969_s4 + $0x180] sm:$0xff] }
 0x72d   :  { %v7196_v35 = vpop.eup %7195  ;;  %v2771_v22 = vld [vmem:[%s11969_s4 + $0x20] sm:$0xff] }
 0x72e   :  { %7203 = vrcp.f32 %v2523_v51  ;;  %v9581_v52 = vmul.f32 %v7196_v35, %v7194_v10  ;;  %v7198_v27 = vpop.eup %7197  ;;  %v2819_v10 = vld [vmem:[%s11969_s4 + $0x1a0] sm:$0xff]  ;;  %v2816_v51 = vld [vmem:[%s11969_s4 + $0x188] sm:$0xff] }
 0x72f   :  { %v7200_v18 = vpop.eup %7199  ;;  %v2524_v5 = vadd.f32 1.0, %v7198_v27  ;;  %v6458_v35 = vcombine.high %v2815_v38, %v2819_v10  ;;  %v2811_v27 = vld [vmem:[%s11969_s4 + $0x160] sm:$0xff] }
 0x730   :  { %v2537_v53 = vpack.c.bf16 %v9581_v52, %v9581_v52 }
 0x731   :  { %7205 = vrcp.f32 %v2524_v5  ;;  %v2800_v5 = vld [vmem:[%s11969_s4 + $0x108] sm:$0xff] }
 0x732   :  { %2571 = vmatmul.mubr.bf16.vlgmr.msra.gmra.mxu0 %v2537_v53  ;;  %2612 = vmatmul.mubr.bf16.vlgmr.msra.gmra.mxu1 %v2537_v53  ;;  %v2820_v53 = vld [vmem:[%s11969_s4 + $0x1a8] sm:$0xff] }
 0x733   :  { %2626 = vmatpush1.bf16.msra.mxu0 %v7595_v62  ;;  %2667 = vmatpush1.bf16.msra.mxu1 %v7596_v55  ;;  %v6457_v62 = vcombine.low %v2815_v38, %v2819_v10  ;;  %v6459_v55 = vcombine.low %v2816_v51, %v2820_v53 }
 0x734   :  { %2627 = vmatprep.subr.bf16.mxu0 %v7597_v49  ;;  %2668 = vmatprep.subr.bf16.mxu1 %v7598_v4  ;;  %v6460_v49 = vcombine.high %v2816_v51, %v2820_v53  ;;  %v2807_v4 = vld [vmem:[%s11969_s4 + $0x140] sm:$0xff] }
 0x735   :  { %2657 = vmatprep.mubr.bf16.mxu0 %v12214_v0  ;;  %2698 = vmatprep.mubr.bf16.mxu1 %v12214_v0  ;;  %v2891_v53 = vld [vmem:[%s11969_s4 + $0x3e0] sm:$0xff] }
 0x737   :  { %2628 = vmatpush1.bf16.msra.mxu0 %v7599_v3  ;;  %2669 = vmatpush1.bf16.msra.mxu1 %v7600_v54  ;;  %v2808_v3 = vld [vmem:[%s11969_s4 + $0x148] sm:$0xff]  ;;  %v6450_v54 = vcombine.high %v2807_v4, %v2811_v27 }
 0x738   :  { %2629 = vmatprep.subr.bf16.mxu0 %v7601_v42  ;;  %2670 = vmatprep.subr.bf16.mxu1 %v7602_v11  ;;  %v6449_v42 = vcombine.low %v2807_v4, %v2811_v27 }
 0x739   :  { %v7202_v43 = vpop.eup %7201 }
 0x73a   :  { %v2533_v45 = vmul.f32 %v7202_v43, %v7200_v18  ;;  %v2812_v18 = vld [vmem:[%s11969_s4 + $0x168] sm:$0xff] }
 0x73b   :  { %v7204_v48 = vpop.eup %7203  ;;  %2630 = vmatpush1.bf16.msra.mxu0 %v7603_v13  ;;  %2671 = vmatpush1.bf16.msra.mxu1 %v7604_v28  ;;  %v6451_v11 = vcombine.low %v2808_v3, %v2812_v18  ;;  %v6452_v43 = vcombine.high %v2808_v3, %v2812_v18  ;;  %v2804_v28 = vld [vmem:[%s11969_s4 + $0x128] sm:$0xff]  ;;  %v2883_v18 = vld [vmem:[%s11969_s4 + $0x3a0] sm:$0xff] }
 0x73c   :  { %v2532_v14 = vmul.f32 %v7204_v48, %v9438_v46  ;;  %2631 = vmatprep.subr.bf16.mxu0 %v7605_v41  ;;  %2672 = vmatprep.subr.bf16.mxu1 %v7606_v44  ;;  %v7608_v46 = vld [vmem:[%s11967_s2 + $0x188] ss:$16 sps:$4 sm:$0xff]   ;;  %v2803_v48 = vld [vmem:[%s11969_s4 + $0x120] sm:$0xff]  ;;  %v6443_v41 = vcombine.low %v2800_v5, %v2804_v28  ;;  %v6444_v44 = vcombine.high %v2800_v5, %v2804_v28 }
 0x73d   :  { %v2875_v28 = vld [vmem:[%s11969_s4 + $0x360] sm:$0xff] }
 0x73e   :  { %v9624_v37 = vadd.f32 %v2533_v45, %v2532_v14  ;;  %v7206_v21 = vpop.eup %7205  ;;  %v2799_v45 = vld [vmem:[%s11969_s4 + $0x100] sm:$0xff] }
 0x73f   :  { %2632 = vmatpush1.bf16.msra.mxu0 %v7607_v6  ;;  %2673 = vmatpush1.bf16.msra.mxu1 %v7608_v46  ;;  %v6442_v13 = vcombine.high %v2799_v45, %v2803_v48  ;;  %v6441_v14 = vcombine.low %v2799_v45, %v2803_v48  ;;  %v2791_v6 = vld [vmem:[%s11969_s4 + $0xc0] sm:$0xff] }
 0x740   :  { %7207 = vtanh.f32 %v9624_v37  ;;  %2633 = vmatprep.subr.bf16.mxu0 %v7609_v47  ;;  %2674 = vmatprep.subr.bf16.mxu1 %v7610_v8  ;;  %v2795_v46 = vld [vmem:[%s11969_s4 + $0xe0] sm:$0xff]  ;;  %v2792_v47 = vld [vmem:[%s11969_s4 + $0xc8] sm:$0xff] }
 0x741   :  { %v6434_v8 = vcombine.high %v2791_v6, %v2795_v46 }
 0x743   :  { %2634 = vmatpush1.bf16.msra.mxu0 %v7611_v23  ;;  %2675 = vmatpush1.bf16.msra.mxu1 %v7612_v31  ;;  %v2796_v23 = vld [vmem:[%s11969_s4 + $0xe8] sm:$0xff]  ;;  %v6433_v31 = vcombine.low %v2791_v6, %v2795_v46 }
 0x744   :  { %2635 = vmatprep.subr.bf16.mxu0 %v7613_v15  ;;  %2676 = vmatprep.subr.bf16.mxu1 %v7614_v40  ;;  %v6435_v15 = vcombine.low %v2792_v47, %v2796_v23  ;;  %v6436_v40 = vcombine.high %v2792_v47, %v2796_v23  ;;  %v2867_v23 = vld [vmem:[%s11969_s4 + $0x320] sm:$0xff] }
 0x747   :  { %2636 = vmatpush1.bf16.msra.mxu0 %v7615_v30  ;;  %2677 = vmatpush1.bf16.msra.mxu1 %v7616_v24  ;;  %v2783_v30 = vld [vmem:[%s11969_s4 + $0x80] sm:$0xff] }
 0x748   :  { %2637 = vmatprep.subr.bf16.mxu0 %v7617_v39  ;;  %2678 = vmatprep.subr.bf16.mxu1 %v7618_v16  ;;  %v2787_v24 = vld [vmem:[%s11969_s4 + $0xa0] sm:$0xff]  ;;  %v2784_v39 = vld [vmem:[%s11969_s4 + $0x88] sm:$0xff] }
 0x749   :  { %v6426_v16 = vcombine.high %v2783_v30, %v2787_v24 }
 0x74b   :  { %2638 = vmatpush1.bf16.msra.mxu0 %v7619_v34  ;;  %2679 = vmatpush1.bf16.msra.mxu1 %v7620_v25  ;;  %v2788_v34 = vld [vmem:[%s11969_s4 + $0xa8] sm:$0xff]  ;;  %v6425_v25 = vcombine.low %v2783_v30, %v2787_v24 }
 0x74c   :  { %2639 = vmatprep.subr.bf16.mxu0 %v7621_v12  ;;  %2680 = vmatprep.subr.bf16.mxu1 %v7622_v7  ;;  %v6428_v12 = vcombine.high %v2784_v39, %v2788_v34  ;;  %v2775_v7 = vld [vmem:[%s11969_s4 + $0x40] sm:$0xff] }
 0x74d   :  { %v7208_v20 = vpop.eup %7207 }
 0x74e   :  { %v9675_v57 = vmul.f32 %v7208_v20, %v7206_v21  ;;  %v6427_v21 = vcombine.low %v2784_v39, %v2788_v34  ;;  %v2779_v20 = vld [vmem:[%s11969_s4 + $0x60] sm:$0xff] }
 0x74f   :  { %2640 = vmatpush1.bf16.msra.mxu0 %v7623_v56  ;;  %2681 = vmatpush1.bf16.msra.mxu1 %v7624_v19  ;;  %v2776_v56 = vld [vmem:[%s11969_s4 + $0x48] sm:$0xff]  ;;  %v6418_v19 = vcombine.high %v2775_v7, %v2779_v20  ;;  %v6417_v29 = vcombine.low %v2775_v7, %v2779_v20  ;;  %v2859_v34 = vld [vmem:[%s11969_s4 + $0x2e0] sm:$0xff] }
 0x750   :  { %v2624_v2 = vpack.c.bf16 %v9675_v57, %v9675_v57  ;;  %3577 = vmatprep.subr.bf16.mxu0 %v6466_v58  ;;  %3650 = vmatprep.subr.bf16.mxu1 %v6468_v26  ;;  %v2767_v58 = vld [vmem:[%s11969_s4] sm:$0xff]  ;;  %v2772_v26 = vld [vmem:[%s11969_s4 + $0x28] sm:$0xff] }
 0x751   :  { %v6409_v38 = vcombine.low %v2767_v58, %v2771_v22  ;;  %v2847_v7 = vld [vmem:[%s11969_s4 + $0x280] sm:$0xff] }
 0x752   :  { %2658 = vmatmul.mubr.bf16.vlgmr.msra.gmra.mxu0 %v2624_v2  ;;  %2699 = vmatmul.mubr.bf16.vlgmr.msra.gmra.mxu1 %v2624_v2  ;;  %v2780_v2 = vld [vmem:[%s11969_s4 + $0x68] sm:$0xff]  ;;  %v2851_v20 = vld [vmem:[%s11969_s4 + $0x2a0] sm:$0xff] }
 0x753   :  { %3578 = vmatpush1.bf16.msra.mxu0 %v6465_v32  ;;  %3651 = vmatpush1.bf16.msra.mxu1 %v6467_v63  ;;  %v6419_v33 = vcombine.low %v2776_v56, %v2780_v2  ;;  %v6420_v60 = vcombine.high %v2776_v56, %v2780_v2  ;;  %v2768_v32 = vld [vmem:[%s11969_s4 + $0x8] sm:$0xff]  ;;  %v6410_v63 = vcombine.high %v2767_v58, %v2771_v22  ;;  %v2839_v22 = vld [vmem:[%s11969_s4 + $0x240] sm:$0xff] }
 0x754   :  { %3579 = vmatprep.subr.bf16.mxu0 %v6458_v35  ;;  %3652 = vmatprep.subr.bf16.mxu1 %v6460_v49  ;;  %v6411_v10 = vcombine.low %v2768_v32, %v2772_v26  ;;  %v6412_v51 = vcombine.high %v2768_v32, %v2772_v26  ;;  %v2887_v35 = vld [vmem:[%s11969_s4 + $0x3c0] sm:$0xff]  ;;  %v2892_v49 = vld [vmem:[%s11969_s4 + $0x3e8] sm:$0xff] }
 0x755   :  { %v6529_v4 = vcombine.low %v2887_v35, %v2891_v53  ;;  %v2848_v2 = vld [vmem:[%s11969_s4 + $0x288] sm:$0xff]  ;;  %v2843_v32 = vld [vmem:[%s11969_s4 + $0x260] sm:$0xff] }
 0x756   :  { %v2844_v26 = vld [vmem:[%s11969_s4 + $0x268] sm:$0xff] }
 0x757   :  { %3580 = vmatpush1.bf16.msra.mxu0 %v6457_v62  ;;  %3653 = vmatpush1.bf16.msra.mxu1 %v6459_v55  ;;  %v2888_v62 = vld [vmem:[%s11969_s4 + $0x3c8] sm:$0xff]  ;;  %v6530_v55 = vcombine.high %v2887_v35, %v2891_v53  ;;  %v2831_v53 = vld [vmem:[%s11969_s4 + $0x200] sm:$0xff] }
 0x758   :  { %3581 = vmatprep.subr.bf16.mxu0 %v6450_v54  ;;  %3654 = vmatprep.subr.bf16.mxu1 %v6452_v43  ;;  %v6531_v27 = vcombine.low %v2888_v62, %v2892_v49  ;;  %v6532_v3 = vcombine.high %v2888_v62, %v2892_v49  ;;  %v2879_v54 = vld [vmem:[%s11969_s4 + $0x380] sm:$0xff]  ;;  %v2884_v43 = vld [vmem:[%s11969_s4 + $0x3a8] sm:$0xff] }
 0x759   :  { %v6521_v45 = vcombine.low %v2879_v54, %v2883_v18  ;;  %v2835_v62 = vld [vmem:[%s11969_s4 + $0x220] sm:$0xff]  ;;  %v2836_v49 = vld [vmem:[%s11969_s4 + $0x228] sm:$0xff] }
 0x75b   :  { %3582 = vmatpush1.bf16.msra.mxu0 %v6449_v42  ;;  %3655 = vmatpush1.bf16.msra.mxu1 %v6451_v11  ;;  %v2880_v42 = vld [vmem:[%s11969_s4 + $0x388] sm:$0xff]  ;;  %v6522_v11 = vcombine.high %v2879_v54, %v2883_v18  ;;  %v6473_v18 = vcombine.low %v2831_v53, %v2835_v62 }
 0x75c   :  { %3583 = vmatprep.subr.bf16.mxu0 %v6442_v13  ;;  %3656 = vmatprep.subr.bf16.mxu1 %v6444_v44  ;;  %v6523_v48 = vcombine.low %v2880_v42, %v2884_v43  ;;  %v6524_v5 = vcombine.high %v2880_v42, %v2884_v43  ;;  %v2871_v13 = vld [vmem:[%s11969_s4 + $0x340] sm:$0xff]  ;;  %v2876_v44 = vld [vmem:[%s11969_s4 + $0x368] sm:$0xff]  ;;  %v9885_v43 = vld [vmem:[%s11969_s4 + $0x1f0] sm:$0xff] }
 0x75d   :  { %v6513_v6 = vcombine.low %v2871_v13, %v2875_v28 }
 0x75f   :  { %3584 = vmatpush1.bf16.msra.mxu0 %v6441_v14  ;;  %3657 = vmatpush1.bf16.msra.mxu1 %v6443_v41  ;;  %v2872_v14 = vld [vmem:[%s11969_s4 + $0x348] sm:$0xff]  ;;  %v6514_v41 = vcombine.high %v2871_v13, %v2875_v28  ;;  %v9899_v13 = vld [vmem:[%s11969_s4 + $0x1f8] sm:$0xff] }
 0x760   :  { %3585 = vmatprep.subr.bf16.mxu0 %v6434_v8  ;;  %3658 = vmatprep.subr.bf16.mxu1 %v6436_v40  ;;  %v6515_v46 = vcombine.low %v2872_v14, %v2876_v44  ;;  %v6516_v47 = vcombine.high %v2872_v14, %v2876_v44  ;;  %v2863_v8 = vld [vmem:[%s11969_s4 + $0x300] sm:$0xff]  ;;  %v2868_v40 = vld [vmem:[%s11969_s4 + $0x328] sm:$0xff] }
 0x761   :  { %v6505_v30 = vcombine.low %v2863_v8, %v2867_v23 }
 0x763   :  { %3586 = vmatpush1.bf16.msra.mxu0 %v6433_v31  ;;  %3659 = vmatpush1.bf16.msra.mxu1 %v6435_v15  ;;  %v2864_v31 = vld [vmem:[%s11969_s4 + $0x308] sm:$0xff]  ;;  %v6506_v15 = vcombine.high %v2863_v8, %v2867_v23  ;;  %v12462_v23 = vld [vmem:[#allocation60_spill] sm:$0xff] }
 0x764   :  { %3587 = vmatprep.subr.bf16.mxu0 %v6426_v16  ;;  %3660 = vmatprep.subr.bf16.mxu1 %v6428_v12  ;;  %v6507_v24 = vcombine.low %v2864_v31, %v2868_v40  ;;  %v6508_v39 = vcombine.high %v2864_v31, %v2868_v40  ;;  %v2855_v16 = vld [vmem:[%s11969_s4 + $0x2c0] sm:$0xff]  ;;  %v2860_v12 = vld [vmem:[%s11969_s4 + $0x2e8] sm:$0xff] }
 0x765   :  { %v6497_v56 = vcombine.low %v2855_v16, %v2859_v34 }
 0x767   :  { %3588 = vmatpush1.bf16.msra.mxu0 %v6425_v25  ;;  %3661 = vmatpush1.bf16.msra.mxu1 %v6427_v21  ;;  %v2856_v25 = vld [vmem:[%s11969_s4 + $0x2c8] sm:$0xff]  ;;  %v6498_v21 = vcombine.high %v2855_v16, %v2859_v34 }
 0x768   :  { %3589 = vmatprep.subr.bf16.mxu0 %v6418_v19  ;;  %3662 = vmatprep.subr.bf16.mxu1 %v6420_v60  ;;  %v6500_v19 = vcombine.high %v2856_v25, %v2860_v12  ;;  %v6490_v60 = vcombine.high %v2847_v7, %v2851_v20 }
 0x76b   :  { %3590 = vmatpush1.bf16.msra.mxu0 %v6417_v29  ;;  %3663 = vmatpush1.bf16.msra.mxu1 %v6419_v33  ;;  %v2852_v29 = vld [vmem:[%s11969_s4 + $0x2a8] sm:$0xff]  ;;  %v6499_v33 = vcombine.low %v2856_v25, %v2860_v12 }
 0x76c   :  { %3591 = vmatprep.subr.bf16.mxu0 %v6410_v63  ;;  %3664 = vmatprep.subr.bf16.mxu1 %v6412_v51  ;;  %v6492_v58 = vcombine.high %v2848_v2, %v2852_v29  ;;  %v2840_v63 = vld [vmem:[%s11969_s4 + $0x248] sm:$0xff]  ;;  %v6482_v51 = vcombine.high %v2839_v22, %v2843_v32 }
 0x76d   :  { %v6484_v35 = vcombine.high %v2840_v63, %v2844_v26 }
 0x76f   :  { %3592 = vmatpush1.bf16.msra.mxu0 %v6409_v38  ;;  %3665 = vmatpush1.bf16.msra.mxu1 %v6411_v10  ;;  %v6489_v38 = vcombine.low %v2847_v7, %v2851_v20  ;;  %v6491_v10 = vcombine.low %v2848_v2, %v2852_v29 }
 0x770   :  { %3593 = vmatprep.subr.bf16.mxu0 %v6530_v55  ;;  %3666 = vmatprep.subr.bf16.mxu1 %v6532_v3  ;;  %v2832_v55 = vld [vmem:[%s11969_s4 + $0x208] sm:$0xff]  ;;  %v6474_v3 = vcombine.high %v2831_v53, %v2835_v62 }
 0x771   :  { %v6476_v54 = vcombine.high %v2832_v55, %v2836_v49  ;;  %v6475_v42 = vcombine.low %v2832_v55, %v2836_v49 }
 0x773   :  { %3594 = vmatpush2.bf16.msra.mxu0 %v6529_v4  ;;  %3667 = vmatpush2.bf16.msra.mxu1 %v6531_v27  ;;  %v6481_v4 = vcombine.low %v2839_v22, %v2843_v32  ;;  %v6483_v27 = vcombine.low %v2840_v63, %v2844_v26  ;;  %v12464_v22 = vld [vmem:[#allocation66_spill] sm:$0xff] }
 0x774   :  { %3595 = vmatprep.subr.bf16.mxu0 %v6522_v11  ;;  %3668 = vmatprep.subr.bf16.mxu1 %v6524_v5  ;;  %v9880_v11 = vld [vmem:[%s11969_s4 + $0x1d0] sm:$0xff] }
 0x775   :  { %v6470_v5 = vcombine.high %v9880_v11, %v9885_v43 }
 0x777   :  { %3596 = vmatpush2.bf16.msra.mxu0 %v6521_v45  ;;  %3669 = vmatpush2.bf16.msra.mxu1 %v6523_v48  ;;  %v9890_v45 = vld [vmem:[%s11969_s4 + $0x1d8] sm:$0xff]  ;;  %v6469_v48 = vcombine.low %v9880_v11, %v9885_v43 }
 0x778   :  { %3597 = vmatprep.subr.bf16.mxu0 %v6514_v41  ;;  %3670 = vmatprep.subr.bf16.mxu1 %v6516_v47  ;;  %v6471_v28 = vcombine.low %v9890_v45, %v9899_v13  ;;  %v6472_v14 = vcombine.high %v9890_v45, %v9899_v13  ;;  %v12461_v47 = vld [vmem:[#allocation63_spill] sm:$0xff]  ;;  %v2802_v11 = vld [vmem:[%s11969_s4 + $0x118] sm:$0xff] }
 0x779   :  { %v452_v8 = vadd.f32 %v12461_v47, %v12446_v61  ;;  %v2806_v43 = vld [vmem:[%s11969_s4 + $0x138] sm:$0xff]  ;;  %v12470_v13 = vld [vmem:[#allocation31_spill] sm:$0xff] }
 0x77b   :  { %3598 = vmatpush2.bf16.msra.mxu0 %v6513_v6  ;;  %3671 = vmatpush2.bf16.msra.mxu1 %v6515_v46  ;;  %v12460_v6 = vld [vmem:[#allocation62_spill] sm:$0xff] }
 0x77c   :  { %3599 = vmatprep.subr.bf16.mxu0 %v6506_v15  ;;  %3672 = vmatprep.subr.bf16.mxu1 %v6508_v39  ;;  %v379_v46 = vadd.f32 %v12460_v6, %v12442_v50  ;;  %v12463_v15 = vld [vmem:[#allocation61_spill] sm:$0xff] }
 0x77f   :  { %3600 = vmatpush2.bf16.msra.mxu0 %v6505_v30  ;;  %3673 = vmatpush2.bf16.msra.mxu1 %v6507_v24 }
 0x780   :  { %3601 = vmatprep.subr.bf16.mxu0 %v6498_v21  ;;  %3674 = vmatprep.subr.bf16.mxu1 %v6500_v19 }
 0x783   :  { %3602 = vmatpush2.bf16.msra.mxu0 %v6497_v56  ;;  %3675 = vmatpush2.bf16.msra.mxu1 %v6499_v33 }
 0x784   :  { %3603 = vmatprep.subr.bf16.mxu0 %v6490_v60  ;;  %3676 = vmatprep.subr.bf16.mxu1 %v6492_v58 }
 0x787   :  { %3604 = vmatpush2.bf16.msra.mxu0 %v6489_v38  ;;  %3677 = vmatpush2.bf16.msra.mxu1 %v6491_v10 }
 0x788   :  { %3605 = vmatprep.subr.bf16.mxu0 %v6482_v51  ;;  %3678 = vmatprep.subr.bf16.mxu1 %v6484_v35  ;;  %v12465_v35 = vld [vmem:[#allocation68_spill] sm:$0xff] }
 0x78b   :  { %3606 = vmatpush2.bf16.msra.mxu0 %v6481_v4  ;;  %3679 = vmatpush2.bf16.msra.mxu1 %v6483_v27 }
 0x78c   :  { %3607 = vmatprep.subr.bf16.mxu0 %v6474_v3  ;;  %3680 = vmatprep.subr.bf16.mxu1 %v6476_v54 }
 0x78f   :  { %3608 = vmatpush2.bf16.msra.mxu0 %v6473_v18  ;;  %3681 = vmatpush2.bf16.msra.mxu1 %v6475_v42 }
 0x790   :  { %3723 = vmatprep.subr.bf16.mxu0 %v6470_v5  ;;  %3796 = vmatprep.subr.bf16.mxu1 %v6472_v14  ;;  %v12466_v5 = vld [vmem:[#allocation67_spill] sm:$0xff] }
 0x7f2   :  { %v2572_v41 = vpop.f32.mrf.mxu0  ;;  %v2613_v44 = vpop.f32.mrf.mxu1 }
 0x7f3   :  { %v2620_v31 = vadd.f32 %v2572_v41, %v12462_v23  ;;  %v2622_v40 = vadd.f32 %v2613_v44, %v12463_v15  ;;  %v12467_v44 = vld [vmem:[#allocation69_spill] sm:$0xff] }
 0x7f4   :  { %v2574_v30 = vpop.f32.mrf.mxu0  ;;  %v2615_v24 = vpop.f32.mrf.mxu1 }
 0x7f5   :  { %v6403_v39 = vmul.f32 -1.442695, %v2620_v31  ;;  %v2621_v16 = vadd.f32 %v2574_v30, %v379_v46  ;;  %v2623_v34 = vadd.f32 %v2615_v24, %v452_v8  ;;  %v6405_v50 = vmul.f32 -1.442695, %v2622_v40 }
 0x7f6   :  { %v2576_v25 = vpop.f32.mrf.mxu0  ;;  %v2617_v21 = vpop.f32.mrf.mxu1 }
 0x7f7   :  { %7209 = vpow2.f32 %v6403_v39  ;;  %v6404_v12 = vmul.f32 -1.442695, %v2621_v16 }
 0x7f8   :  { %v2577_v7 = vpop.f32.mrf.mxu0  ;;  %v2618_v20 = vpop.f32.mrf.mxu1 }
 0x7f9   :  { %7211 = vpow2.f32 %v6404_v12 }
 0x7fa   :  { %7213 = vpow2.f32 %v6405_v50  ;;  %v2817_v50 = vld [vmem:[%s11969_s4 + $0x190] sm:$0xff] }
 0x7fb   :  { %7215 = vtanh.f32 %v2623_v34 }
 0x804   :  { %v7210_v56 = vpop.eup %7209 }
 0x805   :  { %v2720_v19 = vadd.f32 1.0, %v7210_v56  ;;  %v2821_v56 = vld [vmem:[%s11969_s4 + $0x1b0] sm:$0xff] }
 0x806   :  { %v7212_v61 = vpop.eup %7211 }
 0x807   :  { %7217 = vrcp.f32 %v2720_v19  ;;  %v2721_v2 = vadd.f32 1.0, %v7212_v61  ;;  %v7214_v29 = vpop.eup %7213  ;;  %v2818_v19 = vld [vmem:[%s11969_s4 + $0x198] sm:$0xff] }
 0x808   :  { %v7216_v58 = vpop.eup %7215  ;;  %v2722_v55 = vadd.f32 1.0, %v7214_v29  ;;  %v12469_v29 = vld [vmem:[#allocation2_spill] sm:$0xff] }
 0x809   :  { %7219 = vrcp.f32 %v2721_v2  ;;  %v12468_v2 = vld [vmem:[#allocation94_spill] sm:$0xff] }
 0x812   :  { %v2659_v33 = vpop.f32.mrf.mxu0  ;;  %v2700_v60 = vpop.f32.mrf.mxu1 }
 0x813   :  { %v2707_v32 = vadd.f32 %v2659_v33, %v12464_v22  ;;  %v2709_v14 = vadd.f32 %v2700_v60, %v12466_v5  ;;  %v9936_v33 = vpack.c.bf16 %v12469_v29, %v12468_v2  ;;  %v2809_v60 = vld [vmem:[%s11969_s4 + $0x150] sm:$0xff] }
 0x814   :  { %v7218_v63 = vpop.eup %7217  ;;  %v2661_v26 = vpop.f32.mrf.mxu0 }
 0x815   :  { %v2702_v38 = vpop.f32.mrf.mxu1  ;;  %v2731_v10 = vmul.f32 %v7218_v63, %v7216_v58  ;;  %v6406_v51 = vmul.f32 -1.442695, %v2707_v32  ;;  %v2708_v53 = vadd.f32 %v2661_v26, %v12465_v35  ;;  %v6408_v41 = vmul.f32 -1.442695, %v2709_v14  ;;  %v2813_v32 = vld [vmem:[%s11969_s4 + $0x170] sm:$0xff]  ;;  %v2814_v63 = vld [vmem:[%s11969_s4 + $0x178] sm:$0xff] }
 0x816   :  { %v7220_v62 = vpop.eup %7219  ;;  %v2663_v49 = vpop.f32.mrf.mxu0  ;;  %v2710_v6 = vadd.f32 %v2702_v38, %v12467_v44  ;;  %v6462_v58 = vcombine.high %v2817_v50, %v2821_v56  ;;  %v9956_v26 = vpack.c.bf16 %v9363_v1, %v9457_v36  ;;  %v6461_v38 = vcombine.low %v2817_v50, %v2821_v56  ;;  %v2801_v1 = vld [vmem:[%s11969_s4 + $0x110] sm:$0xff] }
 0x817   :  { %v2704_v4 = vpop.f32.mrf.mxu1  ;;  %v2730_v27 = vmul.f32 %v7220_v62, %v9575_v9  ;;  %7221 = vpow2.f32 %v6406_v51  ;;  %v6407_v3 = vmul.f32 -1.442695, %v2708_v53  ;;  %v6454_v51 = vcombine.high %v2809_v60, %v2813_v32  ;;  %v2805_v36 = vld [vmem:[%s11969_s4 + $0x130] sm:$0xff] }
 0x818   :  { %v2664_v54 = vpop.f32.mrf.mxu0  ;;  %v6453_v45 = vcombine.low %v2809_v60, %v2813_v32  ;;  %v2793_v62 = vld [vmem:[%s11969_s4 + $0xd0] sm:$0xff]  ;;  %v6448_v49 = vcombine.high %v2802_v11, %v2806_v43  ;;  %v6445_v5 = vcombine.low %v2801_v1, %v2805_v36  ;;  %v6447_v14 = vcombine.low %v2802_v11, %v2806_v43 }
 0x819   :  { %v2705_v18 = vpop.f32.mrf.mxu1  ;;  %v2732_v42 = vadd.f32 %v2731_v10, %v2730_v27  ;;  %7223 = vpow2.f32 %v6407_v3  ;;  %v2797_v4 = vld [vmem:[%s11969_s4 + $0xf0] sm:$0xff]  ;;  %v2794_v27 = vld [vmem:[%s11969_s4 + $0xd8] sm:$0xff]  ;;  %v12472_v54 = vld [vmem:[#allocation43_spill] sm:$0xff] }
 0x81a   :  { %7225 = vrcp.f32 %v2722_v55  ;;  %v6446_v55 = vcombine.high %v2801_v1, %v2805_v36  ;;  %v2798_v3 = vld [vmem:[%s11969_s4 + $0xf8] sm:$0xff]  ;;  %v12473_v18 = vld [vmem:[#allocation42_spill] sm:$0xff]  ;;  %v2769_v50 = vld [vmem:[%s11969_s4 + $0x10] sm:$0xff] }
 0x81b   :  { %7227 = vtanh.f32 %v2732_v42  ;;  %v9998_v42 = vpack.c.bf16 %v12473_v18, %v12472_v54  ;;  %v6440_v44 = vcombine.high %v2794_v27, %v2798_v3  ;;  %v2773_v56 = vld [vmem:[%s11969_s4 + $0x30] sm:$0xff]  ;;  %v2882_v36 = vld [vmem:[%s11969_s4 + $0x398] sm:$0xff] }
 0x81c   :  { %7229 = vpow2.f32 %v6408_v41  ;;  %v6438_v41 = vcombine.high %v2793_v62, %v2797_v4  ;;  %v2885_v1 = vld [vmem:[%s11969_s4 + $0x3b0] sm:$0xff] }
 0x81d   :  { %7231 = vtanh.f32 %v2710_v6  ;;  %v2785_v6 = vld [vmem:[%s11969_s4 + $0x90] sm:$0xff] }
 0x81e   :  { %v2865_v54 = vld [vmem:[%s11969_s4 + $0x310] sm:$0xff] }
 0x81f   :  { %v2869_v18 = vld [vmem:[%s11969_s4 + $0x330] sm:$0xff] }
 0x824   :  { %v7222_v46 = vpop.eup %7221 }
 0x825   :  { %v2744_v47 = vadd.f32 1.0, %v7222_v46  ;;  %v2789_v46 = vld [vmem:[%s11969_s4 + $0xb0] sm:$0xff] }
 0x826   :  { %v7224_v8 = vpop.eup %7223 }
 0x827   :  { %v7226_v23 = vpop.eup %7225  ;;  %7233 = vrcp.f32 %v2744_v47  ;;  %v2745_v9 = vadd.f32 1.0, %v7224_v8  ;;  %v2786_v47 = vld [vmem:[%s11969_s4 + $0x98] sm:$0xff] }
 0x828   :  { %v7228_v31 = vpop.eup %7227  ;;  %v2790_v8 = vld [vmem:[%s11969_s4 + $0xb8] sm:$0xff] }
 0x829   :  { %7235 = vrcp.f32 %v2745_v9  ;;  %v9916_v15 = vmul.f32 %v7228_v31, %v7226_v23  ;;  %v7230_v40 = vpop.eup %7229  ;;  %v6437_v23 = vcombine.low %v2793_v62, %v2797_v4  ;;  %v6439_v9 = vcombine.low %v2794_v27, %v2798_v3  ;;  %v2874_v62 = vld [vmem:[%s11969_s4 + $0x358] sm:$0xff] }
 0x82a   :  { %v7232_v30 = vpop.eup %7231  ;;  %v2746_v34 = vadd.f32 1.0, %v7230_v40  ;;  %v10016_v31 = vpack.c.bf16 %v9419_v17, %v9325_v59  ;;  %v2777_v40 = vld [vmem:[%s11969_s4 + $0x50] sm:$0xff]  ;;  %v12474_v59 = vld [vmem:[#allocation3_spill] sm:$0xff] }
 0x82b   :  { %v12475_v17 = vld [vmem:[#allocation32_spill] sm:$0xff]  ;;  %v10052_v60 = vpack.c.bf16 %v9916_v15, %v9581_v52  ;;  %v6413_v52 = vcombine.low %v2769_v50, %v2773_v56 }
 0x82c   :  { %7237 = vrcp.f32 %v2746_v34  ;;  %v2782_v34 = vld [vmem:[%s11969_s4 + $0x78] sm:$0xff] }
 0x834   :  { %v7234_v24 = vpop.eup %7233 }
 0x835   :  { %v2755_v39 = vmul.f32 %v7234_v24, %v7232_v30  ;;  %v6430_v30 = vcombine.high %v2785_v6, %v2789_v46  ;;  %v6432_v24 = vcombine.high %v2786_v47, %v2790_v8 }
 0x836   :  { %v7236_v16 = vpop.eup %7235 }
 0x837   :  { %v2754_v25 = vmul.f32 %v7236_v16, %v9624_v37  ;;  %v2822_v37 = vld [vmem:[%s11969_s4 + $0x1b8] sm:$0xff] }
 0x838   :  { %v6464_v22 = vcombine.high %v2818_v19, %v2822_v37  ;;  %v6463_v10 = vcombine.low %v2818_v19, %v2822_v37  ;;  %v2778_v16 = vld [vmem:[%s11969_s4 + $0x58] sm:$0xff] }
 0x839   :  { %v2756_v21 = vadd.f32 %v2755_v39, %v2754_v25  ;;  %v7238_v12 = vpop.eup %7237  ;;  %v2781_v39 = vld [vmem:[%s11969_s4 + $0x70] sm:$0xff]  ;;  %v10034_v25 = vpack.c.bf16 %v12475_v17, %v12474_v59  ;;  %v2770_v19 = vld [vmem:[%s11969_s4 + $0x18] sm:$0xff]  ;;  %v6423_v29 = vcombine.low %v2778_v16, %v2782_v34 }
 0x83a   :  { %v2774_v37 = vld [vmem:[%s11969_s4 + $0x38] sm:$0xff]  ;;  %v6421_v2 = vcombine.low %v2777_v40, %v2781_v39 }
 0x83b   :  { %7239 = vtanh.f32 %v2756_v21  ;;  %v6429_v21 = vcombine.low %v2785_v6, %v2789_v46  ;;  %v6416_v32 = vcombine.high %v2770_v19, %v2774_v37  ;;  %v6415_v15 = vcombine.low %v2770_v19, %v2774_v37  ;;  %v2850_v59 = vld [vmem:[%s11969_s4 + $0x298] sm:$0xff] }
 0x83c   :  { %v6510_v6 = vcombine.high %v2865_v54, %v2869_v18  ;;  %v2854_v17 = vld [vmem:[%s11969_s4 + $0x2b8] sm:$0xff] }
 0x83d   :  { %v2842_v19 = vld [vmem:[%s11969_s4 + $0x258] sm:$0xff] }
 0x83e   :  { %v2846_v37 = vld [vmem:[%s11969_s4 + $0x278] sm:$0xff] }
 0x848   :  { %v7240_v7 = vpop.eup %7239 }
 0x849   :  { %v2758_v20 = vmul.f32 %v7240_v7, %v7238_v12  ;;  %v6431_v12 = vcombine.low %v2786_v47, %v2790_v8  ;;  %v6422_v7 = vcombine.high %v2777_v40, %v2781_v39  ;;  %v2857_v47 = vld [vmem:[%s11969_s4 + $0x2d0] sm:$0xff]  ;;  %v6509_v40 = vcombine.low %v2865_v54, %v2869_v18  ;;  %v10276_v18 = vld [vmem:[%s11970_s5 + $0x68] ss:$16 sps:$4 sm:$0xff]  }
 0x84a   :  { %v2861_v8 = vld [vmem:[%s11969_s4 + $0x2f0] sm:$0xff]  ;;  %12492 = vst [vmem:[#allocation90_spill] sm:$0xff] %v10276_v18 }
 0x84b   :  { %v9932_v61 = vpack.c.bf16 %v9675_v57, %v2758_v20  ;;  %v2810_v57 = vld [vmem:[%s11969_s4 + $0x158] sm:$0xff]  ;;  %v6424_v20 = vcombine.high %v2778_v16, %v2782_v34  ;;  %v2849_v16 = vld [vmem:[%s11969_s4 + $0x290] sm:$0xff] }
 0x84c   :  { %v6456_v35 = vcombine.high %v2810_v57, %v2814_v63  ;;  %v2853_v34 = vld [vmem:[%s11969_s4 + $0x2b0] sm:$0xff] }
 0x84d   :  { %3609 = vmatprep.mubr.bf16.mxu0 %v9932_v61  ;;  %3682 = vmatprep.mubr.bf16.mxu1 %v9932_v61  ;;  %v10271_v54 = vld [vmem:[%s11970_s5 + $0x60] ss:$16 sps:$4 sm:$0xff]  }
 0x84e   :  { %3610 = vmatmul.mubr.bf16.vlgmr.msra.gmra.mxu0 %v9936_v33  ;;  %3683 = vmatmul.mubr.bf16.vlgmr.msra.gmra.mxu1 %v9936_v33  ;;  %12491 = vst [vmem:[#allocation37_spill] sm:$0xff] %v10271_v54 }
 0x84f   :  { %3724 = vmatpush1.bf16.msra.mxu0 %v6469_v48  ;;  %3797 = vmatpush1.bf16.msra.mxu1 %v6471_v28  ;;  %v6455_v48 = vcombine.low %v2810_v57, %v2814_v63  ;;  %v12471_v28 = vld [vmem:[#allocation41_spill] sm:$0xff]  ;;  %v2893_v57 = vld [vmem:[%s11969_s4 + $0x3f0] sm:$0xff] }
 0x850   :  { %3619 = vmatprep.mubr.bf16.mxu0 %v9956_v26  ;;  %3692 = vmatprep.mubr.bf16.mxu1 %v9956_v26  ;;  %v9980_v53 = vpack.c.bf16 %v12471_v28, %v12470_v13  ;;  %v2890_v63 = vld [vmem:[%s11969_s4 + $0x3d8] sm:$0xff]  ;;  %v2873_v13 = vld [vmem:[%s11969_s4 + $0x350] sm:$0xff] }
 0x851   :  { %3725 = vmatprep.subr.bf16.mxu0 %v6462_v58  ;;  %3798 = vmatprep.subr.bf16.mxu1 %v6464_v22  ;;  %v2889_v58 = vld [vmem:[%s11969_s4 + $0x3d0] sm:$0xff]  ;;  %v6414_v22 = vcombine.high %v2769_v50, %v2773_v56 }
 0x852   :  { %v6533_v11 = vcombine.low %v2889_v58, %v2893_v57  ;;  %v2877_v28 = vld [vmem:[%s11969_s4 + $0x370] sm:$0xff] }
 0x853   :  { %3726 = vmatpush1.bf16.msra.mxu0 %v6461_v38  ;;  %3799 = vmatpush1.bf16.msra.mxu1 %v6463_v10  ;;  %v2894_v38 = vld [vmem:[%s11969_s4 + $0x3f8] sm:$0xff]  ;;  %v6534_v10 = vcombine.high %v2889_v58, %v2893_v57  ;;  %v6518_v27 = vcombine.high %v2873_v13, %v2877_v28  ;;  %v2841_v50 = vld [vmem:[%s11969_s4 + $0x250] sm:$0xff] }
 0x854   :  { %3727 = vmatprep.subr.bf16.mxu0 %v6454_v51  ;;  %3800 = vmatprep.subr.bf16.mxu1 %v6456_v35  ;;  %v6536_v51 = vcombine.high %v2890_v63, %v2894_v38  ;;  %v2881_v35 = vld [vmem:[%s11969_s4 + $0x390] sm:$0xff]  ;;  %v6535_v43 = vcombine.low %v2890_v63, %v2894_v38  ;;  %v2834_v63 = vld [vmem:[%s11969_s4 + $0x218] sm:$0xff] }
 0x855   :  { %v2845_v56 = vld [vmem:[%s11969_s4 + $0x270] sm:$0xff]  ;;  %v2838_v38 = vld [vmem:[%s11969_s4 + $0x238] sm:$0xff] }
 0x856   :  { %3620 = vmatmul.mubr.bf16.gmra.mxu0 %v9980_v53  ;;  %3693 = vmatmul.mubr.bf16.gmra.mxu1 %v9980_v53  ;;  %v6486_v58 = vcombine.high %v2841_v50, %v2845_v56  ;;  %v2837_v57 = vld [vmem:[%s11969_s4 + $0x230] sm:$0xff] }
 0x857   :  { %3728 = vmatpush1.bf16.msra.mxu0 %v6453_v45  ;;  %3801 = vmatpush1.bf16.msra.mxu1 %v6455_v48  ;;  %v6526_v45 = vcombine.high %v2881_v35, %v2885_v1 }
 0x858   :  { %3629 = vmatprep.mubr.bf16.mxu0 %v9998_v42  ;;  %3702 = vmatprep.mubr.bf16.mxu1 %v9998_v42 }
 0x859   :  { %3729 = vmatprep.subr.bf16.mxu0 %v6446_v55  ;;  %3802 = vmatprep.subr.bf16.mxu1 %v6448_v49  ;;  %v2878_v55 = vld [vmem:[%s11969_s4 + $0x378] sm:$0xff]  ;;  %v6525_v49 = vcombine.low %v2881_v35, %v2885_v1  ;;  %v6479_v1 = vcombine.low %v2834_v63, %v2838_v38 }
 0x85a   :  { %v6520_v3 = vcombine.high %v2874_v62, %v2878_v55 }
 0x85b   :  { %3730 = vmatpush1.bf16.msra.mxu0 %v6445_v5  ;;  %3803 = vmatpush1.bf16.msra.mxu1 %v6447_v14  ;;  %v2866_v5 = vld [vmem:[%s11969_s4 + $0x318] sm:$0xff] }
 0x85c   :  { %3731 = vmatprep.subr.bf16.mxu0 %v6438_v41  ;;  %3804 = vmatprep.subr.bf16.mxu1 %v6440_v44  ;;  %v2870_v14 = vld [vmem:[%s11969_s4 + $0x338] sm:$0xff]  ;;  %v6517_v41 = vcombine.low %v2873_v13, %v2877_v28  ;;  %v6519_v44 = vcombine.low %v2874_v62, %v2878_v55  ;;  %v10195_v13 = vld [vmem:[%s11970_s5 + $0xc0] ss:$16 sps:$4 sm:$0xff]  }
 0x85d   :  { %v6512_v46 = vcombine.high %v2866_v5, %v2870_v14  ;;  %12479 = vst [vmem:[#allocation89_spill] sm:$0xff] %v10195_v13  ;;  %v10200_v28 = vld [vmem:[%s11970_s5 + $0xc8] ss:$16 sps:$4 sm:$0xff]   ;;  %v10219_v62 = vld [vmem:[%s11970_s5 + $0xa0] ss:$16 sps:$4 sm:$0xff]  }
 0x85e   :  { %3630 = vmatmul.mubr.bf16.gmra.mxu0 %v10016_v31  ;;  %3703 = vmatmul.mubr.bf16.gmra.mxu1 %v10016_v31  ;;  %12480 = vst [vmem:[#allocation46_spill] sm:$0xff] %v10200_v28  ;;  %12483 = vst [vmem:[#allocation47_spill] sm:$0xff] %v10219_v62  ;;  %v10224_v55 = vld [vmem:[%s11970_s5 + $0xa8] ss:$16 sps:$4 sm:$0xff]  }
 0x85f   :  { %3732 = vmatpush1.bf16.msra.mxu0 %v6437_v23  ;;  %3805 = vmatpush1.bf16.msra.mxu1 %v6439_v9  ;;  %v2858_v23 = vld [vmem:[%s11969_s4 + $0x2d8] sm:$0xff]  ;;  %12484 = vst [vmem:[#allocation82_spill] sm:$0xff] %v10224_v55 }
 0x860   :  { %3639 = vmatprep.mubr.bf16.mxu0 %v10034_v25  ;;  %3712 = vmatprep.mubr.bf16.mxu1 %v10034_v25  ;;  %v2862_v9 = vld [vmem:[%s11969_s4 + $0x2f8] sm:$0xff] }
 0x861   :  { %3733 = vmatprep.subr.bf16.mxu0 %v6430_v30  ;;  %3806 = vmatprep.subr.bf16.mxu1 %v6432_v24  ;;  %v6511_v30 = vcombine.low %v2866_v5, %v2870_v14  ;;  %v6502_v24 = vcombine.high %v2857_v47, %v2861_v8  ;;  %v6504_v39 = vcombine.high %v2858_v23, %v2862_v9  ;;  %v10283_v5 = vld [vmem:[%s11970_s5 + $0x44] ss:$16 sps:$4 sm:$0xff]   ;;  %v10288_v14 = vld [vmem:[%s11970_s5 + $0x4c] ss:$16 sps:$4 sm:$0xff]  }
 0x862   :  { %12493 = vst [vmem:[#allocation92_spill] sm:$0xff] %v10283_v5  ;;  %12494 = vst [vmem:[#allocation91_spill] sm:$0xff] %v10288_v14 }
 0x863   :  { %3734 = vmatpush1.bf16.msra.mxu0 %v6429_v21  ;;  %3807 = vmatpush1.bf16.msra.mxu1 %v6431_v12  ;;  %v6501_v21 = vcombine.low %v2857_v47, %v2861_v8  ;;  %v6503_v12 = vcombine.low %v2858_v23, %v2862_v9  ;;  %v10335_v47 = vld [vmem:[%s11970_s5 + $0x4] ss:$16 sps:$4 sm:$0xff]   ;;  %v10340_v8 = vld [vmem:[%s11970_s5 + $0xc] ss:$16 sps:$4 sm:$0xff]   ;;  %v10351_v23 = vld [vmem:[%s11970_s5] ss:$16 sps:$4 sm:$0xff]  }
 0x864   :  { %3735 = vmatprep.subr.bf16.mxu0 %v6422_v7  ;;  %3808 = vmatprep.subr.bf16.mxu1 %v6424_v20  ;;  %v6494_v7 = vcombine.high %v2849_v16, %v2853_v34  ;;  %v6496_v20 = vcombine.high %v2850_v59, %v2854_v17  ;;  %12501 = vst [vmem:[#allocation64_spill] sm:$0xff] %v10335_v47  ;;  %12502 = vst [vmem:[#allocation80_spill] sm:$0xff] %v10340_v8  ;;  %v10356_v9 = vld [vmem:[%s11970_s5 + $0x8] ss:$16 sps:$4 sm:$0xff]  }
 0x865   :  { %12503 = vst [vmem:[#allocation78_spill] sm:$0xff] %v10351_v23  ;;  %12504 = vst [vmem:[#allocation79_spill] sm:$0xff] %v10356_v9 }
 0x866   :  { %3640 = vmatmul.mubr.bf16.gmra.mxu0 %v10052_v60  ;;  %3713 = vmatmul.mubr.bf16.gmra.mxu1 %v10052_v60 }
 0x867   :  { %3736 = vmatpush1.bf16.msra.mxu0 %v6421_v2  ;;  %3809 = vmatpush1.bf16.msra.mxu1 %v6423_v29  ;;  %v6493_v2 = vcombine.low %v2849_v16, %v2853_v34  ;;  %v6495_v29 = vcombine.low %v2850_v59, %v2854_v17  ;;  %v10392_v16 = vld [vmem:[%s11970_s5 + $0x1cc] ss:$16 sps:$4 sm:$0xff]   ;;  %v10401_v34 = vld [vmem:[%s11970_s5 + $0x1c0] ss:$16 sps:$4 sm:$0xff]   ;;  %v10406_v59 = vld [vmem:[%s11970_s5 + $0x1c8] ss:$16 sps:$4 sm:$0xff]  }
 0x868   :  { %3755 = vmatprep.mubr.bf16.mxu0 %v9932_v61  ;;  %3828 = vmatprep.mubr.bf16.mxu1 %v9932_v61  ;;  %v2886_v61 = vld [vmem:[%s11969_s4 + $0x3b8] sm:$0xff]  ;;  %v10413_v17 = vld [vmem:[%s11970_s5 + $0x1a4] ss:$16 sps:$4 sm:$0xff]  }
 0x869   :  { %3737 = vmatprep.subr.bf16.mxu0 %v6414_v22  ;;  %3810 = vmatprep.subr.bf16.mxu1 %v6416_v32  ;;  %v6528_v48 = vcombine.high %v2882_v36, %v2886_v61  ;;  %v6527_v4 = vcombine.low %v2882_v36, %v2886_v61  ;;  %v6488_v22 = vcombine.high %v2842_v19, %v2846_v37  ;;  %v2833_v32 = vld [vmem:[%s11969_s4 + $0x210] sm:$0xff]  ;;  %v10162_v61 = vld [vmem:[%s11970_s5 + $0xec] ss:$16 sps:$4 sm:$0xff]  }
 0x86a   :  { %v6477_v35 = vcombine.low %v2833_v32, %v2837_v57  ;;  %v10157_v36 = vld [vmem:[%s11970_s5 + $0xe4] ss:$16 sps:$4 sm:$0xff]  }
 0x86b   :  { %3738 = vmatpush1.bf16.msra.mxu0 %v6413_v52  ;;  %3811 = vmatpush1.bf16.msra.mxu1 %v6415_v15  ;;  %v6485_v52 = vcombine.low %v2841_v50, %v2845_v56  ;;  %v6487_v15 = vcombine.low %v2842_v19, %v2846_v37  ;;  %v10444_v50 = vld [vmem:[%s11970_s5 + $0x18c] ss:$16 sps:$4 sm:$0xff]   ;;  %v10451_v56 = vld [vmem:[%s11970_s5 + $0x180] ss:$16 sps:$4 sm:$0xff]   ;;  %v10456_v19 = vld [vmem:[%s11970_s5 + $0x188] ss:$16 sps:$4 sm:$0xff]  }
 0x86c   :  { %3739 = vmatprep.subr.bf16.mxu0 %v6534_v10  ;;  %3812 = vmatprep.subr.bf16.mxu1 %v6536_v51  ;;  %v6478_v10 = vcombine.high %v2833_v32, %v2837_v57  ;;  %v6480_v51 = vcombine.high %v2834_v63, %v2838_v38  ;;  %v10463_v37 = vld [vmem:[%s11970_s5 + $0x164] ss:$16 sps:$4 sm:$0xff]   ;;  %v10492_v32 = vld [vmem:[%s11970_s5 + $0x14c] ss:$16 sps:$4 sm:$0xff]   ;;  %v10499_v57 = vld [vmem:[%s11970_s5 + $0x140] ss:$16 sps:$4 sm:$0xff]  }
 0x86d   :  { %v10504_v63 = vld [vmem:[%s11970_s5 + $0x148] ss:$16 sps:$4 sm:$0xff]   ;;  %v10511_v38 = vld [vmem:[%s11970_s5 + $0x124] ss:$16 sps:$4 sm:$0xff]  }
 0x86f   :  { %3740 = vmatpush2.bf16.msra.mxu0 %v6533_v11  ;;  %3813 = vmatpush2.bf16.msra.mxu1 %v6535_v43  ;;  %v10169_v11 = vld [vmem:[%s11970_s5 + $0xe0] ss:$16 sps:$4 sm:$0xff]   ;;  %v10174_v43 = vld [vmem:[%s11970_s5 + $0xe8] ss:$16 sps:$4 sm:$0xff]  }
 0x870   :  { %3741 = vmatprep.subr.bf16.mxu0 %v6526_v45  ;;  %3814 = vmatprep.subr.bf16.mxu1 %v6528_v48  ;;  %12476 = vst [vmem:[#allocation88_spill] sm:$0xff] %v10174_v43  ;;  %v10179_v45 = vld [vmem:[%s11970_s5 + $0xc4] ss:$16 sps:$4 sm:$0xff]   ;;  %v10184_v48 = vld [vmem:[%s11970_s5 + $0xcc] ss:$16 sps:$4 sm:$0xff]  }
 0x871   :  { %12477 = vst [vmem:[#allocation86_spill] sm:$0xff] %v10179_v45  ;;  %12478 = vst [vmem:[#allocation87_spill] sm:$0xff] %v10184_v48 }
 0x873   :  { %3742 = vmatpush2.bf16.msra.mxu0 %v6525_v49  ;;  %3815 = vmatpush2.bf16.msra.mxu1 %v6527_v4  ;;  %v10231_v49 = vld [vmem:[%s11970_s5 + $0x84] ss:$16 sps:$4 sm:$0xff]   ;;  %v10236_v4 = vld [vmem:[%s11970_s5 + $0x8c] ss:$16 sps:$4 sm:$0xff]  }
 0x874   :  { %3743 = vmatprep.subr.bf16.mxu0 %v6518_v27  ;;  %3816 = vmatprep.subr.bf16.mxu1 %v6520_v3  ;;  %12485 = vst [vmem:[#allocation84_spill] sm:$0xff] %v10231_v49  ;;  %12486 = vst [vmem:[#allocation83_spill] sm:$0xff] %v10236_v4  ;;  %v10247_v27 = vld [vmem:[%s11970_s5 + $0x80] ss:$16 sps:$4 sm:$0xff]   ;;  %v10252_v3 = vld [vmem:[%s11970_s5 + $0x88] ss:$16 sps:$4 sm:$0xff]  }
 0x875   :  { %12487 = vst [vmem:[#allocation85_spill] sm:$0xff] %v10247_v27  ;;  %12488 = vst [vmem:[#allocation36_spill] sm:$0xff] %v10252_v3 }
 0x877   :  { %3744 = vmatpush2.bf16.msra.mxu0 %v6517_v41  ;;  %3817 = vmatpush2.bf16.msra.mxu1 %v6519_v44  ;;  %v10299_v41 = vld [vmem:[%s11970_s5 + $0x40] ss:$16 sps:$4 sm:$0xff]   ;;  %v10304_v44 = vld [vmem:[%s11970_s5 + $0x48] ss:$16 sps:$4 sm:$0xff]  }
 0x878   :  { %3745 = vmatprep.subr.bf16.mxu0 %v6510_v6  ;;  %3818 = vmatprep.subr.bf16.mxu1 %v6512_v46  ;;  %12495 = vst [vmem:[#allocation93_spill] sm:$0xff] %v10299_v41  ;;  %12496 = vst [vmem:[#allocation39_spill] sm:$0xff] %v10304_v44  ;;  %v10323_v6 = vld [vmem:[%s11970_s5 + $0x20] ss:$16 sps:$4 sm:$0xff]   ;;  %v10328_v46 = vld [vmem:[%s11970_s5 + $0x28] ss:$16 sps:$4 sm:$0xff]  }
 0x879   :  { %12499 = vst [vmem:[#allocation49_spill] sm:$0xff] %v10323_v6  ;;  %12500 = vst [vmem:[#allocation51_spill] sm:$0xff] %v10328_v46 }
 0x87b   :  { %3746 = vmatpush2.bf16.msra.mxu0 %v6509_v40  ;;  %3819 = vmatpush2.bf16.msra.mxu1 %v6511_v30  ;;  %v10368_v40 = vld [vmem:[%s11970_s5 + $0x1ec] ss:$16 sps:$4 sm:$0xff]   ;;  %v10375_v30 = vld [vmem:[%s11970_s5 + $0x1e0] ss:$16 sps:$4 sm:$0xff]  }
 0x87c   :  { %3747 = vmatprep.subr.bf16.mxu0 %v6502_v24  ;;  %3820 = vmatprep.subr.bf16.mxu1 %v6504_v39  ;;  %12506 = vst [vmem:[#allocation81_spill] sm:$0xff] %v10368_v40  ;;  %v10380_v24 = vld [vmem:[%s11970_s5 + $0x1e8] ss:$16 sps:$4 sm:$0xff]   ;;  %v10387_v39 = vld [vmem:[%s11970_s5 + $0x1c4] ss:$16 sps:$4 sm:$0xff]  }
 0x87f   :  { %3748 = vmatpush2.bf16.msra.mxu0 %v6501_v21  ;;  %3821 = vmatpush2.bf16.msra.mxu1 %v6503_v12  ;;  %v10418_v21 = vld [vmem:[%s11970_s5 + $0x1ac] ss:$16 sps:$4 sm:$0xff]   ;;  %v10427_v12 = vld [vmem:[%s11970_s5 + $0x1a0] ss:$16 sps:$4 sm:$0xff]  }
 0x880   :  { %3749 = vmatprep.subr.bf16.mxu0 %v6494_v7  ;;  %3822 = vmatprep.subr.bf16.mxu1 %v6496_v20  ;;  %v10432_v7 = vld [vmem:[%s11970_s5 + $0x1a8] ss:$16 sps:$4 sm:$0xff]   ;;  %v10439_v20 = vld [vmem:[%s11970_s5 + $0x184] ss:$16 sps:$4 sm:$0xff]  }
 0x883   :  { %3750 = vmatpush2.bf16.msra.mxu0 %v6493_v2  ;;  %3823 = vmatpush2.bf16.msra.mxu1 %v6495_v29  ;;  %v10468_v2 = vld [vmem:[%s11970_s5 + $0x16c] ss:$16 sps:$4 sm:$0xff]   ;;  %v10475_v29 = vld [vmem:[%s11970_s5 + $0x160] ss:$16 sps:$4 sm:$0xff]  }
 0x884   :  { %3751 = vmatprep.subr.bf16.mxu0 %v6486_v58  ;;  %3824 = vmatprep.subr.bf16.mxu1 %v6488_v22  ;;  %v10480_v58 = vld [vmem:[%s11970_s5 + $0x168] ss:$16 sps:$4 sm:$0xff]   ;;  %v10487_v22 = vld [vmem:[%s11970_s5 + $0x144] ss:$16 sps:$4 sm:$0xff]  }
 0x887   :  { %3752 = vmatpush2.bf16.msra.mxu0 %v6485_v52  ;;  %3825 = vmatpush2.bf16.msra.mxu1 %v6487_v15  ;;  %v10516_v52 = vld [vmem:[%s11970_s5 + $0x12c] ss:$16 sps:$4 sm:$0xff]   ;;  %v10523_v15 = vld [vmem:[%s11970_s5 + $0x120] ss:$16 sps:$4 sm:$0xff]  }
 0x888   :  { %3753 = vmatprep.subr.bf16.mxu0 %v6478_v10  ;;  %3826 = vmatprep.subr.bf16.mxu1 %v6480_v51  ;;  %12507 = vst [vmem:[#allocation4_spill] sm:$0xff] %v10516_v52  ;;  %v10528_v10 = vld [vmem:[%s11970_s5 + $0x128] ss:$16 sps:$4 sm:$0xff]   ;;  %v10535_v51 = vld [vmem:[%s11970_s5 + $0x104] ss:$16 sps:$4 sm:$0xff]  }
 0x88b   :  { %3754 = vmatpush2.bf16.msra.mxu0 %v6477_v35  ;;  %3827 = vmatpush2.bf16.msra.mxu1 %v6479_v1  ;;  %v10540_v35 = vld [vmem:[%s11970_s5 + $0x10c] ss:$16 sps:$4 sm:$0xff]   ;;  %v10547_v1 = vld [vmem:[%s11970_s5 + $0x100] ss:$16 sps:$4 sm:$0xff]  }
 0x88c   :  { %4094 = vmatprep.subr.bf16.mxu0 %v10157_v36  ;;  %4135 = vmatprep.subr.bf16.mxu1 %v10162_v61 }
 0x88e   :  { %3756 = vmatmul.mubr.bf16.vlgmr.msra.gmra.mxu0 %v9936_v33  ;;  %3829 = vmatmul.mubr.bf16.vlgmr.msra.gmra.mxu1 %v9936_v33  ;;  %v10207_v33 = vld [vmem:[%s11970_s5 + $0xa4] ss:$16 sps:$4 sm:$0xff]  }
 0x88f   :  { %3765 = vmatprep.mubr.bf16.mxu0 %v9956_v26  ;;  %3838 = vmatprep.mubr.bf16.mxu1 %v9956_v26  ;;  %12481 = vst [vmem:[#allocation44_spill] sm:$0xff] %v10207_v33  ;;  %v10212_v26 = vld [vmem:[%s11970_s5 + $0xac] ss:$16 sps:$4 sm:$0xff]  }
 0x890   :  { %4095 = vmatpush1.bf16.msra.mxu0 %v10169_v11  ;;  %4136 = vmatpush1.bf16.msra.mxu1 %v10174_v43  ;;  %12482 = vst [vmem:[#allocation45_spill] sm:$0xff] %v10212_v26 }
 0x891   :  { %4096 = vmatprep.subr.bf16.mxu0 %v10179_v45  ;;  %4137 = vmatprep.subr.bf16.mxu1 %v10184_v48 }
 0x894   :  { %4097 = vmatpush1.bf16.msra.mxu0 %v10195_v13  ;;  %4138 = vmatpush1.bf16.msra.mxu1 %v10200_v28 }
 0x895   :  { %4098 = vmatprep.subr.bf16.mxu0 %v10207_v33  ;;  %4139 = vmatprep.subr.bf16.mxu1 %v10212_v26 }
 0x896   :  { %3766 = vmatmul.mubr.bf16.gmra.mxu0 %v9980_v53  ;;  %3839 = vmatmul.mubr.bf16.gmra.mxu1 %v9980_v53  ;;  %v10259_v53 = vld [vmem:[%s11970_s5 + $0x64] ss:$16 sps:$4 sm:$0xff]  }
 0x897   :  { %3775 = vmatprep.mubr.bf16.mxu0 %v9998_v42  ;;  %3848 = vmatprep.mubr.bf16.mxu1 %v9998_v42  ;;  %12489 = vst [vmem:[#allocation34_spill] sm:$0xff] %v10259_v53  ;;  %v10264_v42 = vld [vmem:[%s11970_s5 + $0x6c] ss:$16 sps:$4 sm:$0xff]  }
 0x898   :  { %4099 = vmatpush1.bf16.msra.mxu0 %v10219_v62  ;;  %4140 = vmatpush1.bf16.msra.mxu1 %v10224_v55  ;;  %12490 = vst [vmem:[#allocation35_spill] sm:$0xff] %v10264_v42 }
 0x899   :  { %4100 = vmatprep.subr.bf16.mxu0 %v10231_v49  ;;  %4141 = vmatprep.subr.bf16.mxu1 %v10236_v4 }
 0x89c   :  { %4101 = vmatpush1.bf16.msra.mxu0 %v10247_v27  ;;  %4142 = vmatpush1.bf16.msra.mxu1 %v10252_v3 }
 0x89d   :  { %4102 = vmatprep.subr.bf16.mxu0 %v10259_v53  ;;  %4143 = vmatprep.subr.bf16.mxu1 %v10264_v42 }
 0x89e   :  { %3776 = vmatmul.mubr.bf16.gmra.mxu0 %v10016_v31  ;;  %3849 = vmatmul.mubr.bf16.gmra.mxu1 %v10016_v31  ;;  %v10311_v31 = vld [vmem:[%s11970_s5 + $0x24] ss:$16 sps:$4 sm:$0xff]  }
 0x89f   :  { %3785 = vmatprep.mubr.bf16.mxu0 %v10034_v25  ;;  %3858 = vmatprep.mubr.bf16.mxu1 %v10034_v25  ;;  %12497 = vst [vmem:[#allocation48_spill] sm:$0xff] %v10311_v31  ;;  %v10316_v25 = vld [vmem:[%s11970_s5 + $0x2c] ss:$16 sps:$4 sm:$0xff]  }
 0x8a0   :  { %4103 = vmatpush1.bf16.msra.mxu0 %v10271_v54  ;;  %4144 = vmatpush1.bf16.msra.mxu1 %v10276_v18  ;;  %12498 = vst [vmem:[#allocation50_spill] sm:$0xff] %v10316_v25 }
 0x8a1   :  { %4104 = vmatprep.subr.bf16.mxu0 %v10283_v5  ;;  %4145 = vmatprep.subr.bf16.mxu1 %v10288_v14 }
 0x8a4   :  { %4105 = vmatpush1.bf16.msra.mxu0 %v10299_v41  ;;  %4146 = vmatpush1.bf16.msra.mxu1 %v10304_v44 }
 0x8a5   :  { %4106 = vmatprep.subr.bf16.mxu0 %v10311_v31  ;;  %4147 = vmatprep.subr.bf16.mxu1 %v10316_v25 }
 0x8a6   :  { %3786 = vmatmul.mubr.bf16.gmra.mxu0 %v10052_v60  ;;  %3859 = vmatmul.mubr.bf16.gmra.mxu1 %v10052_v60  ;;  %v10363_v60 = vld [vmem:[%s11970_s5 + $0x1e4] ss:$16 sps:$4 sm:$0xff]  }
 0x8a7   :  { %4126 = vmatprep.mubr.bf16.mxu0 %v12214_v0  ;;  %4167 = vmatprep.mubr.bf16.mxu1 %v12214_v0  ;;  %12505 = vst [vmem:[#allocation65_spill] sm:$0xff] %v10363_v60 }
 0x8a8   :  { %4107 = vmatpush1.bf16.msra.mxu0 %v10323_v6  ;;  %4148 = vmatpush1.bf16.msra.mxu1 %v10328_v46 }
 0x8a9   :  { %4108 = vmatprep.subr.bf16.mxu0 %v10335_v47  ;;  %4149 = vmatprep.subr.bf16.mxu1 %v10340_v8 }
 0x8ac   :  { %4109 = vmatpush1.bf16.msra.mxu0 %v10351_v23  ;;  %4150 = vmatpush1.bf16.msra.mxu1 %v10356_v9 }
 0x8ad   :  { %4340 = vmatprep.subr.bf16.mxu0 %v10363_v60  ;;  %4381 = vmatprep.subr.bf16.mxu1 %v10368_v40 }
 0x8af   :  { %4127 = vmatmul.mubr.bf16.vlgmr.msra.gmra.mxu0 %v12214_v0  ;;  %4168 = vmatmul.mubr.bf16.vlgmr.msra.gmra.mxu1 %v12214_v0 }
 0x8b0   :  { %4341 = vmatpush1.bf16.msra.mxu0 %v10375_v30  ;;  %4382 = vmatpush1.bf16.msra.mxu1 %v10380_v24 }
 0x8b1   :  { %4342 = vmatprep.subr.bf16.mxu0 %v10387_v39  ;;  %4383 = vmatprep.subr.bf16.mxu1 %v10392_v16 }
 0x8b2   :  { %4372 = vmatprep.mubr.bf16.mxu0 %v12214_v0  ;;  %4413 = vmatprep.mubr.bf16.mxu1 %v12214_v0 }
 0x8b4   :  { %4343 = vmatpush1.bf16.msra.mxu0 %v10401_v34  ;;  %4384 = vmatpush1.bf16.msra.mxu1 %v10406_v59 }
 0x8b5   :  { %4344 = vmatprep.subr.bf16.mxu0 %v10413_v17  ;;  %4385 = vmatprep.subr.bf16.mxu1 %v10418_v21 }
 0x8b8   :  { %4345 = vmatpush1.bf16.msra.mxu0 %v10427_v12  ;;  %4386 = vmatpush1.bf16.msra.mxu1 %v10432_v7 }
 0x8b9   :  { %4346 = vmatprep.subr.bf16.mxu0 %v10439_v20  ;;  %4387 = vmatprep.subr.bf16.mxu1 %v10444_v50 }
 0x8bc   :  { %4347 = vmatpush1.bf16.msra.mxu0 %v10451_v56  ;;  %4388 = vmatpush1.bf16.msra.mxu1 %v10456_v19 }
 0x8bd   :  { %4348 = vmatprep.subr.bf16.mxu0 %v10463_v37  ;;  %4389 = vmatprep.subr.bf16.mxu1 %v10468_v2 }
 0x8c0   :  { %4349 = vmatpush1.bf16.msra.mxu0 %v10475_v29  ;;  %4390 = vmatpush1.bf16.msra.mxu1 %v10480_v58 }
 0x8c1   :  { %4350 = vmatprep.subr.bf16.mxu0 %v10487_v22  ;;  %4391 = vmatprep.subr.bf16.mxu1 %v10492_v32 }
 0x8c4   :  { %4351 = vmatpush1.bf16.msra.mxu0 %v10499_v57  ;;  %4392 = vmatpush1.bf16.msra.mxu1 %v10504_v63 }
 0x8c5   :  { %4352 = vmatprep.subr.bf16.mxu0 %v10511_v38  ;;  %4393 = vmatprep.subr.bf16.mxu1 %v10516_v52  ;;  %v10552_v52 = vld [vmem:[%s11970_s5 + $0x108] ss:$16 sps:$4 sm:$0xff]  }
 0x8c8   :  { %4353 = vmatpush1.bf16.msra.mxu0 %v10523_v15  ;;  %4394 = vmatpush1.bf16.msra.mxu1 %v10528_v10 }
 0x8c9   :  { %4354 = vmatprep.subr.bf16.mxu0 %v10535_v51  ;;  %4395 = vmatprep.subr.bf16.mxu1 %v10540_v35 }
 0x8cc   :  { %4355 = vmatpush1.bf16.msra.mxu0 %v10547_v1  ;;  %4396 = vmatpush1.bf16.msra.mxu1 %v10552_v52 }
 0x8cd   :  { %4475 = vmatprep.subr.bf16.mxu0 %v10157_v36  ;;  %4516 = vmatprep.subr.bf16.mxu1 %v10162_v61 }
 0x8cf   :  { %4373 = vmatmul.mubr.bf16.vlgmr.msra.gmra.mxu0 %v12214_v0  ;;  %4414 = vmatmul.mubr.bf16.vlgmr.msra.gmra.mxu1 %v12214_v0 }
 0x8d0   :  { %4476 = vmatpush1.bf16.msra.mxu0 %v10169_v11  ;;  %4517 = vmatpush1.bf16.msra.mxu1 %v10174_v43 }
 0x8d1   :  { %4477 = vmatprep.subr.bf16.mxu0 %v10179_v45  ;;  %4518 = vmatprep.subr.bf16.mxu1 %v10184_v48 }
 0x8d2   :  { %4507 = vmatprep.mubr.bf16.mxu0 %v12214_v0  ;;  %4548 = vmatprep.mubr.bf16.mxu1 %v12214_v0 }
 0x8d4   :  { %4478 = vmatpush1.bf16.msra.mxu0 %v10195_v13  ;;  %4519 = vmatpush1.bf16.msra.mxu1 %v10200_v28 }
 0x8d5   :  { %4479 = vmatprep.subr.bf16.mxu0 %v10207_v33  ;;  %4520 = vmatprep.subr.bf16.mxu1 %v10212_v26 }
 0x8d8   :  { %4480 = vmatpush1.bf16.msra.mxu0 %v10219_v62  ;;  %4521 = vmatpush1.bf16.msra.mxu1 %v10224_v55 }
 0x8d9   :  { %4481 = vmatprep.subr.bf16.mxu0 %v10231_v49  ;;  %4522 = vmatprep.subr.bf16.mxu1 %v10236_v4 }
 0x8dc   :  { %4482 = vmatpush1.bf16.msra.mxu0 %v10247_v27  ;;  %4523 = vmatpush1.bf16.msra.mxu1 %v10252_v3 }
 0x8dd   :  { %4483 = vmatprep.subr.bf16.mxu0 %v10259_v53  ;;  %4524 = vmatprep.subr.bf16.mxu1 %v10264_v42 }
 0x8e0   :  { %4484 = vmatpush1.bf16.msra.mxu0 %v10271_v54  ;;  %4525 = vmatpush1.bf16.msra.mxu1 %v10276_v18 }
 0x8e1   :  { %4485 = vmatprep.subr.bf16.mxu0 %v10283_v5  ;;  %4526 = vmatprep.subr.bf16.mxu1 %v10288_v14 }
 0x8e4   :  { %4486 = vmatpush1.bf16.msra.mxu0 %v10299_v41  ;;  %4527 = vmatpush1.bf16.msra.mxu1 %v10304_v44 }
 0x8e5   :  { %4487 = vmatprep.subr.bf16.mxu0 %v10311_v31  ;;  %4528 = vmatprep.subr.bf16.mxu1 %v10316_v25  ;;  %v10599_v25 = vld [vmem:[%s11971_s6] sm:$0xff] }
 0x8e8   :  { %4488 = vmatpush1.bf16.msra.mxu0 %v10323_v6  ;;  %4529 = vmatpush1.bf16.msra.mxu1 %v10328_v46 }
 0x8e9   :  { %4489 = vmatprep.subr.bf16.mxu0 %v10335_v47  ;;  %4530 = vmatprep.subr.bf16.mxu1 %v10340_v8 }
 0x8ec   :  { %4490 = vmatpush1.bf16.msra.mxu0 %v10351_v23  ;;  %4531 = vmatpush1.bf16.msra.mxu1 %v10356_v9  ;;  %v12508_v23 = vld [vmem:[#allocation33_spill] sm:$0xff] }
 0x8ed   :  { %4562 = vmatprep.subr.bf16.mxu0 %v10363_v60  ;;  %4603 = vmatprep.subr.bf16.mxu1 %v10368_v40  ;;  %v12509_v31 = vsub.s32 0, %v12508_v23  ;;  %v12510_v40 = vsub.s32 2, %v12508_v23  ;;  %v12511_v14 = vsub.s32 1, %v12508_v23  ;;  %v12512_v18 = vsub.s32 3, %v12508_v23 }
 0x8ef   :  { %v10612_v9 = vrot.slane %v10599_v25, %v12509_v31  ;;  %v10617_v60 = vrot.slane %v10599_v25, %v12510_v40  ;;  %v10622_v5 = vrot.slane %v10599_v25, %v12511_v14  ;;  %v10627_v54 = vrot.slane %v10599_v25, %v12512_v18 }
 0x90e   :  { %v10601_v6 = vpop.f32.mrf.mxu0  ;;  %v10603_v46 = vpop.f32.mrf.mxu1 }
 0x90f   :  { %v3612_v26 = vadd.f32 %v10601_v6, %v10612_v9  ;;  %v3685_v6 = vadd.f32 %v10603_v46, %v10617_v60 }
 0x910   :  { %v10605_v47 = vpop.f32.mrf.mxu0  ;;  %v10607_v8 = vpop.f32.mrf.mxu1 }
 0x911   :  { %v3687_v43 = vadd.f32 %v10607_v8, %v10627_v54 }
 0x912   :  { %v3615_v44 = vpop.f32.mrf.mxu0  ;;  %v3688_v41 = vpop.f32.mrf.mxu1 }
 0x913   :  { %v10630_v31 = vadd.f32 %v3615_v44, %v10612_v9  ;;  %v10633_v42 = vadd.f32 %v3688_v41, %v10617_v60 }
 0x914   :  { %v3617_v40 = vpop.f32.mrf.mxu0  ;;  %v3690_v53 = vpop.f32.mrf.mxu1 }
 0x915   :  { %12513 = vst [vmem:[#allocation5_spill] sm:$0xff] %v10630_v31  ;;  %12514 = vst [vmem:[#allocation6_spill] sm:$0xff] %v10633_v42  ;;  %v10636_v3 = vadd.f32 %v3617_v40, %v10622_v5  ;;  %v10639_v27 = vadd.f32 %v3690_v53, %v10627_v54 }
 0x916   :  { %v3621_v14 = vpop.f32.mrf.mxu0  ;;  %v3694_v4 = vpop.f32.mrf.mxu1 }
 0x917   :  { %12515 = vst [vmem:[#allocation7_spill] sm:$0xff] %v10636_v3  ;;  %12516 = vst [vmem:[#allocation8_spill] sm:$0xff] %v10639_v27  ;;  %v10642_v49 = vadd.f32 %v3621_v14, %v10612_v9  ;;  %v10645_v18 = vadd.f32 %v3694_v4, %v10617_v60 }
 0x918   :  { %v3623_v44 = vpop.f32.mrf.mxu0  ;;  %v3696_v31 = vpop.f32.mrf.mxu1 }
 0x919   :  { %12517 = vst [vmem:[#allocation9_spill] sm:$0xff] %v10642_v49  ;;  %12518 = vst [vmem:[#allocation10_spill] sm:$0xff] %v10645_v18  ;;  %v10648_v41 = vadd.f32 %v3623_v44, %v10622_v5  ;;  %v10651_v42 = vadd.f32 %v3696_v31, %v10627_v54 }
 0x91a   :  { %v3625_v40 = vpop.f32.mrf.mxu0  ;;  %v3698_v3 = vpop.f32.mrf.mxu1 }
 0x91b   :  { %12519 = vst [vmem:[#allocation11_spill] sm:$0xff] %v10648_v41  ;;  %12520 = vst [vmem:[#allocation12_spill] sm:$0xff] %v10651_v42  ;;  %v10654_v53 = vadd.f32 %v3625_v40, %v10612_v9  ;;  %v10657_v27 = vadd.f32 %v3698_v3, %v10617_v60 }
 0x91c   :  { %v3627_v14 = vpop.f32.mrf.mxu0  ;;  %v3700_v49 = vpop.f32.mrf.mxu1 }
 0x91d   :  { %12521 = vst [vmem:[#allocation13_spill] sm:$0xff] %v10654_v53  ;;  %12522 = vst [vmem:[#allocation14_spill] sm:$0xff] %v10657_v27  ;;  %v10660_v4 = vadd.f32 %v3627_v14, %v10622_v5  ;;  %v10663_v18 = vadd.f32 %v3700_v49, %v10627_v54 }
 0x91e   :  { %v3631_v44 = vpop.f32.mrf.mxu0  ;;  %v3704_v41 = vpop.f32.mrf.mxu1 }
 0x91f   :  { %12523 = vst [vmem:[#allocation15_spill] sm:$0xff] %v10660_v4  ;;  %12524 = vst [vmem:[#allocation16_spill] sm:$0xff] %v10663_v18  ;;  %v10666_v31 = vadd.f32 %v3631_v44, %v10612_v9  ;;  %v10669_v42 = vadd.f32 %v3704_v41, %v10617_v60 }
 0x920   :  { %v3633_v40 = vpop.f32.mrf.mxu0  ;;  %v3706_v53 = vpop.f32.mrf.mxu1 }
 0x921   :  { %12525 = vst [vmem:[#allocation17_spill] sm:$0xff] %v10666_v31  ;;  %12526 = vst [vmem:[#allocation18_spill] sm:$0xff] %v10669_v42  ;;  %v10672_v3 = vadd.f32 %v3633_v40, %v10622_v5  ;;  %v10675_v27 = vadd.f32 %v3706_v53, %v10627_v54 }
 0x922   :  { %v3635_v14 = vpop.f32.mrf.mxu0  ;;  %v3708_v4 = vpop.f32.mrf.mxu1 }
 0x923   :  { %12527 = vst [vmem:[#allocation19_spill] sm:$0xff] %v10672_v3  ;;  %12528 = vst [vmem:[#allocation20_spill] sm:$0xff] %v10675_v27  ;;  %v10678_v49 = vadd.f32 %v3635_v14, %v10612_v9  ;;  %v10681_v18 = vadd.f32 %v3708_v4, %v10617_v60 }
 0x924   :  { %v3637_v44 = vpop.f32.mrf.mxu0  ;;  %v3710_v31 = vpop.f32.mrf.mxu1 }
 0x925   :  { %12529 = vst [vmem:[#allocation21_spill] sm:$0xff] %v10678_v49  ;;  %12530 = vst [vmem:[#allocation22_spill] sm:$0xff] %v10681_v18  ;;  %v10684_v41 = vadd.f32 %v3637_v44, %v10622_v5  ;;  %v10687_v42 = vadd.f32 %v3710_v31, %v10627_v54 }
 0x926   :  { %v3641_v40 = vpop.f32.mrf.mxu0  ;;  %v3714_v3 = vpop.f32.mrf.mxu1 }
 0x927   :  { %12531 = vst [vmem:[#allocation23_spill] sm:$0xff] %v10684_v41  ;;  %12532 = vst [vmem:[#allocation24_spill] sm:$0xff] %v10687_v42  ;;  %v10690_v53 = vadd.f32 %v3641_v40, %v10612_v9  ;;  %v10693_v27 = vadd.f32 %v3714_v3, %v10617_v60 }
 0x928   :  { %v3643_v14 = vpop.f32.mrf.mxu0  ;;  %v3716_v49 = vpop.f32.mrf.mxu1 }
 0x929   :  { %12533 = vst [vmem:[#allocation25_spill] sm:$0xff] %v10690_v53  ;;  %12534 = vst [vmem:[#allocation26_spill] sm:$0xff] %v10693_v27  ;;  %v10696_v4 = vadd.f32 %v3643_v14, %v10622_v5  ;;  %v10699_v18 = vadd.f32 %v3716_v49, %v10627_v54  ;;  %v12541_v14 = vsub.s32 4, %v12508_v23 }
 0x92a   :  { %v3645_v44 = vpop.f32.mrf.mxu0  ;;  %v3718_v41 = vpop.f32.mrf.mxu1 }
 0x92b   :  { %12535 = vst [vmem:[#allocation27_spill] sm:$0xff] %v10696_v4  ;;  %12536 = vst [vmem:[#allocation28_spill] sm:$0xff] %v10699_v18  ;;  %v10702_v31 = vadd.f32 %v3645_v44, %v10612_v9  ;;  %v10705_v42 = vadd.f32 %v3718_v41, %v10617_v60  ;;  %v10716_v49 = vrot.slane %v10599_v25, %v12541_v14  ;;  %v12542_v18 = vsub.s32 6, %v12508_v23 }
 0x92c   :  { %v3647_v40 = vpop.f32.mrf.mxu0  ;;  %v3720_v53 = vpop.f32.mrf.mxu1  ;;  %v12543_v41 = vsub.s32 5, %v12508_v23 }
 0x92d   :  { %12537 = vst [vmem:[#allocation29_spill] sm:$0xff] %v10702_v31  ;;  %12538 = vst [vmem:[#allocation30_spill] sm:$0xff] %v10705_v42  ;;  %v10708_v3 = vadd.f32 %v3647_v40, %v10622_v5  ;;  %v10711_v27 = vadd.f32 %v3720_v53, %v10627_v54  ;;  %v10721_v44 = vrot.slane %v10599_v25, %v12542_v18  ;;  %v12544_v40 = vsub.s32 7, %v12508_v23 }
 0x92e   :  { %v10726_v42 = vrot.slane %v10599_v25, %v12543_v41 }
 0x92f   :  { %12539 = vst [vmem:[#allocation38_spill] sm:$0xff] %v10708_v3  ;;  %12540 = vst [vmem:[#allocation54_spill] sm:$0xff] %v10711_v27  ;;  %v10731_v53 = vrot.slane %v10599_v25, %v12544_v40 }
 0x94e   :  { %v3757_v27 = vpop.f32.mrf.mxu0  ;;  %v3830_v3 = vpop.f32.mrf.mxu1 }
 0x94f   :  { %v10734_v14 = vadd.f32 %v3757_v27, %v10716_v49  ;;  %v10737_v31 = vadd.f32 %v3830_v3, %v10721_v44 }
 0x950   :  { %v3759_v18 = vpop.f32.mrf.mxu0  ;;  %v3832_v4 = vpop.f32.mrf.mxu1 }
 0x951   :  { %12545 = vst [vmem:[#allocation52_spill] sm:$0xff] %v10734_v14  ;;  %12546 = vst [vmem:[#allocation53_spill] sm:$0xff] %v10737_v31  ;;  %v10740_v55 = vadd.f32 %v3759_v18, %v10726_v42  ;;  %v10743_v41 = vadd.f32 %v3832_v4, %v10731_v53 }
 0x952   :  { %v3761_v23 = vpop.f32.mrf.mxu0  ;;  %v3834_v62 = vpop.f32.mrf.mxu1 }
 0x953   :  { %12547 = vst [vmem:[#allocation40_spill] sm:$0xff] %v10740_v55  ;;  %12548 = vst [vmem:[#allocation55_spill] sm:$0xff] %v10743_v41  ;;  %v10746_v25 = vadd.f32 %v3761_v23, %v10716_v49  ;;  %v10749_v40 = vadd.f32 %v3834_v62, %v10721_v44 }
 0x954   :  { %v3763_v27 = vpop.f32.mrf.mxu0  ;;  %v3836_v14 = vpop.f32.mrf.mxu1 }
 0x955   :  { %12549 = vst [vmem:[#allocation74_spill] sm:$0xff] %v10746_v25  ;;  %12550 = vst [vmem:[#allocation76_spill] sm:$0xff] %v10749_v40  ;;  %v10752_v3 = vadd.f32 %v3763_v27, %v10726_v42  ;;  %v10755_v31 = vadd.f32 %v3836_v14, %v10731_v53 }
 0x956   :  { %v3767_v18 = vpop.f32.mrf.mxu0  ;;  %v3840_v55 = vpop.f32.mrf.mxu1 }
 0x957   :  { %12551 = vst [vmem:[#allocation75_spill] sm:$0xff] %v10752_v3  ;;  %12552 = vst [vmem:[#allocation77_spill] sm:$0xff] %v10755_v31  ;;  %v10758_v4 = vadd.f32 %v3767_v18, %v10716_v49  ;;  %v10761_v41 = vadd.f32 %v3840_v55, %v10721_v44 }
 0x958   :  { %v3769_v23 = vpop.f32.mrf.mxu0  ;;  %v3842_v25 = vpop.f32.mrf.mxu1 }
 0x959   :  { %12553 = vst [vmem:[#allocation56_spill] sm:$0xff] %v10758_v4  ;;  %12554 = vst [vmem:[#allocation58_spill] sm:$0xff] %v10761_v41  ;;  %v10764_v62 = vadd.f32 %v3769_v23, %v10726_v42  ;;  %v10767_v40 = vadd.f32 %v3842_v25, %v10731_v53 }
 0x95a   :  { %v3771_v27 = vpop.f32.mrf.mxu0  ;;  %v3844_v3 = vpop.f32.mrf.mxu1 }
 0x95b   :  { %12555 = vst [vmem:[#allocation57_spill] sm:$0xff] %v10764_v62  ;;  %12556 = vst [vmem:[#allocation59_spill] sm:$0xff] %v10767_v40  ;;  %v10770_v14 = vadd.f32 %v3771_v27, %v10716_v49  ;;  %v10773_v31 = vadd.f32 %v3844_v3, %v10721_v44 }
 0x95c   :  { %v3773_v18 = vpop.f32.mrf.mxu0  ;;  %v3846_v4 = vpop.f32.mrf.mxu1 }
 0x95d   :  { %12557 = vst [vmem:[#allocation72_spill] sm:$0xff] %v10770_v14  ;;  %12558 = vst [vmem:[#allocation70_spill] sm:$0xff] %v10773_v31  ;;  %v10776_v55 = vadd.f32 %v3773_v18, %v10726_v42  ;;  %v10779_v41 = vadd.f32 %v3846_v4, %v10731_v53 }
 0x95e   :  { %v3777_v23 = vpop.f32.mrf.mxu0  ;;  %v3850_v62 = vpop.f32.mrf.mxu1 }
 0x95f   :  { %12559 = vst [vmem:[#allocation71_spill] sm:$0xff] %v10776_v55  ;;  %12560 = vst [vmem:[#allocation73_spill] sm:$0xff] %v10779_v41  ;;  %v10782_v25 = vadd.f32 %v3777_v23, %v10716_v49  ;;  %v10785_v40 = vadd.f32 %v3850_v62, %v10721_v44 }
 0x960   :  { %v3779_v27 = vpop.f32.mrf.mxu0  ;;  %v3852_v14 = vpop.f32.mrf.mxu1 }
 0x961   :  { %12561 = vst [vmem:[#allocation62_spill] sm:$0xff] %v10782_v25  ;;  %12562 = vst [vmem:[#allocation63_spill] sm:$0xff] %v10785_v40  ;;  %v10788_v3 = vadd.f32 %v3779_v27, %v10726_v42  ;;  %v10791_v31 = vadd.f32 %v3852_v14, %v10731_v53 }
 0x962   :  { %v3781_v18 = vpop.f32.mrf.mxu0  ;;  %v3854_v55 = vpop.f32.mrf.mxu1 }
 0x963   :  { %12563 = vst [vmem:[#allocation60_spill] sm:$0xff] %v10788_v3  ;;  %12564 = vst [vmem:[#allocation61_spill] sm:$0xff] %v10791_v31  ;;  %v10794_v4 = vadd.f32 %v3781_v18, %v10716_v49  ;;  %v10797_v41 = vadd.f32 %v3854_v55, %v10721_v44 }
 0x964   :  { %v3783_v23 = vpop.f32.mrf.mxu0  ;;  %v3856_v25 = vpop.f32.mrf.mxu1 }
 0x965   :  { %12565 = vst [vmem:[#allocation66_spill] sm:$0xff] %v10794_v4  ;;  %12566 = vst [vmem:[#allocation68_spill] sm:$0xff] %v10797_v41  ;;  %v10800_v62 = vadd.f32 %v3783_v23, %v10726_v42  ;;  %v10803_v40 = vadd.f32 %v3856_v25, %v10731_v53 }
 0x966   :  { %v3787_v27 = vpop.f32.mrf.mxu0  ;;  %v3860_v3 = vpop.f32.mrf.mxu1 }
 0x967   :  { %12567 = vst [vmem:[#allocation67_spill] sm:$0xff] %v10800_v62  ;;  %12568 = vst [vmem:[#allocation69_spill] sm:$0xff] %v10803_v40  ;;  %v10806_v14 = vadd.f32 %v3787_v27, %v10716_v49  ;;  %v10809_v31 = vadd.f32 %v3860_v3, %v10721_v44  ;;  %v3614_v3 = vadd.f32 %v10605_v47, %v10622_v5 }
 0x968   :  { %v3789_v18 = vpop.f32.mrf.mxu0  ;;  %v3862_v4 = vpop.f32.mrf.mxu1 }
 0x969   :  { %12569 = vst [vmem:[#allocation94_spill] sm:$0xff] %v10806_v14  ;;  %12570 = vst [vmem:[#allocation2_spill] sm:$0xff] %v10809_v31  ;;  %v10812_v55 = vadd.f32 %v3789_v18, %v10726_v42  ;;  %v10815_v41 = vadd.f32 %v3862_v4, %v10731_v53 }
 0x96a   :  { %v3791_v23 = vpop.f32.mrf.mxu0  ;;  %v3864_v62 = vpop.f32.mrf.mxu1 }
 0x96b   :  { %12571 = vst [vmem:[#allocation31_spill] sm:$0xff] %v10812_v55  ;;  %12572 = vst [vmem:[#allocation41_spill] sm:$0xff] %v10815_v41 }
 0x96c   :  { %v3793_v25 = vpop.f32.mrf.mxu0  ;;  %v3866_v40 = vpop.f32.mrf.mxu1 }
 0x96d   :  { %v3794_v60 = vadd.f32 %v3793_v25, %v10726_v42  ;;  %v3865_v42 = vadd.f32 %v3864_v62, %v10721_v44 }
 0x96f   :  { %v4128_v27 = vpop.f32.mrf.mxu0  ;;  %v4169_v14 = vpop.f32.mrf.mxu1 }
 0x970   :  { %v4176_v31 = vadd.f32 %v4128_v27, %v3612_v26  ;;  %v4178_v9 = vadd.f32 %v4169_v14, %v3685_v6 }
 0x971   :  { %v4130_v33 = vpop.f32.mrf.mxu0  ;;  %v4171_v28 = vpop.f32.mrf.mxu1 }
 0x972   :  { %v6633_v18 = vmul.f32 -1.442695, %v4176_v31  ;;  %v4177_v55 = vadd.f32 %v4130_v33, %v3614_v3  ;;  %v6635_v5 = vmul.f32 -1.442695, %v4178_v9  ;;  %v4179_v26 = vadd.f32 %v4171_v28, %v3687_v43 }
 0x973   :  { %v4132_v13 = vpop.f32.mrf.mxu0  ;;  %v4173_v4 = vpop.f32.mrf.mxu1 }
 0x974   :  { %7241 = vpow2.f32 %v6633_v18  ;;  %v6634_v41 = vmul.f32 -1.442695, %v4177_v55 }
 0x975   :  { %v4133_v48 = vpop.f32.mrf.mxu0  ;;  %v4174_v45 = vpop.f32.mrf.mxu1 }
 0x976   :  { %7243 = vpow2.f32 %v6634_v41  ;;  %v3792_v45 = vadd.f32 %v3791_v23, %v10716_v49 }
 0x977   :  { %7245 = vpow2.f32 %v6635_v5 }
 0x978   :  { %7247 = vtanh.f32 %v4179_v26 }
 0x981   :  { %v7242_v47 = vpop.eup %7241 }
 0x982   :  { %v4435_v27 = vadd.f32 1.0, %v7242_v47 }
 0x983   :  { %v7244_v33 = vpop.eup %7243 }
 0x984   :  { %7249 = vrcp.f32 %v4435_v27  ;;  %v4436_v13 = vadd.f32 1.0, %v7244_v33  ;;  %v7246_v48 = vpop.eup %7245  ;;  %v3867_v27 = vadd.f32 %v3866_v40, %v10731_v53 }
 0x985   :  { %v7248_v46 = vpop.eup %7247  ;;  %v4437_v4 = vadd.f32 1.0, %v7246_v48 }
 0x986   :  { %7251 = vrcp.f32 %v4436_v13 }
 0x98f   :  { %v4374_v31 = vpop.f32.mrf.mxu0  ;;  %v4415_v41 = vpop.f32.mrf.mxu1 }
 0x990   :  { %v4422_v14 = vadd.f32 %v4374_v31, %v3792_v45  ;;  %v4424_v25 = vadd.f32 %v4415_v41, %v3865_v42  ;;  %v12578_v42 = vld [vmem:[#allocation46_spill] sm:$0xff] }
 0x991   :  { %v7250_v54 = vpop.eup %7249  ;;  %v4376_v8 = vpop.f32.mrf.mxu0 }
 0x992   :  { %v4417_v43 = vpop.f32.mrf.mxu1  ;;  %v4446_v28 = vmul.f32 %v7250_v54, %v7248_v46  ;;  %v6636_v55 = vmul.f32 -1.442695, %v4422_v14  ;;  %v4423_v3 = vadd.f32 %v4376_v8, %v3794_v60  ;;  %v6638_v33 = vmul.f32 -1.442695, %v4424_v25  ;;  %v12581_v25 = vld [vmem:[#allocation47_spill] sm:$0xff] }
 0x993   :  { %v7252_v18 = vpop.eup %7251  ;;  %v4378_v6 = vpop.f32.mrf.mxu0  ;;  %v4425_v45 = vadd.f32 %v4417_v43, %v3867_v27  ;;  %v12583_v27 = vld [vmem:[#allocation84_spill] sm:$0xff] }
 0x994   :  { %v4419_v9 = vpop.f32.mrf.mxu1  ;;  %v4445_v5 = vmul.f32 0.0, %v7252_v18  ;;  %7253 = vpow2.f32 %v6636_v55  ;;  %v6637_v49 = vmul.f32 -1.442695, %v4423_v3  ;;  %v12573_v3 = vld [vmem:[#allocation4_spill] sm:$0xff] }
 0x995   :  { %v4379_v23 = vpop.f32.mrf.mxu0 }
 0x996   :  { %v4420_v26 = vpop.f32.mrf.mxu1  ;;  %v10827_v47 = vadd.f32 %v4446_v28, %v4445_v5  ;;  %7255 = vpow2.f32 %v6637_v49  ;;  %v12574_v5 = vld [vmem:[#allocation88_spill] sm:$0xff]  ;;  %v12575_v49 = vld [vmem:[#allocation86_spill] sm:$0xff]  ;;  %v12576_v23 = vld [vmem:[#allocation87_spill] sm:$0xff] }
 0x997   :  { %7257 = vrcp.f32 %v4437_v4  ;;  %v12577_v26 = vld [vmem:[#allocation89_spill] sm:$0xff] }
 0x998   :  { %7259 = vtanh.f32 %v10827_v47 }
 0x999   :  { %7261 = vpow2.f32 %v6638_v33  ;;  %v12584_v33 = vld [vmem:[#allocation83_spill] sm:$0xff] }
 0x9a1   :  { %v7254_v13 = vpop.eup %7253 }
 0x9a2   :  { %v4459_v48 = vadd.f32 1.0, %v7254_v13  ;;  %v12585_v13 = vld [vmem:[#allocation85_spill] sm:$0xff] }
 0x9a3   :  { %v7256_v31 = vpop.eup %7255 }
 0x9a4   :  { %v7258_v46 = vpop.eup %7257  ;;  %7263 = vrcp.f32 %v4459_v48  ;;  %v4460_v60 = vadd.f32 1.0, %v7256_v31  ;;  %v12587_v48 = vld [vmem:[#allocation34_spill] sm:$0xff]  ;;  %v12588_v31 = vld [vmem:[#allocation35_spill] sm:$0xff] }
 0x9a5   :  { %v7260_v14 = vpop.eup %7259  ;;  %7265 = vtanh.f32 %v4425_v45  ;;  %v12586_v45 = vld [vmem:[#allocation36_spill] sm:$0xff] }
 0x9a6   :  { %7267 = vrcp.f32 %v4460_v60  ;;  %v4449_v54 = vmul.f32 %v7260_v14, %v7258_v46  ;;  %v7262_v44 = vpop.eup %7261  ;;  %v12589_v46 = vld [vmem:[#allocation37_spill] sm:$0xff]  ;;  %v12590_v60 = vld [vmem:[#allocation90_spill] sm:$0xff]  ;;  %v12591_v14 = vld [vmem:[#allocation92_spill] sm:$0xff] }
 0x9a7   :  { %v4461_v41 = vadd.f32 1.0, %v7262_v44  ;;  %v12594_v44 = vld [vmem:[#allocation39_spill] sm:$0xff] }
 0x9a8   :  { %v4474_v8 = vpack.c.bf16 %v4449_v54, %v4449_v54  ;;  %v12592_v54 = vld [vmem:[#allocation91_spill] sm:$0xff] }
 0x9a9   :  { %7269 = vrcp.f32 %v4461_v41  ;;  %v12598_v41 = vld [vmem:[#allocation51_spill] sm:$0xff] }
 0x9aa   :  { %4508 = vmatmul.mubr.bf16.vlgmr.msra.gmra.mxu0 %v4474_v8  ;;  %4549 = vmatmul.mubr.bf16.vlgmr.msra.gmra.mxu1 %v4474_v8  ;;  %v12593_v8 = vld [vmem:[#allocation93_spill] sm:$0xff] }
 0x9ab   :  { %4563 = vmatpush1.bf16.msra.mxu0 %v10375_v30  ;;  %4604 = vmatpush1.bf16.msra.mxu1 %v10380_v24 }
 0x9ac   :  { %4564 = vmatprep.subr.bf16.mxu0 %v10387_v39  ;;  %4605 = vmatprep.subr.bf16.mxu1 %v10392_v16 }
 0x9ad   :  { %4594 = vmatprep.mubr.bf16.mxu0 %v12214_v0  ;;  %4635 = vmatprep.mubr.bf16.mxu1 %v12214_v0 }
 0x9af   :  { %4565 = vmatpush1.bf16.msra.mxu0 %v10401_v34  ;;  %4606 = vmatpush1.bf16.msra.mxu1 %v10406_v59 }
 0x9b0   :  { %4566 = vmatprep.subr.bf16.mxu0 %v10413_v17  ;;  %4607 = vmatprep.subr.bf16.mxu1 %v10418_v21 }
 0x9b1   :  { %v7264_v53 = vpop.eup %7263 }
 0x9b2   :  { %v7266_v40 = vpop.eup %7265 }
 0x9b3   :  { %v7268_v62 = vpop.eup %7267  ;;  %4567 = vmatpush1.bf16.msra.mxu0 %v10427_v12  ;;  %4608 = vmatpush1.bf16.msra.mxu1 %v10432_v7  ;;  %v4470_v28 = vmul.f32 %v7266_v40, %v7264_v53  ;;  %v12595_v53 = vld [vmem:[#allocation48_spill] sm:$0xff]  ;;  %v12596_v40 = vld [vmem:[#allocation50_spill] sm:$0xff] }
 0x9b4   :  { %v4469_v43 = vmul.f32 0.0, %v7268_v62  ;;  %4568 = vmatprep.subr.bf16.mxu0 %v10439_v20  ;;  %4609 = vmatprep.subr.bf16.mxu1 %v10444_v50  ;;  %v12597_v62 = vld [vmem:[#allocation49_spill] sm:$0xff] }
 0x9b6   :  { %v10846_v55 = vadd.f32 %v4470_v28, %v4469_v43  ;;  %v7270_v18 = vpop.eup %7269  ;;  %v12599_v43 = vld [vmem:[#allocation64_spill] sm:$0xff] }
 0x9b7   :  { %4569 = vmatpush1.bf16.msra.mxu0 %v10451_v56  ;;  %4610 = vmatpush1.bf16.msra.mxu1 %v10456_v19  ;;  %v12600_v28 = vld [vmem:[#allocation80_spill] sm:$0xff] }
 0x9b8   :  { %7271 = vtanh.f32 %v10846_v55  ;;  %4570 = vmatprep.subr.bf16.mxu0 %v10463_v37  ;;  %4611 = vmatprep.subr.bf16.mxu1 %v10468_v2 }
 0x9bb   :  { %4571 = vmatpush1.bf16.msra.mxu0 %v10475_v29  ;;  %4612 = vmatpush1.bf16.msra.mxu1 %v10480_v58 }
 0x9bc   :  { %4572 = vmatprep.subr.bf16.mxu0 %v10487_v22  ;;  %4613 = vmatprep.subr.bf16.mxu1 %v10492_v32 }
 0x9bf   :  { %4573 = vmatpush1.bf16.msra.mxu0 %v10499_v57  ;;  %4614 = vmatpush1.bf16.msra.mxu1 %v10504_v63 }
 0x9c0   :  { %4574 = vmatprep.subr.bf16.mxu0 %v10511_v38  ;;  %4615 = vmatprep.subr.bf16.mxu1 %v12573_v3 }
 0x9c3   :  { %4575 = vmatpush1.bf16.msra.mxu0 %v10523_v15  ;;  %4616 = vmatpush1.bf16.msra.mxu1 %v10528_v10 }
 0x9c4   :  { %4576 = vmatprep.subr.bf16.mxu0 %v10535_v51  ;;  %4617 = vmatprep.subr.bf16.mxu1 %v10540_v35 }
 0x9c5   :  { %v7272_v4 = vpop.eup %7271 }
 0x9c6   :  { %v4473_v6 = vmul.f32 %v7272_v4, %v7270_v18  ;;  %v12601_v18 = vld [vmem:[#allocation78_spill] sm:$0xff]  ;;  %v12602_v4 = vld [vmem:[#allocation79_spill] sm:$0xff] }
 0x9c7   :  { %4577 = vmatpush1.bf16.msra.mxu0 %v10547_v1  ;;  %4618 = vmatpush1.bf16.msra.mxu1 %v10552_v52 }
 0x9c8   :  { %v4561_v9 = vpack.c.bf16 %v4473_v6, %v4473_v6  ;;  %4697 = vmatprep.subr.bf16.mxu0 %v10157_v36  ;;  %4738 = vmatprep.subr.bf16.mxu1 %v10162_v61  ;;  %v12579_v36 = vld [vmem:[#allocation44_spill] sm:$0xff]  ;;  %v12580_v61 = vld [vmem:[#allocation45_spill] sm:$0xff] }
 0x9c9   :  { %v12603_v6 = vld [vmem:[#allocation65_spill] sm:$0xff] }
 0x9ca   :  { %4595 = vmatmul.mubr.bf16.vlgmr.msra.gmra.mxu0 %v4561_v9  ;;  %4636 = vmatmul.mubr.bf16.vlgmr.msra.gmra.mxu1 %v4561_v9  ;;  %v12604_v9 = vld [vmem:[#allocation81_spill] sm:$0xff] }
 0x9cb   :  { %4698 = vmatpush1.bf16.msra.mxu0 %v10169_v11  ;;  %4739 = vmatpush1.bf16.msra.mxu1 %v12574_v5  ;;  %v12582_v11 = vld [vmem:[#allocation82_spill] sm:$0xff] }
 0x9cc   :  { %4699 = vmatprep.subr.bf16.mxu0 %v12575_v49  ;;  %4740 = vmatprep.subr.bf16.mxu1 %v12576_v23  ;;  %v12605_v23 = vld [vmem:[#allocation5_spill] sm:$0xff] }
 0x9cd   :  { %4729 = vmatprep.mubr.bf16.mxu0 %v12214_v0  ;;  %4770 = vmatprep.mubr.bf16.mxu1 %v12214_v0 }
 0x9cf   :  { %4700 = vmatpush1.bf16.msra.mxu0 %v12577_v26  ;;  %4741 = vmatpush1.bf16.msra.mxu1 %v12578_v42 }
 0x9d0   :  { %4701 = vmatprep.subr.bf16.mxu0 %v12579_v36  ;;  %4742 = vmatprep.subr.bf16.mxu1 %v12580_v61 }
 0x9d3   :  { %4702 = vmatpush1.bf16.msra.mxu0 %v12581_v25  ;;  %4743 = vmatpush1.bf16.msra.mxu1 %v12582_v11  ;;  %v12606_v25 = vld [vmem:[#allocation7_spill] sm:$0xff] }
 0x9d4   :  { %4703 = vmatprep.subr.bf16.mxu0 %v12583_v27  ;;  %4744 = vmatprep.subr.bf16.mxu1 %v12584_v33 }
 0x9d7   :  { %4704 = vmatpush1.bf16.msra.mxu0 %v12585_v13  ;;  %4745 = vmatpush1.bf16.msra.mxu1 %v12586_v45 }
 0x9d8   :  { %4705 = vmatprep.subr.bf16.mxu0 %v12587_v48  ;;  %4746 = vmatprep.subr.bf16.mxu1 %v12588_v31  ;;  %v12607_v31 = vld [vmem:[#allocation6_spill] sm:$0xff] }
 0x9db   :  { %4706 = vmatpush1.bf16.msra.mxu0 %v12589_v46  ;;  %4747 = vmatpush1.bf16.msra.mxu1 %v12590_v60 }
 0x9dc   :  { %4707 = vmatprep.subr.bf16.mxu0 %v12591_v14  ;;  %4748 = vmatprep.subr.bf16.mxu1 %v12592_v54  ;;  %v12608_v14 = vld [vmem:[#allocation8_spill] sm:$0xff] }
 0x9df   :  { %4708 = vmatpush1.bf16.msra.mxu0 %v12593_v8  ;;  %4749 = vmatpush1.bf16.msra.mxu1 %v12594_v44 }
 0x9e0   :  { %4709 = vmatprep.subr.bf16.mxu0 %v12595_v53  ;;  %4750 = vmatprep.subr.bf16.mxu1 %v12596_v40 }
 0x9e3   :  { %4710 = vmatpush1.bf16.msra.mxu0 %v12597_v62  ;;  %4751 = vmatpush1.bf16.msra.mxu1 %v12598_v41 }
 0x9e4   :  { %4711 = vmatprep.subr.bf16.mxu0 %v12599_v43  ;;  %4752 = vmatprep.subr.bf16.mxu1 %v12600_v28 }
 0x9e7   :  { %4712 = vmatpush1.bf16.msra.mxu0 %v12601_v18  ;;  %4753 = vmatpush1.bf16.msra.mxu1 %v12602_v4  ;;  %v12609_v18 = vld [vmem:[#allocation94_spill] sm:$0xff] }
 0x9e8   :  { %4784 = vmatprep.subr.bf16.mxu0 %v12603_v6  ;;  %4825 = vmatprep.subr.bf16.mxu1 %v12604_v9 }
 0xa6a   :  { %v4509_v5 = vpop.f32.mrf.mxu0  ;;  %v4550_v49 = vpop.f32.mrf.mxu1 }
 0xa6b   :  { %v4557_v26 = vadd.f32 %v4509_v5, %v12605_v23  ;;  %v4559_v46 = vadd.f32 %v4550_v49, %v12607_v31  ;;  %v12611_v31 = vld [vmem:[#allocation2_spill] sm:$0xff] }
 0xa6c   :  { %v4511_v42 = vpop.f32.mrf.mxu0  ;;  %v4552_v36 = vpop.f32.mrf.mxu1 }
 0xa6d   :  { %v6639_v61 = vmul.f32 -1.442695, %v4557_v26  ;;  %v4558_v11 = vadd.f32 %v4511_v42, %v12606_v25  ;;  %v6641_v60 = vmul.f32 -1.442695, %v4559_v46  ;;  %v4560_v54 = vadd.f32 %v4552_v36, %v12608_v14  ;;  %v12610_v26 = vld [vmem:[#allocation31_spill] sm:$0xff]  ;;  %v12612_v14 = vld [vmem:[#allocation41_spill] sm:$0xff] }
 0xa6e   :  { %v4513_v27 = vpop.f32.mrf.mxu0  ;;  %v4554_v33 = vpop.f32.mrf.mxu1 }
 0xa6f   :  { %7273 = vpow2.f32 %v6639_v61  ;;  %v6640_v13 = vmul.f32 -1.442695, %v4558_v11 }
 0xa70   :  { %v4514_v45 = vpop.f32.mrf.mxu0  ;;  %v4555_v48 = vpop.f32.mrf.mxu1 }
 0xa71   :  { %7275 = vpow2.f32 %v6640_v13 }
 0xa72   :  { %7277 = vpow2.f32 %v6641_v60 }
 0xa73   :  { %7279 = vtanh.f32 %v4560_v54 }
 0xa7c   :  { %v7274_v8 = vpop.eup %7273 }
 0xa7d   :  { %v4657_v44 = vadd.f32 1.0, %v7274_v8 }
 0xa7e   :  { %v7276_v53 = vpop.eup %7275 }
 0xa7f   :  { %7281 = vrcp.f32 %v4657_v44  ;;  %v4658_v40 = vadd.f32 1.0, %v7276_v53  ;;  %v7278_v62 = vpop.eup %7277 }
 0xa80   :  { %v7280_v28 = vpop.eup %7279  ;;  %v4659_v61 = vadd.f32 1.0, %v7278_v62 }
 0xa81   :  { %7283 = vrcp.f32 %v4658_v40 }
 0xa8a   :  { %v4596_v41 = vpop.f32.mrf.mxu0  ;;  %v4637_v43 = vpop.f32.mrf.mxu1 }
 0xa8b   :  { %v4644_v4 = vadd.f32 %v4596_v41, %v12609_v18  ;;  %v4646_v46 = vadd.f32 %v4637_v43, %v12611_v31 }
 0xa8c   :  { %v7282_v6 = vpop.eup %7281  ;;  %v4598_v9 = vpop.f32.mrf.mxu0 }
 0xa8d   :  { %v4639_v5 = vpop.f32.mrf.mxu1  ;;  %v4668_v49 = vmul.f32 %v7282_v6, %v7280_v28  ;;  %v6642_v23 = vmul.f32 -1.442695, %v4644_v4  ;;  %v4645_v42 = vadd.f32 %v4598_v9, %v12610_v26  ;;  %v6644_v60 = vmul.f32 -1.442695, %v4646_v46  ;;  %v11088_v6 = vld [vmem:[%s11970_s5 + $0x40] ss:$16 sps:$4 sm:$0xff]  }
 0xa8e   :  { %v7284_v36 = vpop.eup %7283  ;;  %v4600_v25 = vpop.f32.mrf.mxu0  ;;  %v4647_v54 = vadd.f32 %v4639_v5, %v12612_v14  ;;  %12626 = vst [vmem:[#allocation47_spill] sm:$0xff] %v11088_v6  ;;  %v11094_v9 = vld [vmem:[%s11970_s5 + $0x48] ss:$16 sps:$4 sm:$0xff]   ;;  %v11100_v5 = vld [vmem:[%s11970_s5 + $0x24] ss:$16 sps:$4 sm:$0xff]  }
 0xa8f   :  { %v4641_v11 = vpop.f32.mrf.mxu1  ;;  %v4667_v27 = vmul.f32 %v7284_v36, %v10827_v47  ;;  %7285 = vpow2.f32 %v6642_v23  ;;  %v6643_v33 = vmul.f32 -1.442695, %v4645_v42  ;;  %12627 = vst [vmem:[#allocation82_spill] sm:$0xff] %v11094_v9  ;;  %12628 = vst [vmem:[#allocation84_spill] sm:$0xff] %v11100_v5  ;;  %v11112_v23 = vld [vmem:[%s11970_s5 + $0x20] ss:$16 sps:$4 sm:$0xff]  }
 0xa90   :  { %v4601_v13 = vpop.f32.mrf.mxu0  ;;  %12630 = vst [vmem:[#allocation85_spill] sm:$0xff] %v11112_v23  ;;  %v11118_v26 = vld [vmem:[%s11970_s5 + $0x28] ss:$16 sps:$4 sm:$0xff]   ;;  %v11124_v42 = vld [vmem:[%s11970_s5 + $0x4] ss:$16 sps:$4 sm:$0xff]  }
 0xa91   :  { %v4642_v45 = vpop.f32.mrf.mxu1  ;;  %v10910_v48 = vadd.f32 %v4668_v49, %v4667_v27  ;;  %7287 = vpow2.f32 %v6643_v33  ;;  %v11106_v49 = vld [vmem:[%s11970_s5 + $0x2c] ss:$16 sps:$4 sm:$0xff]   ;;  %12631 = vst [vmem:[#allocation36_spill] sm:$0xff] %v11118_v26  ;;  %12632 = vst [vmem:[#allocation34_spill] sm:$0xff] %v11124_v42  ;;  %v11142_v25 = vld [vmem:[%s11970_s5 + $0x8] ss:$16 sps:$4 sm:$0xff]  }
 0xa92   :  { %7289 = vrcp.f32 %v4659_v61  ;;  %12629 = vst [vmem:[#allocation83_spill] sm:$0xff] %v11106_v49  ;;  %v11130_v36 = vld [vmem:[%s11970_s5 + $0xc] ss:$16 sps:$4 sm:$0xff]   ;;  %v11136_v61 = vld [vmem:[%s11970_s5] ss:$16 sps:$4 sm:$0xff]   ;;  %12635 = vst [vmem:[#allocation90_spill] sm:$0xff] %v11142_v25 }
 0xa93   :  { %7291 = vtanh.f32 %v10910_v48  ;;  %12633 = vst [vmem:[#allocation35_spill] sm:$0xff] %v11130_v36  ;;  %12634 = vst [vmem:[#allocation37_spill] sm:$0xff] %v11136_v61  ;;  %v11148_v11 = vld [vmem:[%s11970_s5 + $0x1e4] ss:$16 sps:$4 sm:$0xff]   ;;  %v11154_v27 = vld [vmem:[%s11970_s5 + $0x1ec] ss:$16 sps:$4 sm:$0xff]  }
 0xa94   :  { %7293 = vpow2.f32 %v6644_v60  ;;  %12636 = vst [vmem:[#allocation92_spill] sm:$0xff] %v11148_v11  ;;  %12637 = vst [vmem:[#allocation91_spill] sm:$0xff] %v11154_v27  ;;  %v12638_v45 = vld [vmem:[#allocation9_spill] sm:$0xff] }
 0xa95   :  { %7295 = vtanh.f32 %v4647_v54  ;;  %v12639_v54 = vld [vmem:[#allocation11_spill] sm:$0xff] }
 0xa9c   :  { %v7286_v8 = vpop.eup %7285 }
 0xa9d   :  { %v4681_v44 = vadd.f32 1.0, %v7286_v8 }
 0xa9e   :  { %v7288_v53 = vpop.eup %7287 }
 0xa9f   :  { %v7290_v47 = vpop.eup %7289  ;;  %7297 = vrcp.f32 %v4681_v44  ;;  %v4682_v40 = vadd.f32 1.0, %v7288_v53 }
 0xaa0   :  { %v7292_v62 = vpop.eup %7291 }
 0xaa1   :  { %7299 = vrcp.f32 %v4682_v40  ;;  %v4671_v41 = vmul.f32 %v7292_v62, %v7290_v47  ;;  %v7294_v43 = vpop.eup %7293 }
 0xaa2   :  { %v7296_v18 = vpop.eup %7295 }
 0xaa3   :  { %v4696_v28 = vpack.c.bf16 %v4671_v41, %v4671_v41  ;;  %v12640_v41 = vld [vmem:[#allocation10_spill] sm:$0xff] }
 0xaa5   :  { %4730 = vmatmul.mubr.bf16.vlgmr.msra.gmra.mxu0 %v4696_v28  ;;  %4771 = vmatmul.mubr.bf16.vlgmr.msra.gmra.mxu1 %v4696_v28 }
 0xaa6   :  { %4785 = vmatpush1.bf16.msra.mxu0 %v10375_v30  ;;  %4826 = vmatpush1.bf16.msra.mxu1 %v10380_v24 }
 0xaa7   :  { %4786 = vmatprep.subr.bf16.mxu0 %v10387_v39  ;;  %4827 = vmatprep.subr.bf16.mxu1 %v10392_v16  ;;  %v4683_v39 = vadd.f32 1.0, %v7294_v43 }
 0xaa8   :  { %4816 = vmatprep.mubr.bf16.mxu0 %v12214_v0  ;;  %4857 = vmatprep.mubr.bf16.mxu1 %v12214_v0 }
 0xaa9   :  { %7301 = vrcp.f32 %v4683_v39 }
 0xaaa   :  { %4787 = vmatpush1.bf16.msra.mxu0 %v10401_v34  ;;  %4828 = vmatpush1.bf16.msra.mxu1 %v10406_v59 }
 0xaab   :  { %4788 = vmatprep.subr.bf16.mxu0 %v10413_v17  ;;  %4829 = vmatprep.subr.bf16.mxu1 %v10418_v21 }
 0xaac   :  { %v7298_v30 = vpop.eup %7297 }
 0xaad   :  { %v4692_v24 = vmul.f32 %v7298_v30, %v7296_v18  ;;  %v12641_v18 = vld [vmem:[#allocation12_spill] sm:$0xff] }
 0xaae   :  { %v7300_v4 = vpop.eup %7299  ;;  %4789 = vmatpush1.bf16.msra.mxu0 %v10427_v12  ;;  %4830 = vmatpush1.bf16.msra.mxu1 %v10432_v7  ;;  %v10954_v7 = vld [vmem:[%s11970_s5 + $0xe4] ss:$16 sps:$4 sm:$0xff]  }
 0xaaf   :  { %v4691_v16 = vmul.f32 %v7300_v4, %v10846_v55  ;;  %4790 = vmatprep.subr.bf16.mxu0 %v10439_v20  ;;  %4831 = vmatprep.subr.bf16.mxu1 %v10444_v50  ;;  %v10960_v20 = vld [vmem:[%s11970_s5 + $0xec] ss:$16 sps:$4 sm:$0xff]   ;;  %v10966_v50 = vld [vmem:[%s11970_s5 + $0xe0] ss:$16 sps:$4 sm:$0xff]   ;;  %v11076_v55 = vld [vmem:[%s11970_s5 + $0x44] ss:$16 sps:$4 sm:$0xff]  }
 0xab0   :  { %12624 = vst [vmem:[#allocation44_spill] sm:$0xff] %v11076_v55 }
 0xab1   :  { %v10930_v34 = vadd.f32 %v4692_v24, %v4691_v16 }
 0xab2   :  { %4791 = vmatpush1.bf16.msra.mxu0 %v10451_v56  ;;  %4832 = vmatpush1.bf16.msra.mxu1 %v10456_v19  ;;  %v10972_v56 = vld [vmem:[%s11970_s5 + $0xe8] ss:$16 sps:$4 sm:$0xff]   ;;  %v10978_v19 = vld [vmem:[%s11970_s5 + $0xc4] ss:$16 sps:$4 sm:$0xff]  }
 0xab3   :  { %7303 = vtanh.f32 %v10930_v34  ;;  %4792 = vmatprep.subr.bf16.mxu0 %v10463_v37  ;;  %4833 = vmatprep.subr.bf16.mxu1 %v10468_v2  ;;  %v10984_v37 = vld [vmem:[%s11970_s5 + $0xcc] ss:$16 sps:$4 sm:$0xff]   ;;  %v10992_v2 = vld [vmem:[%s11970_s5 + $0xc0] ss:$16 sps:$4 sm:$0xff]  }
 0xab6   :  { %4793 = vmatpush1.bf16.msra.mxu0 %v10475_v29  ;;  %4834 = vmatpush1.bf16.msra.mxu1 %v10480_v58  ;;  %v7302_v59 = vpop.eup %7301  ;;  %v10998_v29 = vld [vmem:[%s11970_s5 + $0xc8] ss:$16 sps:$4 sm:$0xff]   ;;  %v11004_v58 = vld [vmem:[%s11970_s5 + $0xa4] ss:$16 sps:$4 sm:$0xff]  }
 0xab7   :  { %4794 = vmatprep.subr.bf16.mxu0 %v10487_v22  ;;  %4835 = vmatprep.subr.bf16.mxu1 %v10492_v32  ;;  %v11010_v22 = vld [vmem:[%s11970_s5 + $0xac] ss:$16 sps:$4 sm:$0xff]   ;;  %v11016_v32 = vld [vmem:[%s11970_s5 + $0xa0] ss:$16 sps:$4 sm:$0xff]  }
 0xab8   :  { %12613 = vst [vmem:[#allocation43_spill] sm:$0xff] %v11010_v22  ;;  %12614 = vst [vmem:[#allocation42_spill] sm:$0xff] %v11016_v32 }
 0xaba   :  { %4795 = vmatpush1.bf16.msra.mxu0 %v10499_v57  ;;  %4836 = vmatpush1.bf16.msra.mxu1 %v10504_v63  ;;  %v11022_v57 = vld [vmem:[%s11970_s5 + $0xa8] ss:$16 sps:$4 sm:$0xff]   ;;  %v11028_v63 = vld [vmem:[%s11970_s5 + $0x84] ss:$16 sps:$4 sm:$0xff]  }
 0xabb   :  { %4796 = vmatprep.subr.bf16.mxu0 %v10511_v38  ;;  %4837 = vmatprep.subr.bf16.mxu1 %v12573_v3  ;;  %12615 = vst [vmem:[#allocation3_spill] sm:$0xff] %v11022_v57  ;;  %12616 = vst [vmem:[#allocation32_spill] sm:$0xff] %v11028_v63  ;;  %v11034_v38 = vld [vmem:[%s11970_s5 + $0x8c] ss:$16 sps:$4 sm:$0xff]  }
 0xabc   :  { %12617 = vst [vmem:[#allocation33_spill] sm:$0xff] %v11034_v38  ;;  %v11082_v3 = vld [vmem:[%s11970_s5 + $0x4c] ss:$16 sps:$4 sm:$0xff]  }
 0xabd   :  { %12625 = vst [vmem:[#allocation45_spill] sm:$0xff] %v11082_v3 }
 0xabe   :  { %4797 = vmatpush1.bf16.msra.mxu0 %v10523_v15  ;;  %4838 = vmatpush1.bf16.msra.mxu1 %v10528_v10  ;;  %v11046_v15 = vld [vmem:[%s11970_s5 + $0x88] ss:$16 sps:$4 sm:$0xff]   ;;  %v11052_v10 = vld [vmem:[%s11970_s5 + $0x64] ss:$16 sps:$4 sm:$0xff]  }
 0xabf   :  { %4798 = vmatprep.subr.bf16.mxu0 %v10535_v51  ;;  %4839 = vmatprep.subr.bf16.mxu1 %v10540_v35  ;;  %12619 = vst [vmem:[#allocation88_spill] sm:$0xff] %v11046_v15  ;;  %12620 = vst [vmem:[#allocation86_spill] sm:$0xff] %v11052_v10  ;;  %v11058_v51 = vld [vmem:[%s11970_s5 + $0x6c] ss:$16 sps:$4 sm:$0xff]   ;;  %v11064_v35 = vld [vmem:[%s11970_s5 + $0x60] ss:$16 sps:$4 sm:$0xff]  }
 0xac0   :  { %v7304_v17 = vpop.eup %7303  ;;  %12621 = vst [vmem:[#allocation87_spill] sm:$0xff] %v11058_v51  ;;  %12622 = vst [vmem:[#allocation89_spill] sm:$0xff] %v11064_v35 }
 0xac1   :  { %v4695_v21 = vmul.f32 %v7304_v17, %v7302_v59 }
 0xac2   :  { %4799 = vmatpush1.bf16.msra.mxu0 %v10547_v1  ;;  %4840 = vmatpush1.bf16.msra.mxu1 %v10552_v52  ;;  %v11040_v52 = vld [vmem:[%s11970_s5 + $0x80] ss:$16 sps:$4 sm:$0xff]   ;;  %v11070_v1 = vld [vmem:[%s11970_s5 + $0x68] ss:$16 sps:$4 sm:$0xff]  }
 0xac3   :  { %v4783_v12 = vpack.c.bf16 %v4695_v21, %v4695_v21  ;;  %4919 = vmatprep.subr.bf16.mxu0 %v10954_v7  ;;  %4960 = vmatprep.subr.bf16.mxu1 %v10960_v20  ;;  %12618 = vst [vmem:[#allocation4_spill] sm:$0xff] %v11040_v52  ;;  %12623 = vst [vmem:[#allocation46_spill] sm:$0xff] %v11070_v1 }
 0xac5   :  { %4817 = vmatmul.mubr.bf16.vlgmr.msra.gmra.mxu0 %v4783_v12  ;;  %4858 = vmatmul.mubr.bf16.vlgmr.msra.gmra.mxu1 %v4783_v12 }
 0xac6   :  { %4920 = vmatpush1.bf16.msra.mxu0 %v10966_v50  ;;  %4961 = vmatpush1.bf16.msra.mxu1 %v10972_v56 }
 0xac7   :  { %4921 = vmatprep.subr.bf16.mxu0 %v10978_v19  ;;  %4962 = vmatprep.subr.bf16.mxu1 %v10984_v37 }
 0xac8   :  { %4951 = vmatprep.mubr.bf16.mxu0 %v12214_v0  ;;  %4992 = vmatprep.mubr.bf16.mxu1 %v12214_v0 }
 0xaca   :  { %4922 = vmatpush1.bf16.msra.mxu0 %v10992_v2  ;;  %4963 = vmatpush1.bf16.msra.mxu1 %v10998_v29 }
 0xacb   :  { %4923 = vmatprep.subr.bf16.mxu0 %v11004_v58  ;;  %4964 = vmatprep.subr.bf16.mxu1 %v11010_v22 }
 0xace   :  { %4924 = vmatpush1.bf16.msra.mxu0 %v11016_v32  ;;  %4965 = vmatpush1.bf16.msra.mxu1 %v11022_v57 }
 0xacf   :  { %4925 = vmatprep.subr.bf16.mxu0 %v11028_v63  ;;  %4966 = vmatprep.subr.bf16.mxu1 %v11034_v38 }
 0xad2   :  { %4926 = vmatpush1.bf16.msra.mxu0 %v11040_v52  ;;  %4967 = vmatpush1.bf16.msra.mxu1 %v11046_v15 }
 0xad3   :  { %4927 = vmatprep.subr.bf16.mxu0 %v11052_v10  ;;  %4968 = vmatprep.subr.bf16.mxu1 %v11058_v51 }
 0xad6   :  { %4928 = vmatpush1.bf16.msra.mxu0 %v11064_v35  ;;  %4969 = vmatpush1.bf16.msra.mxu1 %v11070_v1 }
 0xad7   :  { %4929 = vmatprep.subr.bf16.mxu0 %v11076_v55  ;;  %4970 = vmatprep.subr.bf16.mxu1 %v11082_v3 }
 0xada   :  { %4930 = vmatpush1.bf16.msra.mxu0 %v11088_v6  ;;  %4971 = vmatpush1.bf16.msra.mxu1 %v11094_v9 }
 0xadb   :  { %4931 = vmatprep.subr.bf16.mxu0 %v11100_v5  ;;  %4972 = vmatprep.subr.bf16.mxu1 %v11106_v49 }
 0xade   :  { %4932 = vmatpush1.bf16.msra.mxu0 %v11112_v23  ;;  %4973 = vmatpush1.bf16.msra.mxu1 %v11118_v26 }
 0xadf   :  { %4933 = vmatprep.subr.bf16.mxu0 %v11124_v42  ;;  %4974 = vmatprep.subr.bf16.mxu1 %v11130_v36 }
 0xae2   :  { %4934 = vmatpush1.bf16.msra.mxu0 %v11136_v61  ;;  %4975 = vmatpush1.bf16.msra.mxu1 %v11142_v25 }
 0xae3   :  { %5006 = vmatprep.subr.bf16.mxu0 %v11148_v11  ;;  %5047 = vmatprep.subr.bf16.mxu1 %v11154_v27 }
 0xb65   :  { %v4731_v33 = vpop.f32.mrf.mxu0  ;;  %v4772_v13 = vpop.f32.mrf.mxu1 }
 0xb66   :  { %v4779_v31 = vadd.f32 %v4731_v33, %v12638_v45  ;;  %v4781_v28 = vadd.f32 %v4772_v13, %v12640_v41  ;;  %v12642_v33 = vld [vmem:[#allocation66_spill] sm:$0xff] }
 0xb67   :  { %v4733_v46 = vpop.f32.mrf.mxu0  ;;  %v4774_v60 = vpop.f32.mrf.mxu1 }
 0xb68   :  { %v6645_v14 = vmul.f32 -1.442695, %v4779_v31  ;;  %v4780_v8 = vadd.f32 %v4733_v46, %v12639_v54  ;;  %v6647_v43 = vmul.f32 -1.442695, %v4781_v28  ;;  %v4782_v30 = vadd.f32 %v4774_v60, %v12641_v18  ;;  %v12643_v60 = vld [vmem:[#allocation67_spill] sm:$0xff] }
 0xb69   :  { %v4735_v44 = vpop.f32.mrf.mxu0  ;;  %v4776_v53 = vpop.f32.mrf.mxu1 }
 0xb6a   :  { %7305 = vpow2.f32 %v6645_v14  ;;  %v6646_v47 = vmul.f32 -1.442695, %v4780_v8 }
 0xb6b   :  { %v4736_v40 = vpop.f32.mrf.mxu0  ;;  %v4777_v62 = vpop.f32.mrf.mxu1 }
 0xb6c   :  { %7307 = vpow2.f32 %v6646_v47 }
 0xb6d   :  { %7309 = vpow2.f32 %v6647_v43 }
 0xb6e   :  { %7311 = vtanh.f32 %v4782_v30  ;;  %v12644_v30 = vld [vmem:[#allocation68_spill] sm:$0xff] }
 0xb77   :  { %v7306_v24 = vpop.eup %7305 }
 0xb78   :  { %v4879_v4 = vadd.f32 1.0, %v7306_v24 }
 0xb79   :  { %v7308_v39 = vpop.eup %7307 }
 0xb7a   :  { %7313 = vrcp.f32 %v4879_v4  ;;  %v4880_v16 = vadd.f32 1.0, %v7308_v39  ;;  %v7310_v59 = vpop.eup %7309  ;;  %v12645_v39 = vld [vmem:[#allocation69_spill] sm:$0xff] }
 0xb7b   :  { %v7312_v12 = vpop.eup %7311  ;;  %v4881_v53 = vadd.f32 1.0, %v7310_v59 }
 0xb7c   :  { %7315 = vrcp.f32 %v4880_v16 }
 0xb85   :  { %v4818_v17 = vpop.f32.mrf.mxu0  ;;  %v4859_v21 = vpop.f32.mrf.mxu1 }
 0xb86   :  { %v4866_v45 = vadd.f32 %v4818_v17, %v12642_v33  ;;  %v4868_v24 = vadd.f32 %v4859_v21, %v12644_v30  ;;  %v11172_v21 = vld [vmem:[%s11970_s5 + $0x1e0] ss:$16 sps:$4 sm:$0xff]  }
 0xb87   :  { %v7314_v31 = vpop.eup %7313  ;;  %v4820_v46 = vpop.f32.mrf.mxu0  ;;  %v11222_v30 = vld [vmem:[%s11970_s5 + $0x1a0] ss:$16 sps:$4 sm:$0xff]  }
 0xb88   :  { %v4861_v13 = vpop.f32.mrf.mxu1  ;;  %v4890_v14 = vmul.f32 %v7314_v31, %v7312_v12  ;;  %v6648_v54 = vmul.f32 -1.442695, %v4866_v45  ;;  %v4867_v8 = vadd.f32 %v4820_v46, %v12643_v60  ;;  %v6650_v4 = vmul.f32 -1.442695, %v4868_v24  ;;  %v11228_v24 = vld [vmem:[%s11970_s5 + $0x1a8] ss:$16 sps:$4 sm:$0xff]  }
 0xb89   :  { %v7316_v44 = vpop.eup %7315  ;;  %v4822_v47 = vpop.f32.mrf.mxu0  ;;  %v4869_v16 = vadd.f32 %v4861_v13, %v12645_v39  ;;  %v11178_v13 = vld [vmem:[%s11970_s5 + $0x1e8] ss:$16 sps:$4 sm:$0xff]   ;;  %v11235_v39 = vld [vmem:[%s11970_s5 + $0x184] ss:$16 sps:$4 sm:$0xff]  }
 0xb8a   :  { %v4863_v40 = vpop.f32.mrf.mxu1  ;;  %v4889_v62 = vmul.f32 %v7316_v44, %v10910_v48  ;;  %7317 = vpow2.f32 %v6648_v54  ;;  %v6649_v41 = vmul.f32 -1.442695, %v4867_v8  ;;  %v11190_v54 = vld [vmem:[%s11970_s5 + $0x1cc] ss:$16 sps:$4 sm:$0xff]   ;;  %v11198_v8 = vld [vmem:[%s11970_s5 + $0x1c0] ss:$16 sps:$4 sm:$0xff]  }
 0xb8b   :  { %v4823_v28 = vpop.f32.mrf.mxu0  ;;  %v11204_v44 = vld [vmem:[%s11970_s5 + $0x1c8] ss:$16 sps:$4 sm:$0xff]   ;;  %v11210_v47 = vld [vmem:[%s11970_s5 + $0x1a4] ss:$16 sps:$4 sm:$0xff]   ;;  %v11216_v40 = vld [vmem:[%s11970_s5 + $0x1ac] ss:$16 sps:$4 sm:$0xff]  }
 0xb8c   :  { %v4864_v43 = vpop.f32.mrf.mxu1  ;;  %v11164_v18 = vadd.f32 %v4890_v14, %v4889_v62  ;;  %7319 = vpow2.f32 %v6649_v41  ;;  %v11184_v14 = vld [vmem:[%s11970_s5 + $0x1c4] ss:$16 sps:$4 sm:$0xff]  }
 0xb8d   :  { %7321 = vrcp.f32 %v4881_v53 }
 0xb8e   :  { %7323 = vtanh.f32 %v11164_v18 }
 0xb8f   :  { %7325 = vpow2.f32 %v6650_v4 }
 0xb90   :  { %7327 = vtanh.f32 %v4869_v16  ;;  %v11241_v16 = vld [vmem:[%s11970_s5 + $0x18c] ss:$16 sps:$4 sm:$0xff]  }
 0xb97   :  { %v7318_v59 = vpop.eup %7317 }
 0xb98   :  { %v4903_v17 = vadd.f32 1.0, %v7318_v59 }
 0xb99   :  { %v7320_v12 = vpop.eup %7319 }
 0xb9a   :  { %v7322_v48 = vpop.eup %7321  ;;  %7329 = vrcp.f32 %v4903_v17  ;;  %v4904_v33 = vadd.f32 1.0, %v7320_v12  ;;  %v11255_v17 = vld [vmem:[%s11970_s5 + $0x188] ss:$16 sps:$4 sm:$0xff]   ;;  %v11262_v12 = vld [vmem:[%s11970_s5 + $0x164] ss:$16 sps:$4 sm:$0xff]  }
 0xb9b   :  { %v7324_v45 = vpop.eup %7323 }
 0xb9c   :  { %7331 = vrcp.f32 %v4904_v33  ;;  %v4893_v31 = vmul.f32 %v7324_v45, %v7322_v48  ;;  %v7326_v60 = vpop.eup %7325  ;;  %v11268_v48 = vld [vmem:[%s11970_s5 + $0x16c] ss:$16 sps:$4 sm:$0xff]   ;;  %v11274_v33 = vld [vmem:[%s11970_s5 + $0x160] ss:$16 sps:$4 sm:$0xff]   ;;  %v11280_v45 = vld [vmem:[%s11970_s5 + $0x168] ss:$16 sps:$4 sm:$0xff]  }
 0xb9d   :  { %v7328_v53 = vpop.eup %7327  ;;  %v4905_v43 = vadd.f32 1.0, %v7326_v60  ;;  %v11298_v60 = vld [vmem:[%s11970_s5 + $0x140] ss:$16 sps:$4 sm:$0xff]  }
 0xb9e   :  { %v4918_v46 = vpack.c.bf16 %v4893_v31, %v4893_v31  ;;  %v11286_v31 = vld [vmem:[%s11970_s5 + $0x144] ss:$16 sps:$4 sm:$0xff]   ;;  %12646 = vst [vmem:[#allocation93_spill] sm:$0xff] %v11298_v60 }
 0xb9f   :  { %7333 = vrcp.f32 %v4905_v43  ;;  %v11328_v43 = vld [vmem:[%s11970_s5 + $0x128] ss:$16 sps:$4 sm:$0xff]  }
 0xba0   :  { %4952 = vmatmul.mubr.bf16.vlgmr.msra.gmra.mxu0 %v4918_v46  ;;  %4993 = vmatmul.mubr.bf16.vlgmr.msra.gmra.mxu1 %v4918_v46  ;;  %v11292_v46 = vld [vmem:[%s11970_s5 + $0x14c] ss:$16 sps:$4 sm:$0xff]   ;;  %12651 = vst [vmem:[#allocation51_spill] sm:$0xff] %v11328_v43 }
 0xba1   :  { %5007 = vmatpush1.bf16.msra.mxu0 %v11172_v21  ;;  %5048 = vmatpush1.bf16.msra.mxu1 %v11178_v13 }
 0xba2   :  { %5008 = vmatprep.subr.bf16.mxu0 %v11184_v14  ;;  %5049 = vmatprep.subr.bf16.mxu1 %v11190_v54 }
 0xba3   :  { %5038 = vmatprep.mubr.bf16.mxu0 %v12214_v0  ;;  %5079 = vmatprep.mubr.bf16.mxu1 %v12214_v0 }
 0xba5   :  { %5009 = vmatpush1.bf16.msra.mxu0 %v11198_v8  ;;  %5050 = vmatpush1.bf16.msra.mxu1 %v11204_v44 }
 0xba6   :  { %5010 = vmatprep.subr.bf16.mxu0 %v11210_v47  ;;  %5051 = vmatprep.subr.bf16.mxu1 %v11216_v40 }
 0xba7   :  { %v7330_v62 = vpop.eup %7329 }
 0xba8   :  { %v4914_v41 = vmul.f32 %v7330_v62, %v7328_v53  ;;  %v11304_v53 = vld [vmem:[%s11970_s5 + $0x148] ss:$16 sps:$4 sm:$0xff]   ;;  %v11310_v62 = vld [vmem:[%s11970_s5 + $0x124] ss:$16 sps:$4 sm:$0xff]  }
 0xba9   :  { %v7332_v28 = vpop.eup %7331  ;;  %5011 = vmatpush1.bf16.msra.mxu0 %v11222_v30  ;;  %5052 = vmatpush1.bf16.msra.mxu1 %v11228_v24  ;;  %12647 = vst [vmem:[#allocation39_spill] sm:$0xff] %v11304_v53  ;;  %12648 = vst [vmem:[#allocation48_spill] sm:$0xff] %v11310_v62 }
 0xbaa   :  { %v4913_v4 = vmul.f32 %v7332_v28, %v10930_v34  ;;  %5012 = vmatprep.subr.bf16.mxu0 %v11235_v39  ;;  %5053 = vmatprep.subr.bf16.mxu1 %v11241_v16  ;;  %v11249_v34 = vld [vmem:[%s11970_s5 + $0x180] ss:$16 sps:$4 sm:$0xff]  }
 0xbab   :  { %v11322_v28 = vld [vmem:[%s11970_s5 + $0x120] ss:$16 sps:$4 sm:$0xff]  }
 0xbac   :  { %v11244_v59 = vadd.f32 %v4914_v41, %v4913_v4  ;;  %v11316_v41 = vld [vmem:[%s11970_s5 + $0x12c] ss:$16 sps:$4 sm:$0xff]   ;;  %12650 = vst [vmem:[#allocation49_spill] sm:$0xff] %v11322_v28  ;;  %v7334_v4 = vpop.eup %7333 }
 0xbad   :  { %5013 = vmatpush1.bf16.msra.mxu0 %v11249_v34  ;;  %5054 = vmatpush1.bf16.msra.mxu1 %v11255_v17  ;;  %12649 = vst [vmem:[#allocation50_spill] sm:$0xff] %v11316_v41 }
 0xbae   :  { %7335 = vtanh.f32 %v11244_v59  ;;  %5014 = vmatprep.subr.bf16.mxu0 %v11262_v12  ;;  %5055 = vmatprep.subr.bf16.mxu1 %v11268_v48 }
 0xbb1   :  { %5015 = vmatpush1.bf16.msra.mxu0 %v11274_v33  ;;  %5056 = vmatpush1.bf16.msra.mxu1 %v11280_v45 }
 0xbb2   :  { %5016 = vmatprep.subr.bf16.mxu0 %v11286_v31  ;;  %5057 = vmatprep.subr.bf16.mxu1 %v11292_v46 }
 0xbb5   :  { %5017 = vmatpush1.bf16.msra.mxu0 %v11298_v60  ;;  %5058 = vmatpush1.bf16.msra.mxu1 %v11304_v53 }
 0xbb6   :  { %5018 = vmatprep.subr.bf16.mxu0 %v11310_v62  ;;  %5059 = vmatprep.subr.bf16.mxu1 %v11316_v41  ;;  %v11334_v62 = vld [vmem:[%s11970_s5 + $0x104] ss:$16 sps:$4 sm:$0xff]   ;;  %v11340_v41 = vld [vmem:[%s11970_s5 + $0x10c] ss:$16 sps:$4 sm:$0xff]  }
 0xbb7   :  { %12652 = vst [vmem:[#allocation64_spill] sm:$0xff] %v11334_v62 }
 0xbb9   :  { %5019 = vmatpush1.bf16.msra.mxu0 %v11322_v28  ;;  %5060 = vmatpush1.bf16.msra.mxu1 %v11328_v43  ;;  %v11346_v43 = vld [vmem:[%s11970_s5 + $0x100] ss:$16 sps:$4 sm:$0xff]  }
 0xbba   :  { %5020 = vmatprep.subr.bf16.mxu0 %v11334_v62  ;;  %5061 = vmatprep.subr.bf16.mxu1 %v11340_v41  ;;  %v11352_v62 = vld [vmem:[%s11970_s5 + $0x108] ss:$16 sps:$4 sm:$0xff]  }
 0xbbb   :  { %v7336_v28 = vpop.eup %7335 }
 0xbbc   :  { %v4917_v53 = vmul.f32 %v7336_v28, %v7334_v4  ;;  %v12653_v28 = vld [vmem:[#allocation13_spill] sm:$0xff] }
 0xbbd   :  { %5021 = vmatpush1.bf16.msra.mxu0 %v11346_v43  ;;  %5062 = vmatpush1.bf16.msra.mxu1 %v11352_v62 }
 0xbbe   :  { %v5005_v60 = vpack.c.bf16 %v4917_v53, %v4917_v53  ;;  %5141 = vmatprep.subr.bf16.mxu0 %v10954_v7  ;;  %5182 = vmatprep.subr.bf16.mxu1 %v10960_v20 }
 0xbc0   :  { %5039 = vmatmul.mubr.bf16.vlgmr.msra.gmra.mxu0 %v5005_v60  ;;  %5080 = vmatmul.mubr.bf16.vlgmr.msra.gmra.mxu1 %v5005_v60 }
 0xbc1   :  { %5142 = vmatpush1.bf16.msra.mxu0 %v10966_v50  ;;  %5183 = vmatpush1.bf16.msra.mxu1 %v10972_v56 }
 0xbc2   :  { %5143 = vmatprep.subr.bf16.mxu0 %v10978_v19  ;;  %5184 = vmatprep.subr.bf16.mxu1 %v10984_v37 }
 0xbc3   :  { %5173 = vmatprep.mubr.bf16.mxu0 %v12214_v0  ;;  %5214 = vmatprep.mubr.bf16.mxu1 %v12214_v0 }
 0xbc5   :  { %5144 = vmatpush1.bf16.msra.mxu0 %v10992_v2  ;;  %5185 = vmatpush1.bf16.msra.mxu1 %v10998_v29 }
 0xbc6   :  { %5145 = vmatprep.subr.bf16.mxu0 %v11004_v58  ;;  %5186 = vmatprep.subr.bf16.mxu1 %v11010_v22 }
 0xbc9   :  { %5146 = vmatpush1.bf16.msra.mxu0 %v11016_v32  ;;  %5187 = vmatpush1.bf16.msra.mxu1 %v11022_v57 }
 0xbca   :  { %5147 = vmatprep.subr.bf16.mxu0 %v11028_v63  ;;  %5188 = vmatprep.subr.bf16.mxu1 %v11034_v38 }
 0xbcd   :  { %5148 = vmatpush1.bf16.msra.mxu0 %v11040_v52  ;;  %5189 = vmatpush1.bf16.msra.mxu1 %v11046_v15 }
 0xbce   :  { %5149 = vmatprep.subr.bf16.mxu0 %v11052_v10  ;;  %5190 = vmatprep.subr.bf16.mxu1 %v11058_v51 }
 0xbd1   :  { %5150 = vmatpush1.bf16.msra.mxu0 %v11064_v35  ;;  %5191 = vmatpush1.bf16.msra.mxu1 %v11070_v1 }
 0xbd2   :  { %5151 = vmatprep.subr.bf16.mxu0 %v11076_v55  ;;  %5192 = vmatprep.subr.bf16.mxu1 %v11082_v3 }
 0xbd5   :  { %5152 = vmatpush1.bf16.msra.mxu0 %v11088_v6  ;;  %5193 = vmatpush1.bf16.msra.mxu1 %v11094_v9 }
 0xbd6   :  { %5153 = vmatprep.subr.bf16.mxu0 %v11100_v5  ;;  %5194 = vmatprep.subr.bf16.mxu1 %v11106_v49 }
 0xbd9   :  { %5154 = vmatpush1.bf16.msra.mxu0 %v11112_v23  ;;  %5195 = vmatpush1.bf16.msra.mxu1 %v11118_v26  ;;  %v12654_v26 = vld [vmem:[#allocation15_spill] sm:$0xff] }
 0xbda   :  { %5155 = vmatprep.subr.bf16.mxu0 %v11124_v42  ;;  %5196 = vmatprep.subr.bf16.mxu1 %v11130_v36 }
 0xbdd   :  { %5156 = vmatpush1.bf16.msra.mxu0 %v11136_v61  ;;  %5197 = vmatpush1.bf16.msra.mxu1 %v11142_v25  ;;  %v12655_v25 = vld [vmem:[#allocation14_spill] sm:$0xff] }
 0xbde   :  { %5228 = vmatprep.subr.bf16.mxu0 %v11148_v11  ;;  %5269 = vmatprep.subr.bf16.mxu1 %v11154_v27  ;;  %v12656_v27 = vld [vmem:[#allocation16_spill] sm:$0xff] }
 0xc60   :  { %v4953_v60 = vpop.f32.mrf.mxu0  ;;  %v4994_v53 = vpop.f32.mrf.mxu1 }
 0xc61   :  { %v5001_v4 = vadd.f32 %v4953_v60, %v12653_v28  ;;  %v5003_v11 = vadd.f32 %v4994_v53, %v12655_v25 }
 0xc62   :  { %v4955_v49 = vpop.f32.mrf.mxu0  ;;  %v4996_v23 = vpop.f32.mrf.mxu1 }
 0xc63   :  { %v6651_v5 = vmul.f32 -1.442695, %v5001_v4  ;;  %v5002_v9 = vadd.f32 %v4955_v49, %v12654_v26  ;;  %v6653_v55 = vmul.f32 -1.442695, %v5003_v11  ;;  %v5004_v1 = vadd.f32 %v4996_v23, %v12656_v27  ;;  %v12657_v26 = vld [vmem:[#allocation62_spill] sm:$0xff]  ;;  %v12658_v23 = vld [vmem:[#allocation60_spill] sm:$0xff] }
 0xc64   :  { %v4957_v42 = vpop.f32.mrf.mxu0  ;;  %v4998_v6 = vpop.f32.mrf.mxu1 }
 0xc65   :  { %7337 = vpow2.f32 %v6651_v5  ;;  %v6652_v36 = vmul.f32 -1.442695, %v5002_v9 }
 0xc66   :  { %v4958_v61 = vpop.f32.mrf.mxu0  ;;  %v4999_v3 = vpop.f32.mrf.mxu1 }
 0xc67   :  { %7339 = vpow2.f32 %v6652_v36 }
 0xc68   :  { %7341 = vpow2.f32 %v6653_v55 }
 0xc69   :  { %7343 = vtanh.f32 %v5004_v1 }
 0xc72   :  { %v7338_v35 = vpop.eup %7337 }
 0xc73   :  { %v5101_v51 = vadd.f32 1.0, %v7338_v35 }
 0xc74   :  { %v7340_v60 = vpop.eup %7339 }
 0xc75   :  { %7345 = vrcp.f32 %v5101_v51  ;;  %v5102_v28 = vadd.f32 1.0, %v7340_v60  ;;  %v7342_v49 = vpop.eup %7341 }
 0xc76   :  { %v7344_v9 = vpop.eup %7343  ;;  %v5103_v55 = vadd.f32 1.0, %v7342_v49 }
 0xc77   :  { %7347 = vrcp.f32 %v5102_v28 }
 0xc80   :  { %v5040_v6 = vpop.f32.mrf.mxu0  ;;  %v5081_v5 = vpop.f32.mrf.mxu1 }
 0xc81   :  { %v5088_v3 = vadd.f32 %v5040_v6, %v12657_v26  ;;  %v12659_v6 = vld [vmem:[#allocation63_spill] sm:$0xff] }
 0xc82   :  { %v7346_v42 = vpop.eup %7345  ;;  %v5042_v36 = vpop.f32.mrf.mxu0 }
 0xc83   :  { %v5083_v61 = vpop.f32.mrf.mxu1  ;;  %v5112_v25 = vmul.f32 %v7346_v42, %v7344_v9  ;;  %v6654_v11 = vmul.f32 -1.442695, %v5088_v3  ;;  %v5089_v27 = vadd.f32 %v5042_v36, %v12658_v23  ;;  %v5090_v9 = vadd.f32 %v5081_v5, %v12659_v6  ;;  %v12660_v3 = vld [vmem:[#allocation61_spill] sm:$0xff]  ;;  %v12663_v6 = vld [vmem:[#allocation48_spill] sm:$0xff] }
 0xc84   :  { %v7348_v35 = vpop.eup %7347  ;;  %v5044_v53 = vpop.f32.mrf.mxu0  ;;  %v5091_v42 = vadd.f32 %v5083_v61, %v12660_v3  ;;  %v12666_v3 = vld [vmem:[#allocation51_spill] sm:$0xff] }
 0xc85   :  { %v5085_v1 = vpop.f32.mrf.mxu1  ;;  %v5111_v51 = vmul.f32 %v7348_v35, %v11164_v18  ;;  %7349 = vpow2.f32 %v6654_v11  ;;  %v6655_v4 = vmul.f32 -1.442695, %v5089_v27  ;;  %v6656_v26 = vmul.f32 -1.442695, %v5090_v9  ;;  %v12664_v9 = vld [vmem:[#allocation50_spill] sm:$0xff] }
 0xc86   :  { %v5045_v60 = vpop.f32.mrf.mxu0 }
 0xc87   :  { %v5086_v28 = vpop.f32.mrf.mxu1  ;;  %v11398_v10 = vadd.f32 %v5112_v25, %v5111_v51  ;;  %7351 = vpow2.f32 %v6655_v4 }
 0xc88   :  { %7353 = vrcp.f32 %v5103_v55  ;;  %v12662_v28 = vld [vmem:[#allocation39_spill] sm:$0xff] }
 0xc89   :  { %7355 = vtanh.f32 %v11398_v10 }
 0xc8a   :  { %7357 = vpow2.f32 %v6656_v26  ;;  %v12665_v26 = vld [vmem:[#allocation49_spill] sm:$0xff] }
 0xc8b   :  { %7359 = vtanh.f32 %v5091_v42 }
 0xc92   :  { %v7350_v49 = vpop.eup %7349 }
 0xc93   :  { %v5125_v36 = vadd.f32 1.0, %v7350_v49  ;;  %v12667_v49 = vld [vmem:[#allocation64_spill] sm:$0xff] }
 0xc94   :  { %v7352_v23 = vpop.eup %7351 }
 0xc95   :  { %v7354_v18 = vpop.eup %7353  ;;  %7361 = vrcp.f32 %v5125_v36  ;;  %v5126_v11 = vadd.f32 1.0, %v7352_v23 }
 0xc96   :  { %v7356_v27 = vpop.eup %7355 }
 0xc97   :  { %7363 = vrcp.f32 %v5126_v11  ;;  %v5115_v25 = vmul.f32 %v7356_v27, %v7354_v18  ;;  %v7358_v5 = vpop.eup %7357  ;;  %v12668_v11 = vld [vmem:[#allocation86_spill] sm:$0xff]  ;;  %v12669_v27 = vld [vmem:[#allocation87_spill] sm:$0xff] }
 0xc98   :  { %v7360_v61 = vpop.eup %7359  ;;  %v5127_v51 = vadd.f32 1.0, %v7358_v5  ;;  %v12672_v5 = vld [vmem:[#allocation44_spill] sm:$0xff] }
 0xc99   :  { %v5140_v35 = vpack.c.bf16 %v5115_v25, %v5115_v25  ;;  %v12670_v25 = vld [vmem:[#allocation89_spill] sm:$0xff] }
 0xc9a   :  { %7365 = vrcp.f32 %v5127_v51  ;;  %v12677_v51 = vld [vmem:[#allocation83_spill] sm:$0xff] }
 0xc9b   :  { %5174 = vmatmul.mubr.bf16.vlgmr.msra.gmra.mxu0 %v5140_v35  ;;  %5215 = vmatmul.mubr.bf16.vlgmr.msra.gmra.mxu1 %v5140_v35  ;;  %v12671_v35 = vld [vmem:[#allocation46_spill] sm:$0xff] }
 0xc9c   :  { %5229 = vmatpush1.bf16.msra.mxu0 %v11172_v21  ;;  %5270 = vmatpush1.bf16.msra.mxu1 %v11178_v13 }
 0xc9d   :  { %5230 = vmatprep.subr.bf16.mxu0 %v11184_v14  ;;  %5271 = vmatprep.subr.bf16.mxu1 %v11190_v54 }
 0xc9e   :  { %5260 = vmatprep.mubr.bf16.mxu0 %v12214_v0  ;;  %5301 = vmatprep.mubr.bf16.mxu1 %v12214_v0 }
 0xca0   :  { %5231 = vmatpush1.bf16.msra.mxu0 %v11198_v8  ;;  %5272 = vmatpush1.bf16.msra.mxu1 %v11204_v44 }
 0xca1   :  { %5232 = vmatprep.subr.bf16.mxu0 %v11210_v47  ;;  %5273 = vmatprep.subr.bf16.mxu1 %v11216_v40 }
 0xca2   :  { %v7362_v55 = vpop.eup %7361 }
 0xca3   :  { %v5136_v53 = vmul.f32 %v7362_v55, %v7360_v61  ;;  %v12673_v61 = vld [vmem:[#allocation45_spill] sm:$0xff]  ;;  %v12674_v55 = vld [vmem:[#allocation47_spill] sm:$0xff] }
 0xca4   :  { %v7364_v1 = vpop.eup %7363  ;;  %5233 = vmatpush1.bf16.msra.mxu0 %v11222_v30  ;;  %5274 = vmatpush1.bf16.msra.mxu1 %v11228_v24 }
 0xca5   :  { %v5135_v4 = vmul.f32 %v7364_v1, %v11244_v59  ;;  %5234 = vmatprep.subr.bf16.mxu0 %v11235_v39  ;;  %5275 = vmatprep.subr.bf16.mxu1 %v11241_v16  ;;  %v12661_v59 = vld [vmem:[#allocation93_spill] sm:$0xff]  ;;  %v12676_v1 = vld [vmem:[#allocation84_spill] sm:$0xff] }
 0xca7   :  { %v11418_v60 = vadd.f32 %v5136_v53, %v5135_v4  ;;  %v7366_v42 = vpop.eup %7365  ;;  %v12675_v53 = vld [vmem:[#allocation82_spill] sm:$0xff]  ;;  %v12678_v4 = vld [vmem:[#allocation85_spill] sm:$0xff] }
 0xca8   :  { %5235 = vmatpush1.bf16.msra.mxu0 %v11249_v34  ;;  %5276 = vmatpush1.bf16.msra.mxu1 %v11255_v17 }
 0xca9   :  { %7367 = vtanh.f32 %v11418_v60  ;;  %5236 = vmatprep.subr.bf16.mxu0 %v11262_v12  ;;  %5277 = vmatprep.subr.bf16.mxu1 %v11268_v48 }
 0xcac   :  { %5237 = vmatpush1.bf16.msra.mxu0 %v11274_v33  ;;  %5278 = vmatpush1.bf16.msra.mxu1 %v11280_v45 }
 0xcad   :  { %5238 = vmatprep.subr.bf16.mxu0 %v11286_v31  ;;  %5279 = vmatprep.subr.bf16.mxu1 %v11292_v46 }
 0xcb0   :  { %5239 = vmatpush1.bf16.msra.mxu0 %v12661_v59  ;;  %5280 = vmatpush1.bf16.msra.mxu1 %v12662_v28 }
 0xcb1   :  { %5240 = vmatprep.subr.bf16.mxu0 %v12663_v6  ;;  %5281 = vmatprep.subr.bf16.mxu1 %v12664_v9 }
 0xcb4   :  { %5241 = vmatpush1.bf16.msra.mxu0 %v12665_v26  ;;  %5282 = vmatpush1.bf16.msra.mxu1 %v12666_v3 }
 0xcb5   :  { %5242 = vmatprep.subr.bf16.mxu0 %v12667_v49  ;;  %5283 = vmatprep.subr.bf16.mxu1 %v11340_v41 }
 0xcb6   :  { %v7368_v36 = vpop.eup %7367 }
 0xcb7   :  { %v5139_v23 = vmul.f32 %v7368_v36, %v7366_v42  ;;  %v12679_v42 = vld [vmem:[#allocation36_spill] sm:$0xff]  ;;  %v12680_v36 = vld [vmem:[#allocation34_spill] sm:$0xff] }
 0xcb8   :  { %5243 = vmatpush1.bf16.msra.mxu0 %v11346_v43  ;;  %5284 = vmatpush1.bf16.msra.mxu1 %v11352_v62 }
 0xcb9   :  { %v5227_v18 = vpack.c.bf16 %v5139_v23, %v5139_v23  ;;  %5363 = vmatprep.subr.bf16.mxu0 %v10954_v7  ;;  %5404 = vmatprep.subr.bf16.mxu1 %v10960_v20  ;;  %v12681_v23 = vld [vmem:[#allocation35_spill] sm:$0xff] }
 0xcbb   :  { %5261 = vmatmul.mubr.bf16.vlgmr.msra.gmra.mxu0 %v5227_v18  ;;  %5302 = vmatmul.mubr.bf16.vlgmr.msra.gmra.mxu1 %v5227_v18  ;;  %v12682_v18 = vld [vmem:[#allocation37_spill] sm:$0xff] }
 0xcbc   :  { %5364 = vmatpush1.bf16.msra.mxu0 %v10966_v50  ;;  %5405 = vmatpush1.bf16.msra.mxu1 %v10972_v56 }
 0xcbd   :  { %5365 = vmatprep.subr.bf16.mxu0 %v10978_v19  ;;  %5406 = vmatprep.subr.bf16.mxu1 %v10984_v37 }
 0xcbe   :  { %5395 = vmatprep.mubr.bf16.mxu0 %v12214_v0  ;;  %5436 = vmatprep.mubr.bf16.mxu1 %v12214_v0 }
 0xcc0   :  { %5366 = vmatpush1.bf16.msra.mxu0 %v10992_v2  ;;  %5407 = vmatpush1.bf16.msra.mxu1 %v10998_v29 }
 0xcc1   :  { %5367 = vmatprep.subr.bf16.mxu0 %v11004_v58  ;;  %5408 = vmatprep.subr.bf16.mxu1 %v11010_v22 }
 0xcc4   :  { %5368 = vmatpush1.bf16.msra.mxu0 %v11016_v32  ;;  %5409 = vmatpush1.bf16.msra.mxu1 %v11022_v57 }
 0xcc5   :  { %5369 = vmatprep.subr.bf16.mxu0 %v11028_v63  ;;  %5410 = vmatprep.subr.bf16.mxu1 %v11034_v38 }
 0xcc8   :  { %5370 = vmatpush1.bf16.msra.mxu0 %v11040_v52  ;;  %5411 = vmatpush1.bf16.msra.mxu1 %v11046_v15 }
 0xcc9   :  { %5371 = vmatprep.subr.bf16.mxu0 %v12668_v11  ;;  %5412 = vmatprep.subr.bf16.mxu1 %v12669_v27 }
 0xccc   :  { %5372 = vmatpush1.bf16.msra.mxu0 %v12670_v25  ;;  %5413 = vmatpush1.bf16.msra.mxu1 %v12671_v35  ;;  %v12686_v35 = vld [vmem:[#allocation17_spill] sm:$0xff] }
 0xccd   :  { %5373 = vmatprep.subr.bf16.mxu0 %v12672_v5  ;;  %5414 = vmatprep.subr.bf16.mxu1 %v12673_v61  ;;  %v12683_v5 = vld [vmem:[#allocation90_spill] sm:$0xff]  ;;  %v12684_v61 = vld [vmem:[#allocation92_spill] sm:$0xff] }
 0xcd0   :  { %5374 = vmatpush1.bf16.msra.mxu0 %v12674_v55  ;;  %5415 = vmatpush1.bf16.msra.mxu1 %v12675_v53  ;;  %v12685_v55 = vld [vmem:[#allocation91_spill] sm:$0xff] }
 0xcd1   :  { %5375 = vmatprep.subr.bf16.mxu0 %v12676_v1  ;;  %5416 = vmatprep.subr.bf16.mxu1 %v12677_v51 }
 0xcd4   :  { %5376 = vmatpush1.bf16.msra.mxu0 %v12678_v4  ;;  %5417 = vmatpush1.bf16.msra.mxu1 %v12679_v42  ;;  %v12687_v42 = vld [vmem:[#allocation19_spill] sm:$0xff] }
 0xcd5   :  { %5377 = vmatprep.subr.bf16.mxu0 %v12680_v36  ;;  %5418 = vmatprep.subr.bf16.mxu1 %v12681_v23 }
 0xcd8   :  { %5378 = vmatpush1.bf16.msra.mxu0 %v12682_v18  ;;  %5419 = vmatpush1.bf16.msra.mxu1 %v12683_v5  ;;  %v12688_v5 = vld [vmem:[#allocation18_spill] sm:$0xff] }
 0xcd9   :  { %5450 = vmatprep.subr.bf16.mxu0 %v12684_v61  ;;  %5491 = vmatprep.subr.bf16.mxu1 %v12685_v55  ;;  %v12689_v55 = vld [vmem:[#allocation20_spill] sm:$0xff] }
 0xd5b   :  { %v5175_v53 = vpop.f32.mrf.mxu0  ;;  %v5216_v1 = vpop.f32.mrf.mxu1 }
 0xd5c   :  { %v5223_v51 = vadd.f32 %v5175_v53, %v12686_v35  ;;  %v5225_v61 = vadd.f32 %v5216_v1, %v12688_v5 }
 0xd5d   :  { %v5177_v25 = vpop.f32.mrf.mxu0  ;;  %v5218_v4 = vpop.f32.mrf.mxu1 }
 0xd5e   :  { %v6657_v27 = vmul.f32 -1.442695, %v5223_v51  ;;  %v5224_v11 = vadd.f32 %v5177_v25, %v12687_v42  ;;  %v6659_v38 = vmul.f32 -1.442695, %v5225_v61  ;;  %v5226_v63 = vadd.f32 %v5218_v4, %v12689_v55  ;;  %v12690_v51 = vld [vmem:[#allocation72_spill] sm:$0xff]  ;;  %v12691_v55 = vld [vmem:[#allocation71_spill] sm:$0xff] }
 0xd5f   :  { %v5179_v36 = vpop.f32.mrf.mxu0  ;;  %v5220_v15 = vpop.f32.mrf.mxu1 }
 0xd60   :  { %7369 = vpow2.f32 %v6657_v27  ;;  %v6658_v23 = vmul.f32 -1.442695, %v5224_v11 }
 0xd61   :  { %v5180_v18 = vpop.f32.mrf.mxu0  ;;  %v5221_v52 = vpop.f32.mrf.mxu1 }
 0xd62   :  { %7371 = vpow2.f32 %v6658_v23 }
 0xd63   :  { %7373 = vpow2.f32 %v6659_v38 }
 0xd64   :  { %7375 = vtanh.f32 %v5226_v63 }
 0xd6d   :  { %v7370_v57 = vpop.eup %7369 }
 0xd6e   :  { %v5323_v32 = vadd.f32 1.0, %v7370_v57 }
 0xd6f   :  { %v7372_v35 = vpop.eup %7371 }
 0xd70   :  { %7377 = vrcp.f32 %v5323_v32  ;;  %v5324_v53 = vadd.f32 1.0, %v7372_v35  ;;  %v7374_v25 = vpop.eup %7373 }
 0xd71   :  { %v7376_v11 = vpop.eup %7375  ;;  %v5325_v38 = vadd.f32 1.0, %v7374_v25 }
 0xd72   :  { %7379 = vrcp.f32 %v5324_v53 }
 0xd7b   :  { %v5262_v15 = vpop.f32.mrf.mxu0  ;;  %v5303_v27 = vpop.f32.mrf.mxu1 }
 0xd7c   :  { %v5310_v52 = vadd.f32 %v5262_v15, %v12690_v51  ;;  %v12692_v15 = vld [vmem:[#allocation70_spill] sm:$0xff] }
 0xd7d   :  { %v7378_v42 = vpop.eup %7377  ;;  %v5264_v36 = vpop.f32.mrf.mxu0 }
 0xd7e   :  { %v5305_v5 = vpop.f32.mrf.mxu1  ;;  %v5334_v61 = vmul.f32 %v7378_v42, %v7376_v11  ;;  %v6660_v1 = vmul.f32 -1.442695, %v5310_v52  ;;  %v5311_v4 = vadd.f32 %v5264_v36, %v12691_v55  ;;  %v5312_v11 = vadd.f32 %v5303_v27, %v12692_v15  ;;  %v12693_v52 = vld [vmem:[#allocation73_spill] sm:$0xff] }
 0xd7f   :  { %v7380_v57 = vpop.eup %7379  ;;  %v5266_v23 = vpop.f32.mrf.mxu0  ;;  %v5313_v42 = vadd.f32 %v5305_v5, %v12693_v52  ;;  %v12701_v52 = vld [vmem:[#allocation86_spill] sm:$0xff] }
 0xd80   :  { %v5307_v63 = vpop.f32.mrf.mxu1  ;;  %v5333_v32 = vmul.f32 %v7380_v57, %v11398_v10  ;;  %7381 = vpow2.f32 %v6660_v1  ;;  %v6661_v18 = vmul.f32 -1.442695, %v5311_v4  ;;  %v6662_v51 = vmul.f32 -1.442695, %v5312_v11 }
 0xd81   :  { %v5267_v35 = vpop.f32.mrf.mxu0 }
 0xd82   :  { %v5308_v53 = vpop.f32.mrf.mxu1  ;;  %v11482_v22 = vadd.f32 %v5334_v61, %v5333_v32  ;;  %7383 = vpow2.f32 %v6661_v18 }
 0xd83   :  { %7385 = vrcp.f32 %v5325_v38 }
 0xd84   :  { %7387 = vtanh.f32 %v11482_v22 }
 0xd85   :  { %7389 = vpow2.f32 %v6662_v51  ;;  %v12700_v51 = vld [vmem:[#allocation88_spill] sm:$0xff] }
 0xd86   :  { %7391 = vtanh.f32 %v5313_v42  ;;  %v12705_v42 = vld [vmem:[#allocation44_spill] sm:$0xff] }
 0xd8d   :  { %v7382_v25 = vpop.eup %7381 }
 0xd8e   :  { %v5347_v36 = vadd.f32 1.0, %v7382_v25  ;;  %v12706_v25 = vld [vmem:[#allocation45_spill] sm:$0xff] }
 0xd8f   :  { %v7384_v55 = vpop.eup %7383 }
 0xd90   :  { %v7386_v10 = vpop.eup %7385  ;;  %7393 = vrcp.f32 %v5347_v36  ;;  %v5348_v1 = vadd.f32 1.0, %v7384_v55  ;;  %v12707_v36 = vld [vmem:[#allocation47_spill] sm:$0xff]  ;;  %v12708_v55 = vld [vmem:[#allocation82_spill] sm:$0xff] }
 0xd91   :  { %v7388_v4 = vpop.eup %7387 }
 0xd92   :  { %7395 = vrcp.f32 %v5348_v1  ;;  %v5337_v61 = vmul.f32 %v7388_v4, %v7386_v10  ;;  %v7390_v27 = vpop.eup %7389  ;;  %v12709_v10 = vld [vmem:[#allocation84_spill] sm:$0xff]  ;;  %v12710_v1 = vld [vmem:[#allocation83_spill] sm:$0xff]  ;;  %v12711_v4 = vld [vmem:[#allocation85_spill] sm:$0xff] }
 0xd93   :  { %v7392_v5 = vpop.eup %7391  ;;  %v5349_v32 = vadd.f32 1.0, %v7390_v27  ;;  %v12714_v27 = vld [vmem:[#allocation35_spill] sm:$0xff] }
 0xd94   :  { %v5362_v57 = vpack.c.bf16 %v5337_v61, %v5337_v61  ;;  %v12712_v61 = vld [vmem:[#allocation36_spill] sm:$0xff] }
 0xd95   :  { %7397 = vrcp.f32 %v5349_v32 }
 0xd96   :  { %5396 = vmatmul.mubr.bf16.vlgmr.msra.gmra.mxu0 %v5362_v57  ;;  %5437 = vmatmul.mubr.bf16.vlgmr.msra.gmra.mxu1 %v5362_v57  ;;  %v12713_v57 = vld [vmem:[#allocation34_spill] sm:$0xff] }
 0xd97   :  { %5451 = vmatpush1.bf16.msra.mxu0 %v11172_v21  ;;  %5492 = vmatpush1.bf16.msra.mxu1 %v11178_v13 }
 0xd98   :  { %5452 = vmatprep.subr.bf16.mxu0 %v11184_v14  ;;  %5493 = vmatprep.subr.bf16.mxu1 %v11190_v54 }
 0xd99   :  { %5482 = vmatprep.mubr.bf16.mxu0 %v12214_v0  ;;  %5523 = vmatprep.mubr.bf16.mxu1 %v12214_v0 }
 0xd9b   :  { %5453 = vmatpush1.bf16.msra.mxu0 %v11198_v8  ;;  %5494 = vmatpush1.bf16.msra.mxu1 %v11204_v44 }
 0xd9c   :  { %5454 = vmatprep.subr.bf16.mxu0 %v11210_v47  ;;  %5495 = vmatprep.subr.bf16.mxu1 %v11216_v40 }
 0xd9d   :  { %v7394_v38 = vpop.eup %7393 }
 0xd9e   :  { %v5358_v23 = vmul.f32 %v7394_v38, %v7392_v5  ;;  %v12715_v5 = vld [vmem:[#allocation37_spill] sm:$0xff]  ;;  %v12716_v38 = vld [vmem:[#allocation90_spill] sm:$0xff] }
 0xd9f   :  { %v7396_v63 = vpop.eup %7395  ;;  %5455 = vmatpush1.bf16.msra.mxu0 %v11222_v30  ;;  %5496 = vmatpush1.bf16.msra.mxu1 %v11228_v24 }
 0xda0   :  { %v5357_v18 = vmul.f32 %v7396_v63, %v11418_v60  ;;  %5456 = vmatprep.subr.bf16.mxu0 %v11235_v39  ;;  %5497 = vmatprep.subr.bf16.mxu1 %v11241_v16  ;;  %v12718_v63 = vld [vmem:[#allocation91_spill] sm:$0xff] }
 0xda2   :  { %v11502_v35 = vadd.f32 %v5358_v23, %v5357_v18  ;;  %v7398_v60 = vpop.eup %7397  ;;  %v12717_v23 = vld [vmem:[#allocation92_spill] sm:$0xff] }
 0xda3   :  { %5457 = vmatpush1.bf16.msra.mxu0 %v11249_v34  ;;  %5498 = vmatpush1.bf16.msra.mxu1 %v11255_v17 }
 0xda4   :  { %7399 = vtanh.f32 %v11502_v35  ;;  %5458 = vmatprep.subr.bf16.mxu0 %v11262_v12  ;;  %5499 = vmatprep.subr.bf16.mxu1 %v11268_v48 }
 0xda7   :  { %5459 = vmatpush1.bf16.msra.mxu0 %v11274_v33  ;;  %5500 = vmatpush1.bf16.msra.mxu1 %v11280_v45 }
 0xda8   :  { %5460 = vmatprep.subr.bf16.mxu0 %v11286_v31  ;;  %5501 = vmatprep.subr.bf16.mxu1 %v11292_v46 }
 0xdab   :  { %5461 = vmatpush1.bf16.msra.mxu0 %v12661_v59  ;;  %5502 = vmatpush1.bf16.msra.mxu1 %v12662_v28 }
 0xdac   :  { %5462 = vmatprep.subr.bf16.mxu0 %v12663_v6  ;;  %5503 = vmatprep.subr.bf16.mxu1 %v12664_v9 }
 0xdaf   :  { %5463 = vmatpush1.bf16.msra.mxu0 %v12665_v26  ;;  %5504 = vmatpush1.bf16.msra.mxu1 %v12666_v3 }
 0xdb0   :  { %5464 = vmatprep.subr.bf16.mxu0 %v12667_v49  ;;  %5505 = vmatprep.subr.bf16.mxu1 %v11340_v41 }
 0xdb1   :  { %v7400_v53 = vpop.eup %7399 }
 0xdb2   :  { %v5361_v15 = vmul.f32 %v7400_v53, %v7398_v60  ;;  %v12719_v60 = vld [vmem:[#allocation21_spill] sm:$0xff] }
 0xdb3   :  { %5465 = vmatpush1.bf16.msra.mxu0 %v11346_v43  ;;  %5506 = vmatpush1.bf16.msra.mxu1 %v11352_v62 }
 0xdb4   :  { %v5449_v11 = vpack.c.bf16 %v5361_v15, %v5361_v15  ;;  %5585 = vmatprep.subr.bf16.mxu0 %v10954_v7  ;;  %5626 = vmatprep.subr.bf16.mxu1 %v10960_v20  ;;  %v12694_v7 = vld [vmem:[#allocation43_spill] sm:$0xff]  ;;  %v12695_v20 = vld [vmem:[#allocation42_spill] sm:$0xff] }
 0xdb6   :  { %5483 = vmatmul.mubr.bf16.vlgmr.msra.gmra.mxu0 %v5449_v11  ;;  %5524 = vmatmul.mubr.bf16.vlgmr.msra.gmra.mxu1 %v5449_v11 }
 0xdb7   :  { %5586 = vmatpush1.bf16.msra.mxu0 %v10966_v50  ;;  %5627 = vmatpush1.bf16.msra.mxu1 %v10972_v56  ;;  %v12696_v50 = vld [vmem:[#allocation3_spill] sm:$0xff]  ;;  %v12697_v56 = vld [vmem:[#allocation32_spill] sm:$0xff] }
 0xdb8   :  { %5587 = vmatprep.subr.bf16.mxu0 %v10978_v19  ;;  %5628 = vmatprep.subr.bf16.mxu1 %v10984_v37  ;;  %v12698_v19 = vld [vmem:[#allocation33_spill] sm:$0xff]  ;;  %v12699_v37 = vld [vmem:[#allocation4_spill] sm:$0xff] }
 0xdb9   :  { %5617 = vmatprep.mubr.bf16.mxu0 %v12214_v0  ;;  %5658 = vmatprep.mubr.bf16.mxu1 %v12214_v0 }
 0xdbb   :  { %5588 = vmatpush1.bf16.msra.mxu0 %v10992_v2  ;;  %5629 = vmatpush1.bf16.msra.mxu1 %v10998_v29  ;;  %v12702_v2 = vld [vmem:[#allocation87_spill] sm:$0xff]  ;;  %v12703_v29 = vld [vmem:[#allocation89_spill] sm:$0xff] }
 0xdbc   :  { %5589 = vmatprep.subr.bf16.mxu0 %v11004_v58  ;;  %5630 = vmatprep.subr.bf16.mxu1 %v12694_v7  ;;  %v12704_v58 = vld [vmem:[#allocation46_spill] sm:$0xff] }
 0xdbf   :  { %5590 = vmatpush1.bf16.msra.mxu0 %v12695_v20  ;;  %5631 = vmatpush1.bf16.msra.mxu1 %v12696_v50  ;;  %v12720_v20 = vld [vmem:[#allocation23_spill] sm:$0xff] }
 0xdc0   :  { %5591 = vmatprep.subr.bf16.mxu0 %v12697_v56  ;;  %5632 = vmatprep.subr.bf16.mxu1 %v12698_v19 }
 0xdc3   :  { %5592 = vmatpush1.bf16.msra.mxu0 %v12699_v37  ;;  %5633 = vmatpush1.bf16.msra.mxu1 %v12700_v51 }
 0xdc4   :  { %5593 = vmatprep.subr.bf16.mxu0 %v12701_v52  ;;  %5634 = vmatprep.subr.bf16.mxu1 %v12702_v2  ;;  %v12721_v2 = vld [vmem:[#allocation22_spill] sm:$0xff] }
 0xdc7   :  { %5594 = vmatpush1.bf16.msra.mxu0 %v12703_v29  ;;  %5635 = vmatpush1.bf16.msra.mxu1 %v12704_v58 }
 0xdc8   :  { %5595 = vmatprep.subr.bf16.mxu0 %v12705_v42  ;;  %5636 = vmatprep.subr.bf16.mxu1 %v12706_v25  ;;  %v12722_v42 = vld [vmem:[#allocation24_spill] sm:$0xff] }
 0xdcb   :  { %5596 = vmatpush1.bf16.msra.mxu0 %v12707_v36  ;;  %5637 = vmatpush1.bf16.msra.mxu1 %v12708_v55 }
 0xdcc   :  { %5597 = vmatprep.subr.bf16.mxu0 %v12709_v10  ;;  %5638 = vmatprep.subr.bf16.mxu1 %v12710_v1 }
 0xdcf   :  { %5598 = vmatpush1.bf16.msra.mxu0 %v12711_v4  ;;  %5639 = vmatpush1.bf16.msra.mxu1 %v12712_v61 }
 0xdd0   :  { %5599 = vmatprep.subr.bf16.mxu0 %v12713_v57  ;;  %5640 = vmatprep.subr.bf16.mxu1 %v12714_v27 }
 0xdd3   :  { %5600 = vmatpush1.bf16.msra.mxu0 %v12715_v5  ;;  %5641 = vmatpush1.bf16.msra.mxu1 %v12716_v38  ;;  %v12723_v5 = vld [vmem:[#allocation56_spill] sm:$0xff] }
 0xdd4   :  { %5672 = vmatprep.subr.bf16.mxu0 %v12717_v23  ;;  %5713 = vmatprep.subr.bf16.mxu1 %v12718_v63 }
 0xe56   :  { %v5397_v32 = vpop.f32.mrf.mxu0  ;;  %v5438_v18 = vpop.f32.mrf.mxu1 }
 0xe57   :  { %v5445_v53 = vadd.f32 %v5397_v32, %v12719_v60  ;;  %v5447_v29 = vadd.f32 %v5438_v18, %v12721_v2  ;;  %v12725_v2 = vld [vmem:[#allocation58_spill] sm:$0xff] }
 0xe58   :  { %v5399_v15 = vpop.f32.mrf.mxu0  ;;  %v5440_v11 = vpop.f32.mrf.mxu1 }
 0xe59   :  { %v6663_v7 = vmul.f32 -1.442695, %v5445_v53  ;;  %v5446_v50 = vadd.f32 %v5399_v15, %v12720_v20  ;;  %v6665_v58 = vmul.f32 -1.442695, %v5447_v29  ;;  %v5448_v25 = vadd.f32 %v5440_v11, %v12722_v42  ;;  %v12724_v53 = vld [vmem:[#allocation57_spill] sm:$0xff]  ;;  %v12726_v42 = vld [vmem:[#allocation59_spill] sm:$0xff] }
 0xe5a   :  { %v5401_v56 = vpop.f32.mrf.mxu0  ;;  %v5442_v19 = vpop.f32.mrf.mxu1 }
 0xe5b   :  { %7401 = vpow2.f32 %v6663_v7  ;;  %v6664_v37 = vmul.f32 -1.442695, %v5446_v50 }
 0xe5c   :  { %v5402_v51 = vpop.f32.mrf.mxu0  ;;  %v5443_v52 = vpop.f32.mrf.mxu1 }
 0xe5d   :  { %7403 = vpow2.f32 %v6664_v37 }
 0xe5e   :  { %7405 = vpow2.f32 %v6665_v58 }
 0xe5f   :  { %7407 = vtanh.f32 %v5448_v25 }
 0xe68   :  { %v7402_v36 = vpop.eup %7401 }
 0xe69   :  { %v5545_v55 = vadd.f32 1.0, %v7402_v36 }
 0xe6a   :  { %v7404_v10 = vpop.eup %7403 }
 0xe6b   :  { %7409 = vrcp.f32 %v5545_v55  ;;  %v5546_v1 = vadd.f32 1.0, %v7404_v10  ;;  %v7406_v4 = vpop.eup %7405 }
 0xe6c   :  { %v7408_v27 = vpop.eup %7407  ;;  %v5547_v7 = vadd.f32 1.0, %v7406_v4 }
 0xe6d   :  { %7411 = vrcp.f32 %v5546_v1 }
 0xe76   :  { %v5484_v61 = vpop.f32.mrf.mxu0  ;;  %v5525_v57 = vpop.f32.mrf.mxu1 }
 0xe77   :  { %v5532_v38 = vadd.f32 %v5484_v61, %v12723_v5  ;;  %v5534_v29 = vadd.f32 %v5525_v57, %v12725_v2 }
 0xe78   :  { %v7410_v23 = vpop.eup %7409  ;;  %v5486_v63 = vpop.f32.mrf.mxu0 }
 0xe79   :  { %v5527_v32 = vpop.f32.mrf.mxu1  ;;  %v5556_v18 = vmul.f32 %v7410_v23, %v7408_v27  ;;  %v6666_v60 = vmul.f32 -1.442695, %v5532_v38  ;;  %v5533_v15 = vadd.f32 %v5486_v63, %v12724_v53  ;;  %v6668_v58 = vmul.f32 -1.442695, %v5534_v29  ;;  %v7711_v23 = vld [vmem:[%s11970_s5 + $0x40] ss:$16 sps:$4 sm:$0xff]  }
 0xe7a   :  { %v7412_v11 = vpop.eup %7411  ;;  %v5488_v20 = vpop.f32.mrf.mxu0  ;;  %v5535_v25 = vadd.f32 %v5527_v32, %v12726_v42  ;;  %v7712_v63 = vld [vmem:[%s11970_s5 + $0x48] ss:$16 sps:$4 sm:$0xff]   ;;  %v7713_v32 = vld [vmem:[%s11970_s5 + $0x24] ss:$16 sps:$4 sm:$0xff]  }
 0xe7b   :  { %v5529_v50 = vpop.f32.mrf.mxu1  ;;  %v5555_v56 = vmul.f32 %v7412_v11, %v11482_v22  ;;  %7413 = vpow2.f32 %v6666_v60  ;;  %v6667_v19 = vmul.f32 -1.442695, %v5533_v15  ;;  %v7715_v60 = vld [vmem:[%s11970_s5 + $0x20] ss:$16 sps:$4 sm:$0xff]   ;;  %v7716_v53 = vld [vmem:[%s11970_s5 + $0x28] ss:$16 sps:$4 sm:$0xff]  }
 0xe7c   :  { %v5489_v37 = vpop.f32.mrf.mxu0  ;;  %v7717_v15 = vld [vmem:[%s11970_s5 + $0x4] ss:$16 sps:$4 sm:$0xff]   ;;  %v7718_v11 = vld [vmem:[%s11970_s5 + $0xc] ss:$16 sps:$4 sm:$0xff]   ;;  %v7720_v20 = vld [vmem:[%s11970_s5 + $0x8] ss:$16 sps:$4 sm:$0xff]  }
 0xe7d   :  { %v5530_v51 = vpop.f32.mrf.mxu1  ;;  %v11566_v52 = vadd.f32 %v5556_v18, %v5555_v56  ;;  %7415 = vpow2.f32 %v6667_v19  ;;  %v7714_v18 = vld [vmem:[%s11970_s5 + $0x2c] ss:$16 sps:$4 sm:$0xff]   ;;  %v7721_v50 = vld [vmem:[%s11970_s5 + $0x1e4] ss:$16 sps:$4 sm:$0xff]  }
 0xe7e   :  { %7417 = vrcp.f32 %v5547_v7  ;;  %v7719_v7 = vld [vmem:[%s11970_s5] ss:$16 sps:$4 sm:$0xff]   ;;  %v7722_v56 = vld [vmem:[%s11970_s5 + $0x1ec] ss:$16 sps:$4 sm:$0xff]  }
 0xe7f   :  { %7419 = vtanh.f32 %v11566_v52  ;;  %v12727_v51 = vld [vmem:[#allocation25_spill] sm:$0xff] }
 0xe80   :  { %7421 = vpow2.f32 %v6668_v58 }
 0xe81   :  { %7423 = vtanh.f32 %v5535_v25  ;;  %v12728_v25 = vld [vmem:[#allocation27_spill] sm:$0xff] }
 0xe88   :  { %v7414_v36 = vpop.eup %7413 }
 0xe89   :  { %v5569_v55 = vadd.f32 1.0, %v7414_v36 }
 0xe8a   :  { %v7416_v10 = vpop.eup %7415 }
 0xe8b   :  { %v7418_v22 = vpop.eup %7417  ;;  %7425 = vrcp.f32 %v5569_v55  ;;  %v5570_v1 = vadd.f32 1.0, %v7416_v10 }
 0xe8c   :  { %v7420_v4 = vpop.eup %7419 }
 0xe8d   :  { %7427 = vrcp.f32 %v5570_v1  ;;  %v5559_v61 = vmul.f32 %v7420_v4, %v7418_v22  ;;  %v7422_v57 = vpop.eup %7421 }
 0xe8e   :  { %v7424_v5 = vpop.eup %7423 }
 0xe8f   :  { %v5584_v27 = vpack.c.bf16 %v5559_v61, %v5559_v61  ;;  %v12729_v61 = vld [vmem:[#allocation26_spill] sm:$0xff] }
 0xe91   :  { %5618 = vmatmul.mubr.bf16.vlgmr.msra.gmra.mxu0 %v5584_v27  ;;  %5659 = vmatmul.mubr.bf16.vlgmr.msra.gmra.mxu1 %v5584_v27 }
 0xe92   :  { %5673 = vmatpush1.bf16.msra.mxu0 %v11172_v21  ;;  %5714 = vmatpush1.bf16.msra.mxu1 %v11178_v13 }
 0xe93   :  { %5674 = vmatprep.subr.bf16.mxu0 %v11184_v14  ;;  %5715 = vmatprep.subr.bf16.mxu1 %v11190_v54  ;;  %v5571_v14 = vadd.f32 1.0, %v7422_v57 }
 0xe94   :  { %5704 = vmatprep.mubr.bf16.mxu0 %v12214_v0  ;;  %5745 = vmatprep.mubr.bf16.mxu1 %v12214_v0 }
 0xe95   :  { %7429 = vrcp.f32 %v5571_v14 }
 0xe96   :  { %5675 = vmatpush1.bf16.msra.mxu0 %v11198_v8  ;;  %5716 = vmatpush1.bf16.msra.mxu1 %v11204_v44 }
 0xe97   :  { %5676 = vmatprep.subr.bf16.mxu0 %v11210_v47  ;;  %5717 = vmatprep.subr.bf16.mxu1 %v11216_v40 }
 0xe98   :  { %v7426_v21 = vpop.eup %7425 }
 0xe99   :  { %v5580_v13 = vmul.f32 %v7426_v21, %v7424_v5  ;;  %v12730_v5 = vld [vmem:[#allocation28_spill] sm:$0xff] }
 0xe9a   :  { %v7428_v38 = vpop.eup %7427  ;;  %5677 = vmatpush1.bf16.msra.mxu0 %v11222_v30  ;;  %5718 = vmatpush1.bf16.msra.mxu1 %v11228_v24  ;;  %v7689_v24 = vld [vmem:[%s11970_s5 + $0xe4] ss:$16 sps:$4 sm:$0xff]  }
 0xe9b   :  { %v5579_v54 = vmul.f32 %v7428_v38, %v11502_v35  ;;  %5678 = vmatprep.subr.bf16.mxu0 %v11235_v39  ;;  %5719 = vmatprep.subr.bf16.mxu1 %v11241_v16  ;;  %v7690_v39 = vld [vmem:[%s11970_s5 + $0xec] ss:$16 sps:$4 sm:$0xff]   ;;  %v7691_v16 = vld [vmem:[%s11970_s5 + $0xe0] ss:$16 sps:$4 sm:$0xff]  }
 0xe9c   :  { %v7710_v35 = vld [vmem:[%s11970_s5 + $0x4c] ss:$16 sps:$4 sm:$0xff]  }
 0xe9d   :  { %v11586_v8 = vadd.f32 %v5580_v13, %v5579_v54 }
 0xe9e   :  { %5679 = vmatpush1.bf16.msra.mxu0 %v11249_v34  ;;  %5720 = vmatpush1.bf16.msra.mxu1 %v11255_v17  ;;  %v7692_v34 = vld [vmem:[%s11970_s5 + $0xe8] ss:$16 sps:$4 sm:$0xff]   ;;  %v7693_v17 = vld [vmem:[%s11970_s5 + $0xc4] ss:$16 sps:$4 sm:$0xff]  }
 0xe9f   :  { %7431 = vtanh.f32 %v11586_v8  ;;  %5680 = vmatprep.subr.bf16.mxu0 %v11262_v12  ;;  %5721 = vmatprep.subr.bf16.mxu1 %v11268_v48  ;;  %v7694_v12 = vld [vmem:[%s11970_s5 + $0xcc] ss:$16 sps:$4 sm:$0xff]   ;;  %v7695_v48 = vld [vmem:[%s11970_s5 + $0xc0] ss:$16 sps:$4 sm:$0xff]  }
 0xea2   :  { %5681 = vmatpush1.bf16.msra.mxu0 %v11274_v33  ;;  %5722 = vmatpush1.bf16.msra.mxu1 %v11280_v45  ;;  %v7430_v44 = vpop.eup %7429  ;;  %v7696_v33 = vld [vmem:[%s11970_s5 + $0xc8] ss:$16 sps:$4 sm:$0xff]   ;;  %v7697_v45 = vld [vmem:[%s11970_s5 + $0xa4] ss:$16 sps:$4 sm:$0xff]  }
 0xea3   :  { %5682 = vmatprep.subr.bf16.mxu0 %v11286_v31  ;;  %5723 = vmatprep.subr.bf16.mxu1 %v11292_v46  ;;  %v7698_v31 = vld [vmem:[%s11970_s5 + $0xac] ss:$16 sps:$4 sm:$0xff]   ;;  %v7699_v46 = vld [vmem:[%s11970_s5 + $0xa0] ss:$16 sps:$4 sm:$0xff]  }
 0xea6   :  { %5683 = vmatpush1.bf16.msra.mxu0 %v12661_v59  ;;  %5724 = vmatpush1.bf16.msra.mxu1 %v12662_v28  ;;  %v7703_v59 = vld [vmem:[%s11970_s5 + $0x80] ss:$16 sps:$4 sm:$0xff]   ;;  %v7704_v28 = vld [vmem:[%s11970_s5 + $0x88] ss:$16 sps:$4 sm:$0xff]  }
 0xea7   :  { %5684 = vmatprep.subr.bf16.mxu0 %v12663_v6  ;;  %5725 = vmatprep.subr.bf16.mxu1 %v12664_v9  ;;  %v7705_v6 = vld [vmem:[%s11970_s5 + $0x64] ss:$16 sps:$4 sm:$0xff]   ;;  %v7706_v9 = vld [vmem:[%s11970_s5 + $0x6c] ss:$16 sps:$4 sm:$0xff]  }
 0xeaa   :  { %5685 = vmatpush1.bf16.msra.mxu0 %v12665_v26  ;;  %5726 = vmatpush1.bf16.msra.mxu1 %v12666_v3  ;;  %v7707_v26 = vld [vmem:[%s11970_s5 + $0x60] ss:$16 sps:$4 sm:$0xff]   ;;  %v7708_v3 = vld [vmem:[%s11970_s5 + $0x68] ss:$16 sps:$4 sm:$0xff]  }
 0xeab   :  { %5686 = vmatprep.subr.bf16.mxu0 %v12667_v49  ;;  %5727 = vmatprep.subr.bf16.mxu1 %v11340_v41  ;;  %v7701_v41 = vld [vmem:[%s11970_s5 + $0x84] ss:$16 sps:$4 sm:$0xff]  }
 0xeac   :  { %v7432_v47 = vpop.eup %7431  ;;  %v7709_v49 = vld [vmem:[%s11970_s5 + $0x44] ss:$16 sps:$4 sm:$0xff]  }
 0xead   :  { %v5583_v40 = vmul.f32 %v7432_v47, %v7430_v44 }
 0xeae   :  { %5687 = vmatpush1.bf16.msra.mxu0 %v11346_v43  ;;  %5728 = vmatpush1.bf16.msra.mxu1 %v11352_v62  ;;  %v7700_v62 = vld [vmem:[%s11970_s5 + $0xa8] ss:$16 sps:$4 sm:$0xff]   ;;  %v7702_v43 = vld [vmem:[%s11970_s5 + $0x8c] ss:$16 sps:$4 sm:$0xff]  }
 0xeaf   :  { %v5671_v30 = vpack.c.bf16 %v5583_v40, %v5583_v40  ;;  %5807 = vmatprep.subr.bf16.mxu0 %v7689_v24  ;;  %5848 = vmatprep.subr.bf16.mxu1 %v7690_v39  ;;  %v12731_v24 = vld [vmem:[#allocation74_spill] sm:$0xff] }
 0xeb1   :  { %5705 = vmatmul.mubr.bf16.vlgmr.msra.gmra.mxu0 %v5671_v30  ;;  %5746 = vmatmul.mubr.bf16.vlgmr.msra.gmra.mxu1 %v5671_v30 }
 0xeb2   :  { %5808 = vmatpush1.bf16.msra.mxu0 %v7691_v16  ;;  %5849 = vmatpush1.bf16.msra.mxu1 %v7692_v34 }
 0xeb3   :  { %5809 = vmatprep.subr.bf16.mxu0 %v7693_v17  ;;  %5850 = vmatprep.subr.bf16.mxu1 %v7694_v12 }
 0xeb4   :  { %5839 = vmatprep.mubr.bf16.mxu0 %v12214_v0  ;;  %5880 = vmatprep.mubr.bf16.mxu1 %v12214_v0 }
 0xeb6   :  { %5810 = vmatpush1.bf16.msra.mxu0 %v7695_v48  ;;  %5851 = vmatpush1.bf16.msra.mxu1 %v7696_v33  ;;  %v12732_v33 = vld [vmem:[#allocation75_spill] sm:$0xff] }
 0xeb7   :  { %5811 = vmatprep.subr.bf16.mxu0 %v7697_v45  ;;  %5852 = vmatprep.subr.bf16.mxu1 %v7698_v31 }
 0xeba   :  { %5812 = vmatpush1.bf16.msra.mxu0 %v7699_v46  ;;  %5853 = vmatpush1.bf16.msra.mxu1 %v7700_v62 }
 0xebb   :  { %5813 = vmatprep.subr.bf16.mxu0 %v7701_v41  ;;  %5854 = vmatprep.subr.bf16.mxu1 %v7702_v43 }
 0xebe   :  { %5814 = vmatpush1.bf16.msra.mxu0 %v7703_v59  ;;  %5855 = vmatpush1.bf16.msra.mxu1 %v7704_v28 }
 0xebf   :  { %5815 = vmatprep.subr.bf16.mxu0 %v7705_v6  ;;  %5856 = vmatprep.subr.bf16.mxu1 %v7706_v9 }
 0xec2   :  { %5816 = vmatpush1.bf16.msra.mxu0 %v7707_v26  ;;  %5857 = vmatpush1.bf16.msra.mxu1 %v7708_v3  ;;  %v12733_v26 = vld [vmem:[#allocation76_spill] sm:$0xff] }
 0xec3   :  { %5817 = vmatprep.subr.bf16.mxu0 %v7709_v49  ;;  %5858 = vmatprep.subr.bf16.mxu1 %v7710_v35  ;;  %v12734_v35 = vld [vmem:[#allocation77_spill] sm:$0xff] }
 0xec6   :  { %5818 = vmatpush1.bf16.msra.mxu0 %v7711_v23  ;;  %5859 = vmatpush1.bf16.msra.mxu1 %v7712_v63 }
 0xec7   :  { %5819 = vmatprep.subr.bf16.mxu0 %v7713_v32  ;;  %5860 = vmatprep.subr.bf16.mxu1 %v7714_v18 }
 0xeca   :  { %5820 = vmatpush1.bf16.msra.mxu0 %v7715_v60  ;;  %5861 = vmatpush1.bf16.msra.mxu1 %v7716_v53 }
 0xecb   :  { %5821 = vmatprep.subr.bf16.mxu0 %v7717_v15  ;;  %5862 = vmatprep.subr.bf16.mxu1 %v7718_v11 }
 0xece   :  { %5822 = vmatpush1.bf16.msra.mxu0 %v7719_v7  ;;  %5863 = vmatpush1.bf16.msra.mxu1 %v7720_v20  ;;  %v7723_v7 = vld [vmem:[%s11970_s5 + $0x1e0] ss:$16 sps:$4 sm:$0xff]   ;;  %v7724_v20 = vld [vmem:[%s11970_s5 + $0x1e8] ss:$16 sps:$4 sm:$0xff]  }
 0xecf   :  { %5894 = vmatprep.subr.bf16.mxu0 %v7721_v50  ;;  %5935 = vmatprep.subr.bf16.mxu1 %v7722_v56  ;;  %v7725_v50 = vld [vmem:[%s11970_s5 + $0x1c4] ss:$16 sps:$4 sm:$0xff]   ;;  %v7726_v56 = vld [vmem:[%s11970_s5 + $0x1cc] ss:$16 sps:$4 sm:$0xff]  }
 0xf51   :  { %v5619_v19 = vpop.f32.mrf.mxu0  ;;  %v5660_v37 = vpop.f32.mrf.mxu1 }
 0xf52   :  { %v5667_v2 = vadd.f32 %v5619_v19, %v12727_v51  ;;  %v5669_v27 = vadd.f32 %v5660_v37, %v12729_v61  ;;  %v7727_v37 = vld [vmem:[%s11970_s5 + $0x1c0] ss:$16 sps:$4 sm:$0xff]   ;;  %v7728_v51 = vld [vmem:[%s11970_s5 + $0x1c8] ss:$16 sps:$4 sm:$0xff]  }
 0xf53   :  { %v5621_v29 = vpop.f32.mrf.mxu0  ;;  %v5662_v58 = vpop.f32.mrf.mxu1 }
 0xf54   :  { %v6669_v42 = vmul.f32 -1.442695, %v5667_v2  ;;  %v5668_v36 = vadd.f32 %v5621_v29, %v12728_v25  ;;  %v6671_v57 = vmul.f32 -1.442695, %v5669_v27  ;;  %v5670_v21 = vadd.f32 %v5662_v58, %v12730_v5  ;;  %v7729_v29 = vld [vmem:[%s11970_s5 + $0x1a4] ss:$16 sps:$4 sm:$0xff]  }
 0xf55   :  { %v5623_v55 = vpop.f32.mrf.mxu0  ;;  %v5664_v10 = vpop.f32.mrf.mxu1  ;;  %v7735_v27 = vld [vmem:[%s11970_s5 + $0x180] ss:$16 sps:$4 sm:$0xff]   ;;  %v7738_v5 = vld [vmem:[%s11970_s5 + $0x16c] ss:$16 sps:$4 sm:$0xff]  }
 0xf56   :  { %7433 = vpow2.f32 %v6669_v42  ;;  %v6670_v22 = vmul.f32 -1.442695, %v5668_v36  ;;  %v7731_v55 = vld [vmem:[%s11970_s5 + $0x1a0] ss:$16 sps:$4 sm:$0xff]   ;;  %v7732_v10 = vld [vmem:[%s11970_s5 + $0x1a8] ss:$16 sps:$4 sm:$0xff]  }
 0xf57   :  { %v5624_v1 = vpop.f32.mrf.mxu0  ;;  %v5665_v4 = vpop.f32.mrf.mxu1 }
 0xf58   :  { %7435 = vpow2.f32 %v6670_v22  ;;  %v7733_v1 = vld [vmem:[%s11970_s5 + $0x184] ss:$16 sps:$4 sm:$0xff]   ;;  %v7734_v4 = vld [vmem:[%s11970_s5 + $0x18c] ss:$16 sps:$4 sm:$0xff]  }
 0xf59   :  { %7437 = vpow2.f32 %v6671_v57  ;;  %v7737_v57 = vld [vmem:[%s11970_s5 + $0x164] ss:$16 sps:$4 sm:$0xff]  }
 0xf5a   :  { %7439 = vtanh.f32 %v5670_v21  ;;  %v7739_v21 = vld [vmem:[%s11970_s5 + $0x160] ss:$16 sps:$4 sm:$0xff]  }
 0xf63   :  { %v7434_v13 = vpop.eup %7433 }
 0xf64   :  { %v5767_v38 = vadd.f32 1.0, %v7434_v13  ;;  %v7740_v13 = vld [vmem:[%s11970_s5 + $0x168] ss:$16 sps:$4 sm:$0xff]  }
 0xf65   :  { %v7436_v14 = vpop.eup %7435 }
 0xf66   :  { %7441 = vrcp.f32 %v5767_v38  ;;  %v5768_v54 = vadd.f32 1.0, %v7436_v14  ;;  %v7438_v44 = vpop.eup %7437  ;;  %v7741_v38 = vld [vmem:[%s11970_s5 + $0x144] ss:$16 sps:$4 sm:$0xff]   ;;  %v7742_v14 = vld [vmem:[%s11970_s5 + $0x14c] ss:$16 sps:$4 sm:$0xff]  }
 0xf67   :  { %v7440_v30 = vpop.eup %7439  ;;  %v5769_v46 = vadd.f32 1.0, %v7438_v44  ;;  %v7744_v44 = vld [vmem:[%s11970_s5 + $0x148] ss:$16 sps:$4 sm:$0xff]  }
 0xf68   :  { %7443 = vrcp.f32 %v5768_v54  ;;  %v7743_v54 = vld [vmem:[%s11970_s5 + $0x140] ss:$16 sps:$4 sm:$0xff]  }
 0xf71   :  { %v5706_v47 = vpop.f32.mrf.mxu0  ;;  %v5747_v40 = vpop.f32.mrf.mxu1 }
 0xf72   :  { %v5754_v39 = vadd.f32 %v5706_v47, %v12731_v24  ;;  %v5756_v3 = vadd.f32 %v5747_v40, %v12733_v26  ;;  %v7745_v47 = vld [vmem:[%s11970_s5 + $0x124] ss:$16 sps:$4 sm:$0xff]   ;;  %v7746_v40 = vld [vmem:[%s11970_s5 + $0x12c] ss:$16 sps:$4 sm:$0xff]   ;;  %v7748_v24 = vld [vmem:[%s11970_s5 + $0x128] ss:$16 sps:$4 sm:$0xff]  }
 0xf73   :  { %v7442_v16 = vpop.eup %7441  ;;  %v5708_v34 = vpop.f32.mrf.mxu0  ;;  %v6036_v26 = vld [vmem:[%s11972_s7 + $0x40] sm:$0xff] }
 0xf74   :  { %v5749_v17 = vpop.f32.mrf.mxu1  ;;  %v5778_v12 = vmul.f32 %v7442_v16, %v7440_v30  ;;  %v6672_v48 = vmul.f32 -1.442695, %v5754_v39  ;;  %v5755_v45 = vadd.f32 %v5708_v34, %v12732_v33  ;;  %v6674_v49 = vmul.f32 -1.442695, %v5756_v3  ;;  %v7747_v30 = vld [vmem:[%s11970_s5 + $0x120] ss:$16 sps:$4 sm:$0xff]  }
 0xf75   :  { %v7444_v31 = vpop.eup %7443  ;;  %v5710_v62 = vpop.f32.mrf.mxu0  ;;  %v5757_v23 = vadd.f32 %v5749_v17, %v12734_v35  ;;  %v7749_v16 = vld [vmem:[%s11970_s5 + $0x104] ss:$16 sps:$4 sm:$0xff]   ;;  %v7750_v34 = vld [vmem:[%s11970_s5 + $0x10c] ss:$16 sps:$4 sm:$0xff]   ;;  %v7752_v33 = vld [vmem:[%s11970_s5 + $0x108] ss:$16 sps:$4 sm:$0xff]  }
 0xf76   :  { %v5751_v41 = vpop.f32.mrf.mxu1  ;;  %v5777_v43 = vmul.f32 %v7444_v31, %v11566_v52  ;;  %7445 = vpow2.f32 %v6672_v48  ;;  %v6673_v59 = vmul.f32 -1.442695, %v5755_v45  ;;  %v7751_v48 = vld [vmem:[%s11970_s5 + $0x100] ss:$16 sps:$4 sm:$0xff]   ;;  %v7754_v31 = vmov 0.0   ;;  %v6035_v3 = vld [vmem:[%s11972_s7 + $0x38] sm:$0xff] }
 0xf77   :  { %v5711_v28 = vpop.f32.mrf.mxu0  ;;  %v6042_v62 = vld [vmem:[%s11972_s7 + $0x70] sm:$0xff]  ;;  %v6041_v41 = vld [vmem:[%s11972_s7 + $0x68] sm:$0xff] }
 0xf78   :  { %v5752_v6 = vpop.f32.mrf.mxu1  ;;  %v11718_v9 = vadd.f32 %v5778_v12, %v5777_v43  ;;  %7447 = vpow2.f32 %v6673_v59  ;;  %v6040_v43 = vld [vmem:[%s11972_s7 + $0x60] sm:$0xff]  ;;  %v6039_v59 = vld [vmem:[%s11972_s7 + $0x58] sm:$0xff]  ;;  %v6038_v28 = vld [vmem:[%s11972_s7 + $0x50] sm:$0xff] }
 0xf79   :  { %7449 = vrcp.f32 %v5769_v46  ;;  %v6043_v46 = vld [vmem:[%s11972_s7 + $0x78] sm:$0xff]  ;;  %v6037_v6 = vld [vmem:[%s11972_s7 + $0x48] sm:$0xff] }
 0xf7a   :  { %7451 = vtanh.f32 %v11718_v9  ;;  %v6033_v35 = vld [vmem:[%s11972_s7 + $0x28] sm:$0xff] }
 0xf7b   :  { %7453 = vpow2.f32 %v6674_v49  ;;  %v6034_v49 = vld [vmem:[%s11972_s7 + $0x30] sm:$0xff] }
 0xf7c   :  { %7455 = vtanh.f32 %v5757_v23  ;;  %v6032_v23 = vld [vmem:[%s11972_s7 + $0x20] sm:$0xff] }
 0xf83   :  { %v7446_v63 = vpop.eup %7445 }
 0xf84   :  { %v5791_v32 = vadd.f32 1.0, %v7446_v63  ;;  %v6031_v63 = vld [vmem:[%s11972_s7 + $0x18] sm:$0xff] }
 0xf85   :  { %v7448_v18 = vpop.eup %7447 }
 0xf86   :  { %v7450_v52 = vpop.eup %7449  ;;  %7457 = vrcp.f32 %v5791_v32  ;;  %v5792_v60 = vadd.f32 1.0, %v7448_v18  ;;  %v6030_v32 = vld [vmem:[%s11972_s7 + $0x10] sm:$0xff]  ;;  %v6029_v18 = vld [vmem:[%s11972_s7 + $0x8] sm:$0xff] }
 0xf87   :  { %v7452_v53 = vpop.eup %7451 }
 0xf88   :  { %7459 = vrcp.f32 %v5792_v60  ;;  %v5781_v15 = vmul.f32 %v7452_v53, %v7450_v52  ;;  %v7454_v19 = vpop.eup %7453  ;;  %v6028_v52 = vld [vmem:[%s11972_s7] sm:$0xff]  ;;  %v6059_v60 = vld [vmem:[%s11972_s7 + $0xf8] sm:$0xff]  ;;  %v6058_v53 = vld [vmem:[%s11972_s7 + $0xf0] sm:$0xff] }
 0xf89   :  { %v7456_v2 = vpop.eup %7455  ;;  %v5793_v36 = vadd.f32 1.0, %v7454_v19  ;;  %v6051_v19 = vld [vmem:[%s11972_s7 + $0xb8] sm:$0xff] }
 0xf8a   :  { %v5806_v11 = vpack.c.bf16 %v5781_v15, %v5781_v15  ;;  %v6057_v15 = vld [vmem:[%s11972_s7 + $0xe8] sm:$0xff] }
 0xf8b   :  { %7461 = vrcp.f32 %v5793_v36 }
 0xf8c   :  { %5840 = vmatmul.mubr.bf16.vlgmr.msra.gmra.mxu0 %v5806_v11  ;;  %5881 = vmatmul.mubr.bf16.vlgmr.msra.gmra.mxu1 %v5806_v11  ;;  %v6056_v11 = vld [vmem:[%s11972_s7 + $0xe0] sm:$0xff] }
 0xf8d   :  { %5895 = vmatpush1.bf16.msra.mxu0 %v7723_v7  ;;  %5936 = vmatpush1.bf16.msra.mxu1 %v7724_v20  ;;  %v6055_v7 = vld [vmem:[%s11972_s7 + $0xd8] sm:$0xff]  ;;  %v6054_v20 = vld [vmem:[%s11972_s7 + $0xd0] sm:$0xff] }
 0xf8e   :  { %5896 = vmatprep.subr.bf16.mxu0 %v7725_v50  ;;  %5937 = vmatprep.subr.bf16.mxu1 %v7726_v56  ;;  %v6053_v50 = vld [vmem:[%s11972_s7 + $0xc8] sm:$0xff]  ;;  %v6052_v56 = vld [vmem:[%s11972_s7 + $0xc0] sm:$0xff] }
 0xf8f   :  { %5926 = vmatprep.mubr.bf16.mxu0 %v12214_v0  ;;  %5967 = vmatprep.mubr.bf16.mxu1 %v12214_v0  ;;  %v7730_v0 = vld [vmem:[%s11970_s5 + $0x1ac] ss:$16 sps:$4 sm:$0xff]  }
 0xf91   :  { %5897 = vmatpush1.bf16.msra.mxu0 %v7727_v37  ;;  %5938 = vmatpush1.bf16.msra.mxu1 %v7728_v51  ;;  %v6050_v37 = vld [vmem:[%s11972_s7 + $0xb0] sm:$0xff]  ;;  %v6049_v51 = vld [vmem:[%s11972_s7 + $0xa8] sm:$0xff] }
 0xf92   :  { %5898 = vmatprep.subr.bf16.mxu0 %v7729_v29  ;;  %5939 = vmatprep.subr.bf16.mxu1 %v7730_v0  ;;  %v6047_v29 = vld [vmem:[%s11972_s7 + $0x98] sm:$0xff]  ;;  %v6046_v0 = vld [vmem:[%s11972_s7 + $0x90] sm:$0xff] }
 0xf93   :  { %v7458_v58 = vpop.eup %7457 }
 0xf94   :  { %v5802_v42 = vmul.f32 %v7458_v58, %v7456_v2  ;;  %v6048_v2 = vld [vmem:[%s11972_s7 + $0xa0] sm:$0xff]  ;;  %v6045_v58 = vld [vmem:[%s11972_s7 + $0x88] sm:$0xff] }
 0xf95   :  { %v7460_v25 = vpop.eup %7459  ;;  %5899 = vmatpush1.bf16.msra.mxu0 %v7731_v55  ;;  %5940 = vmatpush1.bf16.msra.mxu1 %v7732_v10  ;;  %v12735_v55 = vld [vmem:[#allocation29_spill] sm:$0xff] }
 0xf96   :  { %v5801_v22 = vmul.f32 %v7460_v25, %v11586_v8  ;;  %5900 = vmatprep.subr.bf16.mxu0 %v7733_v1  ;;  %5941 = vmatprep.subr.bf16.mxu1 %v7734_v4  ;;  %v7736_v8 = vld [vmem:[%s11970_s5 + $0x188] ss:$16 sps:$4 sm:$0xff]  }
 0xf98   :  { %v11762_v61 = vadd.f32 %v5802_v42, %v5801_v22  ;;  %v7462_v39 = vpop.eup %7461  ;;  %v6044_v42 = vld [vmem:[%s11972_s7 + $0x80] sm:$0xff] }
 0xf99   :  { %5901 = vmatpush1.bf16.msra.mxu0 %v7735_v27  ;;  %5942 = vmatpush1.bf16.msra.mxu1 %v7736_v8  ;;  %v12736_v27 = vld [vmem:[#allocation38_spill] sm:$0xff] }
 0xf9a   :  { %7463 = vtanh.f32 %v11762_v61  ;;  %5902 = vmatprep.subr.bf16.mxu0 %v7737_v57  ;;  %5943 = vmatprep.subr.bf16.mxu1 %v7738_v5 }
 0xf9d   :  { %5903 = vmatpush1.bf16.msra.mxu0 %v7739_v21  ;;  %5944 = vmatpush1.bf16.msra.mxu1 %v7740_v13 }
 0xf9e   :  { %5904 = vmatprep.subr.bf16.mxu0 %v7741_v38  ;;  %5945 = vmatprep.subr.bf16.mxu1 %v7742_v14  ;;  %v12737_v14 = vld [vmem:[#allocation30_spill] sm:$0xff] }
 0xfa1   :  { %5905 = vmatpush1.bf16.msra.mxu0 %v7743_v54  ;;  %5946 = vmatpush1.bf16.msra.mxu1 %v7744_v44 }
 0xfa2   :  { %5906 = vmatprep.subr.bf16.mxu0 %v7745_v47  ;;  %5947 = vmatprep.subr.bf16.mxu1 %v7746_v40  ;;  %v12738_v47 = vld [vmem:[#allocation54_spill] sm:$0xff] }
 0xfa5   :  { %5907 = vmatpush1.bf16.msra.mxu0 %v7747_v30  ;;  %5948 = vmatpush1.bf16.msra.mxu1 %v7748_v24 }
 0xfa6   :  { %5908 = vmatprep.subr.bf16.mxu0 %v7749_v16  ;;  %5949 = vmatprep.subr.bf16.mxu1 %v7750_v34 }
 0xfa7   :  { %v7464_v17 = vpop.eup %7463 }
 0xfa8   :  { %v5805_v12 = vmul.f32 %v7464_v17, %v7462_v39 }
 0xfa9   :  { %5909 = vmatpush1.bf16.msra.mxu0 %v7751_v48  ;;  %5950 = vmatpush1.bf16.msra.mxu1 %v7752_v33  ;;  %v12739_v33 = vld [vmem:[#allocation52_spill] sm:$0xff] }
 0xfaa   :  { %v5893_v45 = vpack.c.bf16 %v5805_v12, %v5805_v12  ;;  %6751 = vmatprep.subr.mxu1 %v7754_v31  ;;  %6716 = vmatprep.subr.mxu0 %v7754_v31 }
 0xfac   :  { %5927 = vmatmul.mubr.bf16.vlgmr.msra.gmra.mxu0 %v5893_v45  ;;  %5968 = vmatmul.mubr.bf16.vlgmr.msra.gmra.mxu1 %v5893_v45 }
 0xfad   :  { %6752 = vmatpush3.msra.mxu1 %v6043_v46  ;;  %6783 = vmatprep.mubr.msk.f32.mxu1 %vm7755_vm1, %v7754_v31 }
 0xfae   :  { %6753 = vmatprep.subr.mxu1 %v7754_v31  ;;  %6748 = vmatprep.mubr.msk.f32.mxu0 %vm7755_vm1, %v7754_v31 }
 0xfaf   :  { %6754 = vmatpush3.msra.mxu1 %v6042_v62  ;;  %6717 = vmatpush3.msra.mxu0 %v6059_v60 }
 0xfb0   :  { %6755 = vmatprep.subr.mxu1 %v7754_v31  ;;  %6718 = vmatprep.subr.mxu0 %v7754_v31 }
 0xfb1   :  { %6756 = vmatpush3.msra.mxu1 %v6041_v41  ;;  %6719 = vmatpush3.msra.mxu0 %v6058_v53 }
 0xfb2   :  { %6757 = vmatprep.subr.mxu1 %v7754_v31  ;;  %6720 = vmatprep.subr.mxu0 %v7754_v31 }
 0xfb3   :  { %6758 = vmatpush3.msra.mxu1 %v6040_v43  ;;  %6721 = vmatpush3.msra.mxu0 %v6057_v15  ;;  %v12742_v15 = vld [vmem:[#allocation55_spill] sm:$0xff] }
 0xfb4   :  { %6759 = vmatprep.subr.mxu1 %v7754_v31  ;;  %6722 = vmatprep.subr.mxu0 %v7754_v31 }
 0xfb5   :  { %6760 = vmatpush3.msra.mxu1 %v6039_v59  ;;  %6723 = vmatpush3.msra.mxu0 %v6056_v11  ;;  %v12740_v59 = vld [vmem:[#allocation40_spill] sm:$0xff] }
 0xfb6   :  { %6761 = vmatprep.subr.mxu1 %v7754_v31  ;;  %6724 = vmatprep.subr.mxu0 %v7754_v31 }
 0xfb7   :  { %6762 = vmatpush3.msra.mxu1 %v6038_v28  ;;  %6725 = vmatpush3.msra.mxu0 %v6055_v7 }
 0xfb8   :  { %6763 = vmatprep.subr.mxu1 %v7754_v31  ;;  %6726 = vmatprep.subr.mxu0 %v7754_v31 }
 0xfb9   :  { %6764 = vmatpush3.msra.mxu1 %v6037_v6  ;;  %6727 = vmatpush3.msra.mxu0 %v6054_v20 }
 0xfba   :  { %6765 = vmatprep.subr.mxu1 %v7754_v31  ;;  %6728 = vmatprep.subr.mxu0 %v7754_v31 }
 0xfbb   :  { %6766 = vmatpush3.msra.mxu1 %v6036_v26  ;;  %6729 = vmatpush3.msra.mxu0 %v6053_v50 }
 0xfbc   :  { %6767 = vmatprep.subr.mxu1 %v7754_v31  ;;  %6730 = vmatprep.subr.mxu0 %v7754_v31 }
 0xfbd   :  { %6768 = vmatpush3.msra.mxu1 %v6035_v3  ;;  %6731 = vmatpush3.msra.mxu0 %v6052_v56 }
 0xfbe   :  { %6769 = vmatprep.subr.mxu1 %v7754_v31  ;;  %6732 = vmatprep.subr.mxu0 %v7754_v31 }
 0xfbf   :  { %6770 = vmatpush3.msra.mxu1 %v6034_v49  ;;  %6733 = vmatpush3.msra.mxu0 %v6051_v19 }
 0xfc0   :  { %6771 = vmatprep.subr.mxu1 %v7754_v31  ;;  %6734 = vmatprep.subr.mxu0 %v7754_v31 }
 0xfc1   :  { %6772 = vmatpush3.msra.mxu1 %v6033_v35  ;;  %6735 = vmatpush3.msra.mxu0 %v6050_v37 }
 0xfc2   :  { %6773 = vmatprep.subr.mxu1 %v7754_v31  ;;  %6736 = vmatprep.subr.mxu0 %v7754_v31 }
 0xfc3   :  { %6774 = vmatpush3.msra.mxu1 %v6032_v23  ;;  %6737 = vmatpush3.msra.mxu0 %v6049_v51 }
 0xfc4   :  { %6775 = vmatprep.subr.mxu1 %v7754_v31  ;;  %6738 = vmatprep.subr.mxu0 %v7754_v31 }
 0xfc5   :  { %6776 = vmatpush3.msra.mxu1 %v6031_v63  ;;  %6739 = vmatpush3.msra.mxu0 %v6048_v2 }
 0xfc6   :  { %6777 = vmatprep.subr.mxu1 %v7754_v31  ;;  %6740 = vmatprep.subr.mxu0 %v7754_v31 }
 0xfc7   :  { %6778 = vmatpush3.msra.mxu1 %v6030_v32  ;;  %6741 = vmatpush3.msra.mxu0 %v6047_v29 }
 0xfc8   :  { %6779 = vmatprep.subr.mxu1 %v7754_v31  ;;  %6742 = vmatprep.subr.mxu0 %v7754_v31 }
 0xfc9   :  { %6780 = vmatpush3.msra.mxu1 %v6029_v18  ;;  %6743 = vmatpush3.msra.mxu0 %v6046_v0 }
 0xfca   :  { %6781 = vmatprep.subr.mxu1 %v7754_v31  ;;  %6744 = vmatprep.subr.mxu0 %v7754_v31 }
 0xfcb   :  { %6782 = vmatpush3.msra.mxu1 %v6028_v52  ;;  %6745 = vmatpush3.msra.mxu0 %v6045_v58  ;;  %v12741_v52 = vld [vmem:[#allocation53_spill] sm:$0xff] }
 0xfcc   :  { %6746 = vmatprep.subr.mxu0 %v7754_v31 }
 0xfcd   :  { %6747 = vmatpush3.msra.mxu0 %v6044_v42 }
0x104c   :  { %v5841_v25 = vpop.f32.mrf.mxu0  ;;  %v5882_v36 = vpop.f32.mrf.mxu1 }
0x104d   :  { %v5889_v10 = vadd.f32 %v5841_v25, %v12735_v55  ;;  %v5891_v54 = vadd.f32 %v5882_v36, %v12737_v14 }
0x104e   :  { %v5843_v22 = vpop.f32.mrf.mxu0  ;;  %v5884_v1 = vpop.f32.mrf.mxu1 }
0x104f   :  { %v6675_v4 = vmul.f32 -1.442695, %v5889_v10  ;;  %v5890_v8 = vadd.f32 %v5843_v22, %v12736_v27  ;;  %v6677_v44 = vmul.f32 -1.442695, %v5891_v54  ;;  %v5892_v40 = vadd.f32 %v5884_v1, %v12738_v47 }
0x1050   :  { %v5845_v57 = vpop.f32.mrf.mxu0  ;;  %v5886_v5 = vpop.f32.mrf.mxu1 }
0x1051   :  { %7465 = vpow2.f32 %v6675_v4  ;;  %v6676_v21 = vmul.f32 -1.442695, %v5890_v8  ;;  %v6681_v8 = vld [vmem:[%s11973_s8] ss:$0 sm:$0xff] }
0x1052   :  { %v5846_v13 = vpop.f32.mrf.mxu0  ;;  %v5887_v38 = vpop.f32.mrf.mxu1 }
0x1053   :  { %7467 = vpow2.f32 %v6676_v21 }
0x1054   :  { %7469 = vpow2.f32 %v6677_v44 }
0x1055   :  { %7471 = vtanh.f32 %v5892_v40 }
0x105e   :  { %v7466_v30 = vpop.eup %7465 }
0x105f   :  { %v5989_v24 = vadd.f32 1.0, %v7466_v30 }
0x1060   :  { %v7468_v39 = vpop.eup %7467 }
0x1061   :  { %7473 = vrcp.f32 %v5989_v24  ;;  %v5990_v16 = vadd.f32 1.0, %v7468_v39  ;;  %v7470_v34 = vpop.eup %7469 }
0x1062   :  { %v7472_v48 = vpop.eup %7471  ;;  %v5991_v26 = vadd.f32 1.0, %v7470_v34 }
0x1063   :  { %7475 = vrcp.f32 %v5990_v16 }
0x106c   :  { %v5928_v17 = vpop.f32.mrf.mxu0  ;;  %v5969_v12 = vpop.f32.mrf.mxu1 }
0x106d   :  { %v5976_v45 = vadd.f32 %v5928_v17, %v12739_v33  ;;  %v5978_v60 = vadd.f32 %v5969_v12, %v12741_v52 }
0x106e   :  { %v7474_v31 = vpop.eup %7473  ;;  %v5930_v46 = vpop.f32.mrf.mxu0 }
0x106f   :  { %v5971_v62 = vpop.f32.mrf.mxu1  ;;  %v6000_v41 = vmul.f32 %v7474_v31, %v7472_v48  ;;  %v6678_v43 = vmul.f32 -1.442695, %v5976_v45  ;;  %v5977_v28 = vadd.f32 %v5930_v46, %v12740_v59  ;;  %v6680_v53 = vmul.f32 -1.442695, %v5978_v60 }
0x1070   :  { %v7476_v6 = vpop.eup %7475  ;;  %v5932_v3 = vpop.f32.mrf.mxu0  ;;  %v5979_v11 = vadd.f32 %v5971_v62, %v12742_v15 }
0x1071   :  { %v5973_v49 = vpop.f32.mrf.mxu1  ;;  %v5999_v35 = vmul.f32 %v7476_v6, %v11718_v9  ;;  %7477 = vpow2.f32 %v6678_v43  ;;  %v6679_v23 = vmul.f32 -1.442695, %v5977_v28 }
0x1072   :  { %v5933_v63 = vpop.f32.mrf.mxu0 }
0x1073   :  { %v5974_v32 = vpop.f32.mrf.mxu1  ;;  %v6001_v18 = vadd.f32 %v6000_v41, %v5999_v35  ;;  %7479 = vpow2.f32 %v6679_v23 }
0x1074   :  { %7481 = vrcp.f32 %v5991_v26 }
0x1075   :  { %7483 = vtanh.f32 %v6001_v18 }
0x1076   :  { %7485 = vpow2.f32 %v6680_v53 }
0x1077   :  { %7487 = vtanh.f32 %v5979_v11 }
0x107e   :  { %v7478_v7 = vpop.eup %7477 }
0x107f   :  { %v6013_v20 = vadd.f32 1.0, %v7478_v7 }
0x1080   :  { %v7480_v50 = vpop.eup %7479 }
0x1081   :  { %v7482_v56 = vpop.eup %7481  ;;  %7489 = vrcp.f32 %v6013_v20  ;;  %v6014_v9 = vadd.f32 1.0, %v7480_v50 }
0x1082   :  { %v7484_v19 = vpop.eup %7483 }
0x1083   :  { %7491 = vrcp.f32 %v6014_v9  ;;  %v6003_v37 = vmul.f32 %v7484_v19, %v7482_v56  ;;  %v7486_v51 = vpop.eup %7485 }
0x1084   :  { %v7488_v2 = vpop.eup %7487  ;;  %v6015_v42 = vadd.f32 1.0, %v7486_v51 }
0x1085   :  { %6784 = vmatmul.mubr.f32.vlgmr.msra.gmra.mxu1 %v6003_v37 }
0x1086   :  { %7493 = vrcp.f32 %v6015_v42 }
0x108e   :  { %v7490_v29 = vpop.eup %7489 }
0x108f   :  { %v6024_v0 = vmul.f32 %v7490_v29, %v7488_v2 }
0x1090   :  { %v7492_v58 = vpop.eup %7491 }
0x1091   :  { %v6023_v25 = vmul.f32 %v7492_v58, %v11762_v61 }
0x1093   :  { %v6025_v36 = vadd.f32 %v6024_v0, %v6023_v25  ;;  %v7494_v55 = vpop.eup %7493 }
0x1095   :  { %7495 = vtanh.f32 %v6025_v36 }
0x10a2   :  { %v7496_v10 = vpop.eup %7495 }
0x10a3   :  { %v6027_v22 = vmul.f32 %v7496_v10, %v7494_v55 }
0x10a5   :  { %6749 = vmatmul.mubr.f32.vlgmr.msra.gmra.mxu0 %v6027_v22 }
0x1145   :  { %v6196_v1 = vpop.f32.mrf.mxu1 }
0x1147   :  { %v6785_v4 = vpop.f32.mrf.mxu1 }
0x1165   :  { %v6126_v27 = vpop.f32.mrf.mxu0 }
0x1166   :  { %v6197_v57 = vadd.f32 %v6196_v1, %v6126_v27 }
0x1167   :  { %v6750_v5 = vpop.f32.mrf.mxu0 }
0x1168   :  { %v6207_v21 = vadd.f32 %v6681_v8, %v6197_v57 }
0x116a   :  { %6208 = vst [vmem:[%s11974_s9] sm:$0xff] %v6207_v21 }

</bundles_post_ra>
